<compile_context>
chip_gen: v5e
topology: v5e:2x2
jax: 0.10.0
libtpu: 0.0.40
codegen_flags: <defaults>
</compile_context>

<pallas_src>
import jax
import jax.numpy as jnp
from jax import lax
from jax.experimental import pallas as pl
from jax.experimental.pallas import tpu as pltpu

# ---------------- model hyperparameters (small, deterministic) ----------------
D_MODEL = 32
NHEAD = 4
HEAD_DIM = D_MODEL // NHEAD
D_FF = 64
NUM_LAYERS = 2
DEC_DIM = 16
OUT_PAD = 128                    # lane-dense output width (sliced to DEC_DIM in JAX)
LN_EPS = 1e-5
NEG_INF = -1e9
PVEC_W = 128                     # packed bias/LN row width (one full lane vector)
assert PVEC_W == 4 * D_MODEL
assert PVEC_W >= D_FF + D_MODEL
assert NHEAD * D_MODEL == 128    # lane-dense Wv@Wo slab


# ------------------------------- Pallas kernel --------------------------------
def _layernorm(x, gamma, beta):
    # De-serialized reductions: mean(x) and mean(x*x) are independent, so the
    # two cross-lane (XLU) reduces can issue back-to-back.
    mu = jnp.mean(x, axis=-1, keepdims=True)
    m2 = jnp.mean(x * x, axis=-1, keepdims=True)
    var = m2 - mu * mu
    return (x - mu) * (gamma * lax.rsqrt(var + LN_EPS)) + beta


def fused_encoder_kernel(src_ref, bias_ref, wqk_ref, vwo_ref, w1_ref, w2_ref,
                         pvec_ref, wdec_ref, bdec_ref, out_ref):
    """All encoder layers + decoder-dim projection, whole batch in one shot.

    src_ref  : (B*S, D)     f32   batch folded into sublanes
    bias_ref : (B*S, B*S)   f32   additive attention bias (key-pad + block-diag)
    wqk_ref  : (L, D, 2D)   bf16  [Wq | Wk]
    vwo_ref  : (L, D, H*D)  bf16  [Wv_0@Wo_0 | ... | Wv_{H-1}@Wo_{H-1}]
    w1_ref   : (L, D, D_FF) bf16
    w2_ref   : (L, D_FF, D) bf16
    pvec_ref : (L, 3, 128)  f32   packed biases / LN params:
        row 0: [bq | bk | bo + bv@Wo | pad]
        row 1: [bf1 (D_FF) | bf2 (D) | pad]
        row 2: [g1 | be1 | g2 | be2]
    wdec_ref : (D, 128)     bf16  zero-padded past DEC_DIM
    bdec_ref : (1, 128)     f32
    out_ref  : (B*S, 128)   f32   lane-dense store
    """
    n = src_ref.shape[0]
    x = src_ref[...]                       # (n, D) f32
    bias = bias_ref[...]                   # (n, n) f32, hoisted out of all loops
    scale = 1.0 / float(HEAD_DIM) ** 0.5

    for layer in range(NUM_LAYERS):        # static unroll, weights resident in VMEM
        pv = pvec_ref[layer]               # (3, 128) f32
        xb = x.astype(jnp.bfloat16)

        # fused Q/K projection: one (n,D)@(D,2D) MXU op, bf16 operands
        qk = (jnp.dot(xb, wqk_ref[layer], preferred_element_type=jnp.float32)
              + pv[0:1, 0:2 * D_MODEL])                       # (n, 2D)
        qb = (qk[:, 0:D_MODEL] * scale).astype(jnp.bfloat16)  # pre-scale once
        kb = qk[:, D_MODEL:2 * D_MODEL].astype(jnp.bfloat16)

        # V and output projection fused at pack time: lane-dense (n, H*D) slab
        vproj = jnp.dot(xb, vwo_ref[layer],
                        preferred_element_type=jnp.float32).astype(jnp.bfloat16)

        # accumulator starts from the folded output bias (bo + bv@Wo)
        attn = jnp.broadcast_to(pv[0:1, 2 * D_MODEL:3 * D_MODEL], (n, D_MODEL))
        for h in range(NHEAD):                                # static unrolled heads
            hs = slice(h * HEAD_DIM, (h + 1) * HEAD_DIM)
            s = lax.dot_general(qb[:, hs], kb[:, hs], (((1,), (1,)), ((), ())),
                                preferred_element_type=jnp.float32) + bias
            m = jnp.max(s, axis=-1, keepdims=True)
            p = jnp.exp(s - m)
            denom = jnp.sum(p, axis=-1, keepdims=True)
            p = p * pl.reciprocal(denom, approx=False)        # exact (parity)
            attn = attn + jnp.dot(p.astype(jnp.bfloat16),
                                  vproj[:, h * D_MODEL:(h + 1) * D_MODEL],
                                  preferred_element_type=jnp.float32)

        # residual + post-norm (dropout = identity in eval)
        x = _layernorm(x + attn,
                       pv[2:3, 0:D_MODEL], pv[2:3, D_MODEL:2 * D_MODEL])

        # feed-forward (ReLU)
        h1 = (jnp.dot(x.astype(jnp.bfloat16), w1_ref[layer],
                      preferred_element_type=jnp.float32)
              + pv[1:2, 0:D_FF])
        h1 = jnp.maximum(h1, 0.0)
        h2 = (jnp.dot(h1.astype(jnp.bfloat16), w2_ref[layer],
                      preferred_element_type=jnp.float32)
              + pv[1:2, D_FF:D_FF + D_MODEL])

        x = _layernorm(x + h2,
                       pv[2:3, 2 * D_MODEL:3 * D_MODEL],
                       pv[2:3, 3 * D_MODEL:4 * D_MODEL])

    # fused to_decoder_dim projection, lane-dense (padded) store
    out_ref[...] = (jnp.dot(x.astype(jnp.bfloat16), wdec_ref[...],
                            preferred_element_type=jnp.float32)
                    + bdec_ref[...])


# ------------------------------ Pallas wrapper ---------------------------------
def pack_params(params):
    """Pack per-layer weights into a few contiguous bf16 slabs (fewer DMAs)."""
    layers = params["layers"]
    wqk_l, vwo_l, w1_l, w2_l, pvec_l = [], [], [], [], []
    for p in layers:
        wqk_l.append(jnp.concatenate([p["wq"], p["wk"]], axis=1))        # (D, 2D)
        vwo_l.append(jnp.concatenate(
            [p["wv"][:, h * HEAD_DIM:(h + 1) * HEAD_DIM]
             @ p["wo"][h * HEAD_DIM:(h + 1) * HEAD_DIM, :]
             for h in range(NHEAD)], axis=1))                            # (D, H*D)
        w1_l.append(p["w1"])
        w2_l.append(p["w2"])
        bo_eff = p["bo"] + p["bv"] @ p["wo"]                             # (1, D)
        row0 = jnp.concatenate(
            [p["bq"], p["bk"], bo_eff,
             jnp.zeros((1, PVEC_W - 3 * D_MODEL), jnp.float32)], axis=1)
        row1 = jnp.concatenate(
            [p["bf1"], p["bf2"],
             jnp.zeros((1, PVEC_W - D_FF - D_MODEL), jnp.float32)], axis=1)
        row2 = jnp.concatenate([p["g1"], p["be1"], p["g2"], p["be2"]], axis=1)
        pvec_l.append(jnp.concatenate([row0, row1, row2], axis=0))       # (3, 128)

    wqk = jnp.stack(wqk_l).astype(jnp.bfloat16)       # (L, D, 2D)
    vwo = jnp.stack(vwo_l).astype(jnp.bfloat16)       # (L, D, H*D)
    w1 = jnp.stack(w1_l).astype(jnp.bfloat16)         # (L, D, D_FF)
    w2 = jnp.stack(w2_l).astype(jnp.bfloat16)         # (L, D_FF, D)
    pvec = jnp.stack(pvec_l)                          # (L, 3, 128) f32

    # lane-dense decoder projection (zero-padded to 128 output lanes)
    wdec = jnp.zeros((D_MODEL, OUT_PAD), jnp.float32
                     ).at[:, :DEC_DIM].set(params["w_dec"]).astype(jnp.bfloat16)
    bdec = jnp.zeros((1, OUT_PAD), jnp.float32).at[:, :DEC_DIM].set(params["b_dec"])
    return wqk, vwo, w1, w2, pvec, wdec, bdec


def encoder_fused_pallas(src, bias, packed):
    wqk, vwo, w1, w2, pvec, wdec, bdec = packed
    B, S, D = src.shape
    src2d = src.reshape(B * S, D).astype(jnp.float32)   # batch folded into sublanes
    in_specs = [pl.BlockSpec(memory_space=pltpu.MemorySpace.VMEM) for _ in range(9)]
    out = pl.pallas_call(
        fused_encoder_kernel,
        out_shape=jax.ShapeDtypeStruct((B * S, OUT_PAD), jnp.float32),
        in_specs=in_specs,
        out_specs=pl.BlockSpec(memory_space=pltpu.MemorySpace.VMEM),
    )(src2d, bias, wqk, vwo, w1, w2, pvec, wdec, bdec)
    # lane-dense padded output -> real decoder dim (fuses into the undo_src gathers)
    return out.reshape(B, S, OUT_PAD)[..., :DEC_DIM]


# ----------------------------- glue (plain JAX) --------------------------------
def get_src(temporal_dict, img_dict, nlp_dict, padding_mask_dict, img_cols, nlp_cols):
    temporal = temporal_dict["temporal"]
    temporal_shape = temporal.shape
    B, seq_len, _, d_model = temporal_shape
    temporal = temporal.reshape(B, -1, d_model)
    temporal_padding_mask = padding_mask_dict["temporal_remain_padding_mask"]
    n_temporal = temporal.shape[1]
    temporal_idx = jnp.arange(0, n_temporal)

    idx = n_temporal
    img_li, img_pm_li, img_idx_li = [], [], []
    for col in img_cols:
        data = img_dict[col]
        pm = padding_mask_dict[f"{col}_remain_padding_mask"]
        assert data.shape[1] == pm.shape[-1]
        img_li.append(data)
        img_pm_li.append(pm)
        img_idx_li.append(jnp.arange(idx, idx + data.shape[1]))
        idx += data.shape[1]

    nlp_li, nlp_pm_li, nlp_idx_li = [], [], []
    for col in nlp_cols:
        data = nlp_dict[col]
        pm = padding_mask_dict[f"{col}_remain_padding_mask"]
        assert data.shape[1] == pm.shape[-1]
        nlp_li.append(data)
        nlp_pm_li.append(pm)
        nlp_idx_li.append(jnp.arange(idx, idx + data.shape[1]))
        idx += data.shape[1]

    static = jnp.concatenate(img_li + nlp_li, axis=1)
    static_padding_mask = jnp.concatenate(img_pm_li + nlp_pm_li, axis=1)
    src = jnp.concatenate([temporal, static], axis=1)
    return (src, temporal_shape, temporal_idx, temporal_padding_mask,
            static_padding_mask, img_idx_li, nlp_idx_li)


def undo_src(src, temporal_shape, temporal_idx, img_idx_li, nlp_idx_li,
             img_cols, nlp_cols):
    temporal = jnp.take(src, temporal_idx, axis=1).reshape(
        temporal_shape[0], temporal_shape[1], temporal_shape[2], -1)
    temporal_dict = {"temporal": temporal}
    img_dict = {col: jnp.take(src, idx, axis=1)
                for col, idx in zip(img_cols, img_idx_li)}
    nlp_dict = {col: jnp.take(src, idx, axis=1)
                for col, idx in zip(nlp_cols, nlp_idx_li)}
    return temporal_dict, img_dict, nlp_dict


def encoder_forward(params, temporal_dict, img_dict, nlp_dict, padding_mask_dict,
                    img_cols, nlp_cols):
    (src, temporal_shape, temporal_idx, temporal_pm, static_pm,
     img_idx_li, nlp_idx_li) = get_src(temporal_dict, img_dict, nlp_dict,
                                       padding_mask_dict, img_cols, nlp_cols)
    B, S, _ = src.shape

    # key-padding mask -> additive attention bias (True = pad, PyTorch convention),
    # expanded to a (B*S, B*S) block-diagonal bias so the whole batch runs as one
    # attention matrix (cross-batch entries get NEG_INF).
    key_pad = jnp.concatenate([temporal_pm, static_pm], axis=1)            # (B, S)
    kp_bias = jnp.where(key_pad, NEG_INF, 0.0).astype(jnp.float32)         # (B, S)
    batch_of = jnp.repeat(jnp.arange(B), S)                                # (B*S,)
    cross = batch_of[:, None] != batch_of[None, :]                         # (B*S, B*S)
    bias = jnp.where(cross, NEG_INF, kp_bias.reshape(B * S)[None, :])
    bias = bias.astype(jnp.float32)

    packed = pack_params(params)
    encoded = encoder_fused_pallas(src, bias, packed)

    return undo_src(encoded, temporal_shape, temporal_idx, img_idx_li,
                    nlp_idx_li, img_cols, nlp_cols)


# --------------------------- deterministic init --------------------------------
def init_params(key):
    def w(k, shape, scale=0.02):
        return scale * jax.random.normal(k, shape, jnp.float32)

    layers = []
    for l in range(NUM_LAYERS):
        ks = jax.random.split(jax.random.fold_in(key, l), 6)
        layers.append({
            "wq": w(ks[0], (D_MODEL, D_MODEL)), "bq": jnp.zeros((1, D_MODEL), jnp.float32),
            "wk": w(ks[1], (D_MODEL, D_MODEL)), "bk": jnp.zeros((1, D_MODEL), jnp.float32),
            "wv": w(ks[2], (D_MODEL, D_MODEL)), "bv": jnp.zeros((1, D_MODEL), jnp.float32),
            "wo": w(ks[3], (D_MODEL, D_MODEL)), "bo": jnp.zeros((1, D_MODEL), jnp.float32),
            "g1": jnp.ones((1, D_MODEL), jnp.float32), "be1": jnp.zeros((1, D_MODEL), jnp.float32),
            "w1": w(ks[4], (D_MODEL, D_FF)), "bf1": jnp.zeros((1, D_FF), jnp.float32),
            "w2": w(ks[5], (D_FF, D_MODEL)), "bf2": jnp.zeros((1, D_MODEL), jnp.float32),
            "g2": jnp.ones((1, D_MODEL), jnp.float32), "be2": jnp.zeros((1, D_MODEL), jnp.float32),
        })
    kd = jax.random.fold_in(key, 1000)
    return {
        "layers": layers,
        "w_dec": w(kd, (D_MODEL, DEC_DIM)),
        "b_dec": jnp.zeros((1, DEC_DIM), jnp.float32),
    }


# ----------------------------------- main ---------------------------------------
if __name__ == "__main__":
    key = jax.random.PRNGKey(0)
    kp, k1, k2, k3, k4 = jax.random.split(key, 5)

    B, SEQ_LEN, N_TEMP_FEAT = 2, 4, 3        # temporal tokens = 12
    N_IMG_TOK, N_NLP_TOK = 8, 4              # img tokens = 16, nlp tokens = 4 -> S = 32
    img_cols = ["img0", "img1"]
    nlp_cols = ["nlp0"]

    temporal_dict = {"temporal": jax.random.normal(
        k1, (B, SEQ_LEN, N_TEMP_FEAT, D_MODEL), jnp.float32)}
    img_dict = {
        "img0": jax.random.normal(k2, (B, N_IMG_TOK, D_MODEL), jnp.float32),
        "img1": jax.random.normal(k3, (B, N_IMG_TOK, D_MODEL), jnp.float32),
    }
    nlp_dict = {"nlp0": jax.random.normal(k4, (B, N_NLP_TOK, D_MODEL), jnp.float32)}

    # padding masks: True = padded position (PyTorch key_padding_mask convention)
    img_pad = jnp.zeros((B, N_IMG_TOK), bool).at[:, -1].set(True)
    padding_mask_dict = {
        "temporal_remain_padding_mask": jnp.zeros((B, SEQ_LEN * N_TEMP_FEAT), bool),
        "img0_remain_padding_mask": img_pad,
        "img1_remain_padding_mask": img_pad,
        "nlp0_remain_padding_mask": jnp.zeros((B, N_NLP_TOK), bool),
    }

    params = init_params(kp)

    out = encoder_forward(params, temporal_dict, img_dict, nlp_dict,
                          padding_mask_dict, img_cols, nlp_cols)
    out = jax.block_until_ready(out)

    t_dict, i_dict, n_dict = out
    assert t_dict["temporal"].shape == (B, SEQ_LEN, N_TEMP_FEAT, DEC_DIM)
    assert i_dict["img0"].shape == (B, N_IMG_TOK, DEC_DIM)
    assert n_dict["nlp0"].shape == (B, N_NLP_TOK, DEC_DIM)
    assert all(bool(jnp.all(jnp.isfinite(v))) for v in
               [t_dict["temporal"], i_dict["img0"], i_dict["img1"], n_dict["nlp0"]])
    print("KERNEL_OK")
</pallas_src>

<mosaic_0001>
module attributes {stable_mosaic.version = 11 : i64} {
  func.func @fused_encoder_kernel(%arg0: memref<64x32xf32, #tpu.memory_space<vmem>>, %arg1: memref<64x64xf32, #tpu.memory_space<vmem>>, %arg2: memref<2x32x64xbf16, #tpu.memory_space<vmem>>, %arg3: memref<2x32x128xbf16, #tpu.memory_space<vmem>>, %arg4: memref<2x32x64xbf16, #tpu.memory_space<vmem>>, %arg5: memref<2x64x32xbf16, #tpu.memory_space<vmem>>, %arg6: memref<2x3x128xf32, #tpu.memory_space<vmem>>, %arg7: memref<32x128xbf16, #tpu.memory_space<vmem>>, %arg8: memref<1x128xf32, #tpu.memory_space<vmem>>, %arg9: memref<64x128xf32, #tpu.memory_space<vmem>>) attributes {dimension_semantics = [], scalar_prefetch = 0 : i64, scratch_operands = 0 : i64, tpu.core_type = #tpu.core_type<tc>} {
    %c0 = arith.constant 0 : index
    %c0_0 = arith.constant 0 : index
    %0 = vector.load %arg0[%c0, %c0_0] : memref<64x32xf32, #tpu.memory_space<vmem>>, vector<64x32xf32>
    %c0_1 = arith.constant 0 : index
    %c0_2 = arith.constant 0 : index
    %1 = vector.load %arg1[%c0_1, %c0_2] : memref<64x64xf32, #tpu.memory_space<vmem>>, vector<64x64xf32>
    %c0_3 = arith.constant 0 : index
    %c0_4 = arith.constant 0 : index
    %c0_5 = arith.constant 0 : index
    %2 = vector.load %arg6[%c0_3, %c0_4, %c0_5] : memref<2x3x128xf32, #tpu.memory_space<vmem>>, vector<1x3x128xf32>
    %3 = vector.shape_cast %2 : vector<1x3x128xf32> to vector<3x128xf32>
    %4 = arith.truncf %0 : vector<64x32xf32> to vector<64x32xbf16>
    %c0_6 = arith.constant 0 : index
    %c0_7 = arith.constant 0 : index
    %c0_8 = arith.constant 0 : index
    %5 = vector.load %arg2[%c0_6, %c0_7, %c0_8] : memref<2x32x64xbf16, #tpu.memory_space<vmem>>, vector<1x32x64xbf16>
    %6 = vector.shape_cast %5 : vector<1x32x64xbf16> to vector<32x64xbf16>
    %cst = arith.constant dense<0.000000e+00> : vector<64x64xf32>
    %7 = tpu.matmul %4, %6, %cst {dimension_numbers = #tpu.dot_dimension_numbers<[1], [0], [0], [1], [0, 0, 1, 1], [], []>} : vector<64x32xbf16>, vector<32x64xbf16>, vector<64x64xf32> -> vector<64x64xf32>
    %8 = vector.extract_strided_slice %3 {offsets = [0, 0], sizes = [1, 64], strides = [1, 1]} : vector<3x128xf32> to vector<1x64xf32>
    %9 = vector.broadcast %8 : vector<1x64xf32> to vector<64x64xf32>
    %10 = arith.addf %7, %9 : vector<64x64xf32>
    %11 = vector.extract_strided_slice %10 {offsets = [0, 0], sizes = [64, 32], strides = [1, 1]} : vector<64x64xf32> to vector<64x32xf32>
    %cst_9 = arith.constant 0.353553385 : f32
    %12 = vector.broadcast %cst_9 : f32 to vector<64x32xf32>
    %13 = arith.mulf %11, %12 : vector<64x32xf32>
    %14 = arith.truncf %13 : vector<64x32xf32> to vector<64x32xbf16>
    %15 = vector.extract_strided_slice %10 {offsets = [0, 32], sizes = [64, 32], strides = [1, 1]} : vector<64x64xf32> to vector<64x32xf32>
    %16 = arith.truncf %15 : vector<64x32xf32> to vector<64x32xbf16>
    %c0_10 = arith.constant 0 : index
    %c0_11 = arith.constant 0 : index
    %c0_12 = arith.constant 0 : index
    %17 = vector.load %arg3[%c0_10, %c0_11, %c0_12] : memref<2x32x128xbf16, #tpu.memory_space<vmem>>, vector<1x32x128xbf16>
    %18 = vector.shape_cast %17 : vector<1x32x128xbf16> to vector<32x128xbf16>
    %cst_13 = arith.constant dense<0.000000e+00> : vector<64x128xf32>
    %19 = tpu.matmul %4, %18, %cst_13 {dimension_numbers = #tpu.dot_dimension_numbers<[1], [0], [0], [1], [0, 0, 1, 1], [], []>} : vector<64x32xbf16>, vector<32x128xbf16>, vector<64x128xf32> -> vector<64x128xf32>
    %20 = arith.truncf %19 : vector<64x128xf32> to vector<64x128xbf16>
    %21 = vector.extract_strided_slice %3 {offsets = [0, 64], sizes = [1, 32], strides = [1, 1]} : vector<3x128xf32> to vector<1x32xf32>
    %22 = vector.shape_cast %21 : vector<1x32xf32> to vector<1x32xf32>
    %23 = vector.broadcast %22 : vector<1x32xf32> to vector<64x32xf32>
    %24 = vector.extract_strided_slice %14 {offsets = [0, 0], sizes = [64, 8], strides = [1, 1]} : vector<64x32xbf16> to vector<64x8xbf16>
    %25 = vector.extract_strided_slice %16 {offsets = [0, 0], sizes = [64, 8], strides = [1, 1]} : vector<64x32xbf16> to vector<64x8xbf16>
    %cst_14 = arith.constant dense<0.000000e+00> : vector<64x64xf32>
    %26 = tpu.matmul %24, %25, %cst_14 {dimension_numbers = #tpu.dot_dimension_numbers<[1], [1], [0], [0], [0, 0, 1, 0], [], []>} : vector<64x8xbf16>, vector<64x8xbf16>, vector<64x64xf32> -> vector<64x64xf32>
    %27 = arith.addf %26, %1 : vector<64x64xf32>
    %cst_15 = arith.constant dense<0xFF800000> : vector<64xf32>
    %28 = vector.multi_reduction <maximumf>, %27, %cst_15 [1] : vector<64x64xf32> to vector<64xf32>
    %29 = vector.shape_cast %28 : vector<64xf32> to vector<64x1xf32>
    %30 = vector.broadcast %29 : vector<64x1xf32> to vector<64x64xf32>
    %31 = arith.subf %27, %30 : vector<64x64xf32>
    %32 = math.exp %31 : vector<64x64xf32>
    %cst_16 = arith.constant dense<0.000000e+00> : vector<64xf32>
    %33 = vector.multi_reduction <add>, %32, %cst_16 [1] : vector<64x64xf32> to vector<64xf32>
    %34 = vector.shape_cast %33 : vector<64xf32> to vector<64x1xf32>
    %35 = tpu.reciprocal %34 : vector<64x1xf32> -> vector<64x1xf32>
    %36 = vector.broadcast %35 : vector<64x1xf32> to vector<64x64xf32>
    %37 = arith.mulf %32, %36 : vector<64x64xf32>
    %38 = arith.truncf %37 : vector<64x64xf32> to vector<64x64xbf16>
    %39 = vector.extract_strided_slice %20 {offsets = [0, 0], sizes = [64, 32], strides = [1, 1]} : vector<64x128xbf16> to vector<64x32xbf16>
    %cst_17 = arith.constant dense<0.000000e+00> : vector<64x32xf32>
    %40 = tpu.matmul %38, %39, %cst_17 {dimension_numbers = #tpu.dot_dimension_numbers<[1], [0], [0], [1], [0, 0, 1, 1], [], []>} : vector<64x64xbf16>, vector<64x32xbf16>, vector<64x32xf32> -> vector<64x32xf32>
    %41 = arith.addf %23, %40 : vector<64x32xf32>
    %42 = vector.extract_strided_slice %14 {offsets = [0, 8], sizes = [64, 8], strides = [1, 1]} : vector<64x32xbf16> to vector<64x8xbf16>
    %43 = vector.extract_strided_slice %16 {offsets = [0, 8], sizes = [64, 8], strides = [1, 1]} : vector<64x32xbf16> to vector<64x8xbf16>
    %cst_18 = arith.constant dense<0.000000e+00> : vector<64x64xf32>
    %44 = tpu.matmul %42, %43, %cst_18 {dimension_numbers = #tpu.dot_dimension_numbers<[1], [1], [0], [0], [0, 0, 1, 0], [], []>} : vector<64x8xbf16>, vector<64x8xbf16>, vector<64x64xf32> -> vector<64x64xf32>
    %45 = arith.addf %44, %1 : vector<64x64xf32>
    %cst_19 = arith.constant dense<0xFF800000> : vector<64xf32>
    %46 = vector.multi_reduction <maximumf>, %45, %cst_19 [1] : vector<64x64xf32> to vector<64xf32>
    %47 = vector.shape_cast %46 : vector<64xf32> to vector<64x1xf32>
    %48 = vector.broadcast %47 : vector<64x1xf32> to vector<64x64xf32>
    %49 = arith.subf %45, %48 : vector<64x64xf32>
    %50 = math.exp %49 : vector<64x64xf32>
    %cst_20 = arith.constant dense<0.000000e+00> : vector<64xf32>
    %51 = vector.multi_reduction <add>, %50, %cst_20 [1] : vector<64x64xf32> to vector<64xf32>
    %52 = vector.shape_cast %51 : vector<64xf32> to vector<64x1xf32>
    %53 = tpu.reciprocal %52 : vector<64x1xf32> -> vector<64x1xf32>
    %54 = vector.broadcast %53 : vector<64x1xf32> to vector<64x64xf32>
    %55 = arith.mulf %50, %54 : vector<64x64xf32>
    %56 = arith.truncf %55 : vector<64x64xf32> to vector<64x64xbf16>
    %57 = vector.extract_strided_slice %20 {offsets = [0, 32], sizes = [64, 32], strides = [1, 1]} : vector<64x128xbf16> to vector<64x32xbf16>
    %cst_21 = arith.constant dense<0.000000e+00> : vector<64x32xf32>
    %58 = tpu.matmul %56, %57, %cst_21 {dimension_numbers = #tpu.dot_dimension_numbers<[1], [0], [0], [1], [0, 0, 1, 1], [], []>} : vector<64x64xbf16>, vector<64x32xbf16>, vector<64x32xf32> -> vector<64x32xf32>
    %59 = arith.addf %41, %58 : vector<64x32xf32>
    %60 = vector.extract_strided_slice %14 {offsets = [0, 16], sizes = [64, 8], strides = [1, 1]} : vector<64x32xbf16> to vector<64x8xbf16>
    %61 = vector.extract_strided_slice %16 {offsets = [0, 16], sizes = [64, 8], strides = [1, 1]} : vector<64x32xbf16> to vector<64x8xbf16>
    %cst_22 = arith.constant dense<0.000000e+00> : vector<64x64xf32>
    %62 = tpu.matmul %60, %61, %cst_22 {dimension_numbers = #tpu.dot_dimension_numbers<[1], [1], [0], [0], [0, 0, 1, 0], [], []>} : vector<64x8xbf16>, vector<64x8xbf16>, vector<64x64xf32> -> vector<64x64xf32>
    %63 = arith.addf %62, %1 : vector<64x64xf32>
    %cst_23 = arith.constant dense<0xFF800000> : vector<64xf32>
    %64 = vector.multi_reduction <maximumf>, %63, %cst_23 [1] : vector<64x64xf32> to vector<64xf32>
    %65 = vector.shape_cast %64 : vector<64xf32> to vector<64x1xf32>
    %66 = vector.broadcast %65 : vector<64x1xf32> to vector<64x64xf32>
    %67 = arith.subf %63, %66 : vector<64x64xf32>
    %68 = math.exp %67 : vector<64x64xf32>
    %cst_24 = arith.constant dense<0.000000e+00> : vector<64xf32>
    %69 = vector.multi_reduction <add>, %68, %cst_24 [1] : vector<64x64xf32> to vector<64xf32>
    %70 = vector.shape_cast %69 : vector<64xf32> to vector<64x1xf32>
    %71 = tpu.reciprocal %70 : vector<64x1xf32> -> vector<64x1xf32>
    %72 = vector.broadcast %71 : vector<64x1xf32> to vector<64x64xf32>
    %73 = arith.mulf %68, %72 : vector<64x64xf32>
    %74 = arith.truncf %73 : vector<64x64xf32> to vector<64x64xbf16>
    %75 = vector.extract_strided_slice %20 {offsets = [0, 64], sizes = [64, 32], strides = [1, 1]} : vector<64x128xbf16> to vector<64x32xbf16>
    %cst_25 = arith.constant dense<0.000000e+00> : vector<64x32xf32>
    %76 = tpu.matmul %74, %75, %cst_25 {dimension_numbers = #tpu.dot_dimension_numbers<[1], [0], [0], [1], [0, 0, 1, 1], [], []>} : vector<64x64xbf16>, vector<64x32xbf16>, vector<64x32xf32> -> vector<64x32xf32>
    %77 = arith.addf %59, %76 : vector<64x32xf32>
    %78 = vector.extract_strided_slice %14 {offsets = [0, 24], sizes = [64, 8], strides = [1, 1]} : vector<64x32xbf16> to vector<64x8xbf16>
    %79 = vector.extract_strided_slice %16 {offsets = [0, 24], sizes = [64, 8], strides = [1, 1]} : vector<64x32xbf16> to vector<64x8xbf16>
    %cst_26 = arith.constant dense<0.000000e+00> : vector<64x64xf32>
    %80 = tpu.matmul %78, %79, %cst_26 {dimension_numbers = #tpu.dot_dimension_numbers<[1], [1], [0], [0], [0, 0, 1, 0], [], []>} : vector<64x8xbf16>, vector<64x8xbf16>, vector<64x64xf32> -> vector<64x64xf32>
    %81 = arith.addf %80, %1 : vector<64x64xf32>
    %cst_27 = arith.constant dense<0xFF800000> : vector<64xf32>
    %82 = vector.multi_reduction <maximumf>, %81, %cst_27 [1] : vector<64x64xf32> to vector<64xf32>
    %83 = vector.shape_cast %82 : vector<64xf32> to vector<64x1xf32>
    %84 = vector.broadcast %83 : vector<64x1xf32> to vector<64x64xf32>
    %85 = arith.subf %81, %84 : vector<64x64xf32>
    %86 = math.exp %85 : vector<64x64xf32>
    %cst_28 = arith.constant dense<0.000000e+00> : vector<64xf32>
    %87 = vector.multi_reduction <add>, %86, %cst_28 [1] : vector<64x64xf32> to vector<64xf32>
    %88 = vector.shape_cast %87 : vector<64xf32> to vector<64x1xf32>
    %89 = tpu.reciprocal %88 : vector<64x1xf32> -> vector<64x1xf32>
    %90 = vector.broadcast %89 : vector<64x1xf32> to vector<64x64xf32>
    %91 = arith.mulf %86, %90 : vector<64x64xf32>
    %92 = arith.truncf %91 : vector<64x64xf32> to vector<64x64xbf16>
    %93 = vector.extract_strided_slice %20 {offsets = [0, 96], sizes = [64, 32], strides = [1, 1]} : vector<64x128xbf16> to vector<64x32xbf16>
    %cst_29 = arith.constant dense<0.000000e+00> : vector<64x32xf32>
    %94 = tpu.matmul %92, %93, %cst_29 {dimension_numbers = #tpu.dot_dimension_numbers<[1], [0], [0], [1], [0, 0, 1, 1], [], []>} : vector<64x64xbf16>, vector<64x32xbf16>, vector<64x32xf32> -> vector<64x32xf32>
    %95 = arith.addf %77, %94 : vector<64x32xf32>
    %96 = arith.addf %0, %95 : vector<64x32xf32>
    %97 = vector.extract_strided_slice %3 {offsets = [2, 0], sizes = [1, 32], strides = [1, 1]} : vector<3x128xf32> to vector<1x32xf32>
    %98 = vector.extract_strided_slice %3 {offsets = [2, 32], sizes = [1, 32], strides = [1, 1]} : vector<3x128xf32> to vector<1x32xf32>
    %cst_30 = arith.constant dense<0.000000e+00> : vector<64xf32>
    %99 = vector.multi_reduction <add>, %96, %cst_30 [1] : vector<64x32xf32> to vector<64xf32>
    %100 = vector.shape_cast %99 : vector<64xf32> to vector<64x1xf32>
    %cst_31 = arith.constant 3.200000e+01 : f32
    %101 = vector.broadcast %cst_31 : f32 to vector<64x1xf32>
    %102 = arith.divf %100, %101 : vector<64x1xf32>
    %103 = arith.mulf %96, %96 : vector<64x32xf32>
    %cst_32 = arith.constant dense<0.000000e+00> : vector<64xf32>
    %104 = vector.multi_reduction <add>, %103, %cst_32 [1] : vector<64x32xf32> to vector<64xf32>
    %105 = vector.shape_cast %104 : vector<64xf32> to vector<64x1xf32>
    %cst_33 = arith.constant 3.200000e+01 : f32
    %106 = vector.broadcast %cst_33 : f32 to vector<64x1xf32>
    %107 = arith.divf %105, %106 : vector<64x1xf32>
    %108 = arith.mulf %102, %102 : vector<64x1xf32>
    %109 = arith.subf %107, %108 : vector<64x1xf32>
    %110 = vector.broadcast %102 : vector<64x1xf32> to vector<64x32xf32>
    %111 = arith.subf %96, %110 : vector<64x32xf32>
    %cst_34 = arith.constant 9.99999974E-6 : f32
    %112 = vector.broadcast %cst_34 : f32 to vector<64x1xf32>
    %113 = arith.addf %109, %112 : vector<64x1xf32>
    %114 = math.rsqrt %113 : vector<64x1xf32>
    %115 = vector.broadcast %97 : vector<1x32xf32> to vector<64x32xf32>
    %116 = vector.broadcast %114 : vector<64x1xf32> to vector<64x32xf32>
    %117 = arith.mulf %115, %116 : vector<64x32xf32>
    %118 = arith.mulf %111, %117 : vector<64x32xf32>
    %119 = vector.broadcast %98 : vector<1x32xf32> to vector<64x32xf32>
    %120 = arith.addf %118, %119 : vector<64x32xf32>
    %121 = arith.truncf %120 : vector<64x32xf32> to vector<64x32xbf16>
    %c0_35 = arith.constant 0 : index
    %c0_36 = arith.constant 0 : index
    %c0_37 = arith.constant 0 : index
    %122 = vector.load %arg4[%c0_35, %c0_36, %c0_37] : memref<2x32x64xbf16, #tpu.memory_space<vmem>>, vector<1x32x64xbf16>
    %123 = vector.shape_cast %122 : vector<1x32x64xbf16> to vector<32x64xbf16>
    %cst_38 = arith.constant dense<0.000000e+00> : vector<64x64xf32>
    %124 = tpu.matmul %121, %123, %cst_38 {dimension_numbers = #tpu.dot_dimension_numbers<[1], [0], [0], [1], [0, 0, 1, 1], [], []>} : vector<64x32xbf16>, vector<32x64xbf16>, vector<64x64xf32> -> vector<64x64xf32>
    %125 = vector.extract_strided_slice %3 {offsets = [1, 0], sizes = [1, 64], strides = [1, 1]} : vector<3x128xf32> to vector<1x64xf32>
    %126 = vector.broadcast %125 : vector<1x64xf32> to vector<64x64xf32>
    %127 = arith.addf %124, %126 : vector<64x64xf32>
    %cst_39 = arith.constant 0.000000e+00 : f32
    %128 = vector.broadcast %cst_39 : f32 to vector<64x64xf32>
    %129 = arith.maximumf %127, %128 : vector<64x64xf32>
    %130 = arith.truncf %129 : vector<64x64xf32> to vector<64x64xbf16>
    %c0_40 = arith.constant 0 : index
    %c0_41 = arith.constant 0 : index
    %c0_42 = arith.constant 0 : index
    %131 = vector.load %arg5[%c0_40, %c0_41, %c0_42] : memref<2x64x32xbf16, #tpu.memory_space<vmem>>, vector<1x64x32xbf16>
    %132 = vector.shape_cast %131 : vector<1x64x32xbf16> to vector<64x32xbf16>
    %cst_43 = arith.constant dense<0.000000e+00> : vector<64x32xf32>
    %133 = tpu.matmul %130, %132, %cst_43 {dimension_numbers = #tpu.dot_dimension_numbers<[1], [0], [0], [1], [0, 0, 1, 1], [], []>} : vector<64x64xbf16>, vector<64x32xbf16>, vector<64x32xf32> -> vector<64x32xf32>
    %134 = vector.extract_strided_slice %3 {offsets = [1, 64], sizes = [1, 32], strides = [1, 1]} : vector<3x128xf32> to vector<1x32xf32>
    %135 = vector.broadcast %134 : vector<1x32xf32> to vector<64x32xf32>
    %136 = arith.addf %133, %135 : vector<64x32xf32>
    %137 = arith.addf %120, %136 : vector<64x32xf32>
    %138 = vector.extract_strided_slice %3 {offsets = [2, 64], sizes = [1, 32], strides = [1, 1]} : vector<3x128xf32> to vector<1x32xf32>
    %139 = vector.extract_strided_slice %3 {offsets = [2, 96], sizes = [1, 32], strides = [1, 1]} : vector<3x128xf32> to vector<1x32xf32>
    %cst_44 = arith.constant dense<0.000000e+00> : vector<64xf32>
    %140 = vector.multi_reduction <add>, %137, %cst_44 [1] : vector<64x32xf32> to vector<64xf32>
    %141 = vector.shape_cast %140 : vector<64xf32> to vector<64x1xf32>
    %cst_45 = arith.constant 3.200000e+01 : f32
    %142 = vector.broadcast %cst_45 : f32 to vector<64x1xf32>
    %143 = arith.divf %141, %142 : vector<64x1xf32>
    %144 = arith.mulf %137, %137 : vector<64x32xf32>
    %cst_46 = arith.constant dense<0.000000e+00> : vector<64xf32>
    %145 = vector.multi_reduction <add>, %144, %cst_46 [1] : vector<64x32xf32> to vector<64xf32>
    %146 = vector.shape_cast %145 : vector<64xf32> to vector<64x1xf32>
    %cst_47 = arith.constant 3.200000e+01 : f32
    %147 = vector.broadcast %cst_47 : f32 to vector<64x1xf32>
    %148 = arith.divf %146, %147 : vector<64x1xf32>
    %149 = arith.mulf %143, %143 : vector<64x1xf32>
    %150 = arith.subf %148, %149 : vector<64x1xf32>
    %151 = vector.broadcast %143 : vector<64x1xf32> to vector<64x32xf32>
    %152 = arith.subf %137, %151 : vector<64x32xf32>
    %cst_48 = arith.constant 9.99999974E-6 : f32
    %153 = vector.broadcast %cst_48 : f32 to vector<64x1xf32>
    %154 = arith.addf %150, %153 : vector<64x1xf32>
    %155 = math.rsqrt %154 : vector<64x1xf32>
    %156 = vector.broadcast %138 : vector<1x32xf32> to vector<64x32xf32>
    %157 = vector.broadcast %155 : vector<64x1xf32> to vector<64x32xf32>
    %158 = arith.mulf %156, %157 : vector<64x32xf32>
    %159 = arith.mulf %152, %158 : vector<64x32xf32>
    %160 = vector.broadcast %139 : vector<1x32xf32> to vector<64x32xf32>
    %161 = arith.addf %159, %160 : vector<64x32xf32>
    %c1 = arith.constant 1 : index
    %c0_49 = arith.constant 0 : index
    %c0_50 = arith.constant 0 : index
    %162 = vector.load %arg6[%c1, %c0_49, %c0_50] : memref<2x3x128xf32, #tpu.memory_space<vmem>>, vector<1x3x128xf32>
    %163 = vector.shape_cast %162 : vector<1x3x128xf32> to vector<3x128xf32>
    %164 = arith.truncf %161 : vector<64x32xf32> to vector<64x32xbf16>
    %c1_51 = arith.constant 1 : index
    %c0_52 = arith.constant 0 : index
    %c0_53 = arith.constant 0 : index
    %165 = vector.load %arg2[%c1_51, %c0_52, %c0_53] : memref<2x32x64xbf16, #tpu.memory_space<vmem>>, vector<1x32x64xbf16>
    %166 = vector.shape_cast %165 : vector<1x32x64xbf16> to vector<32x64xbf16>
    %cst_54 = arith.constant dense<0.000000e+00> : vector<64x64xf32>
    %167 = tpu.matmul %164, %166, %cst_54 {dimension_numbers = #tpu.dot_dimension_numbers<[1], [0], [0], [1], [0, 0, 1, 1], [], []>} : vector<64x32xbf16>, vector<32x64xbf16>, vector<64x64xf32> -> vector<64x64xf32>
    %168 = vector.extract_strided_slice %163 {offsets = [0, 0], sizes = [1, 64], strides = [1, 1]} : vector<3x128xf32> to vector<1x64xf32>
    %169 = vector.broadcast %168 : vector<1x64xf32> to vector<64x64xf32>
    %170 = arith.addf %167, %169 : vector<64x64xf32>
    %171 = vector.extract_strided_slice %170 {offsets = [0, 0], sizes = [64, 32], strides = [1, 1]} : vector<64x64xf32> to vector<64x32xf32>
    %cst_55 = arith.constant 0.353553385 : f32
    %172 = vector.broadcast %cst_55 : f32 to vector<64x32xf32>
    %173 = arith.mulf %171, %172 : vector<64x32xf32>
    %174 = arith.truncf %173 : vector<64x32xf32> to vector<64x32xbf16>
    %175 = vector.extract_strided_slice %170 {offsets = [0, 32], sizes = [64, 32], strides = [1, 1]} : vector<64x64xf32> to vector<64x32xf32>
    %176 = arith.truncf %175 : vector<64x32xf32> to vector<64x32xbf16>
    %c1_56 = arith.constant 1 : index
    %c0_57 = arith.constant 0 : index
    %c0_58 = arith.constant 0 : index
    %177 = vector.load %arg3[%c1_56, %c0_57, %c0_58] : memref<2x32x128xbf16, #tpu.memory_space<vmem>>, vector<1x32x128xbf16>
    %178 = vector.shape_cast %177 : vector<1x32x128xbf16> to vector<32x128xbf16>
    %cst_59 = arith.constant dense<0.000000e+00> : vector<64x128xf32>
    %179 = tpu.matmul %164, %178, %cst_59 {dimension_numbers = #tpu.dot_dimension_numbers<[1], [0], [0], [1], [0, 0, 1, 1], [], []>} : vector<64x32xbf16>, vector<32x128xbf16>, vector<64x128xf32> -> vector<64x128xf32>
    %180 = arith.truncf %179 : vector<64x128xf32> to vector<64x128xbf16>
    %181 = vector.extract_strided_slice %163 {offsets = [0, 64], sizes = [1, 32], strides = [1, 1]} : vector<3x128xf32> to vector<1x32xf32>
    %182 = vector.shape_cast %181 : vector<1x32xf32> to vector<1x32xf32>
    %183 = vector.broadcast %182 : vector<1x32xf32> to vector<64x32xf32>
    %184 = vector.extract_strided_slice %174 {offsets = [0, 0], sizes = [64, 8], strides = [1, 1]} : vector<64x32xbf16> to vector<64x8xbf16>
    %185 = vector.extract_strided_slice %176 {offsets = [0, 0], sizes = [64, 8], strides = [1, 1]} : vector<64x32xbf16> to vector<64x8xbf16>
    %cst_60 = arith.constant dense<0.000000e+00> : vector<64x64xf32>
    %186 = tpu.matmul %184, %185, %cst_60 {dimension_numbers = #tpu.dot_dimension_numbers<[1], [1], [0], [0], [0, 0, 1, 0], [], []>} : vector<64x8xbf16>, vector<64x8xbf16>, vector<64x64xf32> -> vector<64x64xf32>
    %187 = arith.addf %186, %1 : vector<64x64xf32>
    %cst_61 = arith.constant dense<0xFF800000> : vector<64xf32>
    %188 = vector.multi_reduction <maximumf>, %187, %cst_61 [1] : vector<64x64xf32> to vector<64xf32>
    %189 = vector.shape_cast %188 : vector<64xf32> to vector<64x1xf32>
    %190 = vector.broadcast %189 : vector<64x1xf32> to vector<64x64xf32>
    %191 = arith.subf %187, %190 : vector<64x64xf32>
    %192 = math.exp %191 : vector<64x64xf32>
    %cst_62 = arith.constant dense<0.000000e+00> : vector<64xf32>
    %193 = vector.multi_reduction <add>, %192, %cst_62 [1] : vector<64x64xf32> to vector<64xf32>
    %194 = vector.shape_cast %193 : vector<64xf32> to vector<64x1xf32>
    %195 = tpu.reciprocal %194 : vector<64x1xf32> -> vector<64x1xf32>
    %196 = vector.broadcast %195 : vector<64x1xf32> to vector<64x64xf32>
    %197 = arith.mulf %192, %196 : vector<64x64xf32>
    %198 = arith.truncf %197 : vector<64x64xf32> to vector<64x64xbf16>
    %199 = vector.extract_strided_slice %180 {offsets = [0, 0], sizes = [64, 32], strides = [1, 1]} : vector<64x128xbf16> to vector<64x32xbf16>
    %cst_63 = arith.constant dense<0.000000e+00> : vector<64x32xf32>
    %200 = tpu.matmul %198, %199, %cst_63 {dimension_numbers = #tpu.dot_dimension_numbers<[1], [0], [0], [1], [0, 0, 1, 1], [], []>} : vector<64x64xbf16>, vector<64x32xbf16>, vector<64x32xf32> -> vector<64x32xf32>
    %201 = arith.addf %183, %200 : vector<64x32xf32>
    %202 = vector.extract_strided_slice %174 {offsets = [0, 8], sizes = [64, 8], strides = [1, 1]} : vector<64x32xbf16> to vector<64x8xbf16>
    %203 = vector.extract_strided_slice %176 {offsets = [0, 8], sizes = [64, 8], strides = [1, 1]} : vector<64x32xbf16> to vector<64x8xbf16>
    %cst_64 = arith.constant dense<0.000000e+00> : vector<64x64xf32>
    %204 = tpu.matmul %202, %203, %cst_64 {dimension_numbers = #tpu.dot_dimension_numbers<[1], [1], [0], [0], [0, 0, 1, 0], [], []>} : vector<64x8xbf16>, vector<64x8xbf16>, vector<64x64xf32> -> vector<64x64xf32>
    %205 = arith.addf %204, %1 : vector<64x64xf32>
    %cst_65 = arith.constant dense<0xFF800000> : vector<64xf32>
    %206 = vector.multi_reduction <maximumf>, %205, %cst_65 [1] : vector<64x64xf32> to vector<64xf32>
    %207 = vector.shape_cast %206 : vector<64xf32> to vector<64x1xf32>
    %208 = vector.broadcast %207 : vector<64x1xf32> to vector<64x64xf32>
    %209 = arith.subf %205, %208 : vector<64x64xf32>
    %210 = math.exp %209 : vector<64x64xf32>
    %cst_66 = arith.constant dense<0.000000e+00> : vector<64xf32>
    %211 = vector.multi_reduction <add>, %210, %cst_66 [1] : vector<64x64xf32> to vector<64xf32>
    %212 = vector.shape_cast %211 : vector<64xf32> to vector<64x1xf32>
    %213 = tpu.reciprocal %212 : vector<64x1xf32> -> vector<64x1xf32>
    %214 = vector.broadcast %213 : vector<64x1xf32> to vector<64x64xf32>
    %215 = arith.mulf %210, %214 : vector<64x64xf32>
    %216 = arith.truncf %215 : vector<64x64xf32> to vector<64x64xbf16>
    %217 = vector.extract_strided_slice %180 {offsets = [0, 32], sizes = [64, 32], strides = [1, 1]} : vector<64x128xbf16> to vector<64x32xbf16>
    %cst_67 = arith.constant dense<0.000000e+00> : vector<64x32xf32>
    %218 = tpu.matmul %216, %217, %cst_67 {dimension_numbers = #tpu.dot_dimension_numbers<[1], [0], [0], [1], [0, 0, 1, 1], [], []>} : vector<64x64xbf16>, vector<64x32xbf16>, vector<64x32xf32> -> vector<64x32xf32>
    %219 = arith.addf %201, %218 : vector<64x32xf32>
    %220 = vector.extract_strided_slice %174 {offsets = [0, 16], sizes = [64, 8], strides = [1, 1]} : vector<64x32xbf16> to vector<64x8xbf16>
    %221 = vector.extract_strided_slice %176 {offsets = [0, 16], sizes = [64, 8], strides = [1, 1]} : vector<64x32xbf16> to vector<64x8xbf16>
    %cst_68 = arith.constant dense<0.000000e+00> : vector<64x64xf32>
    %222 = tpu.matmul %220, %221, %cst_68 {dimension_numbers = #tpu.dot_dimension_numbers<[1], [1], [0], [0], [0, 0, 1, 0], [], []>} : vector<64x8xbf16>, vector<64x8xbf16>, vector<64x64xf32> -> vector<64x64xf32>
    %223 = arith.addf %222, %1 : vector<64x64xf32>
    %cst_69 = arith.constant dense<0xFF800000> : vector<64xf32>
    %224 = vector.multi_reduction <maximumf>, %223, %cst_69 [1] : vector<64x64xf32> to vector<64xf32>
    %225 = vector.shape_cast %224 : vector<64xf32> to vector<64x1xf32>
    %226 = vector.broadcast %225 : vector<64x1xf32> to vector<64x64xf32>
    %227 = arith.subf %223, %226 : vector<64x64xf32>
    %228 = math.exp %227 : vector<64x64xf32>
    %cst_70 = arith.constant dense<0.000000e+00> : vector<64xf32>
    %229 = vector.multi_reduction <add>, %228, %cst_70 [1] : vector<64x64xf32> to vector<64xf32>
    %230 = vector.shape_cast %229 : vector<64xf32> to vector<64x1xf32>
    %231 = tpu.reciprocal %230 : vector<64x1xf32> -> vector<64x1xf32>
    %232 = vector.broadcast %231 : vector<64x1xf32> to vector<64x64xf32>
    %233 = arith.mulf %228, %232 : vector<64x64xf32>
    %234 = arith.truncf %233 : vector<64x64xf32> to vector<64x64xbf16>
    %235 = vector.extract_strided_slice %180 {offsets = [0, 64], sizes = [64, 32], strides = [1, 1]} : vector<64x128xbf16> to vector<64x32xbf16>
    %cst_71 = arith.constant dense<0.000000e+00> : vector<64x32xf32>
    %236 = tpu.matmul %234, %235, %cst_71 {dimension_numbers = #tpu.dot_dimension_numbers<[1], [0], [0], [1], [0, 0, 1, 1], [], []>} : vector<64x64xbf16>, vector<64x32xbf16>, vector<64x32xf32> -> vector<64x32xf32>
    %237 = arith.addf %219, %236 : vector<64x32xf32>
    %238 = vector.extract_strided_slice %174 {offsets = [0, 24], sizes = [64, 8], strides = [1, 1]} : vector<64x32xbf16> to vector<64x8xbf16>
    %239 = vector.extract_strided_slice %176 {offsets = [0, 24], sizes = [64, 8], strides = [1, 1]} : vector<64x32xbf16> to vector<64x8xbf16>
    %cst_72 = arith.constant dense<0.000000e+00> : vector<64x64xf32>
    %240 = tpu.matmul %238, %239, %cst_72 {dimension_numbers = #tpu.dot_dimension_numbers<[1], [1], [0], [0], [0, 0, 1, 0], [], []>} : vector<64x8xbf16>, vector<64x8xbf16>, vector<64x64xf32> -> vector<64x64xf32>
    %241 = arith.addf %240, %1 : vector<64x64xf32>
    %cst_73 = arith.constant dense<0xFF800000> : vector<64xf32>
    %242 = vector.multi_reduction <maximumf>, %241, %cst_73 [1] : vector<64x64xf32> to vector<64xf32>
    %243 = vector.shape_cast %242 : vector<64xf32> to vector<64x1xf32>
    %244 = vector.broadcast %243 : vector<64x1xf32> to vector<64x64xf32>
    %245 = arith.subf %241, %244 : vector<64x64xf32>
    %246 = math.exp %245 : vector<64x64xf32>
    %cst_74 = arith.constant dense<0.000000e+00> : vector<64xf32>
    %247 = vector.multi_reduction <add>, %246, %cst_74 [1] : vector<64x64xf32> to vector<64xf32>
    %248 = vector.shape_cast %247 : vector<64xf32> to vector<64x1xf32>
    %249 = tpu.reciprocal %248 : vector<64x1xf32> -> vector<64x1xf32>
    %250 = vector.broadcast %249 : vector<64x1xf32> to vector<64x64xf32>
    %251 = arith.mulf %246, %250 : vector<64x64xf32>
    %252 = arith.truncf %251 : vector<64x64xf32> to vector<64x64xbf16>
    %253 = vector.extract_strided_slice %180 {offsets = [0, 96], sizes = [64, 32], strides = [1, 1]} : vector<64x128xbf16> to vector<64x32xbf16>
    %cst_75 = arith.constant dense<0.000000e+00> : vector<64x32xf32>
    %254 = tpu.matmul %252, %253, %cst_75 {dimension_numbers = #tpu.dot_dimension_numbers<[1], [0], [0], [1], [0, 0, 1, 1], [], []>} : vector<64x64xbf16>, vector<64x32xbf16>, vector<64x32xf32> -> vector<64x32xf32>
    %255 = arith.addf %237, %254 : vector<64x32xf32>
    %256 = arith.addf %161, %255 : vector<64x32xf32>
    %257 = vector.extract_strided_slice %163 {offsets = [2, 0], sizes = [1, 32], strides = [1, 1]} : vector<3x128xf32> to vector<1x32xf32>
    %258 = vector.extract_strided_slice %163 {offsets = [2, 32], sizes = [1, 32], strides = [1, 1]} : vector<3x128xf32> to vector<1x32xf32>
    %cst_76 = arith.constant dense<0.000000e+00> : vector<64xf32>
    %259 = vector.multi_reduction <add>, %256, %cst_76 [1] : vector<64x32xf32> to vector<64xf32>
    %260 = vector.shape_cast %259 : vector<64xf32> to vector<64x1xf32>
    %cst_77 = arith.constant 3.200000e+01 : f32
    %261 = vector.broadcast %cst_77 : f32 to vector<64x1xf32>
    %262 = arith.divf %260, %261 : vector<64x1xf32>
    %263 = arith.mulf %256, %256 : vector<64x32xf32>
    %cst_78 = arith.constant dense<0.000000e+00> : vector<64xf32>
    %264 = vector.multi_reduction <add>, %263, %cst_78 [1] : vector<64x32xf32> to vector<64xf32>
    %265 = vector.shape_cast %264 : vector<64xf32> to vector<64x1xf32>
    %cst_79 = arith.constant 3.200000e+01 : f32
    %266 = vector.broadcast %cst_79 : f32 to vector<64x1xf32>
    %267 = arith.divf %265, %266 : vector<64x1xf32>
    %268 = arith.mulf %262, %262 : vector<64x1xf32>
    %269 = arith.subf %267, %268 : vector<64x1xf32>
    %270 = vector.broadcast %262 : vector<64x1xf32> to vector<64x32xf32>
    %271 = arith.subf %256, %270 : vector<64x32xf32>
    %cst_80 = arith.constant 9.99999974E-6 : f32
    %272 = vector.broadcast %cst_80 : f32 to vector<64x1xf32>
    %273 = arith.addf %269, %272 : vector<64x1xf32>
    %274 = math.rsqrt %273 : vector<64x1xf32>
    %275 = vector.broadcast %257 : vector<1x32xf32> to vector<64x32xf32>
    %276 = vector.broadcast %274 : vector<64x1xf32> to vector<64x32xf32>
    %277 = arith.mulf %275, %276 : vector<64x32xf32>
    %278 = arith.mulf %271, %277 : vector<64x32xf32>
    %279 = vector.broadcast %258 : vector<1x32xf32> to vector<64x32xf32>
    %280 = arith.addf %278, %279 : vector<64x32xf32>
    %281 = arith.truncf %280 : vector<64x32xf32> to vector<64x32xbf16>
    %c1_81 = arith.constant 1 : index
    %c0_82 = arith.constant 0 : index
    %c0_83 = arith.constant 0 : index
    %282 = vector.load %arg4[%c1_81, %c0_82, %c0_83] : memref<2x32x64xbf16, #tpu.memory_space<vmem>>, vector<1x32x64xbf16>
    %283 = vector.shape_cast %282 : vector<1x32x64xbf16> to vector<32x64xbf16>
    %cst_84 = arith.constant dense<0.000000e+00> : vector<64x64xf32>
    %284 = tpu.matmul %281, %283, %cst_84 {dimension_numbers = #tpu.dot_dimension_numbers<[1], [0], [0], [1], [0, 0, 1, 1], [], []>} : vector<64x32xbf16>, vector<32x64xbf16>, vector<64x64xf32> -> vector<64x64xf32>
    %285 = vector.extract_strided_slice %163 {offsets = [1, 0], sizes = [1, 64], strides = [1, 1]} : vector<3x128xf32> to vector<1x64xf32>
    %286 = vector.broadcast %285 : vector<1x64xf32> to vector<64x64xf32>
    %287 = arith.addf %284, %286 : vector<64x64xf32>
    %cst_85 = arith.constant 0.000000e+00 : f32
    %288 = vector.broadcast %cst_85 : f32 to vector<64x64xf32>
    %289 = arith.maximumf %287, %288 : vector<64x64xf32>
    %290 = arith.truncf %289 : vector<64x64xf32> to vector<64x64xbf16>
    %c1_86 = arith.constant 1 : index
    %c0_87 = arith.constant 0 : index
    %c0_88 = arith.constant 0 : index
    %291 = vector.load %arg5[%c1_86, %c0_87, %c0_88] : memref<2x64x32xbf16, #tpu.memory_space<vmem>>, vector<1x64x32xbf16>
    %292 = vector.shape_cast %291 : vector<1x64x32xbf16> to vector<64x32xbf16>
    %cst_89 = arith.constant dense<0.000000e+00> : vector<64x32xf32>
    %293 = tpu.matmul %290, %292, %cst_89 {dimension_numbers = #tpu.dot_dimension_numbers<[1], [0], [0], [1], [0, 0, 1, 1], [], []>} : vector<64x64xbf16>, vector<64x32xbf16>, vector<64x32xf32> -> vector<64x32xf32>
    %294 = vector.extract_strided_slice %163 {offsets = [1, 64], sizes = [1, 32], strides = [1, 1]} : vector<3x128xf32> to vector<1x32xf32>
    %295 = vector.broadcast %294 : vector<1x32xf32> to vector<64x32xf32>
    %296 = arith.addf %293, %295 : vector<64x32xf32>
    %297 = arith.addf %280, %296 : vector<64x32xf32>
    %298 = vector.extract_strided_slice %163 {offsets = [2, 64], sizes = [1, 32], strides = [1, 1]} : vector<3x128xf32> to vector<1x32xf32>
    %299 = vector.extract_strided_slice %163 {offsets = [2, 96], sizes = [1, 32], strides = [1, 1]} : vector<3x128xf32> to vector<1x32xf32>
    %cst_90 = arith.constant dense<0.000000e+00> : vector<64xf32>
    %300 = vector.multi_reduction <add>, %297, %cst_90 [1] : vector<64x32xf32> to vector<64xf32>
    %301 = vector.shape_cast %300 : vector<64xf32> to vector<64x1xf32>
    %cst_91 = arith.constant 3.200000e+01 : f32
    %302 = vector.broadcast %cst_91 : f32 to vector<64x1xf32>
    %303 = arith.divf %301, %302 : vector<64x1xf32>
    %304 = arith.mulf %297, %297 : vector<64x32xf32>
    %cst_92 = arith.constant dense<0.000000e+00> : vector<64xf32>
    %305 = vector.multi_reduction <add>, %304, %cst_92 [1] : vector<64x32xf32> to vector<64xf32>
    %306 = vector.shape_cast %305 : vector<64xf32> to vector<64x1xf32>
    %cst_93 = arith.constant 3.200000e+01 : f32
    %307 = vector.broadcast %cst_93 : f32 to vector<64x1xf32>
    %308 = arith.divf %306, %307 : vector<64x1xf32>
    %309 = arith.mulf %303, %303 : vector<64x1xf32>
    %310 = arith.subf %308, %309 : vector<64x1xf32>
    %311 = vector.broadcast %303 : vector<64x1xf32> to vector<64x32xf32>
    %312 = arith.subf %297, %311 : vector<64x32xf32>
    %cst_94 = arith.constant 9.99999974E-6 : f32
    %313 = vector.broadcast %cst_94 : f32 to vector<64x1xf32>
    %314 = arith.addf %310, %313 : vector<64x1xf32>
    %315 = math.rsqrt %314 : vector<64x1xf32>
    %316 = vector.broadcast %298 : vector<1x32xf32> to vector<64x32xf32>
    %317 = vector.broadcast %315 : vector<64x1xf32> to vector<64x32xf32>
    %318 = arith.mulf %316, %317 : vector<64x32xf32>
    %319 = arith.mulf %312, %318 : vector<64x32xf32>
    %320 = vector.broadcast %299 : vector<1x32xf32> to vector<64x32xf32>
    %321 = arith.addf %319, %320 : vector<64x32xf32>
    %322 = arith.truncf %321 : vector<64x32xf32> to vector<64x32xbf16>
    %c0_95 = arith.constant 0 : index
    %c0_96 = arith.constant 0 : index
    %323 = vector.load %arg7[%c0_95, %c0_96] : memref<32x128xbf16, #tpu.memory_space<vmem>>, vector<32x128xbf16>
    %cst_97 = arith.constant dense<0.000000e+00> : vector<64x128xf32>
    %324 = tpu.matmul %322, %323, %cst_97 {dimension_numbers = #tpu.dot_dimension_numbers<[1], [0], [0], [1], [0, 0, 1, 1], [], []>} : vector<64x32xbf16>, vector<32x128xbf16>, vector<64x128xf32> -> vector<64x128xf32>
    %c0_98 = arith.constant 0 : index
    %c0_99 = arith.constant 0 : index
    %325 = vector.load %arg8[%c0_98, %c0_99] : memref<1x128xf32, #tpu.memory_space<vmem>>, vector<1x128xf32>
    %326 = vector.broadcast %325 : vector<1x128xf32> to vector<64x128xf32>
    %327 = arith.addf %324, %326 : vector<64x128xf32>
    %c0_100 = arith.constant 0 : index
    %c0_101 = arith.constant 0 : index
    %328 = vector.load %arg9[%c0_100, %c0_101] : memref<64x128xf32, #tpu.memory_space<vmem>>, vector<64x128xf32>
    tpu.vector_store %arg9[%c0_100, %c0_101], %327 {strides = array<i32>} : memref<64x128xf32, #tpu.memory_space<vmem>>, vector<64x128xf32>,
    return
  }
}

</mosaic_0001>

<bundles_post_ra>
// kernel: tpu_custom_call.1
= control target key start
LH: loop header
LB: loop body
LE: loop exit
PB: predicated region body
PF: predicated region fallthrough
CT: control target
= control target key end

     0   :  { %s8240_s0 = inlined_call_operand.vmem [shape: f32[64,32], index: 0, kind: input, shape index: {}]   ;;  %s8241_s1 = inlined_call_operand.vmem [shape: f32[64,64], index: 1, kind: input, shape index: {}]   ;;  %s8242_s2 = inlined_call_operand.vmem [shape: bf16[2,32,64], index: 2, kind: input, shape index: {}]   ;;  %s8243_s3 = inlined_call_operand.vmem [shape: bf16[2,32,128], index: 3, kind: input, shape index: {}]   ;;  %s8244_s4 = inlined_call_operand.vmem [shape: bf16[2,32,64], index: 4, kind: input, shape index: {}]   ;;  %s8245_s5 = inlined_call_operand.vmem [shape: bf16[2,64,32], index: 5, kind: input, shape index: {}]   ;;  %s8246_s6 = inlined_call_operand.vmem [shape: f32[2,3,128], index: 6, kind: input, shape index: {}]   ;;  %s8247_s7 = inlined_call_operand.vmem [shape: bf16[32,128], index: 7, kind: input, shape index: {}]   ;;  %s8248_s8 = inlined_call_operand.vmem [shape: f32[1,128], index: 8, kind: input, shape index: {}]   ;;  %s8249_s9 = inlined_call_operand.hbm [shape: f32[64,128], index: 9, kind: output, shape index: {}]  }
   0x1   :  { %v4908_v0 = vld [vmem:[%s8242_s2 + $0x8] sm:$0xff]  ;;  %v4907_v1 = vld [vmem:[%s8242_s2] sm:$0xff] }
   0x2   :  { %v34_v2 = vld [vmem:[%s8240_s0] sm:$0xff]  ;;  %91 = vmatpush.bf16.msra.mxu0 %v4908_v0  ;;  %4929 = vmatpush.bf16.msra.mxu1 %v4908_v0  ;;  %v35_v3 = vld [vmem:[%s8240_s0 + $0x8] sm:$0xff] }
   0x3   :  { %v38_v4 = vld [vmem:[%s8240_s0 + $0x20] sm:$0xff]  ;;  %v39_v5 = vld [vmem:[%s8240_s0 + $0x28] sm:$0xff] }
   0x4   :  { %v4910_v6 = vld [vmem:[%s8243_s3 + $0x8] sm:$0xff] }
   0x5   :  { %14 = vsyncpa [#allocation3], 0  ;;  %v51_v7 = vpack.c.bf16 %v35_v3, %v34_v2  ;;  %v53_v8 = vpack.c.bf16 %v39_v5, %v38_v4  ;;  %vm72_vm0 = vcmask 261120   ;;  %v4909_v9 = vld [vmem:[%s8243_s3] sm:$0xff]  ;;  %v36_v10 = vld [vmem:[%s8240_s0 + $0x10] sm:$0xff]  ;;  %s5319_s14 = smov 88  }
   0x6   :  { %92 = vmatpush.bf16.msra.mxu0 %v4907_v1  ;;  %4930 = vmatpush.bf16.msra.mxu1 %v4907_v1  ;;  %v37_v11 = vld [vmem:[%s8240_s0 + $0x18] sm:$0xff]  ;;  %v40_v12 = vld [vmem:[%s8240_s0 + $0x30] sm:$0xff]  ;;  %v50_v16 = vld [vmem:[%s8246_s6] sm:$0x7]  ;;  %s5320_s15 = smov 120   ;;  %s5321_s16 = smov 96  }
   0x7   :  { %v41_v13 = vld [vmem:[%s8240_s0 + $0x38] sm:$0xff]  ;;  %v52_v14 = vpack.c.bf16 %v37_v11, %v36_v10  ;;  %v5429_v19 = vperm.slane %v50_v16, 0  ;;  %s5322_s17 = smov 80   ;;  %vm239_vm1 = vcmask 64512   ;;  %vm293_vm2 = vcmask 523264   ;;  %s5323_s30 = smov 72  }
   0x8   :  { %v54_v15 = vpack.c.bf16 %v41_v13, %v40_v12  ;;  %s5324_s18 = smov 112   ;;  %s5325_s19 = smov 104  }
   0x9   :  { %4706 = vmatmul.msk.bf16.vlgmr.msra.gmra.mxu0 %vm72_vm0, %v51_v7  ;;  %4708 = vmatmul.msk.bf16.vlgmr.msra.gmra.mxu1 %vm72_vm0, %v53_v8  ;;  %s5326_s20 = smov 64   ;;  %s5327_s13 = smov 32  }
   0xa   :  { %160 = vmatpush.bf16.msrb.mxu1 %v4910_v6  ;;  %s4686_s29 = sshll.u32 %s8249_s9, 4  ;;  %s5330_s10 = smov 128   ;;  %s4687_s29 = int_to_ptr.hbm [resolvable:$true] %s4686_s29 }
   0xb   :  { %s5331_s11 = smov 8  }
   0xe   :  { %161 = vmatpush.bf16.msrb.mxu1 %v4909_v9 }
  0x19   :  { %4707 = vmatmul.msk.bf16.gmra.mxu0 %vm72_vm0, %v52_v14  ;;  %4709 = vmatmul.msk.bf16.gmra.mxu1 %vm72_vm0, %v54_v15 }
  0x29   :  { %4718 = vmatmul.msk.bf16.vlgmr.msrb.gmra.mxu1 %vm72_vm0, %v51_v7 }
  0x39   :  { %4719 = vmatmul.msk.bf16.gmra.mxu1 %vm72_vm0, %v52_v14 }
  0x49   :  { %4720 = vmatmul.msk.bf16.gmra.mxu1 %vm72_vm0, %v53_v8 }
  0x59   :  { %4721 = vmatmul.msk.bf16.gmra.mxu1 %vm72_vm0, %v54_v15 }
  0x86   :  { %v94_v17 = vpop.f32.mrf.mxu0  ;;  %v104_v18 = vpop.f32.mrf.mxu1 }
  0x87   :  { %v95_v20 = vadd.f32 %v94_v17, %v5429_v19  ;;  %v105_v38 = vadd.f32 %v104_v18, %v5429_v19 }
  0x89   :  { %v130_v21 = vpack.c.bf16 %v95_v20, %v95_v20  ;;  %v114_v24 = vmul.f32 0.35355338, %v95_v20  ;;  %v118_v43 = vmul.f32 0.35355338, %v105_v38  ;;  %v134_v6 = vpack.c.bf16 %v105_v38, %v105_v38 }
  0x8b   :  { %v219_v26 = vunpack.c.l.b16 %v130_v21  ;;  %v122_v29 = vpack.c.bf16 %v114_v24, %v114_v24  ;;  %v126_v52 = vpack.c.bf16 %v118_v43, %v118_v43  ;;  %v223_v9 = vunpack.c.l.b16 %v134_v6 }
  0x8d   :  { %v199_v36 = vunpack.c.l.b16 %v122_v29  ;;  %v203_v63 = vunpack.c.l.b16 %v126_v52 }
  0x8e   :  { %v96_v22 = vpop.f32.mrf.mxu0  ;;  %v106_v23 = vpop.f32.mrf.mxu1 }
  0x8f   :  { %v97_v25 = vadd.f32 %v96_v22, %v5429_v19  ;;  %v107_v33 = vadd.f32 %v106_v23, %v5429_v19 }
  0x91   :  { %v115_v27 = vmul.f32 0.35355338, %v97_v25  ;;  %v131_v28 = vpack.c.bf16 %v97_v25, %v97_v25  ;;  %v119_v41 = vmul.f32 0.35355338, %v107_v33  ;;  %v135_v0 = vpack.c.bf16 %v107_v33, %v107_v33 }
  0x93   :  { %v123_v30 = vpack.c.bf16 %v115_v27, %v115_v27  ;;  %v220_v31 = vunpack.c.l.b16 %v131_v28  ;;  %v127_v46 = vpack.c.bf16 %v119_v41, %v119_v41  ;;  %v224_v8 = vunpack.c.l.b16 %v135_v0 }
  0x95   :  { %v5433_v32 = vpack.c.b16 %v220_v31, %v219_v26  ;;  %v200_v37 = vunpack.c.l.b16 %v123_v30  ;;  %v204_v58 = vunpack.c.l.b16 %v127_v46  ;;  %v5461_v10 = vpack.c.b16 %v224_v8, %v223_v9 }
  0x96   :  { %v99_v34 = vpop.f32.mrf.mxu0  ;;  %v109_v35 = vpop.f32.mrf.mxu1 }
  0x97   :  { %603 = vrot.lane.b32.xlu2 %v5433_v32, %s5319_s14  ;;  %v100_v39 = vadd.f32 %v99_v34, %v5429_v19  ;;  %v110_v40 = vadd.f32 %v109_v35, %v5429_v19  ;;  %v5441_v42 = vpack.c.b16 %v200_v37, %v199_v36  ;;  %v5451_v5 = vpack.c.b16 %v204_v58, %v203_v63 }
  0x99   :  { %v132_v44 = vpack.c.bf16 %v100_v39, %v100_v39  ;;  %v120_v45 = vmul.f32 0.35355338, %v110_v40  ;;  %v136_v49 = vpack.c.bf16 %v110_v40, %v110_v40  ;;  %v116_v12 = vmul.f32 0.35355338, %v100_v39 }
  0x9b   :  { %v221_v53 = vunpack.c.l.b16 %v132_v44  ;;  %v128_v54 = vpack.c.bf16 %v120_v45, %v120_v45  ;;  %v225_v59 = vunpack.c.l.b16 %v136_v49  ;;  %v124_v14 = vpack.c.bf16 %v116_v12, %v116_v12 }
  0x9d   :  { %v205_v1 = vunpack.c.l.b16 %v128_v54  ;;  %v201_v17 = vunpack.c.l.b16 %v124_v14 }
  0x9e   :  { %v101_v47 = vpop.f32.mrf.mxu0  ;;  %v111_v48 = vpop.f32.mrf.mxu1 }
  0x9f   :  { %v102_v50 = vadd.f32 %v101_v47, %v5429_v19  ;;  %v112_v51 = vadd.f32 %v111_v48, %v5429_v19  ;;  %595 = vrot.lane.b32.xlu2 %v5441_v42, %s5320_s15 }
  0xa1   :  { %v133_v55 = vpack.c.bf16 %v102_v50, %v102_v50  ;;  %v121_v56 = vmul.f32 0.35355338, %v112_v51  ;;  %v137_v57 = vpack.c.bf16 %v112_v51, %v112_v51  ;;  %v117_v13 = vmul.f32 0.35355338, %v102_v50 }
  0xa3   :  { %v222_v60 = vunpack.c.l.b16 %v133_v55  ;;  %v129_v61 = vpack.c.bf16 %v121_v56, %v121_v56  ;;  %v226_v62 = vunpack.c.l.b16 %v137_v57  ;;  %v125_v15 = vpack.c.bf16 %v117_v13, %v117_v13 }
  0xa5   :  { %v5447_v2 = vpack.c.b16 %v222_v60, %v221_v53  ;;  %v206_v3 = vunpack.c.l.b16 %v129_v61  ;;  %v5449_v4 = vpack.c.b16 %v226_v62, %v225_v59  ;;  %v202_v18 = vunpack.c.l.b16 %v125_v15 }
  0xa6   :  { %v163_v11 = vpop.f32.mrf.mxu1 }
  0xa7   :  { %v5453_v7 = vpack.c.b16 %v206_v3, %v205_v1  ;;  %237 = vrot.lane.b32.xlu0 %v5449_v4, %s5321_s16  ;;  %233 = vrot.lane.b32.xlu1 %v5447_v2, %s5321_s16  ;;  %v5479_v20 = vpack.c.b16 %v202_v18, %v201_v17  ;;  %v183_v39 = vpack.c.bf16 %v163_v11, %v163_v11  ;;  %v5523_v17 = vld [vmem:[%s8241_s1] sm:$0xff] }
  0xa8   :  { %599 = vrot.lane.b32.xlu2 %v5451_v5, %s5320_s15 }
  0xa9   :  { %v498_v45 = vunpack.c.l.b16 %v183_v39 }
  0xae   :  { %v165_v16 = vpop.f32.mrf.mxu1 }
  0xaf   :  { %235 = vrot.lane.b32.xlu0 %v5461_v10, %s5321_s16  ;;  %231 = vrot.lane.b32.xlu1 %v5433_v32, %s5321_s16  ;;  %v184_v40 = vpack.c.bf16 %v165_v16, %v165_v16 }
  0xb1   :  { %v499_v46 = vunpack.c.l.b16 %v184_v40 }
  0xb3   :  { %v5493_v48 = vpack.c.b16 %v499_v46, %v498_v45 }
  0xb6   :  { %v168_v21 = vpop.f32.mrf.mxu1 }
  0xb7   :  { %965 = vrot.lane.b32.xlu0 %v5461_v10, %s5322_s17  ;;  %607 = vrot.lane.b32.xlu1 %v5461_v10, %s5319_s14  ;;  %v185_v33 = vpack.c.bf16 %v168_v21, %v168_v21 }
  0xb9   :  { %v500_v41 = vunpack.c.l.b16 %v185_v33 }
  0xbe   :  { %v170_v22 = vpop.f32.mrf.mxu1 }
  0xbf   :  { %609 = vrot.lane.b32.xlu0 %v5449_v4, %s5319_s14  ;;  %967 = vrot.lane.b32.xlu1 %v5449_v4, %s5322_s17  ;;  %v186_v34 = vpack.c.bf16 %v170_v22, %v170_v22 }
  0xc1   :  { %v501_v43 = vunpack.c.l.b16 %v186_v34 }
  0xc3   :  { %v5490_v47 = vpack.c.b16 %v501_v43, %v500_v41  ;;  %v5558_v41 = vld [vmem:[%s8241_s1 + $0x28] sm:$0xff] }
  0xc6   :  { %v173_v23 = vpop.f32.mrf.mxu1 }
  0xc7   :  { %605 = vrot.lane.b32.xlu0 %v5447_v2, %s5319_s14  ;;  %963 = vrot.lane.b32.xlu1 %v5447_v2, %s5322_s17  ;;  %v187_v27 = vpack.c.bf16 %v173_v23, %v173_v23  ;;  %v5530_v23 = vld [vmem:[%s8241_s1 + $0x8] sm:$0xff] }
  0xc9   :  { %v502_v35 = vunpack.c.l.b16 %v187_v27  ;;  %v5537_v27 = vld [vmem:[%s8241_s1 + $0x10] sm:$0xff] }
  0xce   :  { %v175_v24 = vpop.f32.mrf.mxu1 }
  0xcf   :  { %597 = vrot.lane.b32.xlu0 %v5479_v20, %s5320_s15  ;;  %961 = vrot.lane.b32.xlu1 %v5433_v32, %s5322_s17  ;;  %v188_v28 = vpack.c.bf16 %v175_v24, %v175_v24 }
  0xd1   :  { %v503_v36 = vunpack.c.l.b16 %v188_v28 }
  0xd3   :  { %v5487_v44 = vpack.c.b16 %v503_v36, %v502_v35  ;;  %v5551_v36 = vld [vmem:[%s8241_s1 + $0x20] sm:$0xff] }
  0xd6   :  { %v178_v25 = vpop.f32.mrf.mxu1 }
  0xd7   :  { %v189_v26 = vpack.c.bf16 %v178_v25, %v178_v25 }
  0xd9   :  { %v504_v30 = vunpack.c.l.b16 %v189_v26 }
  0xde   :  { %v180_v29 = vpop.f32.mrf.mxu1 }
  0xdf   :  { %v190_v31 = vpack.c.bf16 %v180_v29, %v180_v29 }
  0xe1   :  { %v505_v37 = vunpack.c.l.b16 %v190_v31  ;;  %v5544_v31 = vld [vmem:[%s8241_s1 + $0x18] sm:$0xff] }
  0xe3   :  { %v5485_v38 = vpack.c.b16 %v505_v37, %v504_v30 }
  0xe5   :  { %530 = vmatpush.bf16.msra.mxu3 %v5485_v38 }
  0xe9   :  { %531 = vmatpush.bf16.msra.mxu3 %v5487_v44 }
  0xed   :  { %532 = vmatpush.bf16.msra.mxu3 %v5490_v47 }
  0xf1   :  { %533 = vmatpush.bf16.msra.mxu3 %v5493_v48  ;;  %v604_v9 = vpop.permute.xlu2 %603 }
  0xf2   :  { %v624_v12 = vsel %vm239_vm1, %v604_v9, 0 }
  0xf9   :  { %v596_v14 = vpop.permute.xlu2 %595 }
 0x102   :  { %v600_v16 = vpop.permute.xlu2 %599 }
 0x119   :  { %v238_v49 = vpop.permute.xlu0 %237  ;;  %v234_v50 = vpop.permute.xlu1 %233 }
 0x11a   :  { %v262_v51 = vsel %vm239_vm1, %v238_v49, 0  ;;  %v256_v57 = vsel %vm239_vm1, %v234_v50, 0  ;;  %v5567_v49 = vld [vmem:[%s8241_s1 + $0x30] sm:$0xff] }
 0x11b   :  { %268 = vmatpush.bf16.xpose.msra.mxu2 %v262_v51 }
 0x121   :  { %v236_v52 = vpop.permute.xlu0 %235  ;;  %v232_v53 = vpop.permute.xlu1 %231 }
 0x122   :  { %v259_v54 = vsel %vm239_vm1, %v236_v52, 0  ;;  %v253_v60 = vsel %vm239_vm1, %v232_v53, 0  ;;  %v5579_v52 = vld [vmem:[%s8241_s1 + $0x38] sm:$0xff] }
 0x123   :  { %269 = vmatpush.bf16.xpose.msra.mxu2 %v259_v54 }
 0x129   :  { %v966_v55 = vpop.permute.xlu0 %965  ;;  %v608_v56 = vpop.permute.xlu1 %607 }
 0x12a   :  { %v630_v63 = vsel %vm239_vm1, %v608_v56, 0  ;;  %v988_v0 = vsel %vm239_vm1, %v966_v55, 0 }
 0x12b   :  { %270 = vmatpush.bf16.xpose.msra.mxu2 %v256_v57 }
 0x131   :  { %v610_v58 = vpop.permute.xlu0 %609  ;;  %v968_v59 = vpop.permute.xlu1 %967 }
 0x132   :  { %v633_v61 = vsel %vm239_vm1, %v610_v58, 0  ;;  %v991_v62 = vsel %vm239_vm1, %v968_v59, 0 }
 0x133   :  { %271 = vmatpush.bf16.xpose.msra.mxu2 %v253_v60  ;;  %639 = vmatpush.bf16.xpose.msrb.mxu0 %v633_v61 }
 0x134   :  { %997 = vmatpush.bf16.xpose.msrb.mxu3 %v991_v62 }
 0x139   :  { %v964_v1 = vpop.permute.xlu1 %963  ;;  %v606_v3 = vpop.permute.xlu0 %605 }
 0x13a   :  { %4722 = vmatmul.msk.bf16.vlgmr.msra.gmra.mxu2 %vm239_vm1, %v5441_v42  ;;  %v627_v6 = vsel %vm239_vm1, %v606_v3, 0  ;;  %v985_v8 = vsel %vm239_vm1, %v964_v1, 0 }
 0x13b   :  { %640 = vmatpush.bf16.xpose.msrb.mxu0 %v630_v63 }
 0x13c   :  { %998 = vmatpush.bf16.xpose.msrb.mxu3 %v988_v0 }
 0x141   :  { %v962_v11 = vpop.permute.xlu1 %961  ;;  %v598_v15 = vpop.permute.xlu0 %597 }
 0x142   :  { %v982_v13 = vsel %vm239_vm1, %v962_v11, 0 }
 0x143   :  { %641 = vmatpush.bf16.xpose.msrb.mxu0 %v627_v6 }
 0x144   :  { %999 = vmatpush.bf16.xpose.msrb.mxu3 %v985_v8 }
 0x14a   :  { %4723 = vmatmul.msk.bf16.gmra.mxu2 %vm239_vm1, %v5479_v20 }
 0x14b   :  { %642 = vmatpush.bf16.xpose.msrb.mxu0 %v624_v12 }
 0x14c   :  { %1000 = vmatpush.bf16.xpose.msrb.mxu3 %v982_v13 }
 0x152   :  { %4730 = vmatmul.msk.bf16.vlgmr.msrb.gmra.mxu0 %vm239_vm1, %v596_v14 }
 0x15a   :  { %4724 = vmatmul.msk.bf16.gmra.mxu2 %vm239_vm1, %v5451_v5 }
 0x162   :  { %4731 = vmatmul.msk.bf16.gmra.mxu0 %vm239_vm1, %v598_v15 }
 0x16a   :  { %4725 = vmatmul.msk.bf16.gmra.mxu2 %vm239_vm1, %v5453_v7 }
 0x172   :  { %4732 = vmatmul.msk.bf16.gmra.mxu0 %vm239_vm1, %v600_v16 }
 0x1bd   :  { %v273_v18 = vpop.f32.mrf.mxu2 }
 0x1be   :  { %v274_v21 = vadd.f32 %v273_v18, %v5523_v17 }
 0x1c0   :  { %v294_v22 = vsel %vm293_vm2, %v274_v21, -inf }
 0x1c1   :  { %295 = vmax.xlane.f32.xlu2 %v294_v22 }
 0x1c5   :  { %v275_v24 = vpop.f32.mrf.mxu2 }
 0x1c6   :  { %v276_v25 = vadd.f32 %v275_v24, %v5530_v23 }
 0x1c8   :  { %v297_v26 = vsel %vm293_vm2, %v276_v25, -inf }
 0x1c9   :  { %298 = vmax.xlane.f32.xlu2 %v297_v26 }
 0x1cd   :  { %v278_v28 = vpop.f32.mrf.mxu2 }
 0x1ce   :  { %v279_v29 = vadd.f32 %v278_v28, %v5537_v27 }
 0x1d0   :  { %v300_v30 = vsel %vm293_vm2, %v279_v29, -inf }
 0x1d1   :  { %301 = vmax.xlane.f32.xlu0 %v300_v30 }
 0x1d5   :  { %v280_v33 = vpop.f32.mrf.mxu2 }
 0x1d6   :  { %v281_v34 = vadd.f32 %v280_v33, %v5544_v31 }
 0x1d8   :  { %v303_v35 = vsel %vm293_vm2, %v281_v34, -inf }
 0x1d9   :  { %304 = vmax.xlane.f32.xlu1 %v303_v35 }
 0x1dd   :  { %v283_v37 = vpop.f32.mrf.mxu2 }
 0x1de   :  { %v284_v39 = vadd.f32 %v283_v37, %v5551_v36 }
 0x1e0   :  { %v306_v40 = vsel %vm293_vm2, %v284_v39, -inf }
 0x1e1   :  { %307 = vmax.xlane.f32.xlu2 %v306_v40 }
 0x1e5   :  { %v285_v43 = vpop.f32.mrf.mxu2  ;;  %1325 = vrot.lane.b32.xlu0 %v5449_v4, %s5323_s30 }
 0x1e6   :  { %v286_v45 = vadd.f32 %v285_v43, %v5558_v41 }
 0x1e8   :  { %v309_v46 = vsel %vm293_vm2, %v286_v45, -inf }
 0x1e9   :  { %310 = vmax.xlane.f32.xlu2 %v309_v46 }
 0x1ed   :  { %v288_v50 = vpop.f32.mrf.mxu2  ;;  %1323 = vrot.lane.b32.xlu0 %v5461_v10, %s5323_s30 }
 0x1ee   :  { %v5572_v51 = vadd.f32 %v288_v50, %v5567_v49 }
 0x1f0   :  { %v312_v4 = vsel %vm293_vm2, %v5572_v51, -inf }
 0x1f1   :  { %313 = vmax.xlane.f32.xlu2 %v312_v4 }
 0x1f5   :  { %v290_v53 = vpop.f32.mrf.mxu2 }
 0x1f6   :  { %v5582_v54 = vadd.f32 %v290_v53, %v5579_v52 }
 0x1f8   :  { %v315_v55 = vsel %vm293_vm2, %v5582_v54, -inf }
 0x1f9   :  { %316 = vmax.xlane.f32.xlu2 %v315_v55 }
 0x234   :  { %v296_v10 = vpop.xlane.xlu2 %295 }
 0x235   :  { %v318_v56 = vsub.f32 %v274_v21, %v296_v10 }
 0x237   :  { %v326_v57 = vmul.f32 1.442695, %v318_v56 }
 0x239   :  { %4945 = vpow2.f32 %v326_v57 }
 0x23c   :  { %v299_v58 = vpop.xlane.xlu2 %298 }
 0x23d   :  { %v319_v59 = vsub.f32 %v276_v25, %v299_v58 }
 0x23f   :  { %v5586_v60 = vpop.eup %4945  ;;  %v328_v61 = vmul.f32 1.442695, %v319_v59 }
 0x240   :  { %v342_v62 = vsel %vm293_vm2, %v5586_v60, 0.0 }
 0x241   :  { %4947 = vpow2.f32 %v328_v61  ;;  %343 = vadd.xlane.f32.xlu2 %v342_v62 }
 0x244   :  { %v302_v63 = vpop.xlane.xlu0 %301 }
 0x245   :  { %v320_v0 = vsub.f32 %v279_v29, %v302_v63 }
 0x247   :  { %v5590_v1 = vpop.eup %4947  ;;  %v330_v3 = vmul.f32 1.442695, %v320_v0 }
 0x248   :  { %v345_v6 = vsel %vm293_vm2, %v5590_v1, 0.0 }
 0x249   :  { %4949 = vpow2.f32 %v330_v3  ;;  %346 = vadd.xlane.f32.xlu2 %v345_v6 }
 0x24c   :  { %v305_v8 = vpop.xlane.xlu1 %304 }
 0x24d   :  { %v321_v9 = vsub.f32 %v281_v34, %v305_v8 }
 0x24f   :  { %v5594_v11 = vpop.eup %4949  ;;  %v332_v12 = vmul.f32 1.442695, %v321_v9 }
 0x250   :  { %v348_v13 = vsel %vm293_vm2, %v5594_v11, 0.0 }
 0x251   :  { %4951 = vpow2.f32 %v332_v12  ;;  %349 = vadd.xlane.f32.xlu2 %v348_v13 }
 0x254   :  { %v308_v14 = vpop.xlane.xlu2 %307 }
 0x255   :  { %v322_v15 = vsub.f32 %v284_v39, %v308_v14  ;;  %v5624_v39 = vpop.f32.mrf.mxu0 }
 0x257   :  { %v5598_v16 = vpop.eup %4951  ;;  %v334_v18 = vmul.f32 1.442695, %v322_v15  ;;  %v1326_v21 = vpop.permute.xlu0 %1325 }
 0x258   :  { %v1349_v22 = vsel %vm239_vm1, %v1326_v21, 0  ;;  %v351_v24 = vsel %vm293_vm2, %v5598_v16, 0.0 }
 0x259   :  { %4953 = vpow2.f32 %v334_v18  ;;  %1355 = vmatpush.bf16.xpose.msra.mxu0 %v1349_v22  ;;  %352 = vadd.xlane.f32.xlu2 %v351_v24 }
 0x25c   :  { %v311_v25 = vpop.xlane.xlu2 %310 }
 0x25d   :  { %v323_v26 = vsub.f32 %v286_v45, %v311_v25  ;;  %v646_v43 = vpop.f32.mrf.mxu0 }
 0x25f   :  { %v5603_v28 = vpop.eup %4953  ;;  %v336_v29 = vmul.f32 1.442695, %v323_v26  ;;  %v1324_v30 = vpop.permute.xlu0 %1323 }
 0x260   :  { %v1346_v33 = vsel %vm239_vm1, %v1324_v30, 0  ;;  %v354_v34 = vsel %vm293_vm2, %v5603_v28, 0.0 }
 0x261   :  { %4955 = vpow2.f32 %v336_v29  ;;  %1356 = vmatpush.bf16.xpose.msra.mxu0 %v1346_v33  ;;  %355 = vadd.xlane.f32.xlu1 %v354_v34 }
 0x264   :  { %v314_v40 = vpop.xlane.xlu2 %313 }
 0x267   :  { %v5608_v35 = vpop.eup %4955 }
 0x268   :  { %v357_v37 = vsel %vm293_vm2, %v5608_v35, 0.0 }
 0x269   :  { %358 = vadd.xlane.f32.xlu0 %v357_v37 }
 0x271   :  { %953 = vrot.lane.b32.xlu2 %v5441_v42, %s5324_s18 }
 0x279   :  { %955 = vrot.lane.b32.xlu2 %v5479_v20, %s5324_s18 }
 0x27a   :  { %1321 = vrot.lane.b32.xlu1 %v5447_v2, %s5323_s30  ;;  %v324_v2 = vsub.f32 %v5572_v51, %v314_v40 }
 0x27c   :  { %v338_v45 = vmul.f32 1.442695, %v324_v2 }
 0x27d   :  { %601 = vrot.lane.b32.xlu0 %v5453_v7, %s5320_s15 }
 0x27e   :  { %4957 = vpow2.f32 %v338_v45 }
 0x282   :  { %1311 = vrot.lane.b32.xlu1 %v5441_v42, %s5325_s19  ;;  %v649_v42 = vpop.f32.mrf.mxu0 }
 0x283   :  { %v5644_v53 = vadd.f32 %v649_v42, %v5537_v27 }
 0x285   :  { %1319 = vrot.lane.b32.xlu0 %v5433_v32, %s5323_s30  ;;  %v5635_v32 = vpop.eup %4957  ;;  %v670_v10 = vsel %vm293_vm2, %v5644_v53, -inf }
 0x286   :  { %v360_v46 = vsel %vm293_vm2, %v5635_v32, 0.0 }
 0x28a   :  { %957 = vrot.lane.b32.xlu1 %v5451_v5, %s5324_s18  ;;  %v5639_v50 = vpop.f32.mrf.mxu0 }
 0x28d   :  { %1313 = vrot.lane.b32.xlu0 %v5479_v20, %s5325_s19  ;;  %v5641_v20 = vpop.xlane.xlu2 %316 }
 0x292   :  { %1317 = vrot.lane.b32.xlu1 %v5453_v7, %s5325_s19  ;;  %v654_v51 = vpop.f32.mrf.mxu0 }
 0x295   :  { %959 = vrot.lane.b32.xlu0 %v5453_v7, %s5324_s18  ;;  %v5647_v7 = vadd.f32 %v646_v43, %v5530_v23 }
 0x297   :  { %v667_v61 = vsel %vm293_vm2, %v5647_v7, -inf }
 0x29a   :  { %v656_v56 = vpop.f32.mrf.mxu0 }
 0x29b   :  { %v5656_v62 = vadd.f32 %v656_v56, %v5558_v41 }
 0x29d   :  { %v679_v3 = vsel %vm293_vm2, %v5656_v62, -inf }
 0x2a2   :  { %361 = vadd.xlane.f32.xlu2 %v360_v46 }
 0x2b4   :  { %v344_v4 = vpop.xlane.xlu2 %343 }
 0x2b5   :  { %4959 = vrcp.f32 %v344_v4  ;;  %v377_v12 = vand.u32 2147483648, %v344_v4  ;;  %vm371_vm4 = vweird.f32 %v344_v4  ;;  %v375_v15 = vand.u32 2147483647, %v344_v4 }
 0x2b7   :  { %v378_v25 = vor.u32 1.1754944e-38, %v377_v12  ;;  %vm376_vm8 = vcmp.eq.f32.partialorder %v375_v15, 8.507059e+37 }
 0x2ba   :  { %1315 = vrot.lane.b32.xlu2 %v5451_v5, %s5325_s19  ;;  %v5659_v5 = vadd.f32 %v654_v51, %v5551_v36 }
 0x2bb   :  { %v4960_v55 = vpop.eup %4959 }
 0x2bc   :  { %v367_v57 = vmul.f32 %v4960_v55, %v344_v4  ;;  %671 = vmax.xlane.f32.xlu1 %v670_v10  ;;  %v347_v58 = vpop.xlane.xlu2 %346  ;;  %vm372_vm3 = vweird.f32 %v4960_v55  ;;  %v676_v14 = vsel %vm293_vm2, %v5659_v5, -inf }
 0x2bd   :  { %4961 = vrcp.f32 %v347_v58  ;;  %v391_v18 = vand.u32 2147483648, %v347_v58  ;;  %vm373_vm5 = vmor %vm371_vm4, %vm372_vm3  ;;  %v389_v24 = vand.u32 2147483647, %v347_v58  ;;  %vm385_vm7 = vweird.f32 %v347_v58 }
 0x2be   :  { %v368_v59 = vsub.f32 1.0, %v367_v57 }
 0x2bf   :  { %668 = vmax.xlane.f32.xlu0 %v667_v61  ;;  %v392_v33 = vor.u32 1.1754944e-38, %v391_v18  ;;  %vm390_vm10 = vcmp.eq.f32.partialorder %v389_v24, 8.507059e+37  ;;  %v645_v18 = vadd.f32 %v5624_v39, %v5523_v17  ;;  %v5676_v39 = vadd.f32 %v5639_v50, %v5544_v31 }
 0x2c0   :  { %v369_v63 = vmul.f32 %v4960_v55, %v368_v59 }
 0x2c2   :  { %v370_v9 = vadd.f32 %v4960_v55, %v369_v63 }
 0x2c3   :  { %v4962_v0 = vpop.eup %4961 }
 0x2c4   :  { %v381_v6 = vmul.f32 %v4962_v0, %v347_v58  ;;  %680 = vmax.xlane.f32.xlu1 %v679_v3  ;;  %v350_v8 = vpop.xlane.xlu2 %349  ;;  %v374_v22 = vsel %vm373_vm5, %v4960_v55, %v370_v9  ;;  %vm386_vm6 = vweird.f32 %v4962_v0 }
 0x2c5   :  { %4963 = vrcp.f32 %v350_v8  ;;  %v379_v30 = vsel %vm376_vm8, %v378_v25, %v374_v22  ;;  %vm387_vm9 = vmor %vm385_vm7, %vm386_vm6  ;;  %v405_v57 = vand.u32 2147483648, %v350_v8  ;;  %vm399_vm12 = vweird.f32 %v350_v8 }
 0x2c6   :  { %v382_v13 = vsub.f32 1.0, %v381_v6  ;;  %v478_v45 = vmul.f32 %v5586_v60, %v379_v30  ;;  %v403_v59 = vand.u32 2147483647, %v350_v8 }
 0x2c7   :  { %677 = vmax.xlane.f32.xlu0 %v676_v14 }
 0x2c8   :  { %v383_v21 = vmul.f32 %v4962_v0, %v382_v13  ;;  %vm404_vm3 = vcmp.eq.f32.partialorder %v403_v59, 8.507059e+37 }
 0x2ca   :  { %v384_v26 = vadd.f32 %v4962_v0, %v383_v21 }
 0x2cb   :  { %v4964_v29 = vpop.eup %4963 }
 0x2cc   :  { %v395_v34 = vmul.f32 %v4964_v29, %v350_v8  ;;  %v353_v37 = vpop.xlane.xlu2 %352  ;;  %v388_v40 = vsel %vm387_vm9, %v4962_v0, %v384_v26  ;;  %vm400_vm11 = vweird.f32 %v4964_v29  ;;  %v406_v0 = vor.u32 1.1754944e-38, %v405_v57 }
 0x2cd   :  { %4965 = vrcp.f32 %v353_v37  ;;  %v393_v2 = vsel %vm390_vm10, %v392_v33, %v388_v40  ;;  %v419_v61 = vand.u32 2147483648, %v353_v37  ;;  %vm401_vm13 = vmor %vm399_vm12, %vm400_vm11  ;;  %vm413_vm15 = vweird.f32 %v353_v37 }
 0x2ce   :  { %v396_v43 = vsub.f32 1.0, %v395_v34  ;;  %v479_v42 = vmul.f32 %v5590_v1, %v393_v2  ;;  %v417_v1 = vand.u32 2147483647, %v353_v37 }
 0x2cf   :  { %v420_v12 = vor.u32 1.1754944e-38, %v419_v61 }
 0x2d0   :  { %v397_v46 = vmul.f32 %v4964_v29, %v396_v43  ;;  %v486_v51 = vpack.c.bf16 %v479_v42, %v478_v45  ;;  %vm418_vm5 = vcmp.eq.f32.partialorder %v417_v1, 8.507059e+37 }
 0x2d2   :  { %4726 = vmatmul.msk.bf16.vlgmr.msra.gmra.mxu3 %vm293_vm2, %v486_v51  ;;  %v398_v56 = vadd.f32 %v4964_v29, %v397_v46  ;;  %v673_v46 = vsel %vm293_vm2, %v5676_v39, -inf }
 0x2d3   :  { %v4966_v4 = vpop.eup %4965 }
 0x2d4   :  { %v409_v55 = vmul.f32 %v4966_v4, %v353_v37  ;;  %v356_v10 = vpop.xlane.xlu1 %355  ;;  %v402_v60 = vsel %vm401_vm13, %v4964_v29, %v398_v56  ;;  %vm414_vm14 = vweird.f32 %v4966_v4  ;;  %v664_v29 = vsel %vm293_vm2, %v645_v18, -inf }
 0x2d5   :  { %4967 = vrcp.f32 %v356_v10  ;;  %v407_v9 = vsel %vm404_vm3, %v406_v0, %v402_v60  ;;  %vm415_vm4 = vmor %vm413_vm15, %vm414_vm14  ;;  %v433_v37 = vand.u32 2147483648, %v356_v10  ;;  %vm427_vm7 = vweird.f32 %v356_v10 }
 0x2d6   :  { %v410_v58 = vsub.f32 1.0, %v409_v55  ;;  %v480_v22 = vmul.f32 %v5594_v11, %v407_v9  ;;  %v431_v40 = vand.u32 2147483647, %v356_v10 }
 0x2d7   :  { %v434_v42 = vor.u32 1.1754944e-38, %v433_v37 }
 0x2d8   :  { %v411_v63 = vmul.f32 %v4966_v4, %v410_v58  ;;  %vm432_vm11 = vcmp.eq.f32.partialorder %v431_v40, 8.507059e+37 }
 0x2da   :  { %v412_v3 = vadd.f32 %v4966_v4, %v411_v63 }
 0x2db   :  { %v4968_v6 = vpop.eup %4967 }
 0x2dc   :  { %v423_v13 = vmul.f32 %v4968_v6, %v356_v10  ;;  %v359_v14 = vpop.xlane.xlu0 %358  ;;  %v416_v15 = vsel %vm415_vm4, %v4966_v4, %v412_v3  ;;  %vm428_vm6 = vweird.f32 %v4968_v6  ;;  %v5687_v3 = vpop.permute.xlu2 %953 }
 0x2dd   :  { %4969 = vrcp.f32 %v359_v14  ;;  %v421_v8 = vsel %vm418_vm5, %v420_v12, %v416_v15  ;;  %vm429_vm8 = vmor %vm427_vm7, %vm428_vm6  ;;  %v445_v45 = vand.u32 2147483647, %v359_v14  ;;  %vm441_vm10 = vweird.f32 %v359_v14 }
 0x2de   :  { %v424_v21 = vsub.f32 1.0, %v423_v13  ;;  %v481_v24 = vmul.f32 %v5598_v16, %v421_v8  ;;  %v447_v16 = vand.u32 2147483648, %v359_v14 }
 0x2df   :  { %vm446_vm13 = vcmp.eq.f32.partialorder %v445_v45, 8.507059e+37 }
 0x2e0   :  { %v425_v25 = vmul.f32 %v4968_v6, %v424_v21  ;;  %v487_v26 = vpack.c.bf16 %v481_v24, %v480_v22  ;;  %v448_v50 = vor.u32 1.1754944e-38, %v447_v16 }
 0x2e2   :  { %4727 = vmatmul.msk.bf16.gmra.mxu3 %vm293_vm2, %v487_v26  ;;  %v426_v34 = vadd.f32 %v4968_v6, %v425_v25 }
 0x2e3   :  { %v4970_v30 = vpop.eup %4969  ;;  %665 = vmax.xlane.f32.xlu2 %v664_v29 }
 0x2e4   :  { %v437_v33 = vmul.f32 %v4970_v30, %v359_v14  ;;  %v430_v43 = vsel %vm429_vm8, %v4968_v6, %v426_v34  ;;  %vm442_vm9 = vweird.f32 %v4970_v30  ;;  %v5689_v6 = vpop.permute.xlu2 %955 }
 0x2e5   :  { %v435_v4 = vsel %vm432_vm11, %v434_v42, %v430_v43  ;;  %vm443_vm12 = vmor %vm441_vm10, %vm442_vm9 }
 0x2e6   :  { %v438_v11 = vsub.f32 1.0, %v437_v33  ;;  %v482_v58 = vmul.f32 %v5603_v28, %v435_v4 }
 0x2e8   :  { %v439_v2 = vmul.f32 %v4970_v30, %v438_v11 }
 0x2ea   :  { %v440_v51 = vadd.f32 %v4970_v30, %v439_v2 }
 0x2eb   :  { %674 = vmax.xlane.f32.xlu2 %v673_v46 }
 0x2ec   :  { %v1322_v55 = vpop.permute.xlu1 %1321  ;;  %v444_v56 = vsel %vm443_vm12, %v4970_v30, %v440_v51 }
 0x2ed   :  { %v1343_v10 = vsel %vm239_vm1, %v1322_v55, 0  ;;  %v449_v57 = vsel %vm446_vm13, %v448_v50, %v444_v56 }
 0x2ee   :  { %1357 = vmatpush.bf16.xpose.msra.mxu0 %v1343_v10  ;;  %v483_v59 = vmul.f32 %v5608_v35, %v449_v57 }
 0x2ef   :  { %v602_v61 = vpop.permute.xlu0 %601 }
 0x2f0   :  { %4733 = vmatmul.msk.bf16.gmra.mxu0 %vm239_vm1, %v602_v61  ;;  %v488_v63 = vpack.c.bf16 %v483_v59, %v482_v58 }
 0x2f2   :  { %4728 = vmatmul.msk.bf16.gmra.mxu3 %vm293_vm2, %v488_v63 }
 0x2f4   :  { %v1312_v0 = vpop.permute.xlu1 %1311 }
 0x2f7   :  { %v1320_v60 = vpop.permute.xlu0 %1319 }
 0x2f8   :  { %v1340_v1 = vsel %vm239_vm1, %v1320_v60, 0 }
 0x2f9   :  { %1358 = vmatpush.bf16.xpose.msra.mxu0 %v1340_v1  ;;  %v325_v1 = vsub.f32 %v5582_v54, %v5641_v20 }
 0x2fc   :  { %v5695_v12 = vpop.permute.xlu1 %957 }
 0x2ff   :  { %v1314_v28 = vpop.permute.xlu0 %1313 }
 0x300   :  { %4746 = vmatmul.msk.bf16.vlgmr.msra.gmra.mxu0 %vm239_vm1, %v1312_v0 }
 0x304   :  { %v1318_v13 = vpop.permute.xlu1 %1317 }
 0x307   :  { %v5698_v21 = vpop.permute.xlu0 %959 }
 0x310   :  { %4747 = vmatmul.msk.bf16.gmra.mxu0 %vm239_vm1, %v1314_v28 }
 0x315   :  { %v5692_v35 = vpop.xlane.xlu2 %361 }
 0x316   :  { %vm455_vm15 = vweird.f32 %v5692_v35 }
 0x31d   :  { %v1316_v9 = vpop.permute.xlu2 %1315 }
 0x320   :  { %4748 = vmatmul.msk.bf16.gmra.mxu0 %vm239_vm1, %v1316_v9 }
 0x330   :  { %4749 = vmatmul.msk.bf16.gmra.mxu0 %vm239_vm1, %v1318_v13  ;;  %v340_v13 = vmul.f32 1.442695, %v325_v1 }
 0x332   :  { %v669_v25 = vpop.xlane.xlu0 %668 }
 0x333   :  { %v689_v26 = vsub.f32 %v5647_v7, %v669_v25 }
 0x335   :  { %v698_v29 = vmul.f32 1.442695, %v689_v26 }
 0x33a   :  { %v678_v10 = vpop.xlane.xlu0 %677 }
 0x33b   :  { %v692_v59 = vsub.f32 %v5659_v5, %v678_v10 }
 0x356   :  { %v666_v14 = vpop.xlane.xlu2 %665 }
 0x357   :  { %v688_v15 = vsub.f32 %v645_v18, %v666_v14 }
 0x359   :  { %v696_v8 = vmul.f32 1.442695, %v688_v15 }
 0x35b   :  { %4971 = vpow2.f32 %v696_v8 }
 0x35c   :  { %4973 = vpow2.f32 %v698_v29 }
 0x35e   :  { %v675_v4 = vpop.xlane.xlu2 %674 }
 0x361   :  { %v5700_v22 = vpop.eup %4971 }
 0x362   :  { %v712_v24 = vsel %vm293_vm2, %v5700_v22, 0.0  ;;  %v5710_v34 = vpop.eup %4973 }
 0x363   :  { %713 = vadd.xlane.f32.xlu1 %v712_v24  ;;  %v715_v7 = vsel %vm293_vm2, %v5710_v34, 0.0 }
 0x36d   :  { %v659_v30 = vpop.f32.mrf.mxu0 }
 0x36e   :  { %v5706_v33 = vadd.f32 %v659_v30, %v5567_v49 }
 0x370   :  { %v682_v18 = vsel %vm293_vm2, %v5706_v33, -inf }
 0x371   :  { %683 = vmax.xlane.f32.xlu2 %v682_v18 }
 0x375   :  { %v661_v37 = vpop.f32.mrf.mxu0 }
 0x376   :  { %v5713_v11 = vadd.f32 %v661_v37, %v5579_v52 }
 0x378   :  { %v685_v40 = vsel %vm293_vm2, %v5713_v11, -inf }
 0x379   :  { %686 = vmax.xlane.f32.xlu0 %v685_v40  ;;  %716 = vadd.xlane.f32.xlu2 %v715_v7 }
 0x37d   :  { %v1360_v16 = vpop.f32.mrf.mxu0 }
 0x37e   :  { %v5720_v2 = vadd.f32 %v1360_v16, %v5523_v17  ;;  %v672_v17 = vpop.xlane.xlu1 %671 }
 0x37f   :  { %v690_v51 = vsub.f32 %v5644_v53, %v672_v17 }
 0x380   :  { %v1380_v43 = vsel %vm293_vm2, %v5720_v2, -inf }
 0x381   :  { %1381 = vmax.xlane.f32.xlu1 %v1380_v43  ;;  %v700_v50 = vmul.f32 1.442695, %v690_v51 }
 0x383   :  { %4975 = vpow2.f32 %v700_v50 }
 0x385   :  { %v1362_v45 = vpop.f32.mrf.mxu0 }
 0x386   :  { %v5725_v42 = vadd.f32 %v1362_v45, %v5530_v23  ;;  %v691_v23 = vsub.f32 %v5676_v39, %v675_v4  ;;  %v681_v58 = vpop.xlane.xlu1 %680  ;;  %v704_v39 = vmul.f32 1.442695, %v692_v59 }
 0x387   :  { %v693_v53 = vsub.f32 %v5656_v62, %v681_v58 }
 0x388   :  { %v1383_v46 = vsel %vm293_vm2, %v5725_v42, -inf  ;;  %v702_v55 = vmul.f32 1.442695, %v691_v23 }
 0x389   :  { %1384 = vmax.xlane.f32.xlu1 %v1383_v46  ;;  %v5737_v57 = vpop.eup %4975  ;;  %v706_v5 = vmul.f32 1.442695, %v693_v53 }
 0x38a   :  { %4977 = vpow2.f32 %v702_v55  ;;  %v718_v63 = vsel %vm293_vm2, %v5737_v57, 0.0 }
 0x38b   :  { %4979 = vpow2.f32 %v704_v39 }
 0x38c   :  { %4981 = vpow2.f32 %v706_v5 }
 0x38d   :  { %864 = vrot.lane.b32.xlu0 %v5487_v44, %s5321_s16  ;;  %v1365_v56 = vpop.f32.mrf.mxu0  ;;  %4983 = vpow2.f32 %v340_v13 }
 0x38e   :  { %v5750_v0 = vadd.f32 %v1365_v56, %v5537_v27 }
 0x390   :  { %v5740_v61 = vpop.eup %4977  ;;  %v1386_v62 = vsel %vm293_vm2, %v5750_v0, -inf }
 0x391   :  { %866 = vrot.lane.b32.xlu2 %v5485_v38, %s5321_s16  ;;  %v721_v60 = vsel %vm293_vm2, %v5740_v61, 0.0  ;;  %v5759_v27 = vpop.eup %4979 }
 0x392   :  { %v5761_v54 = vpop.eup %4981  ;;  %v724_v20 = vsel %vm293_vm2, %v5759_v27, 0.0 }
 0x393   :  { %v5765_v15 = vpop.eup %4983  ;;  %v727_v8 = vsel %vm293_vm2, %v5761_v54, 0.0 }
 0x394   :  { %v363_v25 = vsel %vm293_vm2, %v5765_v15, 0.0 }
 0x395   :  { %v1367_v28 = vpop.f32.mrf.mxu0 }
 0x396   :  { %v5753_v9 = vadd.f32 %v1367_v28, %v5544_v31 }
 0x398   :  { %v1389_v14 = vsel %vm293_vm2, %v5753_v9, -inf }
 0x39d   :  { %v1370_v31 = vpop.f32.mrf.mxu0 }
 0x39e   :  { %v5770_v24 = vadd.f32 %v1370_v31, %v5551_v36 }
 0x3a0   :  { %v1392_v26 = vsel %vm293_vm2, %v5770_v24, -inf }
 0x3a2   :  { %862 = vrot.lane.b32.xlu1 %v5490_v47, %s5321_s16 }
 0x3a5   :  { %v1372_v30 = vpop.f32.mrf.mxu0 }
 0x3ad   :  { %v1375_v45 = vpop.f32.mrf.mxu0 }
 0x3b5   :  { %v1377_v55 = vpop.f32.mrf.mxu0 }
 0x3b6   :  { %v5798_v56 = vadd.f32 %v1377_v55, %v5579_v52  ;;  %v5808_v52 = vadd.f32 %v1372_v30, %v5558_v41 }
 0x3b7   :  { %719 = vadd.xlane.f32.xlu0 %v718_v63 }
 0x3b8   :  { %v1401_v63 = vsel %vm293_vm2, %v5798_v56, -inf }
 0x3ba   :  { %722 = vadd.xlane.f32.xlu2 %v721_v60 }
 0x3bf   :  { %1387 = vmax.xlane.f32.xlu0 %v1386_v62 }
 0x3c2   :  { %1390 = vmax.xlane.f32.xlu2 %v1389_v14 }
 0x3c7   :  { %725 = vadd.xlane.f32.xlu0 %v724_v20 }
 0x3ca   :  { %728 = vadd.xlane.f32.xlu2 %v727_v8 }
 0x3cc   :  { %364 = vadd.xlane.f32.xlu1 %v363_v25 }
 0x3cf   :  { %1393 = vmax.xlane.f32.xlu0 %v1392_v26 }
 0x3d6   :  { %v5779_v36 = vpop.xlane.xlu1 %713 }
 0x3d7   :  { %vm741_vm11 = vweird.f32 %v5779_v36 }
 0x3e4   :  { %v684_v29 = vpop.xlane.xlu2 %683 }
 0x3e5   :  { %v694_v18 = vsub.f32 %v5706_v33, %v684_v29  ;;  %860 = vrot.lane.b32.xlu1 %v5493_v48, %s5321_s16  ;;  %v5789_v33 = vadd.f32 %v1375_v45, %v5567_v49  ;;  %v461_v45 = vand.u32 2147483648, %v5692_v35 }
 0x3e7   :  { %v708_v37 = vmul.f32 1.442695, %v694_v18  ;;  %v1398_v50 = vsel %vm293_vm2, %v5789_v33, -inf }
 0x3e9   :  { %4985 = vpow2.f32 %v708_v37 }
 0x3ec   :  { %v687_v40 = vpop.xlane.xlu0 %686  ;;  %v5781_v7 = vpop.xlane.xlu2 %716 }
 0x3ed   :  { %v695_v16 = vsub.f32 %v5713_v11, %v687_v40  ;;  %vm755_vm8 = vweird.f32 %v5781_v7 }
 0x3ef   :  { %v5784_v43 = vpop.eup %4985  ;;  %v710_v46 = vmul.f32 1.442695, %v695_v16 }
 0x3f0   :  { %v730_v17 = vsel %vm293_vm2, %v5784_v43, 0.0 }
 0x3f1   :  { %4987 = vpow2.f32 %v710_v46  ;;  %731 = vadd.xlane.f32.xlu2 %v730_v17  ;;  %v459_v46 = vand.u32 2147483647, %v5692_v35 }
 0x3f3   :  { %vm460_vm5 = vcmp.eq.f32.partialorder %v459_v46, 8.507059e+37 }
 0x3f4   :  { %v1382_v51 = vpop.xlane.xlu1 %1381  ;;  %v867_v4 = vpop.permute.xlu2 %866 }
 0x3f5   :  { %888 = vmatpush.bf16.msra.mxu1 %v867_v4  ;;  %v1404_v1 = vsub.f32 %v5720_v2, %v1382_v51 }
 0x3f7   :  { %v5791_v23 = vpop.eup %4987  ;;  %v1412_v28 = vmul.f32 1.442695, %v1404_v1 }
 0x3f8   :  { %v733_v11 = vsel %vm293_vm2, %v5791_v23, 0.0 }
 0x3f9   :  { %734 = vadd.xlane.f32.xlu0 %v733_v11  ;;  %1399 = vmax.xlane.f32.xlu2 %v1398_v50 }
 0x3fc   :  { %v1385_v10 = vpop.xlane.xlu1 %1384 }
 0x3fd   :  { %v1405_v49 = vsub.f32 %v5725_v42, %v1385_v10  ;;  %v1395_v42 = vsel %vm293_vm2, %v5808_v52, -inf }
 0x3ff   :  { %v1414_v58 = vmul.f32 1.442695, %v1405_v49  ;;  %v865_v59 = vpop.permute.xlu0 %864  ;;  %v462_v49 = vor.u32 1.1754944e-38, %v461_v45 }
 0x400   :  { %889 = vmatpush.bf16.msra.mxu1 %v865_v59 }
 0x401   :  { %4989 = vpow2.f32 %v1414_v58  ;;  %1402 = vmax.xlane.f32.xlu0 %v1401_v63 }
 0x402   :  { %4991 = vrcp.f32 %v5692_v35 }
 0x403   :  { %4993 = vpow2.f32 %v1412_v28 }
 0x404   :  { %4995 = vrcp.f32 %v5781_v7 }
 0x405   :  { %4997 = vrcp.f32 %v5779_v36 }
 0x407   :  { %v5803_v53 = vpop.eup %4989 }
 0x408   :  { %v1431_v39 = vsel %vm293_vm2, %v5803_v53, 0.0  ;;  %v4992_v41 = vpop.eup %4991 }
 0x409   :  { %1432 = vadd.xlane.f32.xlu0 %v1431_v39  ;;  %v5818_v5 = vpop.eup %4993  ;;  %v451_v13 = vmul.f32 %v4992_v41, %v5692_v35  ;;  %vm456_vm14 = vweird.f32 %v4992_v41 }
 0x40a   :  { %v1428_v62 = vsel %vm293_vm2, %v5818_v5, 0.0  ;;  %v5825_v2 = vpop.eup %4995  ;;  %vm5843_vm3 = vmor %vm455_vm15, %vm456_vm14 }
 0x40b   :  { %v452_v14 = vsub.f32 1.0, %v451_v13  ;;  %v5827_v20 = vpop.eup %4997  ;;  %v751_v31 = vmul.f32 %v5825_v2, %v5781_v7  ;;  %vm756_vm4 = vweird.f32 %v5825_v2  ;;  %v759_v13 = vand.u32 2147483647, %v5781_v7 }
 0x40c   :  { %v737_v29 = vmul.f32 %v5827_v20, %v5779_v36  ;;  %vm742_vm7 = vweird.f32 %v5827_v20  ;;  %vm5864_vm9 = vmor %vm755_vm8, %vm756_vm4 }
 0x40d   :  { %v453_v26 = vmul.f32 %v4992_v41, %v452_v14  ;;  %v752_v18 = vsub.f32 1.0, %v751_v31  ;;  %v745_v31 = vand.u32 2147483647, %v5779_v36  ;;  %vm743_vm14 = vmor %vm741_vm11, %vm742_vm7  ;;  %vm760_vm15 = vcmp.eq.f32.partialorder %v759_v13, 8.507059e+37 }
 0x40e   :  { %v738_v37 = vsub.f32 1.0, %v737_v29 }
 0x40f   :  { %1396 = vmax.xlane.f32.xlu1 %v1395_v42  ;;  %v454_v40 = vadd.f32 %v4992_v41, %v453_v26  ;;  %v753_v17 = vmul.f32 %v5825_v2, %v752_v18  ;;  %v747_v26 = vand.u32 2147483648, %v5779_v36 }
 0x410   :  { %v739_v11 = vmul.f32 %v5827_v20, %v738_v37 }
 0x411   :  { %1222 = vrot.lane.b32.xlu2 %v5487_v44, %s5326_s20  ;;  %v458_v10 = vsel %vm5843_vm3, %v4992_v41, %v454_v40  ;;  %v754_v58 = vadd.f32 %v5825_v2, %v753_v17  ;;  %v748_v17 = vor.u32 1.1754944e-38, %v747_v26  ;;  %vm746_vm3 = vcmp.eq.f32.partialorder %v745_v31, 8.507059e+37 }
 0x412   :  { %v463_v1 = vsel %vm460_vm5, %v462_v49, %v458_v10  ;;  %v740_v28 = vadd.f32 %v5827_v20, %v739_v11 }
 0x413   :  { %v758_v18 = vsel %vm5864_vm9, %v5825_v2, %v754_v58  ;;  %v484_v45 = vmul.f32 %v5635_v32, %v463_v1 }
 0x414   :  { %v863_v60 = vpop.permute.xlu1 %862  ;;  %v744_v36 = vsel %vm743_vm14, %v5827_v20, %v740_v28 }
 0x415   :  { %890 = vmatpush.bf16.msra.mxu1 %v863_v60  ;;  %v761_v60 = vand.u32 2147483648, %v5781_v7 }
 0x417   :  { %v762_v37 = vor.u32 1.1754944e-38, %v761_v60 }
 0x428   :  { %1224 = vrot.lane.b32.xlu1 %v5485_v38, %s5326_s20 }
 0x42a   :  { %v5835_v30 = vpop.xlane.xlu0 %719 }
 0x42b   :  { %v775_v41 = vand.u32 2147483648, %v5835_v30  ;;  %vm769_vm8 = vweird.f32 %v5835_v30 }
 0x42d   :  { %v5831_v8 = vpop.xlane.xlu2 %722 }
 0x42e   :  { %v789_v60 = vand.u32 2147483648, %v5831_v8  ;;  %vm783_vm5 = vweird.f32 %v5831_v8 }
 0x430   :  { %v790_v26 = vor.u32 1.1754944e-38, %v789_v60 }
 0x432   :  { %v5854_v59 = vpop.xlane.xlu0 %1387 }
 0x435   :  { %v5848_v50 = vpop.xlane.xlu2 %1390 }
 0x43a   :  { %1429 = vadd.xlane.f32.xlu2 %v1428_v62 }
 0x43d   :  { %v5887_v4 = vpop.xlane.xlu2 %728 }
 0x43f   :  { %v365_v25 = vpop.xlane.xlu1 %364 }
 0x440   :  { %4999 = vrcp.f32 %v365_v25  ;;  %v475_v35 = vand.u32 2147483648, %v365_v25  ;;  %v473_v39 = vand.u32 2147483647, %v365_v25  ;;  %vm469_vm10 = vweird.f32 %v365_v25 }
 0x441   :  { %5001 = vrcp.f32 %v5831_v8 }
 0x442   :  { %5003 = vrcp.f32 %v5835_v30  ;;  %v476_v29 = vor.u32 1.1754944e-38, %v475_v35  ;;  %vm474_vm13 = vcmp.eq.f32.partialorder %v473_v39, 8.507059e+37  ;;  %v5889_v35 = vpop.xlane.xlu0 %725 }
 0x443   :  { %5005 = vrcp.f32 %v5887_v4 }
 0x444   :  { %5007 = vrcp.f32 %v5889_v35 }
 0x446   :  { %v5000_v16 = vpop.eup %4999 }
 0x447   :  { %v465_v51 = vmul.f32 %v5000_v16, %v365_v25  ;;  %vm470_vm6 = vweird.f32 %v5000_v16  ;;  %v5856_v42 = vpop.eup %5001 }
 0x448   :  { %v5869_v14 = vpop.eup %5003  ;;  %vm471_vm12 = vmor %vm469_vm10, %vm470_vm6  ;;  %v779_v7 = vmul.f32 %v5856_v42, %v5831_v8  ;;  %vm784_vm4 = vweird.f32 %v5856_v42 }
 0x449   :  { %v466_v55 = vsub.f32 1.0, %v465_v51  ;;  %v765_v46 = vmul.f32 %v5869_v14, %v5835_v30  ;;  %v763_v51 = vsel %vm760_vm15, %v762_v37, %v758_v18  ;;  %vm770_vm6 = vweird.f32 %v5869_v14  ;;  %vm785_vm7 = vmor %vm783_vm5, %vm784_vm4 }
 0x44a   :  { %v849_v32 = vmul.f32 %v5710_v34, %v763_v51  ;;  %v5006_v34 = vpop.eup %5005  ;;  %vm771_vm9 = vmor %vm769_vm8, %vm770_vm6  ;;  %v5913_v37 = vpop.xlane.xlu0 %1393  ;;  %v817_v51 = vand.u32 2147483648, %v5887_v4 }
 0x44b   :  { %v467_v63 = vmul.f32 %v5000_v16, %v466_v55  ;;  %v749_v55 = vsel %vm746_vm3, %v748_v17, %v744_v36  ;;  %v766_v10 = vsub.f32 1.0, %v765_v46  ;;  %v5008_v28 = vpop.eup %5007  ;;  %v807_v13 = vmul.f32 %v5006_v34, %v5887_v4 }
 0x44c   :  { %v848_v49 = vmul.f32 %v5700_v22, %v749_v55  ;;  %v787_v22 = vand.u32 2147483647, %v5831_v8  ;;  %v776_v8 = vor.u32 1.1754944e-38, %v775_v41  ;;  %vm798_vm14 = vweird.f32 %v5008_v28 }
 0x44d   :  { %v468_v62 = vadd.f32 %v5000_v16, %v467_v63  ;;  %v767_v58 = vmul.f32 %v5869_v14, %v766_v10  ;;  %vm797_vm3 = vweird.f32 %v5889_v35  ;;  %v801_v55 = vand.u32 2147483647, %v5889_v35 }
 0x44e   :  { %v856_v63 = vpack.c.bf16 %v849_v32, %v848_v49  ;;  %vm788_vm10 = vcmp.eq.f32.partialorder %v787_v22, 8.507059e+37  ;;  %vm799_vm4 = vmor %vm797_vm3, %vm798_vm14  ;;  %v818_v32 = vor.u32 1.1754944e-38, %v817_v51 }
 0x44f   :  { %v472_v25 = vsel %vm471_vm12, %v5000_v16, %v468_v62  ;;  %v780_v16 = vsub.f32 1.0, %v779_v7  ;;  %v768_v1 = vadd.f32 %v5869_v14, %v767_v58  ;;  %v773_v62 = vand.u32 2147483647, %v5835_v30 }
 0x450   :  { %v477_v40 = vsel %vm474_vm13, %v476_v29, %v472_v25  ;;  %v793_v29 = vmul.f32 %v5008_v28, %v5889_v35  ;;  %v808_v25 = vsub.f32 1.0, %v807_v13  ;;  %vm812_vm12 = vweird.f32 %v5006_v34 }
 0x451   :  { %v485_v2 = vmul.f32 %v5765_v15, %v477_v40  ;;  %v781_v20 = vmul.f32 %v5856_v42, %v780_v16  ;;  %v772_v18 = vsel %vm771_vm9, %v5869_v14, %v768_v1  ;;  %vm774_vm11 = vcmp.eq.f32.partialorder %v773_v62, 8.507059e+37 }
 0x452   :  { %v777_v40 = vsel %vm774_vm11, %v776_v8, %v772_v18  ;;  %vm811_vm13 = vweird.f32 %v5887_v4  ;;  %vm802_vm6 = vcmp.eq.f32.partialorder %v801_v55, 8.507059e+37 }
 0x453   :  { %v489_v11 = vpack.c.bf16 %v485_v2, %v484_v45  ;;  %v782_v39 = vadd.f32 %v5856_v42, %v781_v20  ;;  %v794_v45 = vsub.f32 1.0, %v793_v29  ;;  %v850_v46 = vmul.f32 %v5737_v57, %v777_v40  ;;  %vm813_vm15 = vmor %vm811_vm13, %vm812_vm12 }
 0x454   :  { %v803_v57 = vand.u32 2147483648, %v5889_v35 }
 0x455   :  { %4729 = vmatmul.msk.bf16.gmra.mxu3 %vm293_vm2, %v489_v11  ;;  %v786_v31 = vsel %vm785_vm7, %v5856_v42, %v782_v39  ;;  %v809_v42 = vmul.f32 %v5006_v34, %v808_v25  ;;  %v795_v14 = vmul.f32 %v5008_v28, %v794_v45 }
 0x456   :  { %v791_v7 = vsel %vm788_vm10, %v790_v26, %v786_v31  ;;  %v804_v49 = vor.u32 1.1754944e-38, %v803_v57 }
 0x457   :  { %v861_v15 = vpop.permute.xlu1 %860  ;;  %v851_v30 = vmul.f32 %v5740_v61, %v791_v7  ;;  %v810_v17 = vadd.f32 %v5006_v34, %v809_v42  ;;  %v815_v61 = vand.u32 2147483647, %v5887_v4 }
 0x458   :  { %891 = vmatpush.bf16.msra.mxu1 %v861_v15 }
 0x459   :  { %v857_v2 = vpack.c.bf16 %v851_v30, %v850_v46  ;;  %v814_v10 = vsel %vm813_vm15, %v5006_v34, %v810_v17  ;;  %vm816_vm5 = vcmp.eq.f32.partialorder %v815_v61, 8.507059e+37  ;;  %v5267_v61 = vld [vmem:[%s8241_s1] sm:$0xff] }
 0x45a   :  { %v819_v58 = vsel %vm816_vm5, %v818_v32, %v814_v10  ;;  %v5268_v10 = vld [vmem:[%s8241_s1 + $0x8] sm:$0xff] }
 0x45b   :  { %4734 = vmatmul.msk.bf16.vlgmr.msra.gmra.mxu1 %vm293_vm2, %v856_v63  ;;  %v853_v1 = vmul.f32 %v5761_v54, %v819_v58 }
 0x464   :  { %v5915_v36 = vpop.xlane.xlu2 %731 }
 0x465   :  { %4738 = vmatmul.msk.bf16.vlgmr.msrb.gmra.mxu3 %vm239_vm1, %v5687_v3  ;;  %5009 = vrcp.f32 %v5915_v36  ;;  %v796_v3 = vadd.f32 %v5008_v28, %v795_v14  ;;  %v831_v29 = vand.u32 2147483648, %v5915_v36  ;;  %vm825_vm11 = vweird.f32 %v5915_v36  ;;  %v5949_v14 = vpop.f32.mrf.mxu3 }
 0x467   :  { %v800_v15 = vsel %vm799_vm4, %v5008_v28, %v796_v3  ;;  %v832_v8 = vor.u32 1.1754944e-38, %v831_v29 }
 0x468   :  { %v805_v39 = vsel %vm802_vm6, %v804_v49, %v800_v15  ;;  %v5269_v49 = vld [vmem:[%s8241_s1 + $0x10] sm:$0xff] }
 0x469   :  { %v852_v34 = vmul.f32 %v5759_v27, %v805_v39  ;;  %v5270_v39 = vld [vmem:[%s8241_s1 + $0x18] sm:$0xff] }
 0x46b   :  { %4735 = vmatmul.msk.bf16.gmra.mxu1 %vm293_vm2, %v857_v2  ;;  %v5010_v11 = vpop.eup %5009  ;;  %v858_v13 = vpack.c.bf16 %v853_v1, %v852_v34  ;;  %v5271_v34 = vld [vmem:[%s8241_s1 + $0x20] sm:$0xff] }
 0x46c   :  { %v735_v16 = vpop.xlane.xlu0 %734  ;;  %v821_v20 = vmul.f32 %v5010_v11, %v5915_v36  ;;  %vm826_vm9 = vweird.f32 %v5010_v11  ;;  %v5945_v42 = vpop.xlane.xlu2 %1399 }
 0x46d   :  { %5011 = vrcp.f32 %v735_v16  ;;  %v845_v62 = vand.u32 2147483648, %v735_v16  ;;  %vm839_vm8 = vweird.f32 %v735_v16  ;;  %v843_v26 = vand.u32 2147483647, %v735_v16  ;;  %vm827_vm12 = vmor %vm825_vm11, %vm826_vm9 }
 0x46e   :  { %v822_v60 = vsub.f32 1.0, %v821_v20 }
 0x46f   :  { %v846_v54 = vor.u32 1.1754944e-38, %v845_v62  ;;  %vm844_vm13 = vcmp.eq.f32.partialorder %v843_v26, 8.507059e+37 }
 0x470   :  { %v823_v41 = vmul.f32 %v5010_v11, %v822_v60 }
 0x472   :  { %v824_v31 = vadd.f32 %v5010_v11, %v823_v41 }
 0x473   :  { %v5012_v63 = vpop.eup %5011 }
 0x474   :  { %v835_v4 = vmul.f32 %v5012_v63, %v735_v16  ;;  %vm840_vm7 = vweird.f32 %v5012_v63  ;;  %v828_v18 = vsel %vm827_vm12, %v5010_v11, %v824_v31  ;;  %v1223_v2 = vpop.permute.xlu2 %1222 }
 0x475   :  { %4739 = vmatmul.msk.bf16.gmra.mxu3 %vm239_vm1, %v5689_v6  ;;  %vm841_vm10 = vmor %vm839_vm8, %vm840_vm7  ;;  %v829_v6 = vand.u32 2147483647, %v5915_v36 }
 0x476   :  { %v836_v35 = vsub.f32 1.0, %v835_v4 }
 0x477   :  { %vm830_vm14 = vcmp.eq.f32.partialorder %v829_v6, 8.507059e+37  ;;  %v5273_v6 = vld [vmem:[%s8241_s1 + $0x38] sm:$0xff] }
 0x478   :  { %v837_v22 = vmul.f32 %v5012_v63, %v836_v35  ;;  %v833_v25 = vsel %vm830_vm14, %v832_v8, %v828_v18  ;;  %v6012_v8 = vpop.xlane.xlu0 %1402 }
 0x479   :  { %v854_v45 = vmul.f32 %v5784_v43, %v833_v25 }
 0x47a   :  { %v838_v28 = vadd.f32 %v5012_v63, %v837_v22 }
 0x47b   :  { %4736 = vmatmul.msk.bf16.gmra.mxu1 %vm293_vm2, %v858_v13 }
 0x47c   :  { %v842_v27 = vsel %vm841_vm10, %v5012_v63, %v838_v28  ;;  %v5272_v28 = vld [vmem:[%s8241_s1 + $0x28] sm:$0xff] }
 0x47d   :  { %v847_v7 = vsel %vm844_vm13, %v846_v54, %v842_v27 }
 0x47e   :  { %v855_v40 = vmul.f32 %v5791_v23, %v847_v7 }
 0x480   :  { %v859_v30 = vpack.c.bf16 %v855_v40, %v854_v45  ;;  %v6016_v25 = vpop.xlane.xlu0 %1432 }
 0x481   :  { %vm1471_vm13 = vweird.f32 %v6016_v25 }
 0x482   :  { %v5943_v36 = vpop.xlane.xlu1 %1396 }
 0x485   :  { %4740 = vmatmul.msk.bf16.gmra.mxu3 %vm239_vm1, %v5695_v12  ;;  %v5951_v12 = vpop.f32.mrf.mxu3 }
 0x48b   :  { %4737 = vmatmul.msk.bf16.gmra.mxu1 %vm293_vm2, %v859_v30  ;;  %v1407_v30 = vsub.f32 %v5753_v9, %v5848_v50 }
 0x48d   :  { %v5953_v23 = vpop.f32.mrf.mxu3 }
 0x495   :  { %4741 = vmatmul.msk.bf16.gmra.mxu3 %vm239_vm1, %v5698_v21  ;;  %v5955_v43 = vpop.f32.mrf.mxu3 }
 0x49a   :  { %v1225_v46 = vpop.permute.xlu1 %1224 }
 0x49b   :  { %1246 = vmatpush.bf16.msrb.mxu2 %v1225_v46  ;;  %v1418_v46 = vmul.f32 1.442695, %v1407_v30 }
 0x49d   :  { %v5957_v17 = vpop.f32.mrf.mxu3 }
 0x49f   :  { %1247 = vmatpush.bf16.msrb.mxu2 %v1223_v2 }
 0x4a5   :  { %v5959_v51 = vpop.f32.mrf.mxu3 }
 0x4d8   :  { %v5961_v16 = vpop.f32.mrf.mxu3 }
 0x4e0   :  { %v5963_v3 = vpop.f32.mrf.mxu3 }
 0x4e8   :  { %v1002_v21 = vpop.f32.mrf.mxu3 }
 0x4e9   :  { %v1003_v11 = vadd.f32 %v5267_v61, %v1002_v21 }
 0x4eb   :  { %v1022_v57 = vsel %vm293_vm2, %v1003_v11, -inf }
 0x4ec   :  { %1023 = vmax.xlane.f32.xlu0 %v1022_v57 }
 0x4f0   :  { %v1004_v55 = vpop.f32.mrf.mxu3 }
 0x4f1   :  { %v1005_v32 = vadd.f32 %v5268_v10, %v1004_v55  ;;  %v6024_v10 = vpop.xlane.xlu2 %1429 }
 0x4f2   :  { %vm1457_vm12 = vweird.f32 %v6024_v10 }
 0x4f3   :  { %v1025_v20 = vsel %vm293_vm2, %v1005_v32, -inf }
 0x4f4   :  { %1026 = vmax.xlane.f32.xlu1 %v1025_v20 }
 0x4f8   :  { %v1007_v15 = vpop.f32.mrf.mxu3 }
 0x4f9   :  { %v1008_v58 = vadd.f32 %v5269_v49, %v1007_v15 }
 0x4fb   :  { %v1028_v63 = vsel %vm293_vm2, %v1008_v58, -inf }
 0x4fc   :  { %1029 = vmax.xlane.f32.xlu1 %v1028_v63 }
 0x500   :  { %v1009_v4 = vpop.f32.mrf.mxu3 }
 0x501   :  { %v1010_v60 = vadd.f32 %v5270_v39, %v1009_v4 }
 0x503   :  { %v1031_v1 = vsel %vm293_vm2, %v1010_v60, -inf }
 0x504   :  { %1032 = vmax.xlane.f32.xlu2 %v1031_v1 }
 0x508   :  { %v1012_v35 = vpop.f32.mrf.mxu3 }
 0x509   :  { %v1013_v22 = vadd.f32 %v5271_v34, %v1012_v35 }
 0x50b   :  { %v1034_v41 = vsel %vm293_vm2, %v1013_v22, -inf }
 0x50c   :  { %1035 = vmax.xlane.f32.xlu0 %v1034_v41 }
 0x510   :  { %v1014_v13 = vpop.f32.mrf.mxu3 }
 0x511   :  { %v5988_v62 = vadd.f32 %v5272_v28, %v1014_v13 }
 0x513   :  { %v1037_v31 = vsel %vm293_vm2, %v5988_v62, -inf }
 0x514   :  { %1038 = vmax.xlane.f32.xlu2 %v1037_v31 }
 0x515   :  { %1582 = vrot.lane.b32.xlu1 %v5485_v38, %s5327_s13  ;;  %v5274_v38 = vld [vmem:[%s8241_s1 + $0x30] sm:$0xff] }
 0x518   :  { %v1017_v26 = vpop.f32.mrf.mxu3 }
 0x519   :  { %v6010_v18 = vadd.f32 %v5274_v38, %v1017_v26 }
 0x51b   :  { %v1040_v7 = vsel %vm293_vm2, %v6010_v18, -inf }
 0x51d   :  { %1218 = vrot.lane.b32.xlu1 %v5493_v48, %s5326_s20 }
 0x520   :  { %v1019_v29 = vpop.f32.mrf.mxu3  ;;  %1220 = vrot.lane.b32.xlu0 %v5490_v47, %s5326_s20 }
 0x521   :  { %v6001_v27 = vadd.f32 %v5273_v6, %v1019_v29  ;;  %v1408_v6 = vsub.f32 %v5770_v24, %v5913_v37 }
 0x523   :  { %v1043_v54 = vsel %vm293_vm2, %v6001_v27, -inf  ;;  %v1420_v38 = vmul.f32 1.442695, %v1408_v6 }
 0x524   :  { %1044 = vmax.xlane.f32.xlu2 %v1043_v54 }
 0x525   :  { %1580 = vrot.lane.b32.xlu1 %v5487_v44, %s5327_s13 }
 0x54f   :  { %1041 = vmax.xlane.f32.xlu1 %v1040_v7 }
 0x55f   :  { %v1024_v40 = vpop.xlane.xlu0 %1023 }
 0x560   :  { %v1046_v45 = vsub.f32 %v1003_v11, %v1024_v40 }
 0x562   :  { %v1054_v44 = vmul.f32 1.442695, %v1046_v45 }
 0x564   :  { %5013 = vpow2.f32 %v1054_v44 }
 0x565   :  { %5015 = vpow2.f32 %v1418_v46 }
 0x567   :  { %v1027_v2 = vpop.xlane.xlu1 %1026 }
 0x568   :  { %v1047_v21 = vsub.f32 %v1005_v32, %v1027_v2 }
 0x56a   :  { %v6020_v61 = vpop.eup %5013  ;;  %v1056_v57 = vmul.f32 1.442695, %v1047_v21 }
 0x56b   :  { %v1070_v55 = vsel %vm293_vm2, %v6020_v61, 0.0  ;;  %v6026_v20 = vpop.eup %5015 }
 0x56c   :  { %5017 = vpow2.f32 %v1056_v57  ;;  %1071 = vadd.xlane.f32.xlu0 %v1070_v55  ;;  %v1437_v49 = vsel %vm293_vm2, %v6026_v20, 0.0 }
 0x56f   :  { %v1030_v11 = vpop.xlane.xlu1 %1029 }
 0x570   :  { %v1048_v9 = vsub.f32 %v1008_v58, %v1030_v11 }
 0x572   :  { %v6028_v50 = vpop.eup %5017  ;;  %v1058_v15 = vmul.f32 1.442695, %v1048_v9  ;;  %v1409_v9 = vsub.f32 %v5808_v52, %v5943_v36  ;;  %v1410_v52 = vsub.f32 %v5789_v33, %v5945_v42 }
 0x573   :  { %v1073_v32 = vsel %vm293_vm2, %v6028_v50, 0.0 }
 0x574   :  { %5019 = vpow2.f32 %v1058_v15  ;;  %1074 = vadd.xlane.f32.xlu1 %v1073_v32  ;;  %1438 = vadd.xlane.f32.xlu0 %v1437_v49  ;;  %v1422_v32 = vmul.f32 1.442695, %v1409_v9 }
 0x577   :  { %v1033_v63 = vpop.xlane.xlu2 %1032 }
 0x578   :  { %v1049_v4 = vsub.f32 %v1010_v60, %v1033_v63 }
 0x57a   :  { %v6034_v39 = vpop.eup %5019  ;;  %v1060_v1 = vmul.f32 1.442695, %v1049_v4 }
 0x57b   :  { %v1076_v58 = vsel %vm293_vm2, %v6034_v39, 0.0 }
 0x57c   :  { %5021 = vpow2.f32 %v1060_v1  ;;  %1077 = vadd.xlane.f32.xlu0 %v1076_v58  ;;  %v1424_v58 = vmul.f32 1.442695, %v1410_v52 }
 0x57f   :  { %v1036_v35 = vpop.xlane.xlu0 %1035 }
 0x580   :  { %v1050_v34 = vsub.f32 %v1013_v22, %v1036_v35 }
 0x582   :  { %v6038_v41 = vpop.eup %5021  ;;  %v1062_v13 = vmul.f32 1.442695, %v1050_v34 }
 0x583   :  { %v1079_v28 = vsel %vm293_vm2, %v6038_v41, 0.0 }
 0x584   :  { %5023 = vpow2.f32 %v1062_v13  ;;  %1080 = vadd.xlane.f32.xlu2 %v1079_v28 }
 0x587   :  { %v1583_v31 = vpop.permute.xlu1 %1582  ;;  %v1039_v60 = vpop.xlane.xlu2 %1038 }
 0x588   :  { %v1051_v26 = vsub.f32 %v5988_v62, %v1039_v60  ;;  %1604 = vmatpush.bf16.msrb.mxu1 %v1583_v31 }
 0x58a   :  { %v6043_v29 = vpop.eup %5023  ;;  %v1064_v54 = vmul.f32 1.442695, %v1051_v26 }
 0x58b   :  { %v1082_v22 = vsel %vm293_vm2, %v6043_v29, 0.0 }
 0x58c   :  { %5025 = vpow2.f32 %v1064_v54  ;;  %1083 = vadd.xlane.f32.xlu0 %v1082_v22 }
 0x58d   :  { %1578 = vrot.lane.b32.xlu1 %v5490_v47, %s5327_s13  ;;  %5027 = vpow2.f32 %v1420_v38  ;;  %v1411_v47 = vsub.f32 %v5798_v56, %v6012_v8  ;;  %v1406_v56 = vsub.f32 %v5750_v0, %v5854_v59  ;;  %v893_v0 = vpop.f32.mrf.mxu1 }
 0x58f   :  { %v1219_v7 = vpop.permute.xlu1 %1218  ;;  %v1426_v21 = vmul.f32 1.442695, %v1411_v47  ;;  %v1416_v55 = vmul.f32 1.442695, %v1406_v56 }
 0x592   :  { %v6051_v40 = vpop.eup %5025  ;;  %v1221_v62 = vpop.permute.xlu0 %1220 }
 0x593   :  { %1248 = vmatpush.bf16.msrb.mxu2 %v1221_v62  ;;  %v1085_v45 = vsel %vm293_vm2, %v6051_v40, 0.0  ;;  %v6055_v30 = vpop.eup %5027 }
 0x594   :  { %1086 = vadd.xlane.f32.xlu0 %v1085_v45  ;;  %v1440_v2 = vsel %vm293_vm2, %v6055_v30, 0.0 }
 0x595   :  { %v895_v1 = vpop.f32.mrf.mxu1 }
 0x597   :  { %v1581_v24 = vpop.permute.xlu1 %1580  ;;  %1249 = vmatpush.bf16.msrb.mxu2 %v1219_v7  ;;  %v1045_v37 = vpop.xlane.xlu2 %1044 }
 0x598   :  { %v1053_v44 = vsub.f32 %v6001_v27, %v1045_v37  ;;  %1605 = vmatpush.bf16.msrb.mxu1 %v1581_v24 }
 0x59a   :  { %v1068_v46 = vmul.f32 1.442695, %v1053_v44 }
 0x59c   :  { %5029 = vpow2.f32 %v1068_v46  ;;  %1576 = vrot.lane.b32.xlu2 %v5493_v48, %s5327_s13  ;;  %1441 = vadd.xlane.f32.xlu0 %v1440_v2 }
 0x59d   :  { %5031 = vpow2.f32 %v1426_v21 }
 0x59e   :  { %5033 = vpow2.f32 %v1416_v55 }
 0x59f   :  { %5035 = vpow2.f32 %v1422_v32 }
 0x5a2   :  { %v6064_v57 = vpop.eup %5029 }
 0x5a3   :  { %v1091_v27 = vsel %vm293_vm2, %v6064_v57, 0.0  ;;  %v6070_v8 = vpop.eup %5031 }
 0x5a4   :  { %1092 = vadd.xlane.f32.xlu0 %v1091_v27  ;;  %v1449_v11 = vsel %vm293_vm2, %v6070_v8, 0.0  ;;  %v6074_v48 = vpop.eup %5033 }
 0x5a5   :  { %v1434_v15 = vsel %vm293_vm2, %v6074_v48, 0.0  ;;  %v6082_v59 = vpop.eup %5035 }
 0x5a6   :  { %v1443_v4 = vsel %vm293_vm2, %v6082_v59, 0.0 }
 0x5ac   :  { %1450 = vadd.xlane.f32.xlu0 %v1449_v11 }
 0x5b7   :  { %1435 = vadd.xlane.f32.xlu1 %v1434_v15 }
 0x5c0   :  { %565 = vrot.lane.b32.xlu0 %v5951_v12, %s5326_s20 }
 0x5c2   :  { %v1042_v49 = vpop.xlane.xlu1 %1041 }
 0x5c3   :  { %v1052_v63 = vsub.f32 %v6010_v18, %v1042_v49 }
 0x5c5   :  { %v1066_v36 = vmul.f32 1.442695, %v1052_v63  ;;  %1444 = vadd.xlane.f32.xlu2 %v1443_v4 }
 0x5c7   :  { %5037 = vpow2.f32 %v1066_v36 }
 0x5c8   :  { %923 = vrot.lane.b32.xlu0 %v895_v1, %s5326_s20  ;;  %5039 = vpow2.f32 %v1424_v58 }
 0x5c9   :  { %5041 = vrcp.f32 %v6016_v25 }
 0x5cd   :  { %v6090_v35 = vpop.eup %5037 }
 0x5ce   :  { %v1088_v12 = vsel %vm293_vm2, %v6090_v35, 0.0  ;;  %v6094_v18 = vpop.eup %5039 }
 0x5cf   :  { %1089 = vadd.xlane.f32.xlu1 %v1088_v12  ;;  %v1446_v34 = vsel %vm293_vm2, %v6094_v18, 0.0  ;;  %v6101_v42 = vpop.eup %5041  ;;  %v1463_v12 = vand.u32 2147483648, %v6024_v10 }
 0x5d0   :  { %v1467_v54 = vmul.f32 %v6101_v42, %v6016_v25  ;;  %vm1472_vm6 = vweird.f32 %v6101_v42 }
 0x5d2   :  { %v1468_v62 = vsub.f32 1.0, %v1467_v54 }
 0x5d4   :  { %v1469_v2 = vmul.f32 %v6101_v42, %v1468_v62 }
 0x5d6   :  { %v1470_v49 = vadd.f32 %v6101_v42, %v1469_v2 }
 0x5d7   :  { %1447 = vadd.xlane.f32.xlu1 %v1446_v34 }
 0x5dd   :  { %921 = vrot.lane.b32.xlu2 %v893_v0, %s5326_s20 }
 0x5df   :  { %v1072_v33 = vpop.xlane.xlu0 %1071 }
 0x5e0   :  { %5043 = vrcp.f32 %v1072_v33  ;;  %v1105_v44 = vand.u32 2147483648, %v1072_v33  ;;  %vm1099_vm3 = vweird.f32 %v1072_v33  ;;  %v1103_v47 = vand.u32 2147483647, %v1072_v33 }
 0x5e1   :  { %5045 = vrcp.f32 %v6024_v10 }
 0x5e2   :  { %v1106_v15 = vor.u32 1.1754944e-38, %v1105_v44  ;;  %vm1104_vm7 = vcmp.eq.f32.partialorder %v1103_v47, 8.507059e+37 }
 0x5e5   :  { %569 = vrot.lane.b32.xlu2 %v5955_v43, %s5326_s20 }
 0x5e6   :  { %v5044_v13 = vpop.eup %5043 }
 0x5e7   :  { %v6105_v28 = vpop.eup %5045  ;;  %v1095_v31 = vmul.f32 %v5044_v13, %v1072_v33  ;;  %v1075_v60 = vpop.xlane.xlu1 %1074  ;;  %vm1100_vm15 = vweird.f32 %v5044_v13  ;;  %v1461_v33 = vand.u32 2147483647, %v6024_v10 }
 0x5e8   :  { %v6107_v26 = vpop.xlane.xlu0 %1438  ;;  %5047 = vrcp.f32 %v1075_v60  ;;  %v1453_v22 = vmul.f32 %v6105_v28, %v6024_v10  ;;  %vm6120_vm4 = vmor %vm1099_vm3, %vm1100_vm15  ;;  %v1119_v56 = vand.u32 2147483648, %v1075_v60  ;;  %v1117_v11 = vand.u32 2147483647, %v1075_v60 }
 0x5e9   :  { %v1096_v6 = vsub.f32 1.0, %v1095_v31  ;;  %vm1113_vm8 = vweird.f32 %v1075_v60  ;;  %vm1458_vm9 = vweird.f32 %v6105_v28  ;;  %vm1473_vm15 = vmor %vm1471_vm13, %vm1472_vm6  ;;  %vm1462_vm3 = vcmp.eq.f32.partialorder %v1461_v33, 8.507059e+37 }
 0x5ea   :  { %v1454_v45 = vsub.f32 1.0, %v1453_v22  ;;  %v1120_v63 = vor.u32 1.1754944e-38, %v1119_v56  ;;  %vm1118_vm11 = vcmp.eq.f32.partialorder %v1117_v11, 8.507059e+37  ;;  %vm1459_vm14 = vmor %vm1457_vm12, %vm1458_vm9 }
 0x5eb   :  { %v1097_v38 = vmul.f32 %v5044_v13, %v1096_v6  ;;  %v1475_v6 = vand.u32 2147483647, %v6016_v25 }
 0x5ec   :  { %v1455_v21 = vmul.f32 %v6105_v28, %v1454_v45 }
 0x5ed   :  { %v1098_v43 = vadd.f32 %v5044_v13, %v1097_v38  ;;  %v1474_v38 = vsel %vm1473_vm15, %v6101_v42, %v1470_v49 }
 0x5ee   :  { %v5048_v7 = vpop.eup %5047  ;;  %v1456_v52 = vadd.f32 %v6105_v28, %v1455_v21 }
 0x5ef   :  { %v1109_v24 = vmul.f32 %v5048_v7, %v1075_v60  ;;  %vm1114_vm5 = vweird.f32 %v5048_v7  ;;  %v1102_v9 = vsel %vm6120_vm4, %v5044_v13, %v1098_v43  ;;  %vm1476_vm4 = vcmp.eq.f32.partialorder %v1475_v6, 8.507059e+37 }
 0x5f0   :  { %v6113_v37 = vpop.xlane.xlu0 %1077  ;;  %563 = vrot.lane.b32.xlu1 %v5949_v14, %s5326_s20  ;;  %v1477_v14 = vand.u32 2147483648, %v6016_v25  ;;  %vm1115_vm10 = vmor %vm1113_vm8, %vm1114_vm5  ;;  %v1107_v4 = vsel %vm1104_vm7, %v1106_v15, %v1102_v9  ;;  %v1460_v54 = vsel %vm1459_vm14, %v6105_v28, %v1456_v52 }
 0x5f1   :  { %5049 = vrcp.f32 %v6113_v37  ;;  %v1110_v46 = vsub.f32 1.0, %v1109_v24  ;;  %v1206_v31 = vmul.f32 %v6020_v61, %v1107_v4  ;;  %v1464_v61 = vor.u32 1.1754944e-38, %v1463_v12 }
 0x5f2   :  { %v1133_v28 = vand.u32 2147483648, %v6113_v37  ;;  %vm1127_vm6 = vweird.f32 %v6113_v37 }
 0x5f3   :  { %v1111_v55 = vmul.f32 %v5048_v7, %v1110_v46  ;;  %v1465_v25 = vsel %vm1462_vm3, %v1464_v61, %v1460_v54  ;;  %v1131_v46 = vand.u32 2147483647, %v6113_v37 }
 0x5f4   :  { %v1564_v47 = vmul.f32 %v5818_v5, %v1465_v25  ;;  %v1134_v9 = vor.u32 1.1754944e-38, %v1133_v28 }
 0x5f5   :  { %v1112_v32 = vadd.f32 %v5048_v7, %v1111_v55 }
 0x5f7   :  { %v6128_v0 = vpop.eup %5049  ;;  %v1081_v1 = vpop.xlane.xlu2 %1080  ;;  %v1116_v58 = vsel %vm1115_vm10, %v5048_v7, %v1112_v32  ;;  %v1478_v7 = vor.u32 1.1754944e-38, %v1477_v14  ;;  %vm1132_vm10 = vcmp.eq.f32.partialorder %v1131_v46, 8.507059e+37 }
 0x5f8   :  { %v1123_v36 = vmul.f32 %v6128_v0, %v6113_v37  ;;  %5051 = vrcp.f32 %v1081_v1  ;;  %v1121_v34 = vsel %vm1118_vm11, %v1120_v63, %v1116_v58  ;;  %vm1128_vm5 = vweird.f32 %v6128_v0 }
 0x5f9   :  { %v1207_v60 = vmul.f32 %v6028_v50, %v1121_v34  ;;  %v1479_v62 = vsel %vm1476_vm4, %v1478_v7, %v1474_v38  ;;  %v1147_v2 = vand.u32 2147483648, %v1081_v1  ;;  %vm1129_vm7 = vmor %vm1127_vm6, %vm1128_vm5  ;;  %v1145_v11 = vand.u32 2147483647, %v1081_v1 }
 0x5fa   :  { %v1124_v13 = vsub.f32 1.0, %v1123_v36  ;;  %v1565_v21 = vmul.f32 %v5803_v53, %v1479_v62  ;;  %vm1141_vm9 = vweird.f32 %v1081_v1 }
 0x5fb   :  { %v1214_v10 = vpack.c.bf16 %v1207_v60, %v1206_v31  ;;  %v1148_v37 = vor.u32 1.1754944e-38, %v1147_v2  ;;  %vm1146_vm12 = vcmp.eq.f32.partialorder %v1145_v11, 8.507059e+37  ;;  %v1503_v11 = vand.u32 2147483647, %v6107_v26 }
 0x5fc   :  { %v1125_v22 = vmul.f32 %v6128_v0, %v1124_v13  ;;  %v1572_v14 = vpack.c.bf16 %v1565_v21, %v1564_v47 }
 0x5fd   :  { %4742 = vmatmul.msk.bf16.vlgmr.msrb.gmra.mxu2 %vm293_vm2, %v1214_v10 }
 0x5fe   :  { %v5052_v50 = vpop.eup %5051  ;;  %v1126_v44 = vadd.f32 %v6128_v0, %v1125_v22 }
 0x5ff   :  { %v1137_v45 = vmul.f32 %v5052_v50, %v1081_v1  ;;  %v1579_v43 = vpop.permute.xlu1 %1578  ;;  %v1084_v24 = vpop.xlane.xlu0 %1083  ;;  %vm1142_vm8 = vweird.f32 %v5052_v50 }
 0x600   :  { %5053 = vrcp.f32 %v1084_v24  ;;  %1606 = vmatpush.bf16.msrb.mxu1 %v1579_v43  ;;  %v1577_v56 = vpop.permute.xlu2 %1576  ;;  %v1130_v55 = vsel %vm1129_vm7, %v6128_v0, %v1126_v44  ;;  %vm1143_vm11 = vmor %vm1141_vm9, %vm1142_vm8  ;;  %v1161_v13 = vand.u32 2147483648, %v1084_v24  ;;  %vm1155_vm14 = vweird.f32 %v1084_v24 }
 0x601   :  { %v1138_v42 = vsub.f32 1.0, %v1137_v45  ;;  %v1135_v5 = vsel %vm1132_vm10, %v1134_v9, %v1130_v55  ;;  %v1159_v60 = vand.u32 2147483647, %v1084_v24  ;;  %vm1499_vm9 = vweird.f32 %v6107_v26 }
 0x602   :  { %v1208_v52 = vmul.f32 %v6034_v39, %v1135_v5  ;;  %v1162_v10 = vor.u32 1.1754944e-38, %v1161_v13 }
 0x603   :  { %v1139_v27 = vmul.f32 %v5052_v50, %v1138_v42  ;;  %vm1160_vm5 = vcmp.eq.f32.partialorder %v1159_v60, 8.507059e+37 }
 0x604   :  { %1607 = vmatpush.bf16.msrb.mxu1 %v1577_v56 }
 0x605   :  { %v1140_v15 = vadd.f32 %v5052_v50, %v1139_v27  ;;  %v1505_v27 = vand.u32 2147483648, %v6107_v26 }
 0x606   :  { %v5054_v32 = vpop.eup %5053 }
 0x607   :  { %v1151_v49 = vmul.f32 %v5054_v32, %v1084_v24  ;;  %v1087_v63 = vpop.xlane.xlu0 %1086  ;;  %4750 = vmatmul.msk.bf16.vlgmr.msrb.gmra.mxu1 %vm293_vm2, %v1572_v14  ;;  %v1144_v53 = vsel %vm1143_vm11, %v5052_v50, %v1140_v15  ;;  %vm1156_vm13 = vweird.f32 %v5054_v32 }
 0x608   :  { %5055 = vrcp.f32 %v1087_v63  ;;  %v1149_v0 = vsel %vm1146_vm12, %v1148_v37, %v1144_v53  ;;  %v1175_v6 = vand.u32 2147483648, %v1087_v63  ;;  %vm1157_vm15 = vmor %vm1155_vm14, %vm1156_vm13  ;;  %v1173_v39 = vand.u32 2147483647, %v1087_v63 }
 0x609   :  { %v1152_v4 = vsub.f32 1.0, %v1151_v49  ;;  %v1209_v36 = vmul.f32 %v6038_v41, %v1149_v0  ;;  %vm1169_vm4 = vweird.f32 %v1087_v63  ;;  %5057 = vrcp.f32 %v6107_v26 }
 0x60a   :  { %v1176_v61 = vor.u32 1.1754944e-38, %v1175_v6  ;;  %vm1174_vm7 = vcmp.eq.f32.partialorder %v1173_v39, 8.507059e+37  ;;  %v1506_v37 = vor.u32 1.1754944e-38, %v1505_v27  ;;  %vm1504_vm13 = vcmp.eq.f32.partialorder %v1503_v11, 8.507059e+37 }
 0x60b   :  { %v1153_v1 = vmul.f32 %v5054_v32, %v1152_v4  ;;  %v1215_v58 = vpack.c.bf16 %v1209_v36, %v1208_v52 }
 0x60d   :  { %4743 = vmatmul.msk.bf16.gmra.mxu2 %vm293_vm2, %v1215_v58  ;;  %v1154_v33 = vadd.f32 %v5054_v32, %v1153_v1 }
 0x60e   :  { %v5056_v12 = vpop.eup %5055 }
 0x60f   :  { %v1165_v34 = vmul.f32 %v5056_v12, %v1087_v63  ;;  %v1158_v22 = vsel %vm1157_vm15, %v5054_v32, %v1154_v33  ;;  %vm1170_vm3 = vweird.f32 %v5056_v12  ;;  %v5058_v43 = vpop.eup %5057  ;;  %v6167_v44 = vpop.xlane.xlu0 %1441 }
 0x610   :  { %v1163_v38 = vsel %vm1160_vm5, %v1162_v10, %v1158_v22  ;;  %vm1171_vm6 = vmor %vm1169_vm4, %vm1170_vm3  ;;  %v1495_v24 = vmul.f32 %v5058_v43, %v6107_v26  ;;  %vm1500_vm8 = vweird.f32 %v5058_v43  ;;  %vm1513_vm4 = vweird.f32 %v6167_v44 }
 0x611   :  { %v1166_v31 = vsub.f32 1.0, %v1165_v34  ;;  %v1210_v25 = vmul.f32 %v6043_v29, %v1163_v38  ;;  %vm6177_vm10 = vmor %vm1499_vm9, %vm1500_vm8 }
 0x612   :  { %v1496_v28 = vsub.f32 1.0, %v1495_v24 }
 0x613   :  { %v1167_v54 = vmul.f32 %v5056_v12, %v1166_v31 }
 0x614   :  { %v1497_v47 = vmul.f32 %v5058_v43, %v1496_v28 }
 0x615   :  { %v1168_v41 = vadd.f32 %v5056_v12, %v1167_v54 }
 0x617   :  { %v1172_v7 = vsel %vm1171_vm6, %v5056_v12, %v1168_v41  ;;  %v6170_v46 = vpop.xlane.xlu0 %1092  ;;  %v1517_v41 = vand.u32 2147483647, %v6167_v44 }
 0x618   :  { %v1177_v50 = vsel %vm1174_vm7, %v1176_v61, %v1172_v7  ;;  %v1203_v55 = vand.u32 2147483648, %v6170_v46 }
 0x619   :  { %v1211_v62 = vmul.f32 %v6051_v40, %v1177_v50  ;;  %v1498_v40 = vadd.f32 %v5058_v43, %v1497_v47  ;;  %vm1518_vm9 = vcmp.eq.f32.partialorder %v1517_v41, 8.507059e+37 }
 0x61b   :  { %v1216_v45 = vpack.c.bf16 %v1211_v62, %v1210_v25  ;;  %v1502_v14 = vsel %vm6177_vm10, %v5058_v43, %v1498_v40 }
 0x61c   :  { %v1507_v0 = vsel %vm1504_vm13, %v1506_v37, %v1502_v14 }
 0x61d   :  { %4744 = vmatmul.msk.bf16.gmra.mxu2 %vm293_vm2, %v1216_v45  ;;  %v1567_v12 = vmul.f32 %v6026_v20, %v1507_v0  ;;  %v1519_v20 = vand.u32 2147483648, %v6167_v44 }
 0x61f   :  { %v6186_v53 = vpop.xlane.xlu0 %1450  ;;  %v1520_v43 = vor.u32 1.1754944e-38, %v1519_v20 }
 0x62a   :  { %v1436_v42 = vpop.xlane.xlu1 %1435 }
 0x62b   :  { %5059 = vrcp.f32 %v1436_v42  ;;  %v1491_v9 = vand.u32 2147483648, %v1436_v42  ;;  %v1489_v5 = vand.u32 2147483647, %v1436_v42  ;;  %vm1485_vm12 = vweird.f32 %v1436_v42 }
 0x62c   :  { %5061 = vrcp.f32 %v6167_v44 }
 0x62d   :  { %5063 = vrcp.f32 %v6170_v46  ;;  %v1492_v26 = vor.u32 1.1754944e-38, %v1491_v9  ;;  %vm1490_vm15 = vcmp.eq.f32.partialorder %v1489_v5, 8.507059e+37 }
 0x631   :  { %v5060_v29 = vpop.eup %5059 }
 0x632   :  { %v1481_v2 = vmul.f32 %v5060_v29, %v1436_v42  ;;  %v6172_v21 = vpop.eup %5061  ;;  %vm1486_vm11 = vweird.f32 %v5060_v29 }
 0x633   :  { %v1509_v15 = vmul.f32 %v6172_v21, %v6167_v44  ;;  %vm1487_vm14 = vmor %vm1485_vm12, %vm1486_vm11  ;;  %v6188_v4 = vpop.eup %5063  ;;  %vm1514_vm3 = vweird.f32 %v6172_v21  ;;  %vm1197_vm12 = vweird.f32 %v6170_v46 }
 0x634   :  { %v1482_v56 = vsub.f32 1.0, %v1481_v2  ;;  %v1193_v34 = vmul.f32 %v6188_v4, %v6170_v46  ;;  %vm6204_vm6 = vmor %vm1513_vm4, %vm1514_vm3  ;;  %vm1198_vm11 = vweird.f32 %v6188_v4  ;;  %v6216_v2 = vpop.f32.mrf.mxu1 }
 0x635   :  { %v1510_v52 = vsub.f32 1.0, %v1509_v15  ;;  %vm6224_vm13 = vmor %vm1197_vm12, %vm1198_vm11  ;;  %v1201_v15 = vand.u32 2147483647, %v6170_v46 }
 0x636   :  { %v1483_v32 = vmul.f32 %v5060_v29, %v1482_v56  ;;  %v1194_v6 = vsub.f32 1.0, %v1193_v34 }
 0x637   :  { %v1511_v33 = vmul.f32 %v6172_v21, %v1510_v52  ;;  %vm1202_vm3 = vcmp.eq.f32.partialorder %v1201_v15, 8.507059e+37 }
 0x638   :  { %v1445_v49 = vpop.xlane.xlu2 %1444  ;;  %v1484_v63 = vadd.f32 %v5060_v29, %v1483_v32  ;;  %v1195_v50 = vmul.f32 %v6188_v4, %v1194_v6 }
 0x639   :  { %5065 = vrcp.f32 %v1445_v49  ;;  %v1512_v22 = vadd.f32 %v6172_v21, %v1511_v33  ;;  %v1533_v10 = vand.u32 2147483648, %v1445_v49  ;;  %v1531_v61 = vand.u32 2147483647, %v1445_v49 }
 0x63a   :  { %v1488_v36 = vsel %vm1487_vm14, %v5060_v29, %v1484_v63  ;;  %5067 = vrcp.f32 %v6186_v53  ;;  %vm1527_vm7 = vweird.f32 %v1445_v49  ;;  %v1196_v40 = vadd.f32 %v6188_v4, %v1195_v50 }
 0x63b   :  { %v1493_v1 = vsel %vm1490_vm15, %v1492_v26, %v1488_v36  ;;  %v1516_v45 = vsel %vm6204_vm6, %v6172_v21, %v1512_v22  ;;  %v1534_v24 = vor.u32 1.1754944e-38, %v1533_v10  ;;  %vm1532_vm10 = vcmp.eq.f32.partialorder %v1531_v61, 8.507059e+37 }
 0x63c   :  { %v1566_v58 = vmul.f32 %v6074_v48, %v1493_v1  ;;  %v1521_v47 = vsel %vm1518_vm9, %v1520_v43, %v1516_v45  ;;  %v900_v34 = vpop.f32.mrf.mxu1 }
 0x63d   :  { %v1568_v9 = vmul.f32 %v6055_v30, %v1521_v47  ;;  %v1204_v30 = vor.u32 1.1754944e-38, %v1203_v55 }
 0x63e   :  { %v1573_v13 = vpack.c.bf16 %v1567_v12, %v1566_v58  ;;  %v1561_v58 = vand.u32 2147483648, %v6186_v53 }
 0x63f   :  { %v5066_v31 = vpop.eup %5065 }
 0x640   :  { %v1523_v60 = vmul.f32 %v5066_v31, %v1445_v49  ;;  %4751 = vmatmul.msk.bf16.gmra.mxu1 %vm293_vm2, %v1573_v13  ;;  %v6197_v54 = vpop.eup %5067  ;;  %vm1528_vm5 = vweird.f32 %v5066_v31  ;;  %v1559_v13 = vand.u32 2147483647, %v6186_v53  ;;  %v1562_v41 = vor.u32 1.1754944e-38, %v1561_v58 }
 0x641   :  { %v1551_v25 = vmul.f32 %v6197_v54, %v6186_v53  ;;  %vm1529_vm8 = vmor %vm1527_vm7, %vm1528_vm5  ;;  %vm1556_vm4 = vweird.f32 %v6197_v54  ;;  %vm1555_vm7 = vweird.f32 %v6186_v53 }
 0x642   :  { %v1524_v48 = vsub.f32 1.0, %v1523_v60  ;;  %v1090_v39 = vpop.xlane.xlu1 %1089 }
 0x643   :  { %5069 = vrcp.f32 %v1090_v39  ;;  %v1552_v42 = vsub.f32 1.0, %v1551_v25  ;;  %v1189_v5 = vand.u32 2147483648, %v1090_v39  ;;  %v1187_v63 = vand.u32 2147483647, %v1090_v39 }
 0x644   :  { %v1525_v38 = vmul.f32 %v5066_v31, %v1524_v48  ;;  %vm1183_vm15 = vweird.f32 %v1090_v39  ;;  %v903_v50 = vpop.f32.mrf.mxu1 }
 0x645   :  { %v1553_v32 = vmul.f32 %v6197_v54, %v1552_v42  ;;  %v1190_v52 = vor.u32 1.1754944e-38, %v1189_v5  ;;  %vm1188_vm6 = vcmp.eq.f32.partialorder %v1187_v63, 8.507059e+37 }
 0x646   :  { %v1526_v62 = vadd.f32 %v5066_v31, %v1525_v38 }
 0x647   :  { %v1554_v46 = vadd.f32 %v6197_v54, %v1553_v32 }
 0x648   :  { %v1530_v44 = vsel %vm1529_vm8, %v5066_v31, %v1526_v62  ;;  %vm6238_vm8 = vmor %vm1555_vm7, %vm1556_vm4 }
 0x649   :  { %v5070_v28 = vpop.eup %5069  ;;  %v1535_v29 = vsel %vm1532_vm10, %v1534_v24, %v1530_v44  ;;  %v1558_v48 = vsel %vm6238_vm8, %v6197_v54, %v1554_v46  ;;  %vm1560_vm10 = vcmp.eq.f32.partialorder %v1559_v13, 8.507059e+37 }
 0x64a   :  { %v1179_v27 = vmul.f32 %v5070_v28, %v1090_v39  ;;  %v1448_v56 = vpop.xlane.xlu1 %1447  ;;  %v1569_v21 = vmul.f32 %v6082_v59, %v1535_v29  ;;  %v1200_v59 = vsel %vm6224_vm13, %v6188_v4, %v1196_v40  ;;  %vm1184_vm14 = vweird.f32 %v5070_v28 }
 0x64b   :  { %5071 = vrcp.f32 %v1448_v56  ;;  %vm1185_vm5 = vmor %vm1183_vm15, %vm1184_vm14  ;;  %v1205_v36 = vsel %vm1202_vm3, %v1204_v30, %v1200_v59  ;;  %v1547_v22 = vand.u32 2147483648, %v1448_v56  ;;  %v1545_v20 = vand.u32 2147483647, %v1448_v56 }
 0x64c   :  { %v1180_v11 = vsub.f32 1.0, %v1179_v27  ;;  %v1574_v49 = vpack.c.bf16 %v1569_v21, %v1568_v9  ;;  %v1213_v6 = vmul.f32 %v6064_v57, %v1205_v36  ;;  %vm1541_vm11 = vweird.f32 %v1448_v56  ;;  %v905_v62 = vpop.f32.mrf.mxu1 }
 0x64d   :  { %v1548_v53 = vor.u32 1.1754944e-38, %v1547_v22  ;;  %vm1546_vm13 = vcmp.eq.f32.partialorder %v1545_v20, 8.507059e+37 }
 0x64e   :  { %v1181_v37 = vmul.f32 %v5070_v28, %v1180_v11  ;;  %v922_v11 = vpop.permute.xlu2 %921 }
 0x650   :  { %4752 = vmatmul.msk.bf16.gmra.mxu1 %vm293_vm2, %v1574_v49  ;;  %v1182_v26 = vadd.f32 %v5070_v28, %v1181_v37 }
 0x651   :  { %v5072_v0 = vpop.eup %5071 }
 0x652   :  { %v1537_v1 = vmul.f32 %v5072_v0, %v1448_v56  ;;  %v1186_v4 = vsel %vm1185_vm5, %v5070_v28, %v1182_v26  ;;  %vm1542_vm9 = vweird.f32 %v5072_v0 }
 0x653   :  { %v1191_v12 = vsel %vm1188_vm6, %v1190_v52, %v1186_v4  ;;  %vm1543_vm12 = vmor %vm1541_vm11, %vm1542_vm9 }
 0x654   :  { %v1538_v31 = vsub.f32 1.0, %v1537_v1  ;;  %v1212_v60 = vmul.f32 %v6090_v35, %v1191_v12  ;;  %v1563_v35 = vsel %vm1560_vm10, %v1562_v41, %v1558_v48  ;;  %v908_v45 = vpop.f32.mrf.mxu1 }
 0x655   :  { %v1571_v54 = vmul.f32 %v6070_v8, %v1563_v35 }
 0x656   :  { %v1539_v39 = vmul.f32 %v5072_v0, %v1538_v31  ;;  %v1217_v10 = vpack.c.bf16 %v1213_v6, %v1212_v60  ;;  %v570_v15 = vpop.permute.xlu2 %569 }
 0x657   :  { %v590_v48 = vadd.f32 %v570_v15, %v5429_v19  ;;  %v5276_v15 = vld [vmem:[%s8240_s0 + $0x8] sm:$0xff] }
 0x658   :  { %v1540_v38 = vadd.f32 %v5072_v0, %v1539_v39  ;;  %4745 = vmatmul.msk.bf16.gmra.mxu2 %vm293_vm2, %v1217_v10 }
 0x65a   :  { %v1544_v57 = vsel %vm1543_vm12, %v5072_v0, %v1540_v38 }
 0x65b   :  { %v1549_v61 = vsel %vm1546_vm13, %v1548_v53, %v1544_v57 }
 0x65c   :  { %v1570_v7 = vmul.f32 %v6094_v18, %v1549_v61  ;;  %v910_v43 = vpop.f32.mrf.mxu1 }
 0x65e   :  { %v1575_v25 = vpack.c.bf16 %v1571_v54, %v1570_v7 }
 0x660   :  { %4753 = vmatmul.msk.bf16.gmra.mxu1 %vm293_vm2, %v1575_v25 }
 0x662   :  { %v564_v55 = vpop.permute.xlu1 %563 }
 0x663   :  { %v587_v22 = vadd.f32 %v564_v55, %v5429_v19 }
 0x665   :  { %v945_v38 = vadd.f32 %v922_v11, %v587_v22 }
 0x680   :  { %v1251_v8 = vpop.f32.mrf.mxu2 }
 0x684   :  { %v1609_v24 = vpop.f32.mrf.mxu1 }
 0x685   :  { %1637 = vrot.lane.b32.xlu1 %v1609_v24, %s5326_s20 }
 0x688   :  { %v1253_v18 = vpop.f32.mrf.mxu2 }
 0x68c   :  { %v1611_v44 = vpop.f32.mrf.mxu1 }
 0x68d   :  { %567 = vrot.lane.b32.xlu1 %v5953_v23, %s5326_s20  ;;  %1639 = vrot.lane.b32.xlu0 %v1611_v44, %s5326_s20 }
 0x690   :  { %v1256_v28 = vpop.f32.mrf.mxu2 }
 0x695   :  { %927 = vrot.lane.b32.xlu1 %v900_v34, %s5326_s20  ;;  %925 = vrot.lane.b32.xlu0 %v6216_v2, %s5326_s20 }
 0x698   :  { %v1258_v23 = vpop.f32.mrf.mxu2 }
 0x69d   :  { %571 = vrot.lane.b32.xlu0 %v5957_v17, %s5326_s20 }
 0x6a0   :  { %v1261_v17 = vpop.f32.mrf.mxu2 }
 0x6a5   :  { %931 = vrot.lane.b32.xlu0 %v905_v62, %s5326_s20 }
 0x6a8   :  { %v1263_v2 = vpop.f32.mrf.mxu2 }
 0x6bd   :  { %v1614_v42 = vpop.f32.mrf.mxu1 }
 0x6be   :  { %1641 = vrot.lane.b32.xlu1 %v1614_v42, %s5326_s20 }
 0x6c5   :  { %v1616_v47 = vpop.f32.mrf.mxu1 }
 0x6c6   :  { %573 = vrot.lane.b32.xlu1 %v5959_v51, %s5326_s20  ;;  %1643 = vrot.lane.b32.xlu2 %v1616_v47, %s5326_s20 }
 0x6cd   :  { %v1619_v29 = vpop.f32.mrf.mxu1 }
 0x6ce   :  { %929 = vrot.lane.b32.xlu2 %v903_v50, %s5326_s20  ;;  %1645 = vrot.lane.b32.xlu0 %v1619_v29, %s5326_s20 }
 0x6d5   :  { %v1621_v40 = vpop.f32.mrf.mxu1 }
 0x6d6   :  { %577 = vrot.lane.b32.xlu2 %v5963_v3, %s5326_s20  ;;  %933 = vrot.lane.b32.xlu0 %v908_v45, %s5326_s20 }
 0x6d7   :  { %1647 = vrot.lane.b32.xlu1 %v1621_v40, %s5326_s20 }
 0x6db   :  { %v1266_v51 = vpop.f32.mrf.mxu2 }
 0x6dd   :  { %v1624_v27 = vpop.f32.mrf.mxu1 }
 0x6de   :  { %1281 = vrot.lane.b32.xlu0 %v1253_v18, %s5326_s20 }
 0x6df   :  { %575 = vrot.lane.b32.xlu1 %v5961_v16, %s5326_s20  ;;  %v566_v16 = vpop.permute.xlu0 %565 }
 0x6e0   :  { %v588_v58 = vadd.f32 %v566_v16, %v5429_v19 }
 0x6e3   :  { %v1268_v3 = vpop.f32.mrf.mxu2 }
 0x6e5   :  { %v1626_v56 = vpop.f32.mrf.mxu1 }
 0x6e6   :  { %1285 = vrot.lane.b32.xlu0 %v1258_v23, %s5326_s20  ;;  %1651 = vrot.lane.b32.xlu2 %v1626_v56, %s5326_s20 }
 0x6e7   :  { %1279 = vrot.lane.b32.xlu1 %v1251_v8, %s5326_s20  ;;  %v924_v21 = vpop.permute.xlu0 %923 }
 0x6e8   :  { %v946_v12 = vadd.f32 %v924_v21, %v588_v58  ;;  %v5279_v58 = vld [vmem:[%s8240_s0 + $0x18] sm:$0xff] }
 0x6ee   :  { %1293 = vrot.lane.b32.xlu0 %v1268_v3, %s5326_s20  ;;  %1283 = vrot.lane.b32.xlu2 %v1256_v28, %s5326_s20 }
 0x6ef   :  { %935 = vrot.lane.b32.xlu1 %v910_v43, %s5326_s20 }
 0x6f6   :  { %1289 = vrot.lane.b32.xlu2 %v1263_v2, %s5326_s20 }
 0x6f7   :  { %1649 = vrot.lane.b32.xlu1 %v1624_v27, %s5326_s20  ;;  %v1638_v14 = vpop.permute.xlu1 %1637 }
 0x6fe   :  { %1291 = vrot.lane.b32.xlu2 %v1266_v51, %s5326_s20  ;;  %v5275_v51 = vld [vmem:[%s8240_s0] sm:$0xff] }
 0x6ff   :  { %1287 = vrot.lane.b32.xlu1 %v1261_v17, %s5326_s20  ;;  %v1640_v9 = vpop.permute.xlu0 %1639  ;;  %v568_v5 = vpop.permute.xlu1 %567 }
 0x700   :  { %v589_v60 = vadd.f32 %v568_v5, %v5429_v19 }
 0x707   :  { %v926_v32 = vpop.permute.xlu0 %925  ;;  %v928_v49 = vpop.permute.xlu1 %927 }
 0x708   :  { %v947_v39 = vadd.f32 %v926_v32, %v589_v60  ;;  %v948_v20 = vadd.f32 %v928_v49, %v590_v48  ;;  %v5281_v48 = vld [vmem:[%s8240_s0 + $0x28] sm:$0xff] }
 0x70f   :  { %v572_v37 = vpop.permute.xlu0 %571 }
 0x710   :  { %v591_v8 = vadd.f32 %v572_v37, %v5429_v19 }
 0x717   :  { %v932_v26 = vpop.permute.xlu0 %931 }
 0x720   :  { %v1644_v59 = vpop.permute.xlu2 %1643 }
 0x728   :  { %v930_v63 = vpop.permute.xlu2 %929 }
 0x729   :  { %v949_v18 = vadd.f32 %v930_v63, %v591_v8 }
 0x730   :  { %v1642_v30 = vpop.permute.xlu1 %1641  ;;  %v578_v0 = vpop.permute.xlu2 %577 }
 0x731   :  { %v594_v11 = vadd.f32 %v578_v0, %v5429_v19 }
 0x738   :  { %v574_v52 = vpop.permute.xlu1 %573 }
 0x739   :  { %v592_v53 = vadd.f32 %v574_v52, %v5429_v19 }
 0x73b   :  { %v950_v62 = vadd.f32 %v932_v26, %v592_v53  ;;  %v5282_v53 = vld [vmem:[%s8240_s0 + $0x30] sm:$0xff] }
 0x740   :  { %v1646_v46 = vpop.permute.xlu0 %1645  ;;  %v6285_v36 = vpop.permute.xlu2 %1651 }
 0x748   :  { %v934_v1 = vpop.permute.xlu0 %933  ;;  %v1284_v31 = vpop.permute.xlu2 %1283 }
 0x749   :  { %v1648_v4 = vpop.permute.xlu1 %1647  ;;  %v1305_v10 = vadd.f32 %v1284_v31, %v947_v39 }
 0x74b   :  { %v1663_v7 = vadd.f32 %v1642_v30, %v1305_v10  ;;  %v5277_v30 = vld [vmem:[%s8240_s0 + $0x10] sm:$0xff] }
 0x750   :  { %v1282_v34 = vpop.permute.xlu0 %1281  ;;  %v1290_v50 = vpop.permute.xlu2 %1289 }
 0x751   :  { %v1304_v33 = vadd.f32 %v1282_v34, %v946_v12  ;;  %v576_v13 = vpop.permute.xlu1 %575  ;;  %v1308_v45 = vadd.f32 %v1290_v50, %v950_v62  ;;  %v5328_v62 = vmov 32.0  }
 0x752   :  { %v593_v47 = vadd.f32 %v576_v13, %v5429_v19  ;;  %v5280_v13 = vld [vmem:[%s8240_s0 + $0x20] sm:$0xff]  ;;  %5073 = vrcp.f32 %v5328_v62 }
 0x753   :  { %v1662_v6 = vadd.f32 %v1640_v9, %v1304_v33  ;;  %v1666_v24 = vadd.f32 %v1648_v4, %v1308_v45 }
 0x754   :  { %v951_v17 = vadd.f32 %v934_v1, %v593_v47 }
 0x755   :  { %1679 = vrot.lane.b32.xlu0 %v1662_v6, %s5326_s20 }
 0x758   :  { %v1286_v41 = vpop.permute.xlu0 %1285  ;;  %v1292_v29 = vpop.permute.xlu2 %1291 }
 0x759   :  { %v1306_v35 = vadd.f32 %v1286_v41, %v948_v20  ;;  %v1280_v57 = vpop.permute.xlu1 %1279  ;;  %v1309_v40 = vadd.f32 %v1292_v29, %v951_v17  ;;  %v5074_v45 = vpop.eup %5073 }
 0x75a   :  { %v1303_v61 = vadd.f32 %v1280_v57, %v945_v38  ;;  %vm1738_vm14 = vweird.f32 %v5074_v45 }
 0x75b   :  { %v1664_v54 = vadd.f32 %v1644_v59, %v1306_v35 }
 0x75c   :  { %v1661_v25 = vadd.f32 %v1638_v14, %v1303_v61 }
 0x75d   :  { %1683 = vrot.lane.b32.xlu1 %v1664_v54, %s5326_s20  ;;  %1681 = vrot.lane.b32.xlu0 %v1663_v7, %s5326_s20 }
 0x75e   :  { %1677 = vrot.lane.b32.xlu2 %v1661_v25, %s5326_s20 }
 0x760   :  { %v1294_v55 = vpop.permute.xlu0 %1293 }
 0x761   :  { %v936_v43 = vpop.permute.xlu1 %935 }
 0x762   :  { %v952_v14 = vadd.f32 %v936_v43, %v594_v11  ;;  %v1734_v43 = vmul.f32 32.0, %v5074_v45 }
 0x764   :  { %v1310_v37 = vadd.f32 %v1294_v55, %v952_v14 }
 0x765   :  { %1687 = vrot.lane.b32.xlu0 %v1666_v24, %s5326_s20  ;;  %v1735_v24 = vsub.f32 1.0, %v1734_v43 }
 0x766   :  { %v1668_v63 = vadd.f32 %v6285_v36, %v1310_v37  ;;  %v6337_v36 = vld [vmem:[%s8246_s6] sm:$0x7]  ;;  %v5283_v37 = vld [vmem:[%s8240_s0 + $0x38] sm:$0xff] }
 0x767   :  { %v6340_v4 = vperm.slane %v6337_v36, 2 }
 0x769   :  { %v1650_v44 = vpop.permute.xlu1 %1649 }
 0x76a   :  { %v1667_v2 = vadd.f32 %v1650_v44, %v1309_v40  ;;  %v1736_v44 = vmul.f32 %v5074_v45, %v1735_v24 }
 0x76c   :  { %v1737_v8 = vadd.f32 %v5074_v45, %v1736_v44 }
 0x771   :  { %v1288_v28 = vpop.permute.xlu1 %1287 }
 0x772   :  { %v1307_v42 = vadd.f32 %v1288_v28, %v949_v18  ;;  %v6384_v18 = vsel %vm1738_vm14, %v5074_v45, %v1737_v8 }
 0x773   :  { %8282 = vst [vmem:[#allocation5_spill] sm:$0xff] %v6384_v18 }
 0x774   :  { %v1665_v23 = vadd.f32 %v1646_v46, %v1307_v42 }
 0x776   :  { %1685 = vrot.lane.b32.xlu2 %v1665_v23, %s5326_s20 }
 0x77e   :  { %1689 = vrot.lane.b32.xlu2 %v1667_v2, %s5326_s20  ;;  %v4912_v2 = vld [vmem:[%s8244_s4 + $0x8] sm:$0xff] }
 0x77f   :  { %1968 = vmatpush.bf16.msra.mxu3 %v4912_v2 }
 0x7b8   :  { %v1678_v27 = vpop.permute.xlu2 %1677 }
 0x7b9   :  { %v6304_v56 = vadd.f32 %v5275_v51, %v1678_v27 }
 0x7bb   :  { %v1709_v3 = vsel %vm72_vm0, %v6304_v56, 0.0  ;;  %v1748_v16 = vmul.f32 %v6304_v56, %v6304_v56 }
 0x7bc   :  { %1710 = vadd.xlane.f32.xlu1 %v1709_v3  ;;  %v4911_v3 = vld [vmem:[%s8244_s4] sm:$0xff] }
 0x7bd   :  { %v1756_v21 = vsel %vm72_vm0, %v1748_v16, 0.0  ;;  %1969 = vmatpush.bf16.msra.mxu3 %v4911_v3 }
 0x7be   :  { %1757 = vadd.xlane.f32.xlu0 %v1756_v21 }
 0x7c7   :  { %v1680_v9 = vpop.permute.xlu0 %1679 }
 0x7c8   :  { %v6315_v32 = vadd.f32 %v5276_v15, %v1680_v9 }
 0x7ca   :  { %v1712_v5 = vsel %vm72_vm0, %v6315_v32, 0.0  ;;  %v1749_v59 = vmul.f32 %v6315_v32, %v6315_v32 }
 0x7cb   :  { %1713 = vadd.xlane.f32.xlu2 %v1712_v5 }
 0x7cc   :  { %v1759_v49 = vsel %vm72_vm0, %v1749_v59, 0.0 }
 0x7cd   :  { %1760 = vadd.xlane.f32.xlu1 %v1759_v49 }
 0x7cf   :  { %v1682_v19 = vpop.permute.xlu0 %1681  ;;  %v1684_v1 = vpop.permute.xlu1 %1683 }
 0x7d0   :  { %v6326_v26 = vadd.f32 %v5277_v30, %v1682_v19  ;;  %v6345_v12 = vadd.f32 %v5279_v58, %v1684_v1  ;;  %v1686_v33 = vpop.permute.xlu2 %1685 }
 0x7d1   :  { %v6354_v31 = vadd.f32 %v5280_v13, %v1686_v33 }
 0x7d2   :  { %1691 = vrot.lane.b32.xlu0 %v1668_v63, %s5326_s20  ;;  %v1715_v0 = vsel %vm72_vm0, %v6326_v26, 0.0  ;;  %v1750_v46 = vmul.f32 %v6326_v26, %v6326_v26  ;;  %v1718_v34 = vsel %vm72_vm0, %v6345_v12, 0.0  ;;  %v1751_v10 = vmul.f32 %v6345_v12, %v6345_v12 }
 0x7d3   :  { %v1721_v60 = vsel %vm72_vm0, %v6354_v31, 0.0  ;;  %v1752_v6 = vmul.f32 %v6354_v31, %v6354_v31 }
 0x7d4   :  { %v1762_v52 = vsel %vm72_vm0, %v1750_v46, 0.0  ;;  %v1765_v57 = vsel %vm72_vm0, %v1751_v10, 0.0 }
 0x7d5   :  { %1716 = vadd.xlane.f32.xlu1 %v1715_v0  ;;  %v1768_v20 = vsel %vm72_vm0, %v1752_v6, 0.0 }
 0x7d7   :  { %v1688_v22 = vpop.permute.xlu0 %1687 }
 0x7d8   :  { %v6363_v39 = vadd.f32 %v5281_v48, %v1688_v22  ;;  %v1690_v41 = vpop.permute.xlu2 %1689 }
 0x7d9   :  { %v6373_v35 = vadd.f32 %v5282_v53, %v1690_v41 }
 0x7da   :  { %v1753_v38 = vmul.f32 %v6363_v39, %v6363_v39  ;;  %v1724_v25 = vsel %vm72_vm0, %v6363_v39, 0.0 }
 0x7db   :  { %v1754_v7 = vmul.f32 %v6373_v35, %v6373_v35  ;;  %v1727_v50 = vsel %vm72_vm0, %v6373_v35, 0.0 }
 0x7dc   :  { %v1771_v61 = vsel %vm72_vm0, %v1753_v38, 0.0 }
 0x7dd   :  { %1763 = vadd.xlane.f32.xlu1 %v1762_v52  ;;  %v1774_v54 = vsel %vm72_vm0, %v1754_v7, 0.0 }
 0x7e3   :  { %1918 = vrot.lane.b32.xlu2 %v6340_v4, %s5321_s16 }
 0x7e5   :  { %1719 = vadd.xlane.f32.xlu1 %v1718_v34 }
 0x7ed   :  { %1722 = vadd.xlane.f32.xlu1 %v1721_v60 }
 0x7f5   :  { %1769 = vadd.xlane.f32.xlu1 %v1768_v20 }
 0x7fc   :  { %1766 = vadd.xlane.f32.xlu0 %v1765_v57 }
 0x7fd   :  { %1772 = vadd.xlane.f32.xlu1 %v1771_v61 }
 0x804   :  { %1775 = vadd.xlane.f32.xlu0 %v1774_v54 }
 0x805   :  { %1728 = vadd.xlane.f32.xlu1 %v1727_v50 }
 0x80c   :  { %1725 = vadd.xlane.f32.xlu2 %v1724_v25 }
 0x82f   :  { %v1711_v28 = vpop.xlane.xlu1 %1710 }
 0x830   :  { %v1740_v42 = vmul.f32 %v6384_v18, %v1711_v28 }
 0x831   :  { %v1758_v47 = vpop.xlane.xlu0 %1757 }
 0x832   :  { %v1788_v23 = vmul.f32 %v1740_v42, %v1740_v42  ;;  %v1780_v29 = vmul.f32 %v1758_v47, %v6384_v18  ;;  %v1804_v10 = vsub.f32 %v6304_v56, %v1740_v42 }
 0x834   :  { %v1796_v17 = vsub.f32 %v1780_v29, %v1788_v23 }
 0x836   :  { %v1812_v40 = vadd.f32 1e-05, %v1796_v17 }
 0x838   :  { %5075 = vrsqrt.f32 %v1812_v40  ;;  %vm1826_vm3 = vweird.f32 %v1812_v40 }
 0x83e   :  { %v5076_v27 = vpop.eup %5075  ;;  %v1714_v51 = vpop.xlane.xlu2 %1713 }
 0x83f   :  { %v1821_v16 = vmul.f32 %v5076_v27, %v1812_v40  ;;  %v1741_v21 = vmul.f32 %v6384_v18, %v1714_v51  ;;  %vm1827_vm15 = vweird.f32 %v5076_v27 }
 0x840   :  { %v1761_v55 = vpop.xlane.xlu1 %1760  ;;  %vm1828_vm4 = vmor %vm1826_vm3, %vm1827_vm15 }
 0x841   :  { %v1789_v11 = vmul.f32 %v1741_v21, %v1741_v21  ;;  %v1781_v9 = vmul.f32 %v1761_v55, %v6384_v18  ;;  %v1822_v14 = vmul.f32 %v5076_v27, %v1821_v16  ;;  %v1805_v61 = vsub.f32 %v6315_v32, %v1741_v21 }
 0x843   :  { %v1797_v15 = vsub.f32 %v1781_v9, %v1789_v11  ;;  %v1823_v19 = vmul.f32 0.5, %v1822_v14 }
 0x844   :  { %v1692_v5 = vpop.permute.xlu0 %1691 }
 0x845   :  { %v1813_v59 = vadd.f32 1e-05, %v1797_v15  ;;  %v6399_v49 = vadd.f32 %v5283_v37, %v1692_v5  ;;  %v1824_v0 = vsub.f32 1.5, %v1823_v19 }
 0x846   :  { %v6414_v50 = vpop.permute.xlu2 %1918 }
 0x847   :  { %5077 = vrsqrt.f32 %v1813_v59  ;;  %v1730_v63 = vsel %vm72_vm0, %v6399_v49, 0.0  ;;  %v1755_v46 = vmul.f32 %v6399_v49, %v6399_v49  ;;  %v1825_v1 = vmul.f32 %v5076_v27, %v1824_v0 }
 0x848   :  { %1731 = vadd.xlane.f32.xlu1 %v1730_v63  ;;  %v1717_v30 = vpop.xlane.xlu1 %1716  ;;  %vm1836_vm6 = vweird.f32 %v1813_v59 }
 0x849   :  { %v1777_v34 = vsel %vm72_vm0, %v1755_v46, 0.0  ;;  %v1829_v60 = vsel %vm1828_vm4, %v5076_v27, %v1825_v1  ;;  %v6409_v41 = vmul.f32 %v6384_v18, %v1717_v30 }
 0x84a   :  { %v1901_v48 = vmul.f32 %v6340_v4, %v1829_v60 }
 0x84b   :  { %v1790_v62 = vmul.f32 %v6409_v41, %v6409_v41 }
 0x84c   :  { %v1909_v57 = vmul.f32 %v1901_v48, %v1804_v10  ;;  %v1806_v48 = vsub.f32 %v6326_v26, %v6409_v41 }
 0x84d   :  { %v5078_v52 = vpop.eup %5077 }
 0x84e   :  { %v1831_v58 = vmul.f32 %v5078_v52, %v1813_v59  ;;  %vm1837_vm5 = vweird.f32 %v5078_v52  ;;  %v6419_v45 = vadd.f32 %v6414_v50, %v1909_v57 }
 0x84f   :  { %vm1838_vm7 = vmor %vm1836_vm6, %vm1837_vm5 }
 0x850   :  { %v1832_v33 = vmul.f32 %v5078_v52, %v1831_v58  ;;  %1778 = vadd.xlane.f32.xlu1 %v1777_v34  ;;  %v1764_v13 = vpop.xlane.xlu1 %1763 }
 0x851   :  { %v1782_v54 = vmul.f32 %v1764_v13, %v6384_v18 }
 0x852   :  { %v1833_v6 = vmul.f32 0.5, %v1832_v33 }
 0x853   :  { %v1798_v56 = vsub.f32 %v1782_v54, %v1790_v62 }
 0x854   :  { %v1834_v22 = vsub.f32 1.5, %v1833_v6 }
 0x855   :  { %v1814_v44 = vadd.f32 1e-05, %v1798_v56 }
 0x856   :  { %v1835_v20 = vmul.f32 %v5078_v52, %v1834_v22 }
 0x857   :  { %5079 = vrsqrt.f32 %v1814_v44  ;;  %vm1846_vm9 = vweird.f32 %v1814_v44 }
 0x858   :  { %v1839_v38 = vsel %vm1838_vm7, %v5078_v52, %v1835_v20  ;;  %v1720_v53 = vpop.xlane.xlu1 %1719 }
 0x859   :  { %v1902_v7 = vmul.f32 %v6340_v4, %v1839_v38  ;;  %v1743_v29 = vmul.f32 %v6384_v18, %v1720_v53 }
 0x85b   :  { %v1910_v25 = vmul.f32 %v1902_v7, %v1805_v61  ;;  %v1791_v27 = vmul.f32 %v1743_v29, %v1743_v29  ;;  %v1807_v38 = vsub.f32 %v6345_v12, %v1743_v29 }
 0x85d   :  { %v6422_v43 = vadd.f32 %v6414_v50, %v1910_v25  ;;  %v5080_v47 = vpop.eup %5079 }
 0x85e   :  { %v1841_v40 = vmul.f32 %v5080_v47, %v1814_v44  ;;  %vm1847_vm8 = vweird.f32 %v5080_v47 }
 0x85f   :  { %v1929_v32 = vpack.c.bf16 %v6422_v43, %v6419_v45  ;;  %vm1848_vm10 = vmor %vm1846_vm9, %vm1847_vm8 }
 0x860   :  { %v1723_v24 = vpop.xlane.xlu1 %1722  ;;  %v1842_v16 = vmul.f32 %v5080_v47, %v1841_v40 }
 0x861   :  { %4762 = vmatmul.msk.bf16.vlgmr.msra.gmra.mxu3 %vm72_vm0, %v1929_v32  ;;  %v6428_v8 = vmul.f32 %v6384_v18, %v1723_v24 }
 0x862   :  { %v1843_v11 = vmul.f32 0.5, %v1842_v16 }
 0x863   :  { %v1792_v23 = vmul.f32 %v6428_v8, %v6428_v8 }
 0x864   :  { %v1844_v9 = vsub.f32 1.5, %v1843_v11 }
 0x866   :  { %v1845_v59 = vmul.f32 %v5080_v47, %v1844_v9 }
 0x868   :  { %v1770_v28 = vpop.xlane.xlu1 %1769  ;;  %v1849_v58 = vsel %vm1848_vm10, %v5080_v47, %v1845_v59  ;;  %v1808_v47 = vsub.f32 %v6354_v31, %v6428_v8 }
 0x869   :  { %v1784_v42 = vmul.f32 %v1770_v28, %v6384_v18  ;;  %v1903_v6 = vmul.f32 %v6340_v4, %v1849_v58 }
 0x86b   :  { %v1800_v17 = vsub.f32 %v1784_v42, %v1792_v23  ;;  %v1911_v57 = vmul.f32 %v1903_v6, %v1806_v48 }
 0x86d   :  { %v1816_v3 = vadd.f32 1e-05, %v1800_v17  ;;  %v6443_v54 = vadd.f32 %v6414_v50, %v1911_v57 }
 0x86f   :  { %v1767_v2 = vpop.xlane.xlu0 %1766  ;;  %5081 = vrsqrt.f32 %v1816_v3  ;;  %vm1866_vm15 = vweird.f32 %v1816_v3 }
 0x870   :  { %v1783_v51 = vmul.f32 %v1767_v2, %v6384_v18  ;;  %v1773_v63 = vpop.xlane.xlu1 %1772 }
 0x871   :  { %v1785_v52 = vmul.f32 %v1773_v63, %v6384_v18  ;;  %v6470_v63 = vperm.slane %v6337_v36, 1  ;;  %v4914_v36 = vld [vmem:[%s8245_s5 + $0x8] sm:$0xff] }
 0x872   :  { %v1799_v21 = vsub.f32 %v1783_v51, %v1791_v27 }
 0x873   :  { %2036 = vrot.lane.b32.xlu0 %v6470_v63, %s5326_s20 }
 0x874   :  { %v1815_v55 = vadd.f32 1e-05, %v1799_v21 }
 0x875   :  { %v5082_v14 = vpop.eup %5081 }
 0x876   :  { %5083 = vrsqrt.f32 %v1815_v55  ;;  %v1861_v37 = vmul.f32 %v5082_v14, %v1816_v3  ;;  %vm1856_vm12 = vweird.f32 %v1815_v55  ;;  %vm1867_vm14 = vweird.f32 %v5082_v14 }
 0x877   :  { %vm1868_vm3 = vmor %vm1866_vm15, %vm1867_vm14  ;;  %v1776_v16 = vpop.xlane.xlu0 %1775 }
 0x878   :  { %v1862_v34 = vmul.f32 %v5082_v14, %v1861_v37  ;;  %v1729_v31 = vpop.xlane.xlu1 %1728  ;;  %v1786_v21 = vmul.f32 %v1776_v16, %v6384_v18 }
 0x879   :  { %v1746_v8 = vmul.f32 %v6384_v18, %v1729_v31 }
 0x87a   :  { %v1863_v20 = vmul.f32 0.5, %v1862_v34 }
 0x87b   :  { %v1810_v57 = vsub.f32 %v6373_v35, %v1746_v8 }
 0x87c   :  { %v5084_v15 = vpop.eup %5083  ;;  %v1864_v61 = vsub.f32 1.5, %v1863_v20 }
 0x87d   :  { %v1851_v5 = vmul.f32 %v5084_v15, %v1815_v55  ;;  %vm1857_vm11 = vweird.f32 %v5084_v15 }
 0x87e   :  { %vm1858_vm13 = vmor %vm1856_vm12, %vm1857_vm11  ;;  %v1865_v56 = vmul.f32 %v5082_v14, %v1864_v61 }
 0x87f   :  { %v1852_v19 = vmul.f32 %v5084_v15, %v1851_v5  ;;  %v1726_v30 = vpop.xlane.xlu2 %1725 }
 0x880   :  { %v1745_v0 = vmul.f32 %v6384_v18, %v1726_v30  ;;  %v1869_v24 = vsel %vm1868_vm3, %v5082_v14, %v1865_v56  ;;  %v4916_v30 = vld [vmem:[%s8245_s5 + $0x18] sm:$0xff] }
 0x881   :  { %v1853_v46 = vmul.f32 0.5, %v1852_v19  ;;  %v1905_v28 = vmul.f32 %v6340_v4, %v1869_v24  ;;  %2055 = vmatpush.bf16.msra.mxu2 %v4916_v30 }
 0x882   :  { %v1793_v1 = vmul.f32 %v1745_v0, %v1745_v0  ;;  %v1809_v29 = vsub.f32 %v6363_v39, %v1745_v0  ;;  %v1794_v39 = vmul.f32 %v1746_v8, %v1746_v8 }
 0x883   :  { %v1854_v33 = vsub.f32 1.5, %v1853_v46  ;;  %v1913_v40 = vmul.f32 %v1905_v28, %v1808_v47 }
 0x884   :  { %v1801_v13 = vsub.f32 %v1785_v52, %v1793_v1  ;;  %v1802_v55 = vsub.f32 %v1786_v21, %v1794_v39  ;;  %v4915_v52 = vld [vmem:[%s8245_s5 + $0x10] sm:$0xff] }
 0x885   :  { %v1855_v60 = vmul.f32 %v5084_v15, %v1854_v33  ;;  %v6457_v27 = vadd.f32 %v6414_v50, %v1913_v40  ;;  %2056 = vmatpush.bf16.msra.mxu2 %v4915_v52 }
 0x886   :  { %v1817_v22 = vadd.f32 1e-05, %v1801_v13  ;;  %v1818_v11 = vadd.f32 1e-05, %v1802_v55  ;;  %v4913_v13 = vld [vmem:[%s8245_s5] sm:$0xff] }
 0x887   :  { %v1859_v10 = vsel %vm1858_vm13, %v5084_v15, %v1855_v60 }
 0x888   :  { %5085 = vrsqrt.f32 %v1817_v22  ;;  %v1904_v53 = vmul.f32 %v6340_v4, %v1859_v10  ;;  %vm1876_vm5 = vweird.f32 %v1817_v22  ;;  %vm1886_vm8 = vweird.f32 %v1818_v11 }
 0x889   :  { %5087 = vrsqrt.f32 %v1818_v11  ;;  %2057 = vmatpush.bf16.msra.mxu2 %v4914_v36 }
 0x88a   :  { %v1912_v7 = vmul.f32 %v1904_v53, %v1807_v38 }
 0x88c   :  { %v6446_v25 = vadd.f32 %v6414_v50, %v1912_v7 }
 0x88d   :  { %2058 = vmatpush.bf16.msra.mxu2 %v4913_v13 }
 0x88e   :  { %v5086_v62 = vpop.eup %5085  ;;  %v1930_v41 = vpack.c.bf16 %v6446_v25, %v6443_v54 }
 0x88f   :  { %v1871_v26 = vmul.f32 %v5086_v62, %v1817_v22  ;;  %vm1877_vm4 = vweird.f32 %v5086_v62  ;;  %v5088_v14 = vpop.eup %5087 }
 0x890   :  { %4763 = vmatmul.msk.bf16.gmra.mxu3 %vm72_vm0, %v1930_v41  ;;  %vm1878_vm6 = vmor %vm1876_vm5, %vm1877_vm4  ;;  %v1881_v5 = vmul.f32 %v5088_v14, %v1818_v11  ;;  %vm1887_vm7 = vweird.f32 %v5088_v14 }
 0x891   :  { %v1872_v12 = vmul.f32 %v5086_v62, %v1871_v26  ;;  %vm1888_vm9 = vmor %vm1886_vm8, %vm1887_vm7 }
 0x892   :  { %v1882_v0 = vmul.f32 %v5088_v14, %v1881_v5 }
 0x893   :  { %v1873_v32 = vmul.f32 0.5, %v1872_v12 }
 0x894   :  { %v1883_v58 = vmul.f32 0.5, %v1882_v0 }
 0x895   :  { %v1874_v44 = vsub.f32 1.5, %v1873_v32 }
 0x896   :  { %v1884_v34 = vsub.f32 1.5, %v1883_v58 }
 0x897   :  { %v1875_v42 = vmul.f32 %v5086_v62, %v1874_v44 }
 0x898   :  { %v1885_v60 = vmul.f32 %v5088_v14, %v1884_v34 }
 0x899   :  { %v1879_v23 = vsel %vm1878_vm6, %v5086_v62, %v1875_v42 }
 0x89a   :  { %v1906_v17 = vmul.f32 %v6340_v4, %v1879_v23  ;;  %v1889_v48 = vsel %vm1888_vm9, %v5088_v14, %v1885_v60 }
 0x89b   :  { %v1907_v38 = vmul.f32 %v6340_v4, %v1889_v48 }
 0x89c   :  { %v1914_v2 = vmul.f32 %v1906_v17, %v1809_v29 }
 0x89d   :  { %v1915_v7 = vmul.f32 %v1907_v38, %v1810_v57 }
 0x89e   :  { %v6460_v51 = vadd.f32 %v6414_v50, %v1914_v2 }
 0x89f   :  { %v6491_v41 = vadd.f32 %v6414_v50, %v1915_v7 }
 0x8a0   :  { %v1931_v3 = vpack.c.bf16 %v6460_v51, %v6457_v27 }
 0x8a2   :  { %4764 = vmatmul.msk.bf16.gmra.mxu3 %vm72_vm0, %v1931_v3 }
 0x8bb   :  { %v1732_v9 = vpop.xlane.xlu1 %1731 }
 0x8bc   :  { %v1747_v15 = vmul.f32 %v6384_v18, %v1732_v9 }
 0x8be   :  { %v1795_v37 = vmul.f32 %v1747_v15, %v1747_v15  ;;  %v1811_v62 = vsub.f32 %v6399_v49, %v1747_v15 }
 0x8c3   :  { %v1779_v59 = vpop.xlane.xlu1 %1778 }
 0x8c4   :  { %v1787_v19 = vmul.f32 %v1779_v59, %v6384_v18 }
 0x8c6   :  { %v1803_v46 = vsub.f32 %v1787_v19, %v1795_v37 }
 0x8c8   :  { %v1819_v1 = vadd.f32 1e-05, %v1803_v46 }
 0x8ca   :  { %5089 = vrsqrt.f32 %v1819_v1  ;;  %vm1896_vm11 = vweird.f32 %v1819_v1 }
 0x8d0   :  { %v5090_v33 = vpop.eup %5089 }
 0x8d1   :  { %v1891_v6 = vmul.f32 %v5090_v33, %v1819_v1  ;;  %vm1897_vm10 = vweird.f32 %v5090_v33 }
 0x8d2   :  { %vm1898_vm12 = vmor %vm1896_vm11, %vm1897_vm10 }
 0x8d3   :  { %v1892_v22 = vmul.f32 %v5090_v33, %v1891_v6 }
 0x8d5   :  { %v1893_v20 = vmul.f32 0.5, %v1892_v22 }
 0x8d7   :  { %v1894_v10 = vsub.f32 1.5, %v1893_v20 }
 0x8d9   :  { %v1895_v53 = vmul.f32 %v5090_v33, %v1894_v10 }
 0x8db   :  { %v1899_v61 = vsel %vm1898_vm12, %v5090_v33, %v1895_v53 }
 0x8dc   :  { %v1908_v56 = vmul.f32 %v6340_v4, %v1899_v61 }
 0x8de   :  { %v1916_v26 = vmul.f32 %v1908_v56, %v1811_v62 }
 0x8e0   :  { %v6494_v12 = vadd.f32 %v6414_v50, %v1916_v26 }
 0x8e2   :  { %v1932_v32 = vpack.c.bf16 %v6494_v12, %v6491_v41 }
 0x8e4   :  { %4765 = vmatmul.msk.bf16.gmra.mxu3 %vm72_vm0, %v1932_v32  ;;  %v1971_v35 = vpop.f32.mrf.mxu3 }
 0x8e5   :  { %v1972_v24 = vadd.f32 %v1971_v35, %v6470_v63  ;;  %v6510_v30 = vpop.permute.xlu0 %2036 }
 0x8e7   :  { %v1991_v28 = vmax.f32 %v1972_v24, 0.0 }
 0x8ec   :  { %v1973_v44 = vpop.f32.mrf.mxu3 }
 0x8ed   :  { %v1974_v49 = vadd.f32 %v1973_v44, %v6470_v63 }
 0x8ef   :  { %v1992_v42 = vmax.f32 %v1974_v49, 0.0 }
 0x8f1   :  { %v1999_v47 = vpack.c.bf16 %v1992_v42, %v1991_v28 }
 0x8f3   :  { %4782 = vmatmul.msk.bf16.vlgmr.msra.gmra.mxu2 %vm293_vm2, %v1999_v47 }
 0x913   :  { %v1976_v23 = vpop.f32.mrf.mxu3 }
 0x914   :  { %v1977_v50 = vadd.f32 %v1976_v23, %v6470_v63 }
 0x916   :  { %v1993_v40 = vmax.f32 %v1977_v50, 0.0 }
 0x91b   :  { %v1978_v29 = vpop.f32.mrf.mxu3 }
 0x91c   :  { %v1979_v17 = vadd.f32 %v1978_v29, %v6470_v63 }
 0x91e   :  { %v1994_v2 = vmax.f32 %v1979_v17, 0.0 }
 0x920   :  { %v2000_v3 = vpack.c.bf16 %v1994_v2, %v1993_v40 }
 0x922   :  { %4783 = vmatmul.msk.bf16.gmra.mxu2 %vm293_vm2, %v2000_v3 }
 0x925   :  { %v1981_v31 = vpop.f32.mrf.mxu3 }
 0x926   :  { %v1982_v8 = vadd.f32 %v1981_v31, %v6470_v63 }
 0x928   :  { %v1995_v21 = vmax.f32 %v1982_v8, 0.0 }
 0x92d   :  { %v1983_v16 = vpop.f32.mrf.mxu3 }
 0x92e   :  { %v1984_v39 = vadd.f32 %v1983_v16, %v6470_v63 }
 0x930   :  { %v1996_v55 = vmax.f32 %v1984_v39, 0.0 }
 0x932   :  { %v2001_v11 = vpack.c.bf16 %v1996_v55, %v1995_v21 }
 0x934   :  { %4784 = vmatmul.msk.bf16.gmra.mxu2 %vm293_vm2, %v2001_v11 }
 0x967   :  { %v1986_v9 = vpop.f32.mrf.mxu3 }
 0x968   :  { %v1987_v14 = vadd.f32 %v1986_v9, %v6470_v63 }
 0x96a   :  { %v1997_v59 = vmax.f32 %v1987_v14, 0.0 }
 0x96f   :  { %v1988_v15 = vpop.f32.mrf.mxu3 }
 0x970   :  { %v1989_v5 = vadd.f32 %v1988_v15, %v6470_v63 }
 0x972   :  { %v1998_v37 = vmax.f32 %v1989_v5, 0.0 }
 0x974   :  { %v2002_v19 = vpack.c.bf16 %v1998_v37, %v1997_v59 }
 0x976   :  { %4785 = vmatmul.msk.bf16.gmra.mxu2 %vm293_vm2, %v2002_v19  ;;  %v2060_v0 = vpop.f32.mrf.mxu2 }
 0x977   :  { %v2061_v46 = vadd.f32 %v2060_v0, %v6510_v30 }
 0x979   :  { %v6515_v52 = vadd.f32 %v2061_v46, %v6419_v45 }
 0x97b   :  { %v2088_v1 = vsel %vm72_vm0, %v6515_v52, 0.0  ;;  %v2120_v36 = vmul.f32 %v6515_v52, %v6515_v52 }
 0x97c   :  { %2089 = vadd.xlane.f32.xlu2 %v2088_v1 }
 0x97d   :  { %v2128_v13 = vsel %vm72_vm0, %v2120_v36, 0.0 }
 0x97e   :  { %v2062_v58 = vpop.f32.mrf.mxu2 }
 0x97f   :  { %v2063_v63 = vadd.f32 %v2062_v58, %v6510_v30 }
 0x981   :  { %v6523_v34 = vadd.f32 %v2063_v63, %v6422_v43 }
 0x983   :  { %v2091_v33 = vsel %vm72_vm0, %v6523_v34, 0.0  ;;  %v2121_v45 = vmul.f32 %v6523_v34, %v6523_v34 }
 0x984   :  { %2092 = vadd.xlane.f32.xlu1 %v2091_v33  ;;  %2129 = vadd.xlane.f32.xlu2 %v2128_v13 }
 0x985   :  { %v2131_v60 = vsel %vm72_vm0, %v2121_v45, 0.0 }
 0x98c   :  { %2132 = vadd.xlane.f32.xlu1 %v2131_v60 }
 0x9a5   :  { %v2065_v6 = vpop.f32.mrf.mxu2 }
 0x9a6   :  { %v2066_v22 = vadd.f32 %v2065_v6, %v6510_v30 }
 0x9a8   :  { %v6533_v48 = vadd.f32 %v2066_v22, %v6443_v54 }
 0x9aa   :  { %v2094_v43 = vsel %vm72_vm0, %v6533_v48, 0.0  ;;  %v2122_v20 = vmul.f32 %v6533_v48, %v6533_v48 }
 0x9ab   :  { %2095 = vadd.xlane.f32.xlu2 %v2094_v43 }
 0x9ac   :  { %v2134_v10 = vsel %vm72_vm0, %v2122_v20, 0.0 }
 0x9ad   :  { %v2067_v38 = vpop.f32.mrf.mxu2  ;;  %2135 = vadd.xlane.f32.xlu0 %v2134_v10 }
 0x9ae   :  { %v2068_v53 = vadd.f32 %v2067_v38, %v6510_v30 }
 0x9b0   :  { %v6542_v57 = vadd.f32 %v2068_v53, %v6446_v25 }
 0x9b2   :  { %v2097_v54 = vsel %vm72_vm0, %v6542_v57, 0.0  ;;  %v2123_v61 = vmul.f32 %v6542_v57, %v6542_v57 }
 0x9b3   :  { %2098 = vadd.xlane.f32.xlu1 %v2097_v54 }
 0x9b4   :  { %v2137_v7 = vsel %vm72_vm0, %v2123_v61, 0.0 }
 0x9b5   :  { %2138 = vadd.xlane.f32.xlu2 %v2137_v7 }
 0x9b7   :  { %v2070_v62 = vpop.f32.mrf.mxu2 }
 0x9b8   :  { %v2071_v56 = vadd.f32 %v2070_v62, %v6510_v30 }
 0x9ba   :  { %v6551_v26 = vadd.f32 %v2071_v56, %v6457_v27 }
 0x9bc   :  { %v2100_v25 = vsel %vm72_vm0, %v6551_v26, 0.0  ;;  %v2124_v24 = vmul.f32 %v6551_v26, %v6551_v26 }
 0x9bd   :  { %2101 = vadd.xlane.f32.xlu1 %v2100_v25 }
 0x9be   :  { %v2140_v28 = vsel %vm72_vm0, %v2124_v24, 0.0 }
 0x9bf   :  { %v2072_v32 = vpop.f32.mrf.mxu2 }
 0x9c0   :  { %v2073_v35 = vadd.f32 %v2072_v32, %v6510_v30 }
 0x9c2   :  { %v6559_v44 = vadd.f32 %v2073_v35, %v6460_v51 }
 0x9c4   :  { %v2103_v49 = vsel %vm72_vm0, %v6559_v44, 0.0  ;;  %v2125_v27 = vmul.f32 %v6559_v44, %v6559_v44 }
 0x9c5   :  { %2104 = vadd.xlane.f32.xlu2 %v2103_v49  ;;  %2141 = vadd.xlane.f32.xlu1 %v2140_v28 }
 0x9c6   :  { %v2143_v42 = vsel %vm72_vm0, %v2125_v27, 0.0 }
 0x9cd   :  { %2144 = vadd.xlane.f32.xlu2 %v2143_v42 }
 0x9ef   :  { %v2090_v47 = vpop.xlane.xlu2 %2089 }
 0x9f0   :  { %v6568_v23 = vmul.f32 %v2090_v47, %v6384_v18 }
 0x9f2   :  { %v2160_v29 = vmul.f32 %v6568_v23, %v6568_v23 }
 0x9f7   :  { %v2093_v50 = vpop.xlane.xlu1 %2092  ;;  %v2130_v51 = vpop.xlane.xlu2 %2129 }
 0x9f8   :  { %v2152_v17 = vmul.f32 %v2130_v51, %v6384_v18  ;;  %v6575_v31 = vmul.f32 %v2093_v50, %v6384_v18 }
 0x9f9   :  { %v2075_v40 = vpop.f32.mrf.mxu2 }
 0x9fa   :  { %v2168_v2 = vsub.f32 %v2152_v17, %v2160_v29  ;;  %v2076_v3 = vadd.f32 %v2075_v40, %v6510_v30  ;;  %v2161_v55 = vmul.f32 %v6575_v31, %v6575_v31 }
 0x9fc   :  { %v2184_v8 = vadd.f32 1e-05, %v2168_v2  ;;  %v6578_v16 = vadd.f32 %v2076_v3, %v6491_v41 }
 0x9fe   :  { %5091 = vrsqrt.f32 %v2184_v8  ;;  %v2106_v39 = vsel %vm72_vm0, %v6578_v16, 0.0  ;;  %v2126_v5 = vmul.f32 %v6578_v16, %v6578_v16  ;;  %vm2198_vm4 = vweird.f32 %v2184_v8 }
 0x9ff   :  { %2107 = vadd.xlane.f32.xlu1 %v2106_v39  ;;  %v2133_v21 = vpop.xlane.xlu1 %2132 }
 0xa00   :  { %v2153_v11 = vmul.f32 %v2133_v21, %v6384_v18  ;;  %v2146_v0 = vsel %vm72_vm0, %v2126_v5, 0.0 }
 0xa01   :  { %v2077_v9 = vpop.f32.mrf.mxu2 }
 0xa02   :  { %v2169_v14 = vsub.f32 %v2153_v11, %v2161_v55  ;;  %v2078_v15 = vadd.f32 %v2077_v9, %v6510_v30 }
 0xa04   :  { %v5092_v41 = vpop.eup %5091  ;;  %v2185_v59 = vadd.f32 1e-05, %v2169_v14  ;;  %v6589_v37 = vadd.f32 %v2078_v15, %v6494_v12 }
 0xa05   :  { %v2193_v46 = vmul.f32 %v5092_v41, %v2184_v8  ;;  %vm2199_vm3 = vweird.f32 %v5092_v41 }
 0xa06   :  { %5093 = vrsqrt.f32 %v2185_v59  ;;  %v2109_v19 = vsel %vm72_vm0, %v6589_v37, 0.0  ;;  %v2127_v30 = vmul.f32 %v6589_v37, %v6589_v37  ;;  %vm2208_vm14 = vweird.f32 %v2185_v59  ;;  %vm2200_vm5 = vmor %vm2198_vm4, %vm2199_vm3 }
 0xa07   :  { %2110 = vadd.xlane.f32.xlu2 %v2109_v19  ;;  %2147 = vadd.xlane.f32.xlu1 %v2146_v0  ;;  %v2194_v1 = vmul.f32 %v5092_v41, %v2193_v46 }
 0xa08   :  { %v2149_v36 = vsel %vm72_vm0, %v2127_v30, 0.0 }
 0xa09   :  { %v2195_v33 = vmul.f32 0.5, %v2194_v1 }
 0xa0b   :  { %v2196_v45 = vsub.f32 1.5, %v2195_v33 }
 0xa0c   :  { %v5094_v58 = vpop.eup %5093 }
 0xa0d   :  { %v2203_v63 = vmul.f32 %v5094_v58, %v2185_v59  ;;  %vm2209_vm13 = vweird.f32 %v5094_v58  ;;  %v2197_v43 = vmul.f32 %v5092_v41, %v2196_v45 }
 0xa0e   :  { %vm2210_vm15 = vmor %vm2208_vm14, %vm2209_vm13 }
 0xa0f   :  { %v2204_v12 = vmul.f32 %v5094_v58, %v2203_v63  ;;  %2150 = vadd.xlane.f32.xlu2 %v2149_v36  ;;  %v2201_v10 = vsel %vm2200_vm5, %v5092_v41, %v2197_v43 }
 0xa10   :  { %v2272_v38 = vmul.f32 %v2201_v10, %v6340_v4 }
 0xa11   :  { %v2205_v13 = vmul.f32 0.5, %v2204_v12 }
 0xa13   :  { %v2206_v60 = vsub.f32 1.5, %v2205_v13 }
 0xa15   :  { %v2207_v6 = vmul.f32 %v5094_v58, %v2206_v60 }
 0xa17   :  { %v2211_v22 = vsel %vm2210_vm15, %v5094_v58, %v2207_v6 }
 0xa18   :  { %v2273_v20 = vmul.f32 %v2211_v22, %v6340_v4 }
 0xa1a   :  { %2290 = vrot.lane.b32.xlu0 %v2273_v20, %s5326_s20 }
 0xa1e   :  { %v2096_v53 = vpop.xlane.xlu2 %2095 }
 0xa1f   :  { %v6601_v54 = vmul.f32 %v2096_v53, %v6384_v18 }
 0xa20   :  { %2288 = vrot.lane.b32.xlu1 %v2272_v38, %s5326_s20  ;;  %v2136_v61 = vpop.xlane.xlu0 %2135 }
 0xa21   :  { %v2162_v7 = vmul.f32 %v6601_v54, %v6601_v54  ;;  %v2154_v62 = vmul.f32 %v2136_v61, %v6384_v18 }
 0xa23   :  { %v2170_v56 = vsub.f32 %v2154_v62, %v2162_v7 }
 0xa25   :  { %v2186_v25 = vadd.f32 1e-05, %v2170_v56 }
 0xa26   :  { %v2099_v32 = vpop.xlane.xlu1 %2098 }
 0xa27   :  { %2320 = vrot.lane.b32.xlu2 %v6340_v4, %s5327_s13  ;;  %5095 = vrsqrt.f32 %v2186_v25  ;;  %v6610_v35 = vmul.f32 %v2099_v32, %v6384_v18  ;;  %vm2218_vm7 = vweird.f32 %v2186_v25 }
 0xa28   :  { %v2139_v24 = vpop.xlane.xlu2 %2138 }
 0xa29   :  { %v2163_v49 = vmul.f32 %v6610_v35, %v6610_v35  ;;  %v2155_v28 = vmul.f32 %v2139_v24, %v6384_v18 }
 0xa2b   :  { %v2171_v27 = vsub.f32 %v2155_v28, %v2163_v49  ;;  %v4918_v49 = vld [vmem:[%s8242_s2 + $0x18] sm:$0xff] }
 0xa2c   :  { %v4920_v28 = vld [vmem:[%s8243_s3 + $0x18] sm:$0xff]  ;;  %2373 = vmatpush.bf16.msrb.mxu0 %v4918_v49 }
 0xa2d   :  { %v5096_v42 = vpop.eup %5095  ;;  %v2187_v47 = vadd.f32 1e-05, %v2171_v27  ;;  %2443 = vmatpush.bf16.msra.mxu1 %v4920_v28 }
 0xa2e   :  { %v2213_v50 = vmul.f32 %v5096_v42, %v2186_v25  ;;  %vm2219_vm6 = vweird.f32 %v5096_v42 }
 0xa2f   :  { %5097 = vrsqrt.f32 %v2187_v47  ;;  %vm2220_vm8 = vmor %vm2218_vm7, %vm2219_vm6  ;;  %vm2228_vm10 = vweird.f32 %v2187_v47 }
 0xa30   :  { %v2102_v51 = vpop.xlane.xlu1 %2101  ;;  %v2214_v29 = vmul.f32 %v5096_v42, %v2213_v50 }
 0xa31   :  { %v6616_v2 = vmul.f32 %v2102_v51, %v6384_v18 }
 0xa32   :  { %v2215_v17 = vmul.f32 0.5, %v2214_v29 }
 0xa33   :  { %v2164_v9 = vmul.f32 %v6616_v2, %v6616_v2 }
 0xa34   :  { %v2216_v40 = vsub.f32 1.5, %v2215_v17 }
 0xa35   :  { %v5098_v3 = vpop.eup %5097 }
 0xa36   :  { %v2223_v8 = vmul.f32 %v5098_v3, %v2187_v47  ;;  %v2217_v39 = vmul.f32 %v5096_v42, %v2216_v40  ;;  %vm2229_vm9 = vweird.f32 %v5098_v3  ;;  %v4919_v47 = vld [vmem:[%s8243_s3 + $0x10] sm:$0xff] }
 0xa37   :  { %vm2230_vm11 = vmor %vm2228_vm10, %vm2229_vm9  ;;  %2444 = vmatpush.bf16.msra.mxu1 %v4919_v47 }
 0xa38   :  { %v2142_v21 = vpop.xlane.xlu1 %2141  ;;  %v2105_v55 = vpop.xlane.xlu2 %2104  ;;  %v2224_v11 = vmul.f32 %v5098_v3, %v2223_v8  ;;  %v2221_v15 = vsel %vm2220_vm8, %v5096_v42, %v2217_v39  ;;  %v4917_v42 = vld [vmem:[%s8242_s2 + $0x10] sm:$0xff] }
 0xa39   :  { %v2156_v14 = vmul.f32 %v2142_v21, %v6384_v18  ;;  %v2274_v5 = vmul.f32 %v2221_v15, %v6340_v4  ;;  %v6624_v46 = vmul.f32 %v2105_v55, %v6384_v18  ;;  %2374 = vmatpush.bf16.msrb.mxu0 %v4917_v42 }
 0xa3a   :  { %v2225_v41 = vmul.f32 0.5, %v2224_v11 }
 0xa3b   :  { %v2172_v59 = vsub.f32 %v2156_v14, %v2164_v9  ;;  %2292 = vrot.lane.b32.xlu0 %v2274_v5, %s5326_s20  ;;  %v2165_v58 = vmul.f32 %v6624_v46, %v6624_v46 }
 0xa3c   :  { %v2226_v19 = vsub.f32 1.5, %v2225_v41 }
 0xa3d   :  { %v2188_v0 = vadd.f32 1e-05, %v2172_v59 }
 0xa3e   :  { %v2227_v30 = vmul.f32 %v5098_v3, %v2226_v19 }
 0xa3f   :  { %5099 = vrsqrt.f32 %v2188_v0  ;;  %vm2238_vm13 = vweird.f32 %v2188_v0 }
 0xa40   :  { %v2145_v1 = vpop.xlane.xlu2 %2144  ;;  %v2231_v36 = vsel %vm2230_vm11, %v5098_v3, %v2227_v30 }
 0xa41   :  { %v2157_v63 = vmul.f32 %v2145_v1, %v6384_v18  ;;  %v2275_v33 = vmul.f32 %v2231_v36, %v6340_v4  ;;  %v2177_v1 = vsub.f32 %v6523_v34, %v6575_v31 }
 0xa43   :  { %v2173_v12 = vsub.f32 %v2157_v63, %v2165_v58  ;;  %2294 = vrot.lane.b32.xlu1 %v2275_v33, %s5326_s20  ;;  %v2176_v33 = vsub.f32 %v6515_v52, %v6568_v23 }
 0xa45   :  { %v5100_v13 = vpop.eup %5099  ;;  %v2189_v45 = vadd.f32 1e-05, %v2173_v12 }
 0xa46   :  { %v2233_v60 = vmul.f32 %v5100_v13, %v2188_v0  ;;  %vm2239_vm12 = vweird.f32 %v5100_v13 }
 0xa47   :  { %5101 = vrsqrt.f32 %v2189_v45  ;;  %vm2240_vm14 = vmor %vm2238_vm13, %vm2239_vm12  ;;  %vm2248_vm3 = vweird.f32 %v2189_v45 }
 0xa48   :  { %v2234_v6 = vmul.f32 %v5100_v13, %v2233_v60 }
 0xa4a   :  { %v2235_v22 = vmul.f32 0.5, %v2234_v6 }
 0xa4c   :  { %v2236_v43 = vsub.f32 1.5, %v2235_v22 }
 0xa4d   :  { %v5102_v20 = vpop.eup %5101 }
 0xa4e   :  { %v2243_v10 = vmul.f32 %v5102_v20, %v2189_v45  ;;  %v2237_v38 = vmul.f32 %v5100_v13, %v2236_v43  ;;  %vm2249_vm15 = vweird.f32 %v5102_v20 }
 0xa4f   :  { %vm2250_vm4 = vmor %vm2248_vm3, %vm2249_vm15 }
 0xa50   :  { %v2244_v53 = vmul.f32 %v5102_v20, %v2243_v10  ;;  %v2241_v61 = vsel %vm2240_vm14, %v5100_v13, %v2237_v38 }
 0xa51   :  { %v2276_v7 = vmul.f32 %v2241_v61, %v6340_v4  ;;  %v2178_v61 = vsub.f32 %v6533_v48, %v6601_v54  ;;  %v2180_v48 = vsub.f32 %v6551_v26, %v6616_v2 }
 0xa52   :  { %v2245_v62 = vmul.f32 0.5, %v2244_v53 }
 0xa53   :  { %2296 = vrot.lane.b32.xlu2 %v2276_v7, %s5326_s20 }
 0xa54   :  { %v2246_v56 = vsub.f32 1.5, %v2245_v62  ;;  %v2179_v62 = vsub.f32 %v6542_v57, %v6610_v35  ;;  %v2181_v57 = vsub.f32 %v6559_v44, %v6624_v46 }
 0xa56   :  { %v2247_v25 = vmul.f32 %v5102_v20, %v2246_v56 }
 0xa58   :  { %v2251_v32 = vsel %vm2250_vm4, %v5102_v20, %v2247_v25 }
 0xa59   :  { %v2277_v24 = vmul.f32 %v2251_v32, %v6340_v4 }
 0xa5b   :  { %2298 = vrot.lane.b32.xlu0 %v2277_v24, %s5326_s20 }
 0xa72   :  { %v2108_v27 = vpop.xlane.xlu1 %2107 }
 0xa73   :  { %v6648_v50 = vmul.f32 %v2108_v27, %v6384_v18 }
 0xa75   :  { %v2166_v17 = vmul.f32 %v6648_v50, %v6648_v50  ;;  %v2182_v44 = vsub.f32 %v6578_v16, %v6648_v50 }
 0xa7a   :  { %v2148_v51 = vpop.xlane.xlu1 %2147  ;;  %v2111_v29 = vpop.xlane.xlu2 %2110 }
 0xa7b   :  { %v2158_v40 = vmul.f32 %v2148_v51, %v6384_v18  ;;  %v6654_v39 = vmul.f32 %v2111_v29, %v6384_v18 }
 0xa7d   :  { %v2174_v3 = vsub.f32 %v2158_v40, %v2166_v17  ;;  %v2167_v55 = vmul.f32 %v6654_v39, %v6654_v39  ;;  %v2183_v26 = vsub.f32 %v6589_v37, %v6654_v39  ;;  %v4786_v37 = vld [vmem:[%s8246_s6 + $0x4] sm:$0x7] }
 0xa7f   :  { %v2190_v8 = vadd.f32 1e-05, %v2174_v3 }
 0xa81   :  { %5103 = vrsqrt.f32 %v2190_v8  ;;  %vm2258_vm6 = vweird.f32 %v2190_v8 }
 0xa82   :  { %v2151_v21 = vpop.xlane.xlu2 %2150 }
 0xa83   :  { %v2159_v11 = vmul.f32 %v2151_v21, %v6384_v18 }
 0xa85   :  { %v2175_v9 = vsub.f32 %v2159_v11, %v2167_v55 }
 0xa87   :  { %v5104_v14 = vpop.eup %5103  ;;  %v2191_v15 = vadd.f32 1e-05, %v2175_v9 }
 0xa88   :  { %v2253_v5 = vmul.f32 %v5104_v14, %v2190_v8  ;;  %vm2259_vm5 = vweird.f32 %v5104_v14  ;;  %v6714_v8 = vperm.slane %v4786_v37, 0 }
 0xa89   :  { %5105 = vrsqrt.f32 %v2191_v15  ;;  %vm2260_vm7 = vmor %vm2258_vm6, %vm2259_vm5  ;;  %vm2268_vm9 = vweird.f32 %v2191_v15 }
 0xa8a   :  { %v2254_v41 = vmul.f32 %v5104_v14, %v2253_v5  ;;  %v2321_v13 = vpop.permute.xlu2 %2320  ;;  %8291 = vst [vmem:[#allocation14_spill] sm:$0xff] %v6714_v8 }
 0xa8c   :  { %v2255_v59 = vmul.f32 0.5, %v2254_v41  ;;  %v2291_v0 = vpop.permute.xlu0 %2290 }
 0xa8d   :  { %v2313_v36 = vmul.f32 %v2291_v0, %v2177_v1 }
 0xa8e   :  { %v2256_v19 = vsub.f32 1.5, %v2255_v59 }
 0xa8f   :  { %v5106_v30 = vpop.eup %5105  ;;  %v6666_v10 = vadd.f32 %v2321_v13, %v2313_v36 }
 0xa90   :  { %v2263_v58 = vmul.f32 %v5106_v30, %v2191_v15  ;;  %v2257_v63 = vmul.f32 %v5104_v14, %v2256_v19  ;;  %vm2269_vm8 = vweird.f32 %v5106_v30 }
 0xa91   :  { %8284 = vst [vmem:[#allocation7_spill] sm:$0xff] %v6666_v10  ;;  %vm2270_vm10 = vmor %vm2268_vm9, %vm2269_vm8 }
 0xa92   :  { %v2264_v12 = vmul.f32 %v5106_v30, %v2263_v58  ;;  %v2289_v45 = vpop.permute.xlu1 %2288  ;;  %v2261_v60 = vsel %vm2260_vm7, %v5104_v14, %v2257_v63 }
 0xa93   :  { %v2312_v6 = vmul.f32 %v2289_v45, %v2176_v33  ;;  %v2278_v22 = vmul.f32 %v2261_v60, %v6340_v4 }
 0xa94   :  { %v2265_v43 = vmul.f32 0.5, %v2264_v12 }
 0xa95   :  { %v6664_v20 = vadd.f32 %v2321_v13, %v2312_v6  ;;  %2300 = vrot.lane.b32.xlu1 %v2278_v22, %s5326_s20 }
 0xa96   :  { %v2266_v34 = vsub.f32 1.5, %v2265_v43 }
 0xa97   :  { %8283 = vst [vmem:[#allocation6_spill] sm:$0xff] %v6664_v20  ;;  %v2333_v31 = vpack.c.bf16 %v6666_v10, %v6664_v20 }
 0xa98   :  { %v2267_v52 = vmul.f32 %v5106_v30, %v2266_v34 }
 0xa99   :  { %4799 = vmatmul.msk.bf16.vlgmr.msrb.gmra.mxu0 %vm72_vm0, %v2333_v31  ;;  %4815 = vmatmul.msk.bf16.vlgmr.msra.gmra.mxu1 %vm72_vm0, %v2333_v31 }
 0xa9a   :  { %v2271_v23 = vsel %vm2270_vm10, %v5106_v30, %v2267_v52 }
 0xa9b   :  { %v2279_v38 = vmul.f32 %v2271_v23, %v6340_v4 }
 0xa9d   :  { %2302 = vrot.lane.b32.xlu2 %v2279_v38, %s5326_s20 }
 0xaad   :  { %v2293_v53 = vpop.permute.xlu0 %2292  ;;  %v2297_v4 = vpop.permute.xlu2 %2296 }
 0xaae   :  { %v2314_v7 = vmul.f32 %v2293_v53, %v2178_v61  ;;  %v2316_v54 = vmul.f32 %v2297_v4, %v2180_v48 }
 0xab0   :  { %v6679_v32 = vadd.f32 %v2321_v13, %v2314_v7  ;;  %v6691_v27 = vadd.f32 %v2321_v13, %v2316_v54 }
 0xab2   :  { %8285 = vst [vmem:[#allocation8_spill] sm:$0xff] %v6679_v32 }
 0xab3   :  { %8287 = vst [vmem:[#allocation10_spill] sm:$0xff] %v6691_v27 }
 0xab5   :  { %v2295_v56 = vpop.permute.xlu1 %2294 }
 0xab6   :  { %v2315_v25 = vmul.f32 %v2295_v56, %v2179_v62 }
 0xab8   :  { %v6681_v24 = vadd.f32 %v2321_v13, %v2315_v25 }
 0xaba   :  { %8286 = vst [vmem:[#allocation9_spill] sm:$0xff] %v6681_v24  ;;  %v2334_v49 = vpack.c.bf16 %v6681_v24, %v6679_v32 }
 0xabc   :  { %4800 = vmatmul.msk.bf16.gmra.mxu0 %vm72_vm0, %v2334_v49  ;;  %4816 = vmatmul.msk.bf16.gmra.mxu1 %vm72_vm0, %v2334_v49 }
 0xacd   :  { %v2299_v35 = vpop.permute.xlu0 %2298 }
 0xace   :  { %v2317_v28 = vmul.f32 %v2299_v35, %v2181_v57 }
 0xad0   :  { %v6693_v42 = vadd.f32 %v2321_v13, %v2317_v28 }
 0xad2   :  { %8288 = vst [vmem:[#allocation11_spill] sm:$0xff] %v6693_v42  ;;  %v2335_v47 = vpack.c.bf16 %v6693_v42, %v6691_v27 }
 0xad4   :  { %4801 = vmatmul.msk.bf16.gmra.mxu0 %vm72_vm0, %v2335_v47  ;;  %4817 = vmatmul.msk.bf16.gmra.mxu1 %vm72_vm0, %v2335_v47 }
 0xaf7   :  { %v2303_v51 = vpop.permute.xlu2 %2302 }
 0xaf8   :  { %v2319_v2 = vmul.f32 %v2303_v51, %v2183_v26 }
 0xafa   :  { %v6703_v17 = vadd.f32 %v2321_v13, %v2319_v2 }
 0xafc   :  { %8289 = vst [vmem:[#allocation12_spill] sm:$0xff] %v6703_v17 }
 0xb07   :  { %v2301_v46 = vpop.permute.xlu1 %2300 }
 0xb08   :  { %v2318_v29 = vmul.f32 %v2301_v46, %v2182_v44 }
 0xb0a   :  { %v6705_v40 = vadd.f32 %v2321_v13, %v2318_v29 }
 0xb0c   :  { %8290 = vst [vmem:[#allocation13_spill] sm:$0xff] %v6705_v40  ;;  %v2336_v3 = vpack.c.bf16 %v6703_v17, %v6705_v40 }
 0xb0e   :  { %4802 = vmatmul.msk.bf16.gmra.mxu0 %vm72_vm0, %v2336_v3  ;;  %4818 = vmatmul.msk.bf16.gmra.mxu1 %vm72_vm0, %v2336_v3 }
 0xb16   :  { %v2376_v16 = vpop.f32.mrf.mxu0  ;;  %v6724_v33 = vpop.f32.mrf.mxu1 }
 0xb17   :  { %v2377_v50 = vadd.f32 %v2376_v16, %v6714_v8 }
 0xb19   :  { %v2396_v39 = vmul.f32 0.35355338, %v2377_v50  ;;  %v2412_v55 = vpack.c.bf16 %v2377_v50, %v2377_v50 }
 0xb1b   :  { %v2404_v9 = vpack.c.bf16 %v2396_v39, %v2396_v39  ;;  %v2502_v5 = vunpack.c.l.b16 %v2412_v55 }
 0xb1d   :  { %v2482_v19 = vunpack.c.l.b16 %v2404_v9 }
 0xb1e   :  { %v2378_v21 = vpop.f32.mrf.mxu0  ;;  %v6728_v34 = vpop.f32.mrf.mxu1 }
 0xb1f   :  { %v2379_v11 = vadd.f32 %v2378_v21, %v6714_v8 }
 0xb21   :  { %v2397_v14 = vmul.f32 0.35355338, %v2379_v11  ;;  %v2413_v15 = vpack.c.bf16 %v2379_v11, %v2379_v11 }
 0xb23   :  { %v2405_v41 = vpack.c.bf16 %v2397_v14, %v2397_v14  ;;  %v2503_v59 = vunpack.c.l.b16 %v2413_v15 }
 0xb25   :  { %v2483_v0 = vunpack.c.l.b16 %v2405_v41  ;;  %v6718_v30 = vpack.c.b16 %v2503_v59, %v2502_v5 }
 0xb27   :  { %v6720_v1 = vpack.c.b16 %v2483_v0, %v2482_v19  ;;  %2514 = vrot.lane.b32.xlu2 %v6718_v30, %s5321_s16 }
 0xb39   :  { %v2381_v58 = vpop.f32.mrf.mxu0  ;;  %v6734_v52 = vpop.f32.mrf.mxu1 }
 0xb3a   :  { %v6742_v61 = vadd.f32 %v2381_v58, %v6714_v8 }
 0xb3c   :  { %v2398_v62 = vmul.f32 0.35355338, %v6742_v61 }
 0xb3e   :  { %v2406_v25 = vpack.c.bf16 %v2398_v62, %v2398_v62 }
 0xb40   :  { %v2484_v54 = vunpack.c.l.b16 %v2406_v25 }
 0xb41   :  { %v2383_v63 = vpop.f32.mrf.mxu0  ;;  %v2453_v23 = vpop.f32.mrf.mxu1 }
 0xb42   :  { %v2384_v38 = vadd.f32 %v2383_v63, %v6714_v8  ;;  %v2469_v19 = vpack.c.bf16 %v2453_v23, %v2453_v23  ;;  %v2467_v23 = vpack.c.bf16 %v6728_v34, %v6728_v34 }
 0xb44   :  { %v2399_v7 = vmul.f32 0.35355338, %v2384_v38  ;;  %v2780_v34 = vunpack.c.l.b16 %v2467_v23 }
 0xb46   :  { %v2407_v56 = vpack.c.bf16 %v2399_v7, %v2399_v7  ;;  %v2782_v7 = vunpack.c.l.b16 %v2469_v19 }
 0xb48   :  { %v2485_v4 = vunpack.c.l.b16 %v2407_v56 }
 0xb4a   :  { %v6749_v35 = vpack.c.b16 %v2485_v4, %v2484_v54 }
 0xb51   :  { %v2386_v36 = vpop.f32.mrf.mxu0  ;;  %v2456_v53 = vpop.f32.mrf.mxu1 }
 0xb52   :  { %v2387_v12 = vadd.f32 %v2386_v36, %v6714_v8  ;;  %v2470_v9 = vpack.c.bf16 %v2456_v53, %v2456_v53  ;;  %v2414_v53 = vpack.c.bf16 %v6742_v61, %v6742_v61 }
 0xb54   :  { %v2416_v45 = vpack.c.bf16 %v2387_v12, %v2387_v12  ;;  %v2400_v57 = vmul.f32 0.35355338, %v2387_v12 }
 0xb56   :  { %v2506_v22 = vunpack.c.l.b16 %v2416_v45  ;;  %v2408_v47 = vpack.c.bf16 %v2400_v57, %v2400_v57  ;;  %v2415_v45 = vpack.c.bf16 %v2384_v38, %v2384_v38  ;;  %v2466_v38 = vpack.c.bf16 %v6724_v33, %v6724_v33 }
 0xb58   :  { %v2486_v44 = vunpack.c.l.b16 %v2408_v47  ;;  %v2505_v25 = vunpack.c.l.b16 %v2415_v45  ;;  %v2779_v61 = vunpack.c.l.b16 %v2466_v38 }
 0xb59   :  { %v2388_v13 = vpop.f32.mrf.mxu0  ;;  %v2458_v49 = vpop.f32.mrf.mxu1 }
 0xb5a   :  { %v2389_v60 = vadd.f32 %v2388_v13, %v6714_v8  ;;  %v2471_v16 = vpack.c.bf16 %v2458_v49, %v2458_v49  ;;  %v2468_v13 = vpack.c.bf16 %v6734_v52, %v6734_v52  ;;  %v2504_v49 = vunpack.c.l.b16 %v2414_v53 }
 0xb5b   :  { %v6783_v54 = vpack.c.b16 %v2780_v34, %v2779_v61 }
 0xb5c   :  { %v2417_v6 = vpack.c.bf16 %v2389_v60, %v2389_v60  ;;  %v2401_v48 = vmul.f32 0.35355338, %v2389_v60  ;;  %v2784_v0 = vunpack.c.l.b16 %v2471_v16  ;;  %v2783_v60 = vunpack.c.l.b16 %v2470_v9 }
 0xb5d   :  { %v2781_v56 = vunpack.c.l.b16 %v2468_v13 }
 0xb5e   :  { %v2507_v43 = vunpack.c.l.b16 %v2417_v6  ;;  %v2409_v28 = vpack.c.bf16 %v2401_v48, %v2401_v48  ;;  %v6770_v62 = vpack.c.b16 %v2784_v0, %v2783_v60  ;;  %v2511_v48 = vpack.c.b16 %v2505_v25, %v2504_v49 }
 0xb5f   :  { %v6779_v4 = vpack.c.b16 %v2782_v7, %v2781_v56 }
 0xb60   :  { %v6730_v31 = vpack.c.b16 %v2507_v43, %v2506_v22  ;;  %v2487_v2 = vunpack.c.l.b16 %v2409_v28 }
 0xb62   :  { %2518 = vrot.lane.b32.xlu1 %v6730_v31, %s5321_s16  ;;  %v6754_v29 = vpack.c.b16 %v2487_v2, %v2486_v44 }
 0xb6a   :  { %2888 = vrot.lane.b32.xlu1 %v6730_v31, %s5319_s14 }
 0xb72   :  { %2884 = vrot.lane.b32.xlu1 %v6718_v30, %s5319_s14 }
 0xb7a   :  { %3242 = vrot.lane.b32.xlu1 %v6718_v30, %s5322_s17 }
 0xb81   :  { %v2515_v28 = vpop.permute.xlu2 %2514 }
 0xb82   :  { %3234 = vrot.lane.b32.xlu1 %v6720_v1, %s5324_s18 }
 0xb8a   :  { %3236 = vrot.lane.b32.xlu1 %v6749_v35, %s5324_s18 }
 0xb8b   :  { %v2391_v51 = vpop.f32.mrf.mxu0  ;;  %v2461_v26 = vpop.f32.mrf.mxu1 }
 0xb8c   :  { %v2392_v46 = vadd.f32 %v2391_v51, %v6714_v8  ;;  %v2472_v3 = vpack.c.bf16 %v2461_v26, %v2461_v26 }
 0xb8e   :  { %v2402_v37 = vmul.f32 0.35355338, %v2392_v46  ;;  %v2418_v21 = vpack.c.bf16 %v2392_v46, %v2392_v46  ;;  %v2785_v14 = vunpack.c.l.b16 %v2472_v3 }
 0xb90   :  { %v2410_v15 = vpack.c.bf16 %v2402_v37, %v2402_v37  ;;  %v2508_v58 = vunpack.c.l.b16 %v2418_v21 }
 0xb92   :  { %3596 = vrot.lane.b32.xlu1 %v6754_v29, %s5325_s19  ;;  %v2488_v6 = vunpack.c.l.b16 %v2410_v15 }
 0xb93   :  { %v2393_v50 = vpop.f32.mrf.mxu0  ;;  %v2463_v39 = vpop.f32.mrf.mxu1 }
 0xb94   :  { %v2394_v55 = vadd.f32 %v2393_v50, %v6714_v8  ;;  %v2473_v11 = vpack.c.bf16 %v2463_v39, %v2463_v39 }
 0xb96   :  { %v2403_v5 = vmul.f32 0.35355338, %v2394_v55  ;;  %v2419_v41 = vpack.c.bf16 %v2394_v55, %v2394_v55  ;;  %v2786_v59 = vunpack.c.l.b16 %v2473_v11 }
 0xb98   :  { %v2411_v63 = vpack.c.bf16 %v2403_v5, %v2403_v5  ;;  %v2509_v36 = vunpack.c.l.b16 %v2419_v41  ;;  %v6759_v12 = vpack.c.b16 %v2786_v59, %v2785_v14 }
 0xb9a   :  { %v2489_v22 = vunpack.c.l.b16 %v2411_v63  ;;  %v2513_v43 = vpack.c.b16 %v2509_v36, %v2508_v58  ;;  %2811 = vmatpush.bf16.msrb.mxu2 %v6759_v12  ;;  %3505 = vrot.lane.b32.xlu1 %v6759_v12, %s5326_s20  ;;  %v2535_v63 = vsel %vm239_vm1, %v2515_v28, 0 }
 0xb9c   :  { %v6772_v52 = vpack.c.b16 %v2489_v22, %v2488_v6  ;;  %2890 = vrot.lane.b32.xlu2 %v2513_v43, %s5319_s14  ;;  %2520 = vrot.lane.b32.xlu0 %v2513_v43, %s5321_s16 }
 0xb9e   :  { %2812 = vmatpush.bf16.msrb.mxu2 %v6770_v62 }
 0xba2   :  { %2813 = vmatpush.bf16.msrb.mxu2 %v6779_v4  ;;  %3248 = vrot.lane.b32.xlu1 %v2513_v43, %s5322_s17 }
 0xba4   :  { %2876 = vrot.lane.b32.xlu2 %v6720_v1, %s5320_s15  ;;  %2516 = vrot.lane.b32.xlu0 %v2511_v48, %s5321_s16 }
 0xba6   :  { %2814 = vmatpush.bf16.msrb.mxu2 %v6783_v54 }
 0xbaa   :  { %3606 = vrot.lane.b32.xlu1 %v2513_v43, %s5323_s30 }
 0xbac   :  { %3246 = vrot.lane.b32.xlu2 %v6730_v31, %s5322_s17  ;;  %2886 = vrot.lane.b32.xlu0 %v2511_v48, %s5319_s14 }
 0xbb4   :  { %3244 = vrot.lane.b32.xlu2 %v2511_v48, %s5322_s17  ;;  %2878 = vrot.lane.b32.xlu0 %v6749_v35, %s5320_s15 }
 0xbbc   :  { %3600 = vrot.lane.b32.xlu2 %v6718_v30, %s5323_s30  ;;  %2880 = vrot.lane.b32.xlu0 %v6754_v29, %s5320_s15 }
 0xbc4   :  { %3594 = vrot.lane.b32.xlu2 %v6749_v35, %s5325_s19  ;;  %3604 = vrot.lane.b32.xlu0 %v6730_v31, %s5323_s30 }
 0xbcc   :  { %3147 = vrot.lane.b32.xlu2 %v6759_v12, %s5321_s16  ;;  %3602 = vrot.lane.b32.xlu0 %v2511_v48, %s5323_s30 }
 0xbd4   :  { %3143 = vrot.lane.b32.xlu2 %v6779_v4, %s5321_s16  ;;  %3592 = vrot.lane.b32.xlu0 %v6720_v1, %s5325_s19  ;;  %v2519_v30 = vpop.permute.xlu1 %2518 }
 0xbd5   :  { %v2541_v9 = vsel %vm239_vm1, %v2519_v30, 0  ;;  %v6871_v30 = vld [vmem:[%s8241_s1] sm:$0xff] }
 0xbdc   :  { %3141 = vrot.lane.b32.xlu2 %v6783_v54, %s5321_s16  ;;  %3238 = vrot.lane.b32.xlu0 %v6754_v29, %s5324_s18  ;;  %v2889_v33 = vpop.permute.xlu1 %2888 }
 0xbdd   :  { %v2911_v46 = vsel %vm239_vm1, %v2889_v33, 0 }
 0xbe4   :  { %3145 = vrot.lane.b32.xlu0 %v6770_v62, %s5321_s16  ;;  %2882 = vrot.lane.b32.xlu2 %v6772_v52, %s5320_s15  ;;  %v2885_v31 = vpop.permute.xlu1 %2884 }
 0xbe5   :  { %v2905_v36 = vsel %vm239_vm1, %v2885_v31, 0 }
 0xbec   :  { %3598 = vrot.lane.b32.xlu0 %v6772_v52, %s5325_s19  ;;  %3240 = vrot.lane.b32.xlu2 %v6772_v52, %s5324_s18  ;;  %v3243_v57 = vpop.permute.xlu1 %3242 }
 0xbed   :  { %v3263_v7 = vsel %vm239_vm1, %v3243_v57, 0 }
 0xbf4   :  { %v6823_v47 = vpop.permute.xlu1 %3234 }
 0xbf6   :  { %v2891_v51 = vpop.permute.xlu2 %2890 }
 0xbf7   :  { %v2914_v26 = vsel %vm239_vm1, %v2891_v51, 0 }
 0xbf8   :  { %2920 = vmatpush.bf16.xpose.msra.mxu0 %v2914_v26  ;;  %v6886_v26 = vld [vmem:[%s8241_s1 + $0x8] sm:$0xff] }
 0xbfc   :  { %v6826_v2 = vpop.permute.xlu1 %3236 }
 0xbfe   :  { %v2877_v44 = vpop.permute.xlu2 %2876 }
 0xc00   :  { %2921 = vmatpush.bf16.xpose.msra.mxu0 %v2911_v46 }
 0xc04   :  { %v6829_v3 = vpop.permute.xlu1 %3596 }
 0xc06   :  { %v3247_v37 = vpop.permute.xlu2 %3246 }
 0xc07   :  { %v3269_v6 = vsel %vm239_vm1, %v3247_v37, 0 }
 0xc0c   :  { %v3506_v16 = vpop.permute.xlu1 %3505 }
 0xc0d   :  { %3527 = vmatpush.bf16.msra.mxu2 %v3506_v16 }
 0xc0e   :  { %v2521_v50 = vpop.permute.xlu0 %2520  ;;  %v3245_v39 = vpop.permute.xlu2 %3244 }
 0xc0f   :  { %v2544_v21 = vsel %vm239_vm1, %v2521_v50, 0  ;;  %v3266_v23 = vsel %vm239_vm1, %v3245_v39, 0  ;;  %v6901_v50 = vld [vmem:[%s8241_s1 + $0x10] sm:$0xff] }
 0xc10   :  { %2550 = vmatpush.bf16.xpose.msrb.mxu3 %v2544_v21 }
 0xc14   :  { %v3249_v14 = vpop.permute.xlu1 %3248 }
 0xc15   :  { %v3272_v13 = vsel %vm239_vm1, %v3249_v14, 0 }
 0xc16   :  { %v2517_v55 = vpop.permute.xlu0 %2516  ;;  %v3601_v11 = vpop.permute.xlu2 %3600 }
 0xc17   :  { %v2538_v41 = vsel %vm239_vm1, %v2517_v55, 0  ;;  %v3621_v56 = vsel %vm239_vm1, %v3601_v11, 0 }
 0xc18   :  { %2551 = vmatpush.bf16.xpose.msrb.mxu3 %v2541_v9 }
 0xc1c   :  { %v3607_v19 = vpop.permute.xlu1 %3606 }
 0xc1d   :  { %v3630_v45 = vsel %vm239_vm1, %v3607_v19, 0 }
 0xc1e   :  { %v2887_v15 = vpop.permute.xlu0 %2886  ;;  %v3595_v5 = vpop.permute.xlu2 %3594 }
 0xc1f   :  { %v2908_v59 = vsel %vm239_vm1, %v2887_v15, 0  ;;  %v6916_v15 = vld [vmem:[%s8241_s1 + $0x18] sm:$0xff] }
 0xc20   :  { %2552 = vmatpush.bf16.xpose.msrb.mxu3 %v2538_v41  ;;  %2922 = vmatpush.bf16.xpose.msra.mxu0 %v2908_v59 }
 0xc26   :  { %v2879_v0 = vpop.permute.xlu0 %2878  ;;  %v3148_v58 = vpop.permute.xlu2 %3147 }
 0xc27   :  { %3169 = vmatpush.bf16.msrb.mxu1 %v3148_v58 }
 0xc28   :  { %2553 = vmatpush.bf16.xpose.msrb.mxu3 %v2535_v63  ;;  %2923 = vmatpush.bf16.xpose.msra.mxu0 %v2905_v36  ;;  %v6931_v63 = vld [vmem:[%s8241_s1 + $0x20] sm:$0xff] }
 0xc2e   :  { %v2881_v60 = vpop.permute.xlu0 %2880  ;;  %v3144_v25 = vpop.permute.xlu2 %3143 }
 0xc2f   :  { %4819 = vmatmul.msk.bf16.vlgmr.msrb.gmra.mxu3 %vm239_vm1, %v6720_v1  ;;  %4827 = vmatmul.msk.bf16.vlgmr.msra.gmra.mxu0 %vm239_vm1, %v2877_v44 }
 0xc30   :  { %3278 = vmatpush.bf16.xpose.msra.mxu3 %v3272_v13  ;;  %3636 = vmatpush.bf16.xpose.msrb.mxu0 %v3630_v45 }
 0xc36   :  { %v3605_v22 = vpop.permute.xlu0 %3604 }
 0xc37   :  { %v3627_v43 = vsel %vm239_vm1, %v3605_v22, 0 }
 0xc38   :  { %3279 = vmatpush.bf16.xpose.msra.mxu3 %v3269_v6  ;;  %3637 = vmatpush.bf16.xpose.msrb.mxu0 %v3627_v43  ;;  %v6946_v43 = vld [vmem:[%s8241_s1 + $0x28] sm:$0xff] }
 0xc3e   :  { %v3603_v53 = vpop.permute.xlu0 %3602 }
 0xc3f   :  { %4820 = vmatmul.msk.bf16.gmra.mxu3 %vm239_vm1, %v6749_v35  ;;  %4828 = vmatmul.msk.bf16.gmra.mxu0 %vm239_vm1, %v2879_v0  ;;  %v3624_v1 = vsel %vm239_vm1, %v3603_v53, 0  ;;  %v3142_v35 = vpop.permute.xlu2 %3141 }
 0xc40   :  { %3280 = vmatpush.bf16.xpose.msra.mxu3 %v3266_v23  ;;  %3638 = vmatpush.bf16.xpose.msrb.mxu0 %v3624_v1 }
 0xc46   :  { %v3593_v38 = vpop.permute.xlu0 %3592 }
 0xc47   :  { %v2883_v61 = vpop.permute.xlu2 %2882 }
 0xc48   :  { %3281 = vmatpush.bf16.xpose.msra.mxu3 %v3263_v7  ;;  %3639 = vmatpush.bf16.xpose.msrb.mxu0 %v3621_v56 }
 0xc4e   :  { %v3239_v34 = vpop.permute.xlu0 %3238 }
 0xc4f   :  { %4821 = vmatmul.msk.bf16.gmra.mxu3 %vm239_vm1, %v6754_v29  ;;  %4829 = vmatmul.msk.bf16.gmra.mxu0 %vm239_vm1, %v2881_v60  ;;  %v3241_v29 = vpop.permute.xlu2 %3240 }
 0xc56   :  { %v3146_v49 = vpop.permute.xlu0 %3145 }
 0xc57   :  { %3170 = vmatpush.bf16.msrb.mxu1 %v3146_v49 }
 0xc5b   :  { %3171 = vmatpush.bf16.msrb.mxu1 %v3144_v25 }
 0xc5f   :  { %4822 = vmatmul.msk.bf16.gmra.mxu3 %vm239_vm1, %v6772_v52  ;;  %4830 = vmatmul.msk.bf16.gmra.mxu0 %vm239_vm1, %v2883_v61  ;;  %v3599_v52 = vpop.permute.xlu0 %3598 }
 0xc60   :  { %3172 = vmatpush.bf16.msrb.mxu1 %v3142_v35 }
 0xc6f   :  { %4835 = vmatmul.msk.bf16.vlgmr.msra.gmra.mxu3 %vm239_vm1, %v6823_v47  ;;  %4843 = vmatmul.msk.bf16.vlgmr.msrb.gmra.mxu0 %vm239_vm1, %v3593_v38  ;;  %v6957_v38 = vld [vmem:[%s8241_s1 + $0x30] sm:$0xff] }
 0xc7f   :  { %4836 = vmatmul.msk.bf16.gmra.mxu3 %vm239_vm1, %v6826_v2  ;;  %4844 = vmatmul.msk.bf16.gmra.mxu0 %vm239_vm1, %v3595_v5 }
 0xc8f   :  { %4837 = vmatmul.msk.bf16.gmra.mxu3 %vm239_vm1, %v3239_v34  ;;  %4845 = vmatmul.msk.bf16.gmra.mxu0 %vm239_vm1, %v6829_v3 }
 0xc9f   :  { %4838 = vmatmul.msk.bf16.gmra.mxu3 %vm239_vm1, %v3241_v29  ;;  %4846 = vmatmul.msk.bf16.gmra.mxu0 %vm239_vm1, %v3599_v52  ;;  %v6974_v52 = vld [vmem:[%s8241_s1 + $0x38] sm:$0xff] }
 0xcac   :  { %v2925_v48 = vpop.f32.mrf.mxu0 }
 0xcad   :  { %v6874_v33 = vadd.f32 %v6871_v30, %v2925_v48 }
 0xcaf   :  { %v2945_v31 = vsel %vm293_vm2, %v6874_v33, -inf }
 0xcb0   :  { %2946 = vmax.xlane.f32.xlu0 %v2945_v31 }
 0xcb2   :  { %v2555_v57 = vpop.f32.mrf.mxu3 }
 0xcb3   :  { %v6879_v28 = vadd.f32 %v6871_v30, %v2555_v57 }
 0xcb4   :  { %v2927_v47 = vpop.f32.mrf.mxu0 }
 0xcb5   :  { %v2575_v51 = vsel %vm293_vm2, %v6879_v28, -inf  ;;  %v6889_v2 = vadd.f32 %v6886_v26, %v2927_v47 }
 0xcb6   :  { %2576 = vmax.xlane.f32.xlu1 %v2575_v51 }
 0xcb7   :  { %v2948_v16 = vsel %vm293_vm2, %v6889_v2, -inf }
 0xcba   :  { %v2557_v44 = vpop.f32.mrf.mxu3 }
 0xcbb   :  { %v6892_v46 = vadd.f32 %v6886_v26, %v2557_v44 }
 0xcbc   :  { %v2930_v3 = vpop.f32.mrf.mxu0 }
 0xcbd   :  { %v2578_v37 = vsel %vm293_vm2, %v6892_v46, -inf  ;;  %v6904_v39 = vadd.f32 %v6901_v50, %v2930_v3 }
 0xcbe   :  { %2579 = vmax.xlane.f32.xlu2 %v2578_v37  ;;  %2949 = vmax.xlane.f32.xlu1 %v2948_v16 }
 0xcbf   :  { %v2951_v14 = vsel %vm293_vm2, %v6904_v39, -inf }
 0xcc2   :  { %v2560_v21 = vpop.f32.mrf.mxu3 }
 0xcc3   :  { %v6907_v55 = vadd.f32 %v6901_v50, %v2560_v21 }
 0xcc4   :  { %v2932_v11 = vpop.f32.mrf.mxu0 }
 0xcc5   :  { %v2581_v9 = vsel %vm293_vm2, %v6907_v55, -inf  ;;  %v6919_v5 = vadd.f32 %v6916_v15, %v2932_v11 }
 0xcc6   :  { %2582 = vmax.xlane.f32.xlu2 %v2581_v9  ;;  %2952 = vmax.xlane.f32.xlu1 %v2951_v14 }
 0xcc7   :  { %v2954_v0 = vsel %vm293_vm2, %v6919_v5, -inf }
 0xcca   :  { %v2562_v41 = vpop.f32.mrf.mxu3 }
 0xccb   :  { %v6922_v59 = vadd.f32 %v6916_v15, %v2562_v41 }
 0xccc   :  { %v2935_v19 = vpop.f32.mrf.mxu0 }
 0xccd   :  { %v2584_v58 = vsel %vm293_vm2, %v6922_v59, -inf  ;;  %v6934_v36 = vadd.f32 %v6931_v63, %v2935_v19 }
 0xcce   :  { %2955 = vmax.xlane.f32.xlu2 %v2954_v0  ;;  %2585 = vmax.xlane.f32.xlu0 %v2584_v58 }
 0xccf   :  { %v2957_v6 = vsel %vm293_vm2, %v6934_v36, -inf }
 0xcd2   :  { %v2565_v13 = vpop.f32.mrf.mxu3 }
 0xcd3   :  { %v6937_v45 = vadd.f32 %v6931_v63, %v2565_v13 }
 0xcd4   :  { %v2937_v60 = vpop.f32.mrf.mxu0 }
 0xcd5   :  { %v2587_v22 = vsel %vm293_vm2, %v6937_v45, -inf  ;;  %v6949_v23 = vadd.f32 %v6946_v43, %v2937_v60 }
 0xcd6   :  { %2958 = vmax.xlane.f32.xlu2 %v2957_v6  ;;  %2588 = vmax.xlane.f32.xlu0 %v2587_v22 }
 0xcd7   :  { %v2960_v34 = vsel %vm293_vm2, %v6949_v23, -inf }
 0xcda   :  { %v2567_v53 = vpop.f32.mrf.mxu3 }
 0xcdb   :  { %v6952_v1 = vadd.f32 %v6946_v43, %v2567_v53 }
 0xcdc   :  { %v2940_v7 = vpop.f32.mrf.mxu0 }
 0xcdd   :  { %v6960_v56 = vadd.f32 %v6957_v38, %v2940_v7  ;;  %v2590_v25 = vsel %vm293_vm2, %v6952_v1, -inf }
 0xcde   :  { %2591 = vmax.xlane.f32.xlu1 %v2590_v25  ;;  %2961 = vmax.xlane.f32.xlu0 %v2960_v34 }
 0xcdf   :  { %v2963_v35 = vsel %vm293_vm2, %v6960_v56, -inf }
 0xce0   :  { %2964 = vmax.xlane.f32.xlu2 %v2963_v35 }
 0xce2   :  { %v2570_v49 = vpop.f32.mrf.mxu3 }
 0xce3   :  { %v6969_v61 = vadd.f32 %v6957_v38, %v2570_v49 }
 0xce4   :  { %v2942_v29 = vpop.f32.mrf.mxu0 }
 0xce5   :  { %v6977_v48 = vadd.f32 %v6974_v52, %v2942_v29  ;;  %v2593_v31 = vsel %vm293_vm2, %v6969_v61, -inf }
 0xce6   :  { %2594 = vmax.xlane.f32.xlu1 %v2593_v31 }
 0xce7   :  { %v2966_v57 = vsel %vm293_vm2, %v6977_v48, -inf }
 0xce8   :  { %2967 = vmax.xlane.f32.xlu0 %v2966_v57 }
 0xcea   :  { %v2572_v47 = vpop.f32.mrf.mxu3 }
 0xceb   :  { %v6984_v51 = vadd.f32 %v6974_v52, %v2572_v47 }
 0xcec   :  { %v3641_v44 = vpop.f32.mrf.mxu0 }
 0xced   :  { %v6987_v3 = vadd.f32 %v6871_v30, %v3641_v44  ;;  %v2596_v37 = vsel %vm293_vm2, %v6984_v51, -inf }
 0xcee   :  { %2597 = vmax.xlane.f32.xlu2 %v2596_v37 }
 0xcef   :  { %v3661_v16 = vsel %vm293_vm2, %v6987_v3, -inf }
 0xcf0   :  { %3662 = vmax.xlane.f32.xlu1 %v3661_v16 }
 0xcf2   :  { %v3283_v21 = vpop.f32.mrf.mxu3 }
 0xcf3   :  { %v6994_v11 = vadd.f32 %v6871_v30, %v3283_v21 }
 0xcf4   :  { %v3643_v9 = vpop.f32.mrf.mxu0 }
 0xcf5   :  { %v6997_v14 = vadd.f32 %v6886_v26, %v3643_v9  ;;  %v3303_v41 = vsel %vm293_vm2, %v6994_v11, -inf }
 0xcf6   :  { %3304 = vmax.xlane.f32.xlu0 %v3303_v41 }
 0xcf7   :  { %v3664_v19 = vsel %vm293_vm2, %v6997_v14, -inf }
 0xcf8   :  { %3665 = vmax.xlane.f32.xlu1 %v3664_v19 }
 0xcfa   :  { %v3285_v0 = vpop.f32.mrf.mxu3 }
 0xcfb   :  { %v7004_v58 = vadd.f32 %v6886_v26, %v3285_v0 }
 0xcfc   :  { %v3646_v13 = vpop.f32.mrf.mxu0 }
 0xcfd   :  { %v3306_v30 = vsel %vm293_vm2, %v7004_v58, -inf  ;;  %v7009_v6 = vadd.f32 %v6901_v50, %v3646_v13 }
 0xcff   :  { %v3667_v53 = vsel %vm293_vm2, %v7009_v6, -inf }
 0xd00   :  { %3307 = vmax.xlane.f32.xlu1 %v3306_v30 }
 0xd02   :  { %v3288_v60 = vpop.f32.mrf.mxu3 }
 0xd03   :  { %v7014_v25 = vadd.f32 %v6901_v50, %v3288_v60 }
 0xd04   :  { %v3648_v22 = vpop.f32.mrf.mxu0 }
 0xd05   :  { %v3309_v49 = vsel %vm293_vm2, %v7014_v25, -inf  ;;  %v7027_v57 = vadd.f32 %v6916_v15, %v3648_v22 }
 0xd07   :  { %v3670_v16 = vsel %vm293_vm2, %v7027_v57, -inf }
 0xd08   :  { %3668 = vmax.xlane.f32.xlu1 %v3667_v53 }
 0xd0a   :  { %v3290_v7 = vpop.f32.mrf.mxu3 }
 0xd0b   :  { %v7017_v26 = vadd.f32 %v6916_v15, %v3290_v7 }
 0xd0c   :  { %v3651_v34 = vpop.f32.mrf.mxu0 }
 0xd0d   :  { %v3312_v35 = vsel %vm293_vm2, %v7017_v26, -inf  ;;  %v7024_v29 = vadd.f32 %v6931_v63, %v3651_v34 }
 0xd0e   :  { %3313 = vmax.xlane.f32.xlu2 %v3312_v35 }
 0xd0f   :  { %v3673_v37 = vsel %vm293_vm2, %v7024_v29, -inf }
 0xd10   :  { %3310 = vmax.xlane.f32.xlu1 %v3309_v49 }
 0xd12   :  { %v3293_v31 = vpop.f32.mrf.mxu3 }
 0xd13   :  { %v7030_v50 = vadd.f32 %v6931_v63, %v3293_v31 }
 0xd14   :  { %v3653_v47 = vpop.f32.mrf.mxu0 }
 0xd15   :  { %v3315_v44 = vsel %vm293_vm2, %v7030_v50, -inf  ;;  %v7039_v15 = vadd.f32 %v6946_v43, %v3653_v47 }
 0xd16   :  { %3316 = vmax.xlane.f32.xlu0 %v3315_v44  ;;  %3674 = vmax.xlane.f32.xlu2 %v3673_v37 }
 0xd17   :  { %v3676_v0 = vsel %vm293_vm2, %v7039_v15, -inf }
 0xd18   :  { %3671 = vmax.xlane.f32.xlu1 %v3670_v16 }
 0xd1a   :  { %v3295_v21 = vpop.f32.mrf.mxu3 }
 0xd1b   :  { %v7042_v63 = vadd.f32 %v6946_v43, %v3295_v21 }
 0xd1c   :  { %v3656_v9 = vpop.f32.mrf.mxu0 }
 0xd1d   :  { %v7045_v41 = vadd.f32 %v6957_v38, %v3656_v9  ;;  %v3318_v19 = vsel %vm293_vm2, %v7042_v63, -inf }
 0xd1e   :  { %3319 = vmax.xlane.f32.xlu2 %v3318_v19 }
 0xd1f   :  { %v3679_v13 = vsel %vm293_vm2, %v7045_v41, -inf }
 0xd20   :  { %3677 = vmax.xlane.f32.xlu1 %v3676_v0  ;;  %3680 = vmax.xlane.f32.xlu0 %v3679_v13 }
 0xd22   :  { %v3298_v30 = vpop.f32.mrf.mxu3 }
 0xd23   :  { %v7054_v43 = vadd.f32 %v6957_v38, %v3298_v30  ;;  %v2947_v60 = vpop.xlane.xlu0 %2946 }
 0xd24   :  { %v2969_v22 = vsub.f32 %v6874_v33, %v2947_v60  ;;  %v3658_v53 = vpop.f32.mrf.mxu0 }
 0xd25   :  { %v7058_v7 = vadd.f32 %v6974_v52, %v3658_v53  ;;  %v3321_v49 = vsel %vm293_vm2, %v7054_v43, -inf }
 0xd26   :  { %v2977_v34 = vmul.f32 1.442695, %v2969_v22 }
 0xd27   :  { %v3682_v35 = vsel %vm293_vm2, %v7058_v7, -inf }
 0xd28   :  { %5107 = vpow2.f32 %v2977_v34  ;;  %3683 = vmax.xlane.f32.xlu2 %v3682_v35  ;;  %3322 = vmax.xlane.f32.xlu1 %v3321_v49 }
 0xd29   :  { %v2577_v31 = vpop.xlane.xlu1 %2576 }
 0xd2a   :  { %v2599_v38 = vsub.f32 %v6879_v28, %v2577_v31  ;;  %v3300_v47 = vpop.f32.mrf.mxu3 }
 0xd2b   :  { %v7066_v33 = vadd.f32 %v6974_v52, %v3300_v47 }
 0xd2c   :  { %v2607_v44 = vmul.f32 1.442695, %v2599_v38 }
 0xd2d   :  { %v3324_v37 = vsel %vm293_vm2, %v7066_v33, -inf }
 0xd2e   :  { %v7070_v16 = vpop.eup %5107  ;;  %5109 = vpow2.f32 %v2607_v44  ;;  %3325 = vmax.xlane.f32.xlu0 %v3324_v37 }
 0xd2f   :  { %v2993_v21 = vsel %vm293_vm2, %v7070_v16, 0.0 }
 0xd30   :  { %2994 = vadd.xlane.f32.xlu1 %v2993_v21 }
 0xd31   :  { %v2950_v9 = vpop.xlane.xlu1 %2949  ;;  %v2580_v19 = vpop.xlane.xlu2 %2579 }
 0xd32   :  { %v2970_v28 = vsub.f32 %v6889_v2, %v2950_v9  ;;  %v2600_v0 = vsub.f32 %v6892_v46, %v2580_v19 }
 0xd34   :  { %v7076_v52 = vpop.eup %5109  ;;  %v2979_v13 = vmul.f32 1.442695, %v2970_v28  ;;  %v2609_v30 = vmul.f32 1.442695, %v2600_v0 }
 0xd35   :  { %v2623_v60 = vsel %vm293_vm2, %v7076_v52, 0.0 }
 0xd36   :  { %5111 = vpow2.f32 %v2979_v13  ;;  %2624 = vadd.xlane.f32.xlu0 %v2623_v60 }
 0xd37   :  { %5113 = vpow2.f32 %v2609_v30 }
 0xd39   :  { %v2953_v22 = vpop.xlane.xlu1 %2952  ;;  %v2583_v53 = vpop.xlane.xlu2 %2582 }
 0xd3a   :  { %v2971_v34 = vsub.f32 %v6904_v39, %v2953_v22  ;;  %v2601_v35 = vsub.f32 %v6907_v55, %v2583_v53 }
 0xd3c   :  { %v7082_v49 = vpop.eup %5111  ;;  %v2981_v2 = vmul.f32 1.442695, %v2971_v34  ;;  %v2611_v46 = vmul.f32 1.442695, %v2601_v35 }
 0xd3d   :  { %v7084_v31 = vpop.eup %5113  ;;  %v2996_v38 = vsel %vm293_vm2, %v7082_v49, 0.0 }
 0xd3e   :  { %5115 = vpow2.f32 %v2981_v2  ;;  %2997 = vadd.xlane.f32.xlu2 %v2996_v38  ;;  %v2626_v47 = vsel %vm293_vm2, %v7084_v31, 0.0 }
 0xd3f   :  { %5117 = vpow2.f32 %v2611_v46  ;;  %2627 = vadd.xlane.f32.xlu1 %v2626_v47 }
 0xd41   :  { %v2586_v44 = vpop.xlane.xlu0 %2585  ;;  %v2956_v39 = vpop.xlane.xlu2 %2955 }
 0xd42   :  { %v2602_v55 = vsub.f32 %v6922_v59, %v2586_v44  ;;  %v2972_v37 = vsub.f32 %v6919_v5, %v2956_v39 }
 0xd44   :  { %v7092_v21 = vpop.eup %5115  ;;  %v2613_v9 = vmul.f32 1.442695, %v2602_v55  ;;  %v2983_v19 = vmul.f32 1.442695, %v2972_v37 }
 0xd45   :  { %v7094_v28 = vpop.eup %5117  ;;  %v2999_v0 = vsel %vm293_vm2, %v7092_v21, 0.0 }
 0xd46   :  { %5119 = vpow2.f32 %v2613_v9  ;;  %v2629_v13 = vsel %vm293_vm2, %v7094_v28, 0.0 }
 0xd47   :  { %5121 = vpow2.f32 %v2983_v19  ;;  %3000 = vadd.xlane.f32.xlu1 %v2999_v0  ;;  %2630 = vadd.xlane.f32.xlu0 %v2629_v13 }
 0xd49   :  { %v2589_v30 = vpop.xlane.xlu0 %2588  ;;  %v2959_v59 = vpop.xlane.xlu2 %2958 }
 0xd4a   :  { %v2603_v5 = vsub.f32 %v6937_v45, %v2589_v30  ;;  %v2973_v60 = vsub.f32 %v6934_v36, %v2959_v59 }
 0xd4c   :  { %v7102_v22 = vpop.eup %5119  ;;  %v2615_v53 = vmul.f32 1.442695, %v2603_v5  ;;  %v2985_v34 = vmul.f32 1.442695, %v2973_v60 }
 0xd4d   :  { %v7104_v35 = vpop.eup %5121  ;;  %v2632_v2 = vsel %vm293_vm2, %v7102_v22, 0.0 }
 0xd4e   :  { %5123 = vpow2.f32 %v2615_v53  ;;  %v3002_v46 = vsel %vm293_vm2, %v7104_v35, 0.0 }
 0xd4f   :  { %5125 = vpow2.f32 %v2985_v34  ;;  %2633 = vadd.xlane.f32.xlu1 %v2632_v2  ;;  %3003 = vadd.xlane.f32.xlu0 %v3002_v46 }
 0xd51   :  { %v2592_v38 = vpop.xlane.xlu1 %2591  ;;  %v2962_v45 = vpop.xlane.xlu0 %2961 }
 0xd52   :  { %v2974_v36 = vsub.f32 %v6949_v23, %v2962_v45  ;;  %v2604_v9 = vsub.f32 %v6952_v1, %v2592_v38 }
 0xd53   :  { %v2965_v47 = vpop.xlane.xlu2 %2964 }
 0xd54   :  { %v7111_v44 = vpop.eup %5123  ;;  %v2987_v39 = vmul.f32 1.442695, %v2974_v36  ;;  %v2975_v55 = vsub.f32 %v6960_v56, %v2965_v47  ;;  %v2617_v23 = vmul.f32 1.442695, %v2604_v9 }
 0xd55   :  { %v7114_v37 = vpop.eup %5125  ;;  %v2635_v19 = vsel %vm293_vm2, %v7111_v44, 0.0 }
 0xd56   :  { %v2989_v0 = vmul.f32 1.442695, %v2975_v55  ;;  %v3005_v13 = vsel %vm293_vm2, %v7114_v37, 0.0  ;;  %5127 = vpow2.f32 %v2987_v39 }
 0xd57   :  { %2636 = vadd.xlane.f32.xlu1 %v2635_v19  ;;  %3006 = vadd.xlane.f32.xlu0 %v3005_v13 }
 0xd58   :  { %5129 = vpow2.f32 %v2989_v0 }
 0xd59   :  { %v2595_v30 = vpop.xlane.xlu1 %2594  ;;  %5131 = vpow2.f32 %v2617_v23 }
 0xd5a   :  { %v2605_v1 = vsub.f32 %v6969_v61, %v2595_v30 }
 0xd5b   :  { %v2968_v59 = vpop.xlane.xlu0 %2967 }
 0xd5c   :  { %v2976_v56 = vsub.f32 %v6977_v48, %v2968_v59  ;;  %v7122_v5 = vpop.eup %5127  ;;  %v2619_v46 = vmul.f32 1.442695, %v2605_v1 }
 0xd5d   :  { %v3008_v34 = vsel %vm293_vm2, %v7122_v5, 0.0 }
 0xd5e   :  { %v7125_v60 = vpop.eup %5129  ;;  %v2991_v53 = vmul.f32 1.442695, %v2976_v56 }
 0xd5f   :  { %3009 = vadd.xlane.f32.xlu1 %v3008_v34  ;;  %v3011_v2 = vsel %vm293_vm2, %v7125_v60, 0.0  ;;  %v7132_v45 = vpop.eup %5131 }
 0xd60   :  { %5133 = vpow2.f32 %v2991_v53  ;;  %3012 = vadd.xlane.f32.xlu0 %v3011_v2  ;;  %v2638_v39 = vsel %vm293_vm2, %v7132_v45, 0.0 }
 0xd61   :  { %v2598_v38 = vpop.xlane.xlu2 %2597  ;;  %5135 = vpow2.f32 %v2619_v46 }
 0xd62   :  { %v2606_v48 = vsub.f32 %v6984_v51, %v2598_v38 }
 0xd63   :  { %v3663_v36 = vpop.xlane.xlu1 %3662 }
 0xd64   :  { %v2621_v61 = vmul.f32 1.442695, %v2606_v48  ;;  %v3685_v48 = vsub.f32 %v6987_v3, %v3663_v36 }
 0xd66   :  { %v7134_v47 = vpop.eup %5133  ;;  %5137 = vpow2.f32 %v2621_v61 }
 0xd67   :  { %2639 = vadd.xlane.f32.xlu1 %v2638_v39  ;;  %v3014_v55 = vsel %vm293_vm2, %v7134_v47, 0.0  ;;  %v7140_v9 = vpop.eup %5135 }
 0xd68   :  { %3015 = vadd.xlane.f32.xlu2 %v3014_v55  ;;  %v2641_v13 = vsel %vm293_vm2, %v7140_v9, 0.0 }
 0xd69   :  { %v3305_v56 = vpop.xlane.xlu0 %3304 }
 0xd6a   :  { %v3327_v39 = vsub.f32 %v6994_v11, %v3305_v56 }
 0xd6b   :  { %v3666_v19 = vpop.xlane.xlu1 %3665 }
 0xd6c   :  { %v7142_v51 = vpop.eup %5137  ;;  %v3686_v18 = vsub.f32 %v6997_v14, %v3666_v19 }
 0xd6d   :  { %v2644_v0 = vsel %vm293_vm2, %v7142_v51, 0.0 }
 0xd6e   :  { %2645 = vadd.xlane.f32.xlu0 %v2644_v0 }
 0xd6f   :  { %2642 = vadd.xlane.f32.xlu1 %v2641_v13 }
 0xd73   :  { %v3308_v23 = vpop.xlane.xlu1 %3307 }
 0xd74   :  { %v3328_v55 = vsub.f32 %v7004_v58, %v3308_v23 }
 0xd76   :  { %v3337_v27 = vmul.f32 1.442695, %v3328_v55 }
 0xd7b   :  { %v7148_v30 = vpop.xlane.xlu1 %3668 }
 0xd80   :  { %3501 = vrot.lane.b32.xlu2 %v6779_v4, %s5326_s20 }
 0xd81   :  { %v3314_v53 = vpop.xlane.xlu2 %3313 }
 0xd82   :  { %3503 = vrot.lane.b32.xlu0 %v6770_v62, %s5326_s20  ;;  %v3330_v3 = vsub.f32 %v7017_v26, %v3314_v53 }
 0xd83   :  { %v3311_v59 = vpop.xlane.xlu1 %3310 }
 0xd84   :  { %v3329_v0 = vsub.f32 %v7014_v25, %v3311_v59  ;;  %v3695_v25 = vmul.f32 1.442695, %v3686_v18  ;;  %v3341_v59 = vmul.f32 1.442695, %v3330_v3 }
 0xd86   :  { %v3339_v36 = vmul.f32 1.442695, %v3329_v0 }
 0xd88   :  { %3863 = vrot.lane.b32.xlu1 %v6759_v12, %s5327_s13  ;;  %3499 = vrot.lane.b32.xlu2 %v6783_v54, %s5326_s20  ;;  %v3693_v12 = vmul.f32 1.442695, %v3685_v48 }
 0xd89   :  { %v3317_v34 = vpop.xlane.xlu0 %3316  ;;  %v3675_v46 = vpop.xlane.xlu2 %3674 }
 0xd8a   :  { %5139 = vpow2.f32 %v3693_v12  ;;  %v3331_v11 = vsub.f32 %v7030_v50, %v3317_v34 }
 0xd8b   :  { %v3672_v1 = vpop.xlane.xlu1 %3671 }
 0xd8c   :  { %v3688_v58 = vsub.f32 %v7027_v57, %v3672_v1  ;;  %v3343_v14 = vmul.f32 1.442695, %v3331_v11  ;;  %v3689_v1 = vsub.f32 %v7024_v29, %v3675_v46 }
 0xd8e   :  { %v3699_v53 = vmul.f32 1.442695, %v3688_v58  ;;  %v3701_v29 = vmul.f32 1.442695, %v3689_v1 }
 0xd90   :  { %3861 = vrot.lane.b32.xlu2 %v6770_v62, %s5327_s13  ;;  %v3335_v62 = vmul.f32 1.442695, %v3327_v39  ;;  %v7179_v23 = vpop.eup %5139 }
 0xd91   :  { %v3320_v13 = vpop.xlane.xlu2 %3319  ;;  %8292 = vst [vmem:[#allocation15_spill] sm:$0xff] %v7179_v23  ;;  %v3709_v57 = vsel %vm293_vm2, %v7179_v23, 0.0 }
 0xd92   :  { %v3332_v48 = vsub.f32 %v7042_v63, %v3320_v13 }
 0xd93   :  { %v7160_v2 = vpop.xlane.xlu1 %3677  ;;  %v7162_v38 = vpop.xlane.xlu0 %3680 }
 0xd94   :  { %v3345_v13 = vmul.f32 1.442695, %v3332_v48 }
 0xd9b   :  { %v7165_v61 = vpop.xlane.xlu1 %3322  ;;  %v7181_v19 = vpop.xlane.xlu2 %3683 }
 0xda1   :  { %v7170_v17 = vpop.xlane.xlu0 %3325 }
 0xda3   :  { %v7173_v42 = vpop.xlane.xlu1 %2994 }
 0xda4   :  { %5141 = vrcp.f32 %v7173_v42  ;;  %vm3022_vm1 = vweird.f32 %v7173_v42 }
 0xda5   :  { %5143 = vpow2.f32 %v3335_v62 }
 0xda6   :  { %5145 = vpow2.f32 %v3337_v27 }
 0xda7   :  { %5147 = vpow2.f32 %v3339_v36 }
 0xda9   :  { %v7183_v56 = vpop.xlane.xlu0 %2624 }
 0xdaa   :  { %v7185_v26 = vpop.eup %5141  ;;  %5149 = vrcp.f32 %v7183_v56  ;;  %vm2652_vm13 = vweird.f32 %v7183_v56 }
 0xdab   :  { %5151 = vpow2.f32 %v3695_v25  ;;  %v7190_v18 = vpop.eup %5143  ;;  %v3018_v27 = vmul.f32 %v7185_v26, %v7173_v42  ;;  %vm3023_vm12 = vweird.f32 %v7185_v26 }
 0xdac   :  { %5153 = vpow2.f32 %v3341_v59  ;;  %3710 = vadd.xlane.f32.xlu0 %v3709_v57  ;;  %v7194_v50 = vpop.eup %5145  ;;  %v3026_v59 = vand.u32 2147483647, %v7173_v42  ;;  %vm7267_vm15 = vmor %vm3022_vm1, %vm3023_vm12 }
 0xdad   :  { %5155 = vpow2.f32 %v3343_v14  ;;  %v7197_v34 = vpop.eup %5147  ;;  %v3019_v55 = vsub.f32 1.0, %v3018_v27  ;;  %v3354_v62 = vsel %vm293_vm2, %v7194_v50, 0.0  ;;  %v3351_v27 = vsel %vm293_vm2, %v7190_v18, 0.0 }
 0xdae   :  { %5157 = vpow2.f32 %v3699_v53  ;;  %8293 = vst [vmem:[#allocation16_spill] sm:$0xff] %v7197_v34  ;;  %v3357_v58 = vsel %vm293_vm2, %v7197_v34, 0.0  ;;  %v3028_v53 = vand.u32 2147483648, %v7173_v42  ;;  %vm7243_vm11 = vcmp.eq.f32.partialorder %v3026_v59, 8.507059e+37 }
 0xdaf   :  { %v3020_v14 = vmul.f32 %v7185_v26, %v3019_v55 }
 0xdb0   :  { %v7200_v12 = vpop.eup %5149  ;;  %v3029_v24 = vor.u32 1.1754944e-38, %v3028_v53  ;;  %v2658_v53 = vand.u32 2147483648, %v7183_v56 }
 0xdb1   :  { %v7202_v39 = vpop.eup %5151  ;;  %v2648_v0 = vmul.f32 %v7200_v12, %v7183_v56  ;;  %v7208_v3 = vpop.xlane.xlu2 %2997  ;;  %v3021_v40 = vadd.f32 %v7185_v26, %v3020_v14  ;;  %vm2653_vm14 = vweird.f32 %v7200_v12  ;;  %v2656_v14 = vand.u32 2147483647, %v7183_v56 }
 0xdb2   :  { %8294 = vst [vmem:[#allocation17_spill] sm:$0xff] %v7202_v39  ;;  %v7210_v36 = vpop.eup %5153  ;;  %3355 = vadd.xlane.f32.xlu1 %v3354_v62  ;;  %v7212_v46 = vpop.xlane.xlu1 %2627  ;;  %5159 = vrcp.f32 %v7208_v3  ;;  %v3712_v1 = vsel %vm293_vm2, %v7202_v39, 0.0  ;;  %vm7283_vm3 = vmor %vm2652_vm13, %vm2653_vm14  ;;  %vm3036_vm7 = vweird.f32 %v7208_v3 }
 0xdb3   :  { %8295 = vst [vmem:[#allocation18_spill] sm:$0xff] %v7210_v36  ;;  %v7215_v63 = vpop.eup %5155  ;;  %v2649_v11 = vsub.f32 1.0, %v2648_v0  ;;  %5161 = vrcp.f32 %v7212_v46  ;;  %v3360_v48 = vsel %vm293_vm2, %v7210_v36, 0.0  ;;  %vm2657_vm6 = vcmp.eq.f32.partialorder %v2656_v14, 8.507059e+37 }
 0xdb4   :  { %8296 = vst [vmem:[#allocation19_spill] sm:$0xff] %v7215_v63  ;;  %v7220_v25 = vpop.eup %5157  ;;  %3358 = vadd.xlane.f32.xlu0 %v3357_v58  ;;  %5163 = vpow2.f32 %v3701_v29  ;;  %v7236_v55 = vsel %vm293_vm2, %v7215_v63, 0.0  ;;  %v3025_v63 = vsel %vm7267_vm15, %v7185_v26, %v3021_v40  ;;  %v2670_v40 = vand.u32 2147483647, %v7212_v46 }
 0xdb5   :  { %8297 = vst [vmem:[#allocation20_spill] sm:$0xff] %v7220_v25  ;;  %v2650_v57 = vmul.f32 %v7200_v12, %v2649_v11  ;;  %5165 = vpow2.f32 %v3345_v13  ;;  %v3718_v0 = vsel %vm293_vm2, %v7220_v25, 0.0  ;;  %v3042_v25 = vand.u32 2147483648, %v7208_v3 }
 0xdb6   :  { %v2659_v26 = vor.u32 1.1754944e-38, %v2658_v53  ;;  %v3030_v56 = vsel %vm7243_vm11, %v3029_v24, %v3025_v63  ;;  %vm2666_vm8 = vweird.f32 %v7212_v46  ;;  %vm2671_vm12 = vcmp.eq.f32.partialorder %v2670_v40, 8.507059e+37 }
 0xdb7   :  { %v2651_v29 = vadd.f32 %v7200_v12, %v2650_v57  ;;  %v3129_v63 = vmul.f32 %v7070_v16, %v3030_v56 }
 0xdb8   :  { %v5160_v62 = vpop.eup %5159 }
 0xdb9   :  { %v5162_v58 = vpop.eup %5161  ;;  %v3032_v32 = vmul.f32 %v5160_v62, %v7208_v3  ;;  %3352 = vadd.xlane.f32.xlu2 %v3351_v27  ;;  %vm3037_vm4 = vweird.f32 %v5160_v62 }
 0xdba   :  { %v2662_v59 = vmul.f32 %v5162_v58, %v7212_v46  ;;  %v7254_v11 = vpop.xlane.xlu1 %3000  ;;  %v7256_v10 = vpop.xlane.xlu0 %2630  ;;  %3361 = vadd.xlane.f32.xlu1 %v3360_v48  ;;  %v3040_v48 = vand.u32 2147483647, %v7208_v3  ;;  %vm2667_vm5 = vweird.f32 %v5162_v58  ;;  %vm3038_vm9 = vmor %vm3036_vm7, %vm3037_vm4 }
 0xdbb   :  { %v3033_v20 = vsub.f32 1.0, %v3032_v32  ;;  %5167 = vrcp.f32 %v7254_v11  ;;  %v7261_v27 = vpop.eup %5163  ;;  %vm2668_vm10 = vmor %vm2666_vm8, %vm2667_vm5  ;;  %v3056_v40 = vand.u32 2147483648, %v7254_v11  ;;  %v2684_v56 = vand.u32 2147483647, %v7256_v10 }
 0xdbc   :  { %v2663_v8 = vsub.f32 1.0, %v2662_v59  ;;  %5169 = vrcp.f32 %v7256_v10  ;;  %3719 = vadd.xlane.f32.xlu0 %v3718_v0  ;;  %v7274_v32 = vpop.eup %5165  ;;  %v2672_v59 = vand.u32 2147483648, %v7212_v46  ;;  %v2655_v0 = vsel %vm7283_vm3, %v7200_v12, %v2651_v29 }
 0xdbd   :  { %v3034_v34 = vmul.f32 %v5160_v62, %v3033_v20  ;;  %v3043_v20 = vor.u32 1.1754944e-38, %v3042_v25  ;;  %v2660_v12 = vsel %vm2657_vm6, %v2659_v26, %v2655_v0  ;;  %vm3041_vm1 = vcmp.eq.f32.partialorder %v3040_v48, 8.507059e+37 }
 0xdbe   :  { %v2664_v36 = vmul.f32 %v5162_v58, %v2663_v8  ;;  %v2673_v8 = vor.u32 1.1754944e-38, %v2672_v59  ;;  %vm3050_vm13 = vweird.f32 %v7254_v11  ;;  %vm2680_vm15 = vweird.f32 %v7256_v10 }
 0xdbf   :  { %v3035_v57 = vadd.f32 %v5160_v62, %v3034_v34  ;;  %vm7363_vm5 = vcmp.eq.f32.partialorder %v2684_v56, 8.507059e+37 }
 0xdc0   :  { %v2665_v39 = vadd.f32 %v5162_v58, %v2664_v36 }
 0xdc1   :  { %v7296_v23 = vpop.eup %5167  ;;  %v3039_v29 = vsel %vm3038_vm9, %v5160_v62, %v3035_v57  ;;  %3713 = vadd.xlane.f32.xlu2 %v3712_v1  ;;  %v2759_v62 = vmul.f32 %v7076_v52, %v2660_v12  ;;  %v3721_v12 = vsel %vm293_vm2, %v7261_v27, 0.0 }
 0xdc2   :  { %v7298_v14 = vpop.eup %5169  ;;  %v2669_v34 = vsel %vm2668_vm10, %v5162_v58, %v2665_v39  ;;  %v3044_v3 = vsel %vm3041_vm1, %v3043_v20, %v3039_v29  ;;  %v3046_v24 = vmul.f32 %v7296_v23, %v7254_v11  ;;  %v7302_v36 = vpop.xlane.xlu1 %2633  ;;  %v8304_v58 = vsub.f32 %v7058_v7, %v7181_v19 }
 0xdc3   :  { %v7304_v46 = vpop.xlane.xlu0 %3003  ;;  %v2674_v25 = vsel %vm2671_vm12, %v2673_v8, %v2669_v34  ;;  %v3130_v13 = vmul.f32 %v7082_v49, %v3044_v3  ;;  %v2676_v1 = vmul.f32 %v7298_v14, %v7256_v10  ;;  %5171 = vrcp.f32 %v7302_v36 }
 0xdc4   :  { %v2760_v39 = vmul.f32 %v7084_v31, %v2674_v25  ;;  %3364 = vadd.xlane.f32.xlu0 %v7236_v55  ;;  %v3707_v53 = vmul.f32 1.442695, %v8304_v58  ;;  %v8305_v49 = vsub.f32 %v7066_v33, %v7170_v17  ;;  %v3047_v0 = vsub.f32 1.0, %v3046_v24 }
 0xdc5   :  { %v3137_v48 = vpack.c.bf16 %v3130_v13, %v3129_v63  ;;  %v2677_v16 = vsub.f32 1.0, %v2676_v1  ;;  %5173 = vrcp.f32 %v7304_v46  ;;  %v3366_v33 = vsel %vm293_vm2, %v7274_v32, 0.0 }
 0xdc6   :  { %v3349_v42 = vmul.f32 1.442695, %v8305_v49  ;;  %v2767_v59 = vpack.c.bf16 %v2760_v39, %v2759_v62  ;;  %5175 = vpow2.f32 %v3707_v53  ;;  %v3048_v7 = vmul.f32 %v7296_v23, %v3047_v0 }
 0xdc7   :  { %4831 = vmatmul.msk.bf16.vlgmr.msrb.gmra.mxu1 %vm293_vm2, %v3137_v48  ;;  %v2678_v52 = vmul.f32 %v7298_v14, %v2677_v16  ;;  %v3054_v55 = vand.u32 2147483647, %v7254_v11  ;;  %v2686_v20 = vand.u32 2147483648, %v7256_v10  ;;  %vm2681_vm11 = vweird.f32 %v7298_v14 }
 0xdc8   :  { %4823 = vmatmul.msk.bf16.vlgmr.msrb.gmra.mxu2 %vm293_vm2, %v2767_v59  ;;  %5177 = vpow2.f32 %v3349_v42  ;;  %v3049_v3 = vadd.f32 %v7296_v23, %v3048_v7  ;;  %vm3051_vm14 = vweird.f32 %v7296_v23  ;;  %v3057_v25 = vor.u32 1.1754944e-38, %v3056_v40  ;;  %vm7359_vm4 = vmor %vm2680_vm15, %vm2681_vm11 }
 0xdc9   :  { %v7324_v31 = vpop.eup %5171  ;;  %v2679_v8 = vadd.f32 %v7298_v14, %v2678_v52  ;;  %vm7352_vm3 = vcmp.eq.f32.partialorder %v3054_v55, 8.507059e+37  ;;  %v2687_v10 = vor.u32 1.1754944e-38, %v2686_v20  ;;  %v2700_v53 = vand.u32 2147483648, %v7302_v36  ;;  %vm7373_vm7 = vmor %vm3050_vm13, %vm3051_vm14 }
 0xdca   :  { %v7327_v19 = vpop.xlane.xlu1 %2636  ;;  %v2690_v26 = vmul.f32 %v7324_v31, %v7302_v36  ;;  %vm2695_vm6 = vweird.f32 %v7324_v31  ;;  %v3053_v52 = vsel %vm7373_vm7, %v7296_v23, %v3049_v3  ;;  %vm2694_vm9 = vweird.f32 %v7302_v36 }
 0xdcb   :  { %v7329_v17 = vpop.xlane.xlu0 %3006  ;;  %5179 = vrcp.f32 %v7327_v19  ;;  %v5174_v57 = vpop.eup %5173  ;;  %v2683_v49 = vsel %vm7359_vm4, %v7298_v14, %v2679_v8  ;;  %v2698_v11 = vand.u32 2147483647, %v7302_v36  ;;  %v3070_v7 = vand.u32 2147483648, %v7304_v46  ;;  %vm7391_vm10 = vmor %vm2694_vm9, %vm2695_vm6 }
 0xdcc   :  { %5181 = vrcp.f32 %v7329_v17  ;;  %3367 = vadd.xlane.f32.xlu0 %v3366_v33  ;;  %v2691_v29 = vsub.f32 1.0, %v2690_v26  ;;  %v3060_v34 = vmul.f32 %v5174_v57, %v7304_v46  ;;  %v7350_v24 = vpop.eup %5175  ;;  %vm3065_vm8 = vweird.f32 %v5174_v57 }
 0xdcd   :  { %vm3064_vm1 = vweird.f32 %v7304_v46  ;;  %v3068_v40 = vand.u32 2147483647, %v7304_v46  ;;  %v2701_v26 = vor.u32 1.1754944e-38, %v2700_v53  ;;  %v2688_v46 = vsel %vm7363_vm5, %v2687_v10, %v2683_v49 }
 0xdce   :  { %v2692_v13 = vmul.f32 %v7324_v31, %v2691_v29  ;;  %v3061_v1 = vsub.f32 1.0, %v3060_v34  ;;  %v7357_v62 = vpop.eup %5177  ;;  %vm7405_vm12 = vmor %vm3064_vm1, %vm3065_vm8  ;;  %vm2699_vm11 = vcmp.eq.f32.partialorder %v2698_v11, 8.507059e+37  ;;  %v3071_v29 = vor.u32 1.1754944e-38, %v3070_v7 }
 0xdcf   :  { %vm3069_vm13 = vcmp.eq.f32.partialorder %v3068_v40, 8.507059e+37  ;;  %vm3078_vm15 = vweird.f32 %v7329_v17  ;;  %v3082_v7 = vand.u32 2147483647, %v7329_v17  ;;  %vm2708_vm4 = vweird.f32 %v7327_v19 }
 0xdd0   :  { %v2693_v42 = vadd.f32 %v7324_v31, %v2692_v13  ;;  %v3062_v59 = vmul.f32 %v5174_v57, %v3061_v1  ;;  %v2712_v56 = vand.u32 2147483647, %v7327_v19 }
 0xdd1   :  { %v7369_v48 = vpop.eup %5179  ;;  %vm3083_vm9 = vcmp.eq.f32.partialorder %v3082_v7, 8.507059e+37 }
 0xdd2   :  { %v7381_v0 = vpop.eup %5181  ;;  %v7389_v33 = vpop.xlane.xlu1 %3009  ;;  %v3063_v55 = vadd.f32 %v5174_v57, %v3062_v59  ;;  %v2697_v36 = vsel %vm7391_vm10, %v7324_v31, %v2693_v42  ;;  %v3058_v31 = vsel %vm7352_vm3, %v3057_v25, %v3053_v52  ;;  %v3690_v42 = vsub.f32 %v7039_v15, %v7160_v2 }
 0xdd3   :  { %v3074_v23 = vmul.f32 %v7381_v0, %v7329_v17  ;;  %3857 = vrot.lane.b32.xlu1 %v6783_v54, %s5327_s13  ;;  %5183 = vrcp.f32 %v7389_v33  ;;  %v2704_v54 = vmul.f32 %v7369_v48, %v7327_v19  ;;  %v7418_v34 = vpop.xlane.xlu0 %3012  ;;  %v2702_v3 = vsel %vm2699_vm11, %v2701_v26, %v2697_v36 }
 0xdd4   :  { %3722 = vadd.xlane.f32.xlu0 %v3721_v12  ;;  %v3067_v20 = vsel %vm7405_vm12, %v5174_v57, %v3063_v55  ;;  %v2761_v12 = vmul.f32 %v7094_v28, %v2688_v46  ;;  %v2762_v13 = vmul.f32 %v7102_v22, %v2702_v3  ;;  %v3131_v57 = vmul.f32 %v7092_v21, %v3058_v31 }
 0xdd5   :  { %v3075_v8 = vsub.f32 1.0, %v3074_v23  ;;  %v3072_v1 = vsel %vm3069_vm13, %v3071_v29, %v3067_v20  ;;  %v2705_v39 = vsub.f32 1.0, %v2704_v54  ;;  %5185 = vrcp.f32 %v7418_v34 }
 0xdd6   :  { %v3132_v63 = vmul.f32 %v7104_v35, %v3072_v1  ;;  %v2768_v10 = vpack.c.bf16 %v2762_v13, %v2761_v12  ;;  %v3372_v21 = vsel %vm293_vm2, %v7357_v62, 0.0  ;;  %vm3079_vm14 = vweird.f32 %v7381_v0 }
 0xdd7   :  { %v3076_v58 = vmul.f32 %v7381_v0, %v3075_v8  ;;  %v3084_v59 = vand.u32 2147483648, %v7329_v17  ;;  %v3730_v52 = vsel %vm293_vm2, %v7350_v24, 0.0  ;;  %vm2709_vm5 = vweird.f32 %v7369_v48  ;;  %vm7455_vm6 = vmor %vm3078_vm15, %vm3079_vm14 }
 0xdd8   :  { %v3138_v22 = vpack.c.bf16 %v3132_v63, %v3131_v57  ;;  %4824 = vmatmul.msk.bf16.gmra.mxu2 %vm293_vm2, %v2768_v10  ;;  %vm3092_vm7 = vweird.f32 %v7389_v33  ;;  %v3098_v2 = vand.u32 2147483648, %v7389_v33  ;;  %v3096_v23 = vand.u32 2147483647, %v7389_v33  ;;  %vm7488_vm10 = vmor %vm2708_vm4, %vm2709_vm5 }
 0xdd9   :  { %3859 = vrot.lane.b32.xlu2 %v6779_v4, %s5327_s13  ;;  %v5184_v25 = vpop.eup %5183  ;;  %v2706_v4 = vmul.f32 %v7369_v48, %v2705_v39  ;;  %v3077_v35 = vadd.f32 %v7381_v0, %v3076_v58  ;;  %v3085_v46 = vor.u32 1.1754944e-38, %v3084_v59  ;;  %v2714_v3 = vand.u32 2147483648, %v7327_v19 }
 0xdda   :  { %v7428_v53 = vpop.xlane.xlu1 %2639  ;;  %v3088_v28 = vmul.f32 %v5184_v25, %v7389_v33  ;;  %4832 = vmatmul.msk.bf16.gmra.mxu1 %vm293_vm2, %v3138_v22  ;;  %vm3093_vm3 = vweird.f32 %v5184_v25  ;;  %v3099_v12 = vor.u32 1.1754944e-38, %v3098_v2  ;;  %vm3097_vm1 = vcmp.eq.f32.partialorder %v3096_v23, 8.507059e+37 }
 0xddb   :  { %v7431_v16 = vpop.xlane.xlu2 %3015  ;;  %5187 = vrcp.f32 %v7428_v53  ;;  %v7447_v11 = vpop.eup %5185  ;;  %v2707_v55 = vadd.f32 %v7369_v48, %v2706_v4  ;;  %v3081_v17 = vsel %vm7455_vm6, %v7381_v0, %v3077_v35  ;;  %vm7469_vm8 = vmor %vm3092_vm7, %vm3093_vm3  ;;  %v2726_v58 = vand.u32 2147483647, %v7428_v53 }
 0xddc   :  { %3373 = vadd.xlane.f32.xlu0 %v3372_v21  ;;  %v3089_v49 = vsub.f32 1.0, %v3088_v28  ;;  %5189 = vrcp.f32 %v7431_v16  ;;  %v3102_v54 = vmul.f32 %v7447_v11, %v7418_v34  ;;  %v3086_v1 = vsel %vm3083_vm9, %v3085_v46, %v3081_v17 }
 0xddd   :  { %v2711_v57 = vsel %vm7488_vm10, %v7369_v48, %v2707_v55  ;;  %v3133_v22 = vmul.f32 %v7114_v37, %v3086_v1  ;;  %v3687_v48 = vsub.f32 %v7009_v6, %v7148_v30  ;;  %vm2713_vm11 = vcmp.eq.f32.partialorder %v2712_v56, 8.507059e+37 }
 0xdde   :  { %v3090_v14 = vmul.f32 %v5184_v25, %v3089_v49  ;;  %v3103_v63 = vsub.f32 1.0, %v3102_v54  ;;  %v2715_v35 = vor.u32 1.1754944e-38, %v2714_v3  ;;  %vm2722_vm13 = vweird.f32 %v7428_v53 }
 0xddf   :  { %vm2727_vm15 = vcmp.eq.f32.partialorder %v2726_v58, 8.507059e+37  ;;  %v3124_v17 = vand.u32 2147483647, %v7431_v16  ;;  %vm3106_vm4 = vweird.f32 %v7418_v34  ;;  %vm3107_vm5 = vweird.f32 %v7447_v11 }
 0xde0   :  { %v3091_v40 = vadd.f32 %v5184_v25, %v3090_v14  ;;  %v3703_v14 = vmul.f32 1.442695, %v3690_v42  ;;  %v2716_v30 = vsel %vm2713_vm11, %v2715_v35, %v2711_v57  ;;  %vm3120_vm6 = vweird.f32 %v7431_v16 }
 0xde1   :  { %v7466_v36 = vpop.xlane.xlu0 %2645  ;;  %v5188_v26 = vpop.eup %5187  ;;  %v2763_v46 = vmul.f32 %v7111_v44, %v2716_v30  ;;  %v3110_v29 = vand.u32 2147483647, %v7418_v34  ;;  %v3112_v44 = vand.u32 2147483648, %v7418_v34 }
 0xde2   :  { %v7475_v8 = vpop.xlane.xlu1 %2642  ;;  %5191 = vrcp.f32 %v7466_v36  ;;  %v7478_v0 = vpop.eup %5189  ;;  %v3095_v33 = vsel %vm7469_vm8, %v5184_v25, %v3091_v40  ;;  %v2718_v31 = vmul.f32 %v5188_v26, %v7428_v53  ;;  %v2728_v25 = vand.u32 2147483648, %v7428_v53 }
 0xde3   :  { %5193 = vrcp.f32 %v7475_v8  ;;  %v3116_v13 = vmul.f32 %v7478_v0, %v7431_v16  ;;  %v3100_v28 = vsel %vm3097_vm1, %v3099_v12, %v3095_v33  ;;  %vm2723_vm12 = vweird.f32 %v5188_v26  ;;  %v7514_v6 = vpop.permute.xlu2 %3501  ;;  %vm7552_vm1 = vmor %vm3106_vm4, %vm3107_vm5 }
 0xde4   :  { %3731 = vadd.xlane.f32.xlu0 %v3730_v52  ;;  %v2719_v39 = vsub.f32 1.0, %v2718_v31  ;;  %v3134_v21 = vmul.f32 %v7122_v5, %v3100_v28  ;;  %vm2724_vm14 = vmor %vm2722_vm13, %vm2723_vm12  ;;  %v2729_v5 = vor.u32 1.1754944e-38, %v2728_v25  ;;  %v3104_v53 = vmul.f32 %v7447_v11, %v3103_v63 }
 0xde5   :  { %v3117_v10 = vsub.f32 1.0, %v3116_v13  ;;  %vm3121_vm3 = vweird.f32 %v7478_v0  ;;  %5195 = vpow2.f32 %v3703_v14  ;;  %vm7538_vm8 = vcmp.eq.f32.partialorder %v3124_v17, 8.507059e+37 }
 0xde6   :  { %v2720_v19 = vmul.f32 %v5188_v26, %v2719_v39  ;;  %v3139_v37 = vpack.c.bf16 %v3134_v21, %v3133_v22  ;;  %v3105_v33 = vadd.f32 %v7447_v11, %v3104_v53  ;;  %vm7534_vm7 = vmor %vm3120_vm6, %vm3121_vm3  ;;  %v2742_v39 = vand.u32 2147483648, %v7475_v8 }
 0xde7   :  { %v3118_v52 = vmul.f32 %v7478_v0, %v3117_v10  ;;  %vm2750_vm12 = vweird.f32 %v7466_v36  ;;  %vm2736_vm11 = vweird.f32 %v7475_v8  ;;  %v2740_v63 = vand.u32 2147483647, %v7475_v8 }
 0xde8   :  { %v7502_v4 = vpop.eup %5191  ;;  %v2721_v59 = vadd.f32 %v5188_v26, %v2720_v19  ;;  %v3109_v58 = vsel %vm7552_vm1, %v7447_v11, %v3105_v33  ;;  %v2754_v25 = vand.u32 2147483647, %v7466_v36  ;;  %v3697_v28 = vmul.f32 1.442695, %v3687_v48 }
 0xde9   :  { %v7507_v49 = vpop.eup %5193  ;;  %v2746_v7 = vmul.f32 %v7502_v4, %v7466_v36  ;;  %v3119_v42 = vadd.f32 %v7478_v0, %v3118_v52  ;;  %vm2751_vm9 = vweird.f32 %v7502_v4  ;;  %v3113_v19 = vor.u32 1.1754944e-38, %v3112_v44 }
 0xdea   :  { %v2732_v15 = vmul.f32 %v7507_v49, %v7475_v8  ;;  %v2725_v2 = vsel %vm2724_vm14, %v5188_v26, %v2721_v59  ;;  %4833 = vmatmul.msk.bf16.gmra.mxu1 %vm293_vm2, %v3139_v37  ;;  %v3126_v26 = vand.u32 2147483648, %v7431_v16  ;;  %vm2737_vm10 = vweird.f32 %v7507_v49  ;;  %vm7564_vm13 = vmor %vm2750_vm12, %vm2751_vm9 }
 0xdeb   :  { %v2747_v55 = vsub.f32 1.0, %v2746_v7  ;;  %v2730_v23 = vsel %vm2727_vm15, %v2729_v5, %v2725_v2  ;;  %v3123_v16 = vsel %vm7534_vm7, %v7478_v0, %v3119_v42  ;;  %v2756_v0 = vand.u32 2147483648, %v7466_v36  ;;  %v7569_v10 = vpop.eup %5195  ;;  %vm7573_vm14 = vmor %vm2736_vm11, %vm2737_vm10  ;;  %v3500_v11 = vpop.permute.xlu2 %3499 }
 0xdec   :  { %v2733_v40 = vsub.f32 1.0, %v2732_v15  ;;  %v2764_v20 = vmul.f32 %v7132_v45, %v2730_v23  ;;  %v3127_v57 = vor.u32 1.1754944e-38, %v3126_v26  ;;  %vm3111_vm15 = vcmp.eq.f32.partialorder %v3110_v29, 8.507059e+37 }
 0xded   :  { %v2748_v56 = vmul.f32 %v7502_v4, %v2747_v55  ;;  %v2743_v35 = vor.u32 1.1754944e-38, %v2742_v39  ;;  %v2757_v59 = vor.u32 1.1754944e-38, %v2756_v0  ;;  %v3114_v52 = vsel %vm3111_vm15, %v3113_v19, %v3109_v58 }
 0xdee   :  { %v2734_v54 = vmul.f32 %v7507_v49, %v2733_v40  ;;  %v2769_v31 = vpack.c.bf16 %v2764_v20, %v2763_v46  ;;  %v3128_v8 = vsel %vm7538_vm8, %v3127_v57, %v3123_v16  ;;  %vm2741_vm3 = vcmp.eq.f32.partialorder %v2740_v63, 8.507059e+37 }
 0xdef   :  { %v2749_v13 = vadd.f32 %v7502_v4, %v2748_v56  ;;  %vm2755_vm4 = vcmp.eq.f32.partialorder %v2754_v25, 8.507059e+37  ;;  %v3136_v7 = vmul.f32 %v7134_v47, %v3128_v8  ;;  %5197 = vpow2.f32 %v3697_v28 }
 0xdf0   :  { %v2735_v12 = vadd.f32 %v7507_v49, %v2734_v54  ;;  %4825 = vmatmul.msk.bf16.gmra.mxu2 %vm293_vm2, %v2769_v31  ;;  %v3333_v37 = vsub.f32 %v7054_v43, %v7165_v61  ;;  %v3724_v47 = vsel %vm293_vm2, %v7569_v10, 0.0 }
 0xdf1   :  { %v2753_v48 = vsel %vm7564_vm13, %v7502_v4, %v2749_v13 }
 0xdf2   :  { %v2739_v36 = vsel %vm7573_vm14, %v7507_v49, %v2735_v12  ;;  %v2758_v5 = vsel %vm2755_vm4, %v2757_v59, %v2753_v48  ;;  %v3135_v49 = vmul.f32 %v7125_v60, %v3114_v52  ;;  %v3347_v2 = vmul.f32 1.442695, %v3333_v37 }
 0xdf3   :  { %v2744_v14 = vsel %vm2741_vm3, %v2743_v35, %v2739_v36  ;;  %v2766_v53 = vmul.f32 %v7142_v51, %v2758_v5  ;;  %v3862_v61 = vpop.permute.xlu2 %3861 }
 0xdf4   :  { %v3504_v21 = vpop.permute.xlu0 %3503  ;;  %v3140_v4 = vpack.c.bf16 %v3136_v7, %v3135_v49  ;;  %v2765_v30 = vmul.f32 %v7140_v9, %v2744_v14  ;;  %5199 = vpow2.f32 %v3347_v2 }
 0xdf5   :  { %3528 = vmatpush.bf16.msra.mxu2 %v3504_v21  ;;  %v7595_v43 = vpop.eup %5197 }
 0xdf6   :  { %v2770_v60 = vpack.c.bf16 %v2766_v53, %v2765_v30  ;;  %v3715_v9 = vsel %vm293_vm2, %v7595_v43, 0.0 }
 0xdf9   :  { %3529 = vmatpush.bf16.msra.mxu2 %v7514_v6  ;;  %v3691_v6 = vsub.f32 %v7045_v41, %v7162_v38 }
 0xdfa   :  { %v3864_v15 = vpop.permute.xlu1 %3863  ;;  %4834 = vmatmul.msk.bf16.gmra.mxu1 %vm293_vm2, %v3140_v4  ;;  %v7602_v55 = vpop.eup %5199 }
 0xdfb   :  { %3885 = vmatpush.bf16.msra.mxu1 %v3864_v15  ;;  %v3705_v51 = vmul.f32 1.442695, %v3691_v6  ;;  %v3369_v17 = vsel %vm293_vm2, %v7602_v55, 0.0 }
 0xdfd   :  { %3725 = vadd.xlane.f32.xlu1 %v3724_v47  ;;  %3530 = vmatpush.bf16.msra.mxu2 %v3500_v11  ;;  %5201 = vpow2.f32 %v3705_v51 }
 0xdff   :  { %3886 = vmatpush.bf16.msra.mxu1 %v3862_v61 }
 0xe00   :  { %4826 = vmatmul.msk.bf16.gmra.mxu2 %vm293_vm2, %v2770_v60 }
 0xe02   :  { %3716 = vadd.xlane.f32.xlu2 %v3715_v9 }
 0xe03   :  { %v7606_v40 = vpop.eup %5201 }
 0xe04   :  { %v3727_v41 = vsel %vm293_vm2, %v7606_v40, 0.0 }
 0xe0a   :  { %3370 = vadd.xlane.f32.xlu2 %v3369_v17 }
 0xe12   :  { %3728 = vadd.xlane.f32.xlu2 %v3727_v41 }
 0xe1f   :  { %v7610_v38 = vpop.xlane.xlu0 %3710 }
 0xe20   :  { %v3742_v59 = vand.u32 2147483647, %v7610_v38  ;;  %v3744_v53 = vand.u32 2147483648, %v7610_v38  ;;  %vm3738_vm13 = vweird.f32 %v7610_v38 }
 0xe22   :  { %vm7654_vm14 = vcmp.eq.f32.partialorder %v3742_v59, 8.507059e+37 }
 0xe25   :  { %v3356_v23 = vpop.xlane.xlu1 %3355 }
 0xe26   :  { %5203 = vrcp.f32 %v3356_v23  ;;  %vm3394_vm6 = vweird.f32 %v3356_v23  ;;  %v3400_v39 = vand.u32 2147483648, %v3356_v23  ;;  %v3398_v0 = vand.u32 2147483647, %v3356_v23 }
 0xe27   :  { %v7612_v42 = vpop.xlane.xlu0 %3358  ;;  %5205 = vrcp.f32 %v7610_v38 }
 0xe28   :  { %5207 = vrcp.f32 %v7612_v42  ;;  %v3401_v36 = vor.u32 1.1754944e-38, %v3400_v39  ;;  %vm3399_vm9 = vcmp.eq.f32.partialorder %v3398_v0, 8.507059e+37 }
 0xe2c   :  { %v5204_v56 = vpop.eup %5203  ;;  %v3353_v46 = vpop.xlane.xlu2 %3352 }
 0xe2d   :  { %v3390_v20 = vmul.f32 %v5204_v56, %v3356_v23  ;;  %v7616_v26 = vpop.xlane.xlu1 %3361  ;;  %5209 = vrcp.f32 %v3353_v46  ;;  %v7618_v54 = vpop.eup %5205  ;;  %vm3395_vm5 = vweird.f32 %v5204_v56  ;;  %v3386_v28 = vand.u32 2147483648, %v3353_v46 }
 0xe2e   :  { %5211 = vrcp.f32 %v7616_v26  ;;  %v3734_v29 = vmul.f32 %v7618_v54, %v7610_v38  ;;  %v7625_v45 = vpop.eup %5207  ;;  %vm7634_vm7 = vmor %vm3394_vm6, %vm3395_vm5  ;;  %v3384_v21 = vand.u32 2147483647, %v3353_v46  ;;  %vm3380_vm10 = vweird.f32 %v3353_v46 }
 0xe2f   :  { %v3391_v33 = vsub.f32 1.0, %v3390_v20  ;;  %v7621_v31 = vpop.xlane.xlu0 %3719  ;;  %v3404_v25 = vmul.f32 %v7625_v45, %v7612_v42  ;;  %v3387_v7 = vor.u32 1.1754944e-38, %v3386_v28  ;;  %vm3739_vm11 = vweird.f32 %v7618_v54 }
 0xe30   :  { %v3735_v57 = vsub.f32 1.0, %v3734_v29  ;;  %vm3385_vm12 = vcmp.eq.f32.partialorder %v3384_v21, 8.507059e+37  ;;  %vm7661_vm15 = vmor %vm3738_vm13, %vm3739_vm11  ;;  %vm3422_vm4 = vweird.f32 %v7616_v26  ;;  %v3426_v20 = vand.u32 2147483647, %v7616_v26 }
 0xe31   :  { %v3392_v44 = vmul.f32 %v5204_v56, %v3391_v33  ;;  %v3405_v14 = vsub.f32 1.0, %v3404_v25  ;;  %v3428_v33 = vand.u32 2147483648, %v7616_v26 }
 0xe32   :  { %v3736_v8 = vmul.f32 %v7618_v54, %v3735_v57  ;;  %v3414_v57 = vand.u32 2147483648, %v7612_v42  ;;  %vm3427_vm11 = vcmp.eq.f32.partialorder %v3426_v20, 8.507059e+37  ;;  %v8346_v20 = vld [vmem:[#allocation19_spill] sm:$0xff] }
 0xe33   :  { %v5210_v3 = vpop.eup %5209  ;;  %v3393_v12 = vadd.f32 %v5204_v56, %v3392_v44 }
 0xe34   :  { %v7627_v16 = vpop.eup %5211  ;;  %v3376_v13 = vmul.f32 %v5210_v3, %v3353_v46  ;;  %v7629_v1 = vpop.xlane.xlu2 %3713  ;;  %vm3381_vm8 = vweird.f32 %v5210_v3  ;;  %v3737_v15 = vadd.f32 %v7618_v54, %v3736_v8 }
 0xe35   :  { %v3418_v58 = vmul.f32 %v7627_v16, %v7616_v26  ;;  %5213 = vrcp.f32 %v7629_v1  ;;  %v3397_v22 = vsel %vm7634_vm7, %v5204_v56, %v3393_v12  ;;  %vm3382_vm1 = vmor %vm3380_vm10, %vm3381_vm8  ;;  %v3756_v23 = vand.u32 2147483647, %v7629_v1  ;;  %v8342_v26 = vld [vmem:[#allocation15_spill] sm:$0xff] }
 0xe36   :  { %v3377_v63 = vsub.f32 1.0, %v3376_v13  ;;  %v3402_v52 = vsel %vm3399_vm9, %v3401_v36, %v3397_v22  ;;  %v3741_v41 = vsel %vm7661_vm15, %v7618_v54, %v3737_v15  ;;  %v3745_v56 = vor.u32 1.1754944e-38, %v3744_v53  ;;  %v8345_v15 = vld [vmem:[#allocation16_spill] sm:$0xff] }
 0xe37   :  { %v7640_v19 = vpop.xlane.xlu0 %3364  ;;  %v3419_v48 = vsub.f32 1.0, %v3418_v58  ;;  %v3488_v2 = vmul.f32 %v7194_v50, %v3402_v52  ;;  %v3406_v50 = vmul.f32 %v7625_v45, %v3405_v14  ;;  %vm3423_vm5 = vweird.f32 %v7627_v16 }
 0xe38   :  { %v3378_v11 = vmul.f32 %v5210_v3, %v3377_v63  ;;  %5215 = vrcp.f32 %v7640_v19  ;;  %vm3752_vm6 = vweird.f32 %v7629_v1  ;;  %v3746_v54 = vsel %vm7654_vm14, %v3745_v56, %v3741_v41  ;;  %vm7688_vm9 = vmor %vm3422_vm4, %vm3423_vm5 }
 0xe39   :  { %v3420_v47 = vmul.f32 %v7627_v16, %v3419_v48  ;;  %v3407_v44 = vadd.f32 %v7625_v45, %v3406_v50  ;;  %vm3409_vm7 = vweird.f32 %v7625_v45  ;;  %vm3757_vm10 = vcmp.eq.f32.partialorder %v3756_v23, 8.507059e+37 }
 0xe3a   :  { %v3379_v35 = vadd.f32 %v5210_v3, %v3378_v11  ;;  %v3412_v63 = vand.u32 2147483647, %v7612_v42  ;;  %v3845_v28 = vmul.f32 %v8342_v26, %v3746_v54  ;;  %v3429_v22 = vor.u32 1.1754944e-38, %v3428_v33  ;;  %v8343_v11 = vld [vmem:[#allocation17_spill] sm:$0xff] }
 0xe3b   :  { %v5214_v37 = vpop.eup %5213  ;;  %v3421_v46 = vadd.f32 %v7627_v16, %v3420_v47  ;;  %v3415_v48 = vor.u32 1.1754944e-38, %v3414_v57  ;;  %v3442_v51 = vand.u32 2147483648, %v7640_v19  ;;  %vm3436_vm5 = vweird.f32 %v7640_v19 }
 0xe3c   :  { %v3383_v5 = vsel %vm3382_vm1, %v5210_v3, %v3379_v35  ;;  %v3860_v49 = vpop.permute.xlu2 %3859  ;;  %v3748_v30 = vmul.f32 %v5214_v37, %v7629_v1  ;;  %vm3753_vm3 = vweird.f32 %v5214_v37  ;;  %vm3408_vm1 = vweird.f32 %v7612_v42 }
 0xe3d   :  { %v3388_v4 = vsel %vm3385_vm12, %v3387_v7, %v3383_v5  ;;  %3887 = vmatpush.bf16.msra.mxu1 %v3860_v49  ;;  %vm3754_vm8 = vmor %vm3752_vm6, %vm3753_vm3  ;;  %v3425_v34 = vsel %vm7688_vm9, %v7627_v16, %v3421_v46  ;;  %vm3413_vm13 = vcmp.eq.f32.partialorder %v3412_v63, 8.507059e+37  ;;  %v8344_v5 = vld [vmem:[#allocation18_spill] sm:$0xff]  ;;  %v3440_v50 = vand.u32 2147483647, %v7640_v19 }
 0xe3e   :  { %v3487_v61 = vmul.f32 %v7190_v18, %v3388_v4  ;;  %v3749_v6 = vsub.f32 1.0, %v3748_v30  ;;  %v3758_v18 = vand.u32 2147483648, %v7629_v1  ;;  %v7683_v13 = vpop.eup %5215  ;;  %vm3410_vm12 = vmor %vm3408_vm1, %vm3409_vm7  ;;  %v3430_v35 = vsel %vm3427_vm11, %v3429_v22, %v3425_v34 }
 0xe3f   :  { %v7659_v9 = vpop.xlane.xlu0 %3367  ;;  %v3411_v36 = vsel %vm3410_vm12, %v7625_v45, %v3407_v44  ;;  %v3432_v42 = vmul.f32 %v7683_v13, %v7640_v19  ;;  %v3490_v49 = vmul.f32 %v8344_v5, %v3430_v35  ;;  %vm3437_vm15 = vweird.f32 %v7683_v13 }
 0xe40   :  { %v3495_v17 = vpack.c.bf16 %v3488_v2, %v3487_v61  ;;  %5217 = vrcp.f32 %v7659_v9  ;;  %v3750_v38 = vmul.f32 %v5214_v37, %v3749_v6  ;;  %v3759_v3 = vor.u32 1.1754944e-38, %v3758_v18  ;;  %vm3438_vm6 = vmor %vm3436_vm5, %vm3437_vm15 }
 0xe41   :  { %v3416_v7 = vsel %vm3413_vm13, %v3415_v48, %v3411_v36  ;;  %v3456_v47 = vand.u32 2147483648, %v7659_v9  ;;  %vm3450_vm3 = vweird.f32 %v7659_v9  ;;  %v3454_v6 = vand.u32 2147483647, %v7659_v9 }
 0xe42   :  { %4839 = vmatmul.msk.bf16.vlgmr.msra.gmra.mxu2 %vm293_vm2, %v3495_v17  ;;  %v3751_v29 = vadd.f32 %v5214_v37, %v3750_v38  ;;  %v3489_v4 = vmul.f32 %v8345_v15, %v3416_v7  ;;  %v3443_v38 = vor.u32 1.1754944e-38, %v3442_v51  ;;  %5219 = vrcp.f32 %v7621_v31 }
 0xe43   :  { %v3457_v18 = vor.u32 1.1754944e-38, %v3456_v47  ;;  %vm3455_vm7 = vcmp.eq.f32.partialorder %v3454_v6, 8.507059e+37  ;;  %v3786_v22 = vand.u32 2147483648, %v7621_v31  ;;  %v8349_v6 = vld [vmem:[#allocation20_spill] sm:$0xff] }
 0xe44   :  { %v3174_v12 = vpop.f32.mrf.mxu1  ;;  %v3755_v1 = vsel %vm3754_vm8, %v5214_v37, %v3751_v29  ;;  %v3433_v37 = vsub.f32 1.0, %v3432_v42  ;;  %v3496_v53 = vpack.c.bf16 %v3490_v49, %v3489_v4  ;;  %vm3441_vm8 = vcmp.eq.f32.partialorder %v3440_v50, 8.507059e+37 }
 0xe45   :  { %v3858_v0 = vpop.permute.xlu1 %3857  ;;  %3202 = vrot.lane.b32.xlu0 %v3174_v12, %s5326_s20  ;;  %v3760_v25 = vsel %vm3757_vm10, %v3759_v3, %v3755_v1  ;;  %vm3780_vm10 = vweird.f32 %v7621_v31 }
 0xe46   :  { %v5218_v58 = vpop.eup %5217  ;;  %3888 = vmatpush.bf16.msra.mxu1 %v3858_v0  ;;  %v3846_v21 = vmul.f32 %v8343_v11, %v3760_v25  ;;  %v3434_v30 = vmul.f32 %v7683_v13, %v3433_v37 }
 0xe47   :  { %v3446_v8 = vmul.f32 %v5218_v58, %v7659_v9  ;;  %vm3451_vm14 = vweird.f32 %v5218_v58  ;;  %v7727_v44 = vpop.xlane.xlu0 %3722 }
 0xe48   :  { %v3853_v16 = vpack.c.bf16 %v3846_v21, %v3845_v28  ;;  %v3435_v60 = vadd.f32 %v7683_v13, %v3434_v30  ;;  %vm3452_vm4 = vmor %vm3450_vm3, %vm3451_vm14  ;;  %v5220_v3 = vpop.eup %5219  ;;  %v3784_v21 = vand.u32 2147483647, %v7621_v31 }
 0xe49   :  { %v3447_v59 = vsub.f32 1.0, %v3446_v8  ;;  %vm3781_vm9 = vweird.f32 %v5220_v3 }
 0xe4a   :  { %4847 = vmatmul.msk.bf16.vlgmr.msra.gmra.mxu1 %vm293_vm2, %v3853_v16  ;;  %v3439_v41 = vsel %vm3438_vm6, %v7683_v13, %v3435_v60  ;;  %v3776_v13 = vmul.f32 %v5220_v3, %v7621_v31  ;;  %vm3782_vm1 = vmor %vm3780_vm10, %vm3781_vm9  ;;  %vm3785_vm12 = vcmp.eq.f32.partialorder %v3784_v21, 8.507059e+37 }
 0xe4b   :  { %v2816_v52 = vpop.f32.mrf.mxu2  ;;  %v3448_v45 = vmul.f32 %v5218_v58, %v3447_v59  ;;  %v3444_v9 = vsel %vm3441_vm8, %v3443_v38, %v3439_v41 }
 0xe4c   :  { %2844 = vrot.lane.b32.xlu2 %v2816_v52, %s5326_s20  ;;  %v3176_v14 = vpop.f32.mrf.mxu1  ;;  %v3491_v33 = vmul.f32 %v8346_v20, %v3444_v9  ;;  %v3777_v39 = vsub.f32 1.0, %v3776_v13  ;;  %v3787_v52 = vor.u32 1.1754944e-38, %v3786_v22 }
 0xe4d   :  { %3204 = vrot.lane.b32.xlu1 %v3176_v14, %s5326_s20  ;;  %v3449_v2 = vadd.f32 %v5218_v58, %v3448_v45 }
 0xe4e   :  { %v3778_v63 = vmul.f32 %v5220_v3, %v3777_v39 }
 0xe4f   :  { %v3453_v17 = vsel %vm3452_vm4, %v5218_v58, %v3449_v2  ;;  %v7734_v57 = vpop.xlane.xlu0 %3373 }
 0xe50   :  { %v3458_v23 = vsel %vm3455_vm7, %v3457_v18, %v3453_v17  ;;  %5221 = vrcp.f32 %v7734_v57  ;;  %v3779_v26 = vadd.f32 %v5220_v3, %v3778_v63  ;;  %vm3478_vm3 = vweird.f32 %v7734_v57 }
 0xe51   :  { %v3492_v46 = vmul.f32 %v7274_v32, %v3458_v23  ;;  %v3484_v9 = vand.u32 2147483648, %v7734_v57 }
 0xe52   :  { %4840 = vmatmul.msk.bf16.gmra.mxu2 %vm293_vm2, %v3496_v53  ;;  %v3783_v48 = vsel %vm3782_vm1, %v5220_v3, %v3779_v26 }
 0xe53   :  { %v2818_v61 = vpop.f32.mrf.mxu2  ;;  %v3497_v29 = vpack.c.bf16 %v3492_v46, %v3491_v33  ;;  %v3788_v14 = vsel %vm3785_vm12, %v3787_v52, %v3783_v48  ;;  %v3482_v46 = vand.u32 2147483647, %v7734_v57  ;;  %v3485_v39 = vor.u32 1.1754944e-38, %v3484_v9 }
 0xe54   :  { %2846 = vrot.lane.b32.xlu0 %v2818_v61, %s5326_s20  ;;  %v3848_v51 = vmul.f32 %v8349_v6, %v3788_v14 }
 0xe55   :  { %vm3483_vm7 = vcmp.eq.f32.partialorder %v3482_v46, 8.507059e+37 }
 0xe56   :  { %v7741_v25 = vpop.eup %5221 }
 0xe57   :  { %v3179_v56 = vpop.f32.mrf.mxu1  ;;  %v3474_v28 = vmul.f32 %v7741_v25, %v7734_v57  ;;  %vm3479_vm14 = vweird.f32 %v7741_v25  ;;  %v7772_v17 = vpop.xlane.xlu0 %3731 }
 0xe58   :  { %3206 = vrot.lane.b32.xlu2 %v3179_v56, %s5326_s20  ;;  %vm7786_vm5 = vmor %vm3478_vm3, %vm3479_vm14  ;;  %vm3794_vm14 = vweird.f32 %v7727_v44 }
 0xe59   :  { %v3475_v16 = vsub.f32 1.0, %v3474_v28 }
 0xe5b   :  { %v2821_v54 = vpop.f32.mrf.mxu2  ;;  %v3476_v5 = vmul.f32 %v7741_v25, %v3475_v16  ;;  %v3800_v16 = vand.u32 2147483648, %v7727_v44 }
 0xe5d   :  { %v3477_v50 = vadd.f32 %v7741_v25, %v3476_v5 }
 0xe5f   :  { %v3181_v19 = vpop.f32.mrf.mxu1 }
 0xe60   :  { %2848 = vrot.lane.b32.xlu2 %v2821_v54, %s5326_s20  ;;  %3208 = vrot.lane.b32.xlu1 %v3181_v19, %s5326_s20 }
 0xe62   :  { %4841 = vmatmul.msk.bf16.gmra.mxu2 %vm293_vm2, %v3497_v29 }
 0xe63   :  { %v2823_v32 = vpop.f32.mrf.mxu2 }
 0xe67   :  { %v3184_v12 = vpop.f32.mrf.mxu1 }
 0xe68   :  { %3210 = vrot.lane.b32.xlu0 %v3184_v12, %s5326_s20  ;;  %v3481_v12 = vsel %vm7786_vm5, %v7741_v25, %v3477_v50 }
 0xe69   :  { %v3486_v26 = vsel %vm3483_vm7, %v3485_v39, %v3481_v12 }
 0xe6a   :  { %v3494_v52 = vmul.f32 %v7357_v62, %v3486_v26  ;;  %v3801_v62 = vor.u32 1.1754944e-38, %v3800_v16 }
 0xe6f   :  { %v3186_v1 = vpop.f32.mrf.mxu1 }
 0xe70   :  { %2850 = vrot.lane.b32.xlu0 %v2823_v32, %s5326_s20  ;;  %3212 = vrot.lane.b32.xlu2 %v3186_v1, %s5326_s20  ;;  %v7739_v0 = vpop.xlane.xlu1 %3725 }
 0xe71   :  { %v3814_v22 = vand.u32 2147483648, %v7739_v0 }
 0xe73   :  { %v2826_v58 = vpop.f32.mrf.mxu2  ;;  %v3815_v14 = vor.u32 1.1754944e-38, %v3814_v22 }
 0xe75   :  { %v3717_v34 = vpop.xlane.xlu2 %3716 }
 0xe76   :  { %5223 = vrcp.f32 %v3717_v34  ;;  %v3772_v45 = vand.u32 2147483648, %v3717_v34  ;;  %v3770_v4 = vand.u32 2147483647, %v3717_v34  ;;  %vm3766_vm13 = vweird.f32 %v3717_v34 }
 0xe77   :  { %5225 = vrcp.f32 %v7739_v0  ;;  %v3189_v11 = vpop.f32.mrf.mxu1 }
 0xe78   :  { %5227 = vrcp.f32 %v7727_v44  ;;  %2852 = vrot.lane.b32.xlu2 %v2826_v58, %s5326_s20  ;;  %v3773_v41 = vor.u32 1.1754944e-38, %v3772_v45  ;;  %vm3771_vm4 = vcmp.eq.f32.partialorder %v3770_v4, 8.507059e+37 }
 0xe7b   :  { %v2828_v36 = vpop.f32.mrf.mxu2 }
 0xe7c   :  { %v5224_v8 = vpop.eup %5223  ;;  %2854 = vrot.lane.b32.xlu1 %v2828_v36, %s5326_s20  ;;  %v3812_v36 = vand.u32 2147483647, %v7739_v0 }
 0xe7d   :  { %v7751_v42 = vpop.eup %5225  ;;  %v3762_v35 = vmul.f32 %v5224_v8, %v3717_v34  ;;  %v7754_v59 = vpop.xlane.xlu2 %3370  ;;  %vm3767_vm11 = vweird.f32 %v5224_v8 }
 0xe7e   :  { %5229 = vrcp.f32 %v7754_v59  ;;  %v7757_v7 = vpop.eup %5227  ;;  %v3804_v37 = vmul.f32 %v7751_v42, %v7739_v0  ;;  %vm7766_vm15 = vmor %vm3766_vm13, %vm3767_vm11  ;;  %v3470_v19 = vand.u32 2147483648, %v7754_v59  ;;  %v3468_v13 = vand.u32 2147483647, %v7754_v59 }
 0xe7f   :  { %v3763_v31 = vsub.f32 1.0, %v3762_v35  ;;  %v3790_v15 = vmul.f32 %v7757_v7, %v7727_v44  ;;  %v3191_v61 = vpop.f32.mrf.mxu1  ;;  %vm3464_vm8 = vweird.f32 %v7754_v59  ;;  %vm3809_vm9 = vweird.f32 %v7751_v42 }
 0xe80   :  { %3214 = vrot.lane.b32.xlu2 %v3189_v11, %s5326_s20  ;;  %v3805_v2 = vsub.f32 1.0, %v3804_v37  ;;  %v3471_v34 = vor.u32 1.1754944e-38, %v3470_v19  ;;  %vm3795_vm1 = vweird.f32 %v7757_v7  ;;  %vm3469_vm12 = vcmp.eq.f32.partialorder %v3468_v13, 8.507059e+37 }
 0xe81   :  { %v3764_v49 = vmul.f32 %v5224_v8, %v3763_v31  ;;  %v3791_v56 = vsub.f32 1.0, %v3790_v15  ;;  %vm3808_vm11 = vweird.f32 %v7739_v0  ;;  %v3798_v31 = vand.u32 2147483647, %v7727_v44 }
 0xe82   :  { %v3806_v54 = vmul.f32 %v7751_v42, %v3805_v2  ;;  %vm7819_vm13 = vmor %vm3808_vm11, %vm3809_vm9  ;;  %vm3813_vm3 = vcmp.eq.f32.partialorder %v3812_v36, 8.507059e+37  ;;  %vm3836_vm9 = vweird.f32 %v7772_v17 }
 0xe83   :  { %v3765_v30 = vadd.f32 %v5224_v8, %v3764_v49  ;;  %v2831_v60 = vpop.f32.mrf.mxu2  ;;  %v3792_v57 = vmul.f32 %v7757_v7, %v3791_v56 }
 0xe84   :  { %v5230_v53 = vpop.eup %5229  ;;  %3216 = vrot.lane.b32.xlu1 %v3191_v61, %s5326_s20  ;;  %v3807_v63 = vadd.f32 %v7751_v42, %v3806_v54 }
 0xe85   :  { %v3769_v18 = vsel %vm7766_vm15, %v5224_v8, %v3765_v30  ;;  %v3460_v38 = vmul.f32 %v5230_v53, %v7754_v59  ;;  %v7778_v23 = vpop.xlane.xlu2 %3728  ;;  %vm3465_vm6 = vweird.f32 %v5230_v53  ;;  %v3793_v8 = vadd.f32 %v7757_v7, %v3792_v57  ;;  %vm3796_vm15 = vmor %vm3794_vm14, %vm3795_vm1 }
 0xe86   :  { %5231 = vrcp.f32 %v7778_v23  ;;  %v3774_v33 = vsel %vm3771_vm4, %v3773_v41, %v3769_v18  ;;  %vm7802_vm10 = vmor %vm3464_vm8, %vm3465_vm6  ;;  %v3811_v0 = vsel %vm7819_vm13, %v7751_v42, %v3807_v63  ;;  %vm3799_vm4 = vcmp.eq.f32.partialorder %v3798_v31, 8.507059e+37 }
 0xe87   :  { %v3461_v20 = vsub.f32 1.0, %v3460_v38  ;;  %5233 = vrcp.f32 %v7772_v17  ;;  %v3847_v3 = vmul.f32 %v7595_v43, %v3774_v33  ;;  %v3797_v49 = vsel %vm3796_vm15, %v7757_v7, %v3793_v8 }
 0xe88   :  { %v3816_v44 = vsel %vm3813_vm3, %v3815_v14, %v3811_v0  ;;  %v3802_v15 = vsel %vm3799_vm4, %v3801_v62, %v3797_v49  ;;  %v3828_v7 = vand.u32 2147483648, %v7778_v23  ;;  %vm3822_vm7 = vweird.f32 %v7778_v23 }
 0xe89   :  { %v3462_v32 = vmul.f32 %v5230_v53, %v3461_v20  ;;  %v3854_v1 = vpack.c.bf16 %v3848_v51, %v3847_v3  ;;  %v3850_v4 = vmul.f32 %v7569_v10, %v3816_v44  ;;  %v3826_v6 = vand.u32 2147483647, %v7778_v23 }
 0xe8a   :  { %v3842_v51 = vand.u32 2147483648, %v7772_v17  ;;  %v3829_v50 = vor.u32 1.1754944e-38, %v3828_v7 }
 0xe8b   :  { %v3463_v58 = vadd.f32 %v5230_v53, %v3462_v32  ;;  %v2833_v25 = vpop.f32.mrf.mxu2  ;;  %4848 = vmatmul.msk.bf16.gmra.mxu1 %vm293_vm2, %v3854_v1  ;;  %vm3827_vm1 = vcmp.eq.f32.partialorder %v3826_v6, 8.507059e+37 }
 0xe8c   :  { %v5232_v28 = vpop.eup %5231  ;;  %2858 = vrot.lane.b32.xlu0 %v2833_v25, %s5326_s20  ;;  %2856 = vrot.lane.b32.xlu1 %v2831_v60, %s5326_s20  ;;  %v3843_v41 = vor.u32 1.1754944e-38, %v3842_v51 }
 0xe8d   :  { %v3467_v11 = vsel %vm7802_vm10, %v5230_v53, %v3463_v58  ;;  %v5234_v21 = vpop.eup %5233  ;;  %v3818_v37 = vmul.f32 %v5232_v28, %v7778_v23  ;;  %v3849_v53 = vmul.f32 %v7261_v27, %v3802_v15  ;;  %vm3823_vm5 = vweird.f32 %v5232_v28 }
 0xe8e   :  { %v3472_v48 = vsel %vm3469_vm12, %v3471_v34, %v3467_v11  ;;  %vm3837_vm6 = vweird.f32 %v5234_v21  ;;  %vm3824_vm8 = vmor %vm3822_vm7, %vm3823_vm5  ;;  %v3840_v27 = vand.u32 2147483647, %v7772_v17 }
 0xe8f   :  { %v3493_v59 = vmul.f32 %v7602_v55, %v3472_v48  ;;  %v3832_v55 = vmul.f32 %v5234_v21, %v7772_v17  ;;  %v3819_v45 = vsub.f32 1.0, %v3818_v37  ;;  %v3855_v47 = vpack.c.bf16 %v3850_v4, %v3849_v53  ;;  %vm3838_vm10 = vmor %vm3836_vm9, %vm3837_vm6  ;;  %v8356_v17 = vld [vmem:[#allocation14_spill] sm:$0xff] }
 0xe90   :  { %vm3841_vm12 = vcmp.eq.f32.partialorder %v3840_v27, 8.507059e+37 }
 0xe91   :  { %v3498_v5 = vpack.c.bf16 %v3494_v52, %v3493_v59  ;;  %v3833_v42 = vsub.f32 1.0, %v3832_v55  ;;  %v3820_v30 = vmul.f32 %v5232_v28, %v3819_v45 }
 0xe93   :  { %4842 = vmatmul.msk.bf16.gmra.mxu2 %vm293_vm2, %v3498_v5  ;;  %v3834_v2 = vmul.f32 %v5234_v21, %v3833_v42  ;;  %v3821_v61 = vadd.f32 %v5232_v28, %v3820_v30 }
 0xe95   :  { %v3835_v60 = vadd.f32 %v5234_v21, %v3834_v2  ;;  %v3825_v10 = vsel %vm3824_vm8, %v5232_v28, %v3821_v61 }
 0xe96   :  { %v3830_v38 = vsel %vm3827_vm1, %v3829_v50, %v3825_v10 }
 0xe97   :  { %v3839_v18 = vsel %vm3838_vm10, %v5234_v21, %v3835_v60  ;;  %v3851_v9 = vmul.f32 %v7606_v40, %v3830_v38 }
 0xe98   :  { %v3844_v56 = vsel %vm3841_vm12, %v3843_v41, %v3839_v18 }
 0xe99   :  { %v3852_v23 = vmul.f32 %v7350_v24, %v3844_v56 }
 0xe9b   :  { %4849 = vmatmul.msk.bf16.gmra.mxu1 %vm293_vm2, %v3855_v47  ;;  %v3856_v46 = vpack.c.bf16 %v3852_v23, %v3851_v9 }
 0xea6   :  { %v2845_v20 = vpop.permute.xlu2 %2844 }
 0xea7   :  { %v2868_v31 = vadd.f32 %v2845_v20, %v8356_v17 }
 0xeab   :  { %4850 = vmatmul.msk.bf16.gmra.mxu1 %vm293_vm2, %v3856_v46 }
 0xeb2   :  { %v3207_v33 = vpop.permute.xlu2 %3206 }
 0xeb7   :  { %v3203_v12 = vpop.permute.xlu0 %3202 }
 0xeb8   :  { %v3226_v37 = vadd.f32 %v3203_v12, %v2868_v31 }
 0xeba   :  { %v2849_v29 = vpop.permute.xlu2 %2848 }
 0xebb   :  { %v2870_v54 = vadd.f32 %v2849_v29, %v8356_v17 }
 0xebd   :  { %v7849_v19 = vadd.f32 %v3207_v33, %v2870_v54 }
 0xebf   :  { %v3205_v44 = vpop.permute.xlu1 %3204 }
 0xec5   :  { %v3532_v32 = vpop.f32.mrf.mxu2 }
 0xec6   :  { %v2847_v24 = vpop.permute.xlu0 %2846 }
 0xec7   :  { %v3890_v3 = vpop.f32.mrf.mxu1  ;;  %v2869_v62 = vadd.f32 %v2847_v24, %v8356_v17 }
 0xec8   :  { %3918 = vrot.lane.b32.xlu2 %v3890_v3, %s5326_s20 }
 0xec9   :  { %v3227_v45 = vadd.f32 %v3205_v44, %v2869_v62 }
 0xeca   :  { %v7852_v13 = vpop.permute.xlu2 %3212 }
 0xecd   :  { %v3534_v57 = vpop.f32.mrf.mxu2 }
 0xecf   :  { %v3892_v40 = vpop.f32.mrf.mxu1 }
 0xed0   :  { %3560 = vrot.lane.b32.xlu2 %v3532_v32, %s5326_s20  ;;  %3920 = vrot.lane.b32.xlu0 %v3892_v40, %s5326_s20 }
 0xed2   :  { %v2853_v39 = vpop.permute.xlu2 %2852  ;;  %v3209_v30 = vpop.permute.xlu1 %3208 }
 0xed3   :  { %v2872_v1 = vadd.f32 %v2853_v39, %v8356_v17 }
 0xed5   :  { %v3537_v43 = vpop.f32.mrf.mxu2 }
 0xed8   :  { %3562 = vrot.lane.b32.xlu0 %v3534_v57, %s5326_s20 }
 0xeda   :  { %v3211_v58 = vpop.permute.xlu0 %3210  ;;  %v3215_v36 = vpop.permute.xlu2 %3214 }
 0xedb   :  { %v7858_v63 = vadd.f32 %v3211_v58, %v2872_v1 }
 0xedd   :  { %v3539_v34 = vpop.f32.mrf.mxu2 }
 0xee2   :  { %v2851_v52 = vpop.permute.xlu0 %2850 }
 0xee3   :  { %v2871_v61 = vadd.f32 %v2851_v52, %v8356_v17  ;;  %v8359_v52 = vld [vmem:[#allocation8_spill] sm:$0xff] }
 0xee5   :  { %v3542_v26 = vpop.f32.mrf.mxu2  ;;  %v3229_v60 = vadd.f32 %v3209_v30, %v2871_v61  ;;  %v8361_v30 = vld [vmem:[#allocation13_spill] sm:$0xff] }
 0xeed   :  { %v3544_v22 = vpop.f32.mrf.mxu2 }
 0xeee   :  { %v2855_v53 = vpop.permute.xlu1 %2854 }
 0xeef   :  { %v2873_v38 = vadd.f32 %v2855_v53, %v8356_v17 }
 0xef1   :  { %v3231_v9 = vadd.f32 %v7852_v13, %v2873_v38 }
 0xef6   :  { %v3217_v47 = vpop.permute.xlu1 %3216 }
 0xefe   :  { %v2859_v14 = vpop.permute.xlu0 %2858  ;;  %v2857_v27 = vpop.permute.xlu1 %2856 }
 0xeff   :  { %v2874_v12 = vadd.f32 %v2857_v27, %v8356_v17 }
 0xf01   :  { %v3232_v32 = vadd.f32 %v3215_v36, %v2874_v12  ;;  %v4922_v12 = vld [vmem:[%s8244_s4 + $0x18] sm:$0xff] }
 0xf02   :  { %4243 = vmatpush.bf16.msrb.mxu3 %v4922_v12 }
 0xf08   :  { %v3895_v25 = vpop.f32.mrf.mxu1 }
 0xf09   :  { %3922 = vrot.lane.b32.xlu1 %v3895_v25, %s5326_s20 }
 0xf10   :  { %v3897_v28 = vpop.f32.mrf.mxu1 }
 0xf11   :  { %3924 = vrot.lane.b32.xlu0 %v3897_v28, %s5326_s20 }
 0xf16   :  { %v3547_v21 = vpop.f32.mrf.mxu2 }
 0xf18   :  { %v3900_v11 = vpop.f32.mrf.mxu1 }
 0xf19   :  { %3564 = vrot.lane.b32.xlu0 %v3537_v43, %s5326_s20  ;;  %3926 = vrot.lane.b32.xlu2 %v3900_v11, %s5326_s20  ;;  %v8357_v43 = vld [vmem:[#allocation6_spill] sm:$0xff] }
 0xf1e   :  { %v3549_v48 = vpop.f32.mrf.mxu2 }
 0xf20   :  { %v3902_v8 = vpop.f32.mrf.mxu1 }
 0xf21   :  { %3570 = vrot.lane.b32.xlu0 %v3544_v22, %s5326_s20  ;;  %3566 = vrot.lane.b32.xlu2 %v3539_v34, %s5326_s20 }
 0xf22   :  { %3928 = vrot.lane.b32.xlu1 %v3902_v8, %s5326_s20  ;;  %v3919_v35 = vpop.permute.xlu2 %3918  ;;  %v2875_v8 = vadd.f32 %v2859_v14, %v8356_v17 }
 0xf28   :  { %v3905_v16 = vpop.f32.mrf.mxu1 }
 0xf29   :  { %3574 = vrot.lane.b32.xlu2 %v3549_v48, %s5326_s20  ;;  %v3233_v48 = vadd.f32 %v3217_v47, %v2875_v8 }
 0xf2a   :  { %3568 = vrot.lane.b32.xlu1 %v3542_v26, %s5326_s20  ;;  %v3561_v0 = vpop.permute.xlu2 %3560 }
 0xf2b   :  { %v3584_v5 = vadd.f32 %v3561_v0, %v3226_v37  ;;  %v7911_v0 = vld [vmem:[%s8246_s6 + $0x4] sm:$0x7] }
 0xf2c   :  { %v7914_v37 = vperm.slane %v7911_v0, 2 }
 0xf2d   :  { %v3942_v49 = vadd.f32 %v3919_v35, %v3584_v5 }
 0xf30   :  { %v3907_v59 = vpop.f32.mrf.mxu1 }
 0xf31   :  { %3932 = vrot.lane.b32.xlu0 %v3907_v59, %s5326_s20 }
 0xf32   :  { %3930 = vrot.lane.b32.xlu1 %v3905_v16, %s5326_s20 }
 0xf39   :  { %3572 = vrot.lane.b32.xlu0 %v3547_v21, %s5326_s20 }
 0xf41   :  { %3958 = vrot.lane.b32.xlu0 %v3942_v49, %s5326_s20 }
 0xf42   :  { %v3921_v55 = vpop.permute.xlu0 %3920 }
 0xf4a   :  { %v3563_v15 = vpop.permute.xlu0 %3562 }
 0xf4b   :  { %v3585_v42 = vadd.f32 %v3563_v15, %v3227_v45 }
 0xf4d   :  { %v3943_v4 = vadd.f32 %v3921_v55, %v3585_v42  ;;  %v8360_v55 = vld [vmem:[#allocation9_spill] sm:$0xff] }
 0xf4f   :  { %3960 = vrot.lane.b32.xlu2 %v3943_v4, %s5326_s20 }
 0xf73   :  { %v3927_v2 = vpop.permute.xlu2 %3926 }
 0xf7b   :  { %v3567_v7 = vpop.permute.xlu2 %3566  ;;  %v3923_v18 = vpop.permute.xlu1 %3922 }
 0xf7c   :  { %v3587_v6 = vadd.f32 %v3567_v7, %v3229_v60  ;;  %v8362_v7 = vld [vmem:[#allocation10_spill] sm:$0xff] }
 0xf83   :  { %v3925_v51 = vpop.permute.xlu0 %3924  ;;  %v3575_v40 = vpop.permute.xlu2 %3574 }
 0xf84   :  { %v3945_v10 = vadd.f32 %v3925_v51, %v3587_v6  ;;  %v3591_v16 = vadd.f32 %v3575_v40, %v3233_v48  ;;  %v8363_v6 = vld [vmem:[#allocation11_spill] sm:$0xff] }
 0xf86   :  { %3964 = vrot.lane.b32.xlu1 %v3945_v10, %s5326_s20 }
 0xf8b   :  { %v3565_v50 = vpop.permute.xlu0 %3564 }
 0xf8c   :  { %v3586_v41 = vadd.f32 %v3565_v50, %v7849_v19 }
 0xf8e   :  { %v3944_v56 = vadd.f32 %v3923_v18, %v3586_v41 }
 0xf90   :  { %3962 = vrot.lane.b32.xlu2 %v3944_v56, %s5326_s20 }
 0xf93   :  { %v3571_v23 = vpop.permute.xlu0 %3570 }
 0xf94   :  { %v3589_v46 = vadd.f32 %v3571_v23, %v3231_v9  ;;  %v3929_v20 = vpop.permute.xlu1 %3928 }
 0xf96   :  { %v3947_v33 = vadd.f32 %v3929_v20, %v3589_v46  ;;  %v8364_v20 = vld [vmem:[#allocation5_spill] sm:$0xff] }
 0xf98   :  { %3968 = vrot.lane.b32.xlu2 %v3947_v33, %s5326_s20 }
 0xf9c   :  { %v3569_v29 = vpop.permute.xlu1 %3568 }
 0xf9d   :  { %v3588_v54 = vadd.f32 %v3569_v29, %v7858_v63  ;;  %v8358_v63 = vld [vmem:[#allocation7_spill] sm:$0xff] }
 0xf9f   :  { %v3946_v3 = vadd.f32 %v3927_v2, %v3588_v54 }
 0xfa1   :  { %3966 = vrot.lane.b32.xlu0 %v3946_v3, %s5326_s20 }
 0xfa3   :  { %v3933_v19 = vpop.permute.xlu0 %3932 }
 0xfa4   :  { %v3931_v13 = vpop.permute.xlu1 %3930  ;;  %v3949_v35 = vadd.f32 %v3933_v19, %v3591_v16 }
 0xfa9   :  { %v3961_v1 = vpop.permute.xlu2 %3960 }
 0xfaa   :  { %v7891_v25 = vadd.f32 %v3961_v1, %v8358_v63 }
 0xfab   :  { %v3573_v24 = vpop.permute.xlu0 %3572 }
 0xfac   :  { %v3590_v57 = vadd.f32 %v3573_v24, %v3232_v32  ;;  %v4023_v28 = vmul.f32 %v7891_v25, %v7891_v25  ;;  %v3993_v11 = vsel %vm72_vm0, %v7891_v25, 0.0 }
 0xfae   :  { %v3948_v39 = vadd.f32 %v3931_v13, %v3590_v57  ;;  %v4033_v22 = vsel %vm72_vm0, %v4023_v28, 0.0  ;;  %v8365_v28 = vld [vmem:[#allocation12_spill] sm:$0xff] }
 0xfb0   :  { %3970 = vrot.lane.b32.xlu2 %v3948_v39, %s5326_s20 }
 0xfb3   :  { %v3959_v58 = vpop.permute.xlu0 %3958 }
 0xfb4   :  { %v7888_v34 = vadd.f32 %v3959_v58, %v8357_v43 }
 0xfb6   :  { %v3990_v26 = vsel %vm72_vm0, %v7888_v34, 0.0  ;;  %v4022_v21 = vmul.f32 %v7888_v34, %v7888_v34 }
 0xfb7   :  { %3991 = vadd.xlane.f32.xlu1 %v3990_v26 }
 0xfb8   :  { %v4030_v36 = vsel %vm72_vm0, %v4022_v21, 0.0 }
 0xfbf   :  { %4034 = vadd.xlane.f32.xlu1 %v4033_v22 }
 0xfcb   :  { %3994 = vadd.xlane.f32.xlu0 %v3993_v11  ;;  %v4921_v11 = vld [vmem:[%s8244_s4 + $0x10] sm:$0xff] }
 0xfcc   :  { %4244 = vmatpush.bf16.msrb.mxu3 %v4921_v11 }
 0xfd9   :  { %4031 = vadd.xlane.f32.xlu2 %v4030_v36 }
 0xfdf   :  { %3972 = vrot.lane.b32.xlu0 %v3949_v35, %s5326_s20 }
 0xfea   :  { %v3963_v59 = vpop.permute.xlu2 %3962 }
 0xfeb   :  { %v7906_v31 = vadd.f32 %v3963_v59, %v8359_v52 }
 0xfed   :  { %v3996_v17 = vsel %vm72_vm0, %v7906_v31, 0.0  ;;  %v4024_v14 = vmul.f32 %v7906_v31, %v7906_v31 }
 0xfee   :  { %3997 = vadd.xlane.f32.xlu1 %v3996_v17 }
 0xfef   :  { %v4036_v5 = vsel %vm72_vm0, %v4024_v14, 0.0 }
 0xff1   :  { %4192 = vrot.lane.b32.xlu2 %v7914_v37, %s5321_s16 }
 0xff2   :  { %v3969_v45 = vpop.permute.xlu2 %3968 }
 0xff3   :  { %v7941_v51 = vadd.f32 %v3969_v45, %v8363_v6 }
 0xff5   :  { %v4005_v10 = vsel %vm72_vm0, %v7941_v51, 0.0  ;;  %v4027_v41 = vmul.f32 %v7941_v51, %v7941_v51 }
 0xff6   :  { %4037 = vadd.xlane.f32.xlu1 %v4036_v5 }
 0xff7   :  { %v4045_v38 = vsel %vm72_vm0, %v4027_v41, 0.0 }
 0xff8   :  { %v3965_v49 = vpop.permute.xlu1 %3964 }
 0xff9   :  { %v7924_v62 = vadd.f32 %v3965_v49, %v8360_v55 }
 0xffb   :  { %v3999_v44 = vsel %vm72_vm0, %v7924_v62, 0.0  ;;  %v4025_v15 = vmul.f32 %v7924_v62, %v7924_v62 }
 0xffd   :  { %v4039_v42 = vsel %vm72_vm0, %v4025_v15, 0.0 }
 0xffe   :  { %4000 = vadd.xlane.f32.xlu1 %v3999_v44 }
0x1009   :  { %4040 = vadd.xlane.f32.xlu0 %v4039_v42 }
0x100a   :  { %v3971_v4 = vpop.permute.xlu2 %3970 }
0x100b   :  { %v7932_v53 = vadd.f32 %v3971_v4, %v8361_v30 }
0x100d   :  { %v4028_v2 = vmul.f32 %v7932_v53, %v7932_v53  ;;  %v4008_v56 = vsel %vm72_vm0, %v7932_v53, 0.0 }
0x100f   :  { %v4048_v47 = vsel %vm72_vm0, %v4028_v2, 0.0 }
0x1011   :  { %4049 = vadd.xlane.f32.xlu0 %v4048_v47 }
0x1013   :  { %v3967_v61 = vpop.permute.xlu0 %3966 }
0x1014   :  { %v7938_v60 = vadd.f32 %v3967_v61, %v8362_v7 }
0x1016   :  { %v4002_v27 = vsel %vm72_vm0, %v7938_v60, 0.0  ;;  %v4026_v50 = vmul.f32 %v7938_v60, %v7938_v60 }
0x1017   :  { %4003 = vadd.xlane.f32.xlu1 %v4002_v27 }
0x1018   :  { %v4042_v18 = vsel %vm72_vm0, %v4026_v50, 0.0 }
0x101a   :  { %4006 = vadd.xlane.f32.xlu2 %v4005_v10 }
0x101f   :  { %4043 = vadd.xlane.f32.xlu1 %v4042_v18 }
0x1027   :  { %4046 = vadd.xlane.f32.xlu1 %v4045_v38 }
0x102a   :  { %v3992_v9 = vpop.xlane.xlu1 %3991 }
0x102b   :  { %v4014_v32 = vmul.f32 %v3992_v9, %v8364_v20 }
0x102d   :  { %v4062_v57 = vmul.f32 %v4014_v32, %v4014_v32  ;;  %v4078_v42 = vsub.f32 %v7888_v34, %v4014_v32 }
0x102f   :  { %4009 = vadd.xlane.f32.xlu1 %v4008_v56 }
0x1032   :  { %v4035_v23 = vpop.xlane.xlu1 %4034 }
0x1033   :  { %v4055_v29 = vmul.f32 %v4035_v23, %v8364_v20 }
0x103e   :  { %v3995_v46 = vpop.xlane.xlu0 %3994 }
0x103f   :  { %v4015_v33 = vmul.f32 %v3995_v46, %v8364_v20 }
0x1041   :  { %v4063_v54 = vmul.f32 %v4015_v33, %v4015_v33  ;;  %v4079_v45 = vsub.f32 %v7891_v25, %v4015_v33 }
0x1043   :  { %v4071_v3 = vsub.f32 %v4055_v29, %v4063_v54 }
0x1045   :  { %v4087_v19 = vadd.f32 1e-05, %v4071_v3 }
0x1047   :  { %5235 = vrsqrt.f32 %v4087_v19  ;;  %vm4110_vm13 = vweird.f32 %v4087_v19 }
0x104c   :  { %v4032_v40 = vpop.xlane.xlu2 %4031 }
0x104d   :  { %v5236_v24 = vpop.eup %5235  ;;  %v4054_v13 = vmul.f32 %v4032_v40, %v8364_v20 }
0x104e   :  { %v4105_v39 = vmul.f32 %v5236_v24, %v4087_v19  ;;  %vm4111_vm11 = vweird.f32 %v5236_v24 }
0x104f   :  { %v4070_v1 = vsub.f32 %v4054_v13, %v4062_v57  ;;  %vm4112_vm14 = vmor %vm4110_vm13, %vm4111_vm11 }
0x1050   :  { %v4106_v58 = vmul.f32 %v5236_v24, %v4105_v39 }
0x1051   :  { %v4086_v43 = vadd.f32 1e-05, %v4070_v1  ;;  %v3973_v63 = vpop.permute.xlu0 %3972 }
0x1052   :  { %v4107_v26 = vmul.f32 0.5, %v4106_v58  ;;  %v7963_v22 = vadd.f32 %v3973_v63, %v8365_v28 }
0x1053   :  { %5237 = vrsqrt.f32 %v4086_v43  ;;  %vm4100_vm3 = vweird.f32 %v4086_v43 }
0x1054   :  { %v4011_v21 = vsel %vm72_vm0, %v7963_v22, 0.0  ;;  %v4108_v8 = vsub.f32 1.5, %v4107_v26  ;;  %v4029_v36 = vmul.f32 %v7963_v22, %v7963_v22  ;;  %v7977_v2 = vpop.permute.xlu2 %4192 }
0x1055   :  { %4012 = vadd.xlane.f32.xlu1 %v4011_v21 }
0x1056   :  { %v4109_v16 = vmul.f32 %v5236_v24, %v4108_v8  ;;  %v4051_v52 = vsel %vm72_vm0, %v4029_v36, 0.0 }
0x1058   :  { %v4113_v17 = vsel %vm4112_vm14, %v5236_v24, %v4109_v16 }
0x1059   :  { %v5238_v48 = vpop.eup %5237  ;;  %v4176_v49 = vmul.f32 %v7914_v37, %v4113_v17 }
0x105a   :  { %v4095_v35 = vmul.f32 %v5238_v48, %v4086_v43  ;;  %vm4101_vm15 = vweird.f32 %v5238_v48 }
0x105b   :  { %vm4102_vm4 = vmor %vm4100_vm3, %vm4101_vm15  ;;  %v4184_v4 = vmul.f32 %v4176_v49, %v4079_v45 }
0x105c   :  { %v4096_v59 = vmul.f32 %v5238_v48, %v4095_v35 }
0x105d   :  { %4052 = vadd.xlane.f32.xlu1 %v4051_v52  ;;  %v7984_v27 = vadd.f32 %v7977_v2, %v4184_v4 }
0x105e   :  { %v4097_v14 = vmul.f32 0.5, %v4096_v59 }
0x1060   :  { %v4098_v5 = vsub.f32 1.5, %v4097_v14 }
0x1061   :  { %v3998_v55 = vpop.xlane.xlu1 %3997 }
0x1062   :  { %v4099_v44 = vmul.f32 %v5238_v48, %v4098_v5  ;;  %v4016_v47 = vmul.f32 %v3998_v55, %v8364_v20 }
0x1064   :  { %v4103_v15 = vsel %vm4102_vm4, %v5238_v48, %v4099_v44  ;;  %v4064_v25 = vmul.f32 %v4016_v47, %v4016_v47  ;;  %v4080_v11 = vsub.f32 %v7906_v31, %v4016_v47 }
0x1065   :  { %v4175_v30 = vmul.f32 %v7914_v37, %v4103_v15 }
0x1067   :  { %v4183_v61 = vmul.f32 %v4175_v30, %v4078_v42 }
0x1069   :  { %v4038_v7 = vpop.xlane.xlu1 %4037  ;;  %v7981_v6 = vadd.f32 %v7977_v2, %v4183_v61 }
0x106a   :  { %v4056_v10 = vmul.f32 %v4038_v7, %v8364_v20 }
0x106b   :  { %v4203_v34 = vpack.c.bf16 %v7984_v27, %v7981_v6 }
0x106c   :  { %v4072_v50 = vsub.f32 %v4056_v10, %v4064_v25 }
0x106d   :  { %4863 = vmatmul.msk.bf16.vlgmr.msrb.gmra.mxu3 %vm72_vm0, %v4203_v34 }
0x106e   :  { %v4088_v18 = vadd.f32 1e-05, %v4072_v50 }
0x1070   :  { %5239 = vrsqrt.f32 %v4088_v18  ;;  %vm4120_vm6 = vweird.f32 %v4088_v18 }
0x1071   :  { %v4001_v41 = vpop.xlane.xlu1 %4000 }
0x1072   :  { %v4017_v56 = vmul.f32 %v4001_v41, %v8364_v20 }
0x1074   :  { %v4065_v46 = vmul.f32 %v4017_v56, %v4017_v56  ;;  %v4081_v16 = vsub.f32 %v7924_v62, %v4017_v56 }
0x1076   :  { %v5240_v38 = vpop.eup %5239 }
0x1077   :  { %v4115_v9 = vmul.f32 %v5240_v38, %v4088_v18  ;;  %vm4121_vm5 = vweird.f32 %v5240_v38 }
0x1078   :  { %vm4122_vm7 = vmor %vm4120_vm6, %vm4121_vm5 }
0x1079   :  { %v4116_v29 = vmul.f32 %v5240_v38, %v4115_v9 }
0x107b   :  { %v4117_v19 = vmul.f32 0.5, %v4116_v29 }
0x107c   :  { %v4041_v23 = vpop.xlane.xlu0 %4040 }
0x107d   :  { %v4057_v33 = vmul.f32 %v4041_v23, %v8364_v20  ;;  %v4118_v12 = vsub.f32 1.5, %v4117_v19 }
0x107f   :  { %v4073_v54 = vsub.f32 %v4057_v33, %v4065_v46  ;;  %v4119_v40 = vmul.f32 %v5240_v38, %v4118_v12 }
0x1081   :  { %v4089_v3 = vadd.f32 1e-05, %v4073_v54  ;;  %v4123_v39 = vsel %vm4122_vm7, %v5240_v38, %v4119_v40 }
0x1082   :  { %v4177_v63 = vmul.f32 %v7914_v37, %v4123_v39 }
0x1083   :  { %5241 = vrsqrt.f32 %v4089_v3  ;;  %vm4130_vm9 = vweird.f32 %v4089_v3 }
0x1084   :  { %v4185_v52 = vmul.f32 %v4177_v63, %v4080_v11 }
0x1086   :  { %v8000_v49 = vadd.f32 %v7977_v2, %v4185_v52 }
0x1089   :  { %v5242_v32 = vpop.eup %5241 }
0x108a   :  { %v4125_v24 = vmul.f32 %v5242_v32, %v4089_v3  ;;  %v4004_v57 = vpop.xlane.xlu1 %4003  ;;  %vm4131_vm8 = vweird.f32 %v5242_v32 }
0x108b   :  { %v4018_v58 = vmul.f32 %v4004_v57, %v8364_v20  ;;  %vm4132_vm10 = vmor %vm4130_vm9, %vm4131_vm8 }
0x108c   :  { %v4126_v13 = vmul.f32 %v5242_v32, %v4125_v24  ;;  %v4050_v24 = vpop.xlane.xlu0 %4049 }
0x108d   :  { %v4066_v21 = vmul.f32 %v4018_v58, %v4018_v58  ;;  %v4007_v48 = vpop.xlane.xlu2 %4006  ;;  %v4082_v23 = vsub.f32 %v7938_v60, %v4018_v58  ;;  %v8025_v58 = vperm.slane %v7911_v0, 1  ;;  %v4925_v0 = vld [vmem:[%s8245_s5 + $0x30] sm:$0xff] }
0x108e   :  { %v4127_v1 = vmul.f32 0.5, %v4126_v13  ;;  %v4019_v17 = vmul.f32 %v4007_v48, %v8364_v20  ;;  %v4060_v13 = vmul.f32 %v4050_v24, %v8364_v20  ;;  %v4926_v48 = vld [vmem:[%s8245_s5 + $0x38] sm:$0xff] }
0x108f   :  { %4312 = vrot.lane.b32.xlu0 %v8025_v58, %s5326_s20  ;;  %4331 = vmatpush.bf16.msrb.mxu2 %v4926_v48 }
0x1090   :  { %v4128_v43 = vsub.f32 1.5, %v4127_v1  ;;  %v4067_v44 = vmul.f32 %v4019_v17, %v4019_v17  ;;  %v4083_v29 = vsub.f32 %v7941_v51, %v4019_v17  ;;  %v4924_v17 = vld [vmem:[%s8245_s5 + $0x28] sm:$0xff] }
0x1092   :  { %v4129_v26 = vmul.f32 %v5242_v32, %v4128_v43  ;;  %v4044_v28 = vpop.xlane.xlu1 %4043 }
0x1093   :  { %v4058_v8 = vmul.f32 %v4044_v28, %v8364_v20  ;;  %4332 = vmatpush.bf16.msrb.mxu2 %v4925_v0 }
0x1094   :  { %v4133_v36 = vsel %vm4132_vm10, %v5242_v32, %v4129_v26 }
0x1095   :  { %v4178_v35 = vmul.f32 %v7914_v37, %v4133_v36  ;;  %v4074_v59 = vsub.f32 %v4058_v8, %v4066_v21 }
0x1097   :  { %v4090_v14 = vadd.f32 1e-05, %v4074_v59  ;;  %v4186_v5 = vmul.f32 %v4178_v35, %v4081_v16  ;;  %4333 = vmatpush.bf16.msrb.mxu2 %v4924_v17 }
0x1099   :  { %5243 = vrsqrt.f32 %v4090_v14  ;;  %v8003_v31 = vadd.f32 %v7977_v2, %v4186_v5  ;;  %vm4140_vm12 = vweird.f32 %v4090_v14 }
0x109a   :  { %v4047_v55 = vpop.xlane.xlu1 %4046 }
0x109b   :  { %v4059_v45 = vmul.f32 %v4047_v55, %v8364_v20  ;;  %v4204_v62 = vpack.c.bf16 %v8003_v31, %v8000_v49  ;;  %v4923_v55 = vld [vmem:[%s8245_s5 + $0x20] sm:$0xff] }
0x109c   :  { %4334 = vmatpush.bf16.msrb.mxu2 %v4923_v55 }
0x109d   :  { %v4075_v15 = vsub.f32 %v4059_v45, %v4067_v44  ;;  %4864 = vmatmul.msk.bf16.gmra.mxu3 %vm72_vm0, %v4204_v62 }
0x109f   :  { %v5244_v42 = vpop.eup %5243  ;;  %v4091_v4 = vadd.f32 1e-05, %v4075_v15 }
0x10a0   :  { %v4135_v30 = vmul.f32 %v5244_v42, %v4090_v14  ;;  %vm4141_vm1 = vweird.f32 %v5244_v42 }
0x10a1   :  { %5245 = vrsqrt.f32 %v4091_v4  ;;  %vm4142_vm11 = vmor %vm4140_vm12, %vm4141_vm1  ;;  %vm4150_vm14 = vweird.f32 %v4091_v4 }
0x10a2   :  { %v4136_v47 = vmul.f32 %v5244_v42, %v4135_v30  ;;  %v4010_v33 = vpop.xlane.xlu1 %4009 }
0x10a3   :  { %v4020_v19 = vmul.f32 %v4010_v33, %v8364_v20 }
0x10a4   :  { %v4137_v61 = vmul.f32 0.5, %v4136_v47 }
0x10a5   :  { %v4068_v57 = vmul.f32 %v4020_v19, %v4020_v19  ;;  %v4084_v30 = vsub.f32 %v7932_v53, %v4020_v19 }
0x10a6   :  { %v4138_v7 = vsub.f32 1.5, %v4137_v61 }
0x10a7   :  { %v5246_v25 = vpop.eup %5245  ;;  %v4076_v51 = vsub.f32 %v4060_v13, %v4068_v57 }
0x10a8   :  { %v4139_v10 = vmul.f32 %v5244_v42, %v4138_v7  ;;  %v4145_v34 = vmul.f32 %v5246_v25, %v4091_v4  ;;  %vm4151_vm13 = vweird.f32 %v5246_v25 }
0x10a9   :  { %vm4152_vm15 = vmor %vm4150_vm14, %vm4151_vm13  ;;  %v4092_v39 = vadd.f32 1e-05, %v4076_v51 }
0x10aa   :  { %v4146_v50 = vmul.f32 %v5246_v25, %v4145_v34  ;;  %v4143_v18 = vsel %vm4142_vm11, %v5244_v42, %v4139_v10 }
0x10ab   :  { %v4179_v56 = vmul.f32 %v7914_v37, %v4143_v18  ;;  %5247 = vrsqrt.f32 %v4092_v39  ;;  %vm4160_vm4 = vweird.f32 %v4092_v39 }
0x10ac   :  { %v4147_v41 = vmul.f32 0.5, %v4146_v50 }
0x10ad   :  { %v4187_v3 = vmul.f32 %v4179_v56, %v4082_v23 }
0x10ae   :  { %v4148_v38 = vsub.f32 1.5, %v4147_v41 }
0x10af   :  { %v8015_v32 = vadd.f32 %v7977_v2, %v4187_v3 }
0x10b0   :  { %v4149_v9 = vmul.f32 %v5246_v25, %v4148_v38 }
0x10b1   :  { %v5248_v43 = vpop.eup %5247 }
0x10b2   :  { %v4153_v46 = vsel %vm4152_vm15, %v5246_v25, %v4149_v9  ;;  %v4155_v26 = vmul.f32 %v5248_v43, %v4092_v39  ;;  %vm4161_vm3 = vweird.f32 %v5248_v43 }
0x10b3   :  { %v4180_v54 = vmul.f32 %v7914_v37, %v4153_v46  ;;  %vm4162_vm5 = vmor %vm4160_vm4, %vm4161_vm3 }
0x10b4   :  { %v4156_v8 = vmul.f32 %v5248_v43, %v4155_v26 }
0x10b5   :  { %v4188_v12 = vmul.f32 %v4180_v54, %v4083_v29 }
0x10b6   :  { %v4157_v35 = vmul.f32 0.5, %v4156_v8 }
0x10b7   :  { %v8018_v40 = vadd.f32 %v7977_v2, %v4188_v12 }
0x10b8   :  { %v4158_v59 = vsub.f32 1.5, %v4157_v35 }
0x10b9   :  { %v4205_v60 = vpack.c.bf16 %v8018_v40, %v8015_v32 }
0x10ba   :  { %v4159_v14 = vmul.f32 %v5248_v43, %v4158_v59 }
0x10bb   :  { %4865 = vmatmul.msk.bf16.gmra.mxu3 %vm72_vm0, %v4205_v60 }
0x10bc   :  { %v4163_v45 = vsel %vm4162_vm5, %v5248_v43, %v4159_v14 }
0x10bd   :  { %v4181_v42 = vmul.f32 %v7914_v37, %v4163_v45 }
0x10bf   :  { %v4189_v61 = vmul.f32 %v4181_v42, %v4084_v30 }
0x10c1   :  { %v8048_v34 = vadd.f32 %v7977_v2, %v4189_v61 }
0x10c8   :  { %v4013_v1 = vpop.xlane.xlu1 %4012 }
0x10c9   :  { %v4021_v63 = vmul.f32 %v4013_v1, %v8364_v20 }
0x10cb   :  { %v4069_v11 = vmul.f32 %v4021_v63, %v4021_v63  ;;  %v4085_v7 = vsub.f32 %v7963_v22, %v4021_v63 }
0x10d0   :  { %v4053_v28 = vpop.xlane.xlu1 %4052 }
0x10d1   :  { %v4061_v21 = vmul.f32 %v4053_v28, %v8364_v20 }
0x10d3   :  { %v4077_v36 = vsub.f32 %v4061_v21, %v4069_v11 }
0x10d5   :  { %v4093_v16 = vadd.f32 1e-05, %v4077_v36 }
0x10d7   :  { %5249 = vrsqrt.f32 %v4093_v16  ;;  %vm4170_vm7 = vweird.f32 %v4093_v16 }
0x10dd   :  { %v5250_v52 = vpop.eup %5249 }
0x10de   :  { %v4165_v5 = vmul.f32 %v5250_v52, %v4093_v16  ;;  %vm4171_vm6 = vweird.f32 %v5250_v52 }
0x10df   :  { %vm4172_vm8 = vmor %vm4170_vm7, %vm4171_vm6 }
0x10e0   :  { %v4166_v44 = vmul.f32 %v5250_v52, %v4165_v5 }
0x10e2   :  { %v4167_v62 = vmul.f32 0.5, %v4166_v44 }
0x10e4   :  { %v4168_v15 = vsub.f32 1.5, %v4167_v62 }
0x10e6   :  { %v4169_v4 = vmul.f32 %v5250_v52, %v4168_v15 }
0x10e8   :  { %v4173_v47 = vsel %vm4172_vm8, %v5250_v52, %v4169_v4 }
0x10e9   :  { %v4182_v25 = vmul.f32 %v7914_v37, %v4173_v47 }
0x10eb   :  { %v4190_v10 = vmul.f32 %v4182_v25, %v4085_v7 }
0x10ed   :  { %v8051_v50 = vadd.f32 %v7977_v2, %v4190_v10 }
0x10ef   :  { %v4206_v18 = vpack.c.bf16 %v8051_v50, %v8048_v34 }
0x10f0   :  { %v4246_v41 = vpop.f32.mrf.mxu3 }
0x10f1   :  { %4866 = vmatmul.msk.bf16.gmra.mxu3 %vm72_vm0, %v4206_v18  ;;  %v4247_v53 = vadd.f32 %v4246_v41, %v8025_v58 }
0x10f3   :  { %v4266_v56 = vmax.f32 %v4247_v53, 0.0 }
0x10f8   :  { %v4248_v38 = vpop.f32.mrf.mxu3 }
0x10f9   :  { %v4249_v22 = vadd.f32 %v4248_v38, %v8025_v58 }
0x10fb   :  { %v4267_v9 = vmax.f32 %v4249_v22, 0.0 }
0x10fd   :  { %v4274_v23 = vpack.c.bf16 %v4267_v9, %v4266_v56 }
0x10ff   :  { %4891 = vmatmul.msk.bf16.vlgmr.msrb.gmra.mxu2 %vm293_vm2, %v4274_v23 }
0x1101   :  { %v8067_v21 = vpop.permute.xlu0 %4312 }
0x1120   :  { %v4251_v46 = vpop.f32.mrf.mxu3 }
0x1121   :  { %v4252_v2 = vadd.f32 %v4251_v46, %v8025_v58 }
0x1123   :  { %v4268_v54 = vmax.f32 %v4252_v2, 0.0 }
0x1128   :  { %v4253_v33 = vpop.f32.mrf.mxu3 }
0x1129   :  { %v4254_v29 = vadd.f32 %v4253_v33, %v8025_v58 }
0x112b   :  { %v4269_v3 = vmax.f32 %v4254_v29, 0.0 }
0x112d   :  { %v4275_v19 = vpack.c.bf16 %v4269_v3, %v4268_v54 }
0x112f   :  { %4892 = vmatmul.msk.bf16.gmra.mxu2 %vm293_vm2, %v4275_v19 }
0x113e   :  { %v4256_v12 = vpop.f32.mrf.mxu3 }
0x113f   :  { %v4257_v24 = vadd.f32 %v4256_v12, %v8025_v58 }
0x1141   :  { %v4270_v13 = vmax.f32 %v4257_v24, 0.0 }
0x1146   :  { %v4258_v57 = vpop.f32.mrf.mxu3 }
0x1147   :  { %v4259_v60 = vadd.f32 %v4258_v57, %v8025_v58 }
0x1149   :  { %v4271_v51 = vmax.f32 %v4259_v60, 0.0 }
0x114b   :  { %v4276_v39 = vpack.c.bf16 %v4271_v51, %v4270_v13 }
0x114d   :  { %4893 = vmatmul.msk.bf16.gmra.mxu2 %vm293_vm2, %v4276_v39 }
0x1174   :  { %v4261_v1 = vpop.f32.mrf.mxu3 }
0x1175   :  { %v4262_v43 = vadd.f32 %v4261_v1, %v8025_v58 }
0x1177   :  { %v4272_v28 = vmax.f32 %v4262_v43, 0.0 }
0x117c   :  { %v4263_v63 = vpop.f32.mrf.mxu3 }
0x117d   :  { %v4264_v26 = vadd.f32 %v4263_v63, %v8025_v58 }
0x117f   :  { %v4273_v11 = vmax.f32 %v4264_v26, 0.0 }
0x1181   :  { %v4277_v8 = vpack.c.bf16 %v4273_v11, %v4272_v28 }
0x1182   :  { %v4336_v36 = vpop.f32.mrf.mxu2 }
0x1183   :  { %v4337_v48 = vadd.f32 %v4336_v36, %v8067_v21  ;;  %4894 = vmatmul.msk.bf16.gmra.mxu2 %vm293_vm2, %v4277_v8 }
0x1185   :  { %v8072_v16 = vadd.f32 %v4337_v48, %v7981_v6 }
0x1187   :  { %v4364_v0 = vsel %vm72_vm0, %v8072_v16, 0.0  ;;  %v4396_v59 = vmul.f32 %v8072_v16, %v8072_v16 }
0x1188   :  { %4365 = vadd.xlane.f32.xlu2 %v4364_v0 }
0x1189   :  { %v4404_v14 = vsel %vm72_vm0, %v4396_v59, 0.0 }
0x118a   :  { %v4338_v35 = vpop.f32.mrf.mxu2 }
0x118b   :  { %v4339_v58 = vadd.f32 %v4338_v35, %v8067_v21 }
0x118d   :  { %v8080_v52 = vadd.f32 %v4339_v58, %v7984_v27 }
0x118f   :  { %v4367_v17 = vsel %vm72_vm0, %v8080_v52, 0.0  ;;  %v4397_v6 = vmul.f32 %v8080_v52, %v8080_v52 }
0x1190   :  { %4368 = vadd.xlane.f32.xlu1 %v4367_v17  ;;  %4405 = vadd.xlane.f32.xlu2 %v4404_v14 }
0x1191   :  { %v4407_v5 = vsel %vm72_vm0, %v4397_v6, 0.0 }
0x1198   :  { %4408 = vadd.xlane.f32.xlu1 %v4407_v5 }
0x11b2   :  { %v4341_v55 = vpop.f32.mrf.mxu2 }
0x11b3   :  { %v4342_v44 = vadd.f32 %v4341_v55, %v8067_v21 }
0x11b5   :  { %v8090_v45 = vadd.f32 %v4342_v44, %v8000_v49 }
0x11b7   :  { %v4370_v27 = vsel %vm72_vm0, %v8090_v45, 0.0  ;;  %v4398_v62 = vmul.f32 %v8090_v45, %v8090_v45 }
0x11b8   :  { %4371 = vadd.xlane.f32.xlu2 %v4370_v27 }
0x11b9   :  { %v4410_v15 = vsel %vm72_vm0, %v4398_v62, 0.0 }
0x11ba   :  { %v4343_v42 = vpop.f32.mrf.mxu2  ;;  %4411 = vadd.xlane.f32.xlu0 %v4410_v15 }
0x11bb   :  { %v4344_v4 = vadd.f32 %v4343_v42, %v8067_v21 }
0x11bd   :  { %v8099_v30 = vadd.f32 %v4344_v4, %v8003_v31 }
0x11bf   :  { %v4373_v49 = vsel %vm72_vm0, %v8099_v30, 0.0  ;;  %v4399_v47 = vmul.f32 %v8099_v30, %v8099_v30 }
0x11c0   :  { %4374 = vadd.xlane.f32.xlu1 %v4373_v49 }
0x11c1   :  { %v4413_v61 = vsel %vm72_vm0, %v4399_v47, 0.0 }
0x11c2   :  { %4414 = vadd.xlane.f32.xlu2 %v4413_v61 }
0x11d0   :  { %v4346_v7 = vpop.f32.mrf.mxu2 }
0x11d1   :  { %v4347_v25 = vadd.f32 %v4346_v7, %v8067_v21 }
0x11d3   :  { %v8108_v10 = vadd.f32 %v4347_v25, %v8015_v32 }
0x11d5   :  { %v4376_v31 = vsel %vm72_vm0, %v8108_v10, 0.0  ;;  %v4400_v53 = vmul.f32 %v8108_v10, %v8108_v10 }
0x11d6   :  { %4377 = vadd.xlane.f32.xlu1 %v4376_v31 }
0x11d7   :  { %v4416_v56 = vsel %vm72_vm0, %v4400_v53, 0.0 }
0x11d8   :  { %v4348_v18 = vpop.f32.mrf.mxu2 }
0x11d9   :  { %v4349_v41 = vadd.f32 %v4348_v18, %v8067_v21 }
0x11db   :  { %v8116_v38 = vadd.f32 %v4349_v41, %v8018_v40 }
0x11dd   :  { %v4379_v22 = vsel %vm72_vm0, %v8116_v38, 0.0  ;;  %v4401_v32 = vmul.f32 %v8116_v38, %v8116_v38 }
0x11de   :  { %4380 = vadd.xlane.f32.xlu2 %v4379_v22  ;;  %4417 = vadd.xlane.f32.xlu1 %v4416_v56 }
0x11df   :  { %v4419_v9 = vsel %vm72_vm0, %v4401_v32, 0.0 }
0x11e6   :  { %4420 = vadd.xlane.f32.xlu2 %v4419_v9 }
0x11fb   :  { %v4366_v23 = vpop.xlane.xlu2 %4365 }
0x11fc   :  { %v8125_v46 = vmul.f32 %v4366_v23, %v8364_v20 }
0x11fe   :  { %v4436_v33 = vmul.f32 %v8125_v46, %v8125_v46 }
0x1203   :  { %v4369_v2 = vpop.xlane.xlu1 %4368  ;;  %v4406_v40 = vpop.xlane.xlu2 %4405 }
0x1204   :  { %v4428_v29 = vmul.f32 %v4406_v40, %v8364_v20  ;;  %v8132_v12 = vmul.f32 %v4369_v2, %v8364_v20 }
0x1206   :  { %v4444_v54 = vsub.f32 %v4428_v29, %v4436_v33  ;;  %v4351_v3 = vpop.f32.mrf.mxu2  ;;  %v4437_v51 = vmul.f32 %v8132_v12, %v8132_v12 }
0x1207   :  { %v4352_v19 = vadd.f32 %v4351_v3, %v8067_v21 }
0x1208   :  { %v4460_v24 = vadd.f32 1e-05, %v4444_v54 }
0x1209   :  { %v8135_v57 = vadd.f32 %v4352_v19, %v8048_v34 }
0x120a   :  { %5251 = vrsqrt.f32 %v4460_v24  ;;  %vm4474_vm12 = vweird.f32 %v4460_v24 }
0x120b   :  { %v4409_v60 = vpop.xlane.xlu1 %4408  ;;  %v4382_v13 = vsel %vm72_vm0, %v8135_v57, 0.0  ;;  %v4402_v26 = vmul.f32 %v8135_v57, %v8135_v57 }
0x120c   :  { %v4429_v39 = vmul.f32 %v4409_v60, %v8364_v20  ;;  %4383 = vadd.xlane.f32.xlu1 %v4382_v13 }
0x120d   :  { %v4422_v36 = vsel %vm72_vm0, %v4402_v26, 0.0 }
0x120e   :  { %v4445_v1 = vsub.f32 %v4429_v39, %v4437_v51  ;;  %v4353_v43 = vpop.f32.mrf.mxu2 }
0x120f   :  { %v4354_v63 = vadd.f32 %v4353_v43, %v8067_v21 }
0x1210   :  { %v4461_v34 = vadd.f32 1e-05, %v4445_v1  ;;  %v5252_v28 = vpop.eup %5251 }
0x1211   :  { %v8146_v11 = vadd.f32 %v4354_v63, %v8051_v50  ;;  %v4469_v48 = vmul.f32 %v5252_v28, %v4460_v24  ;;  %vm4475_vm1 = vweird.f32 %v5252_v28 }
0x1212   :  { %5253 = vrsqrt.f32 %v4461_v34  ;;  %vm4484_vm9 = vweird.f32 %v4461_v34  ;;  %vm4476_vm11 = vmor %vm4474_vm12, %vm4475_vm1 }
0x1213   :  { %v4385_v8 = vsel %vm72_vm0, %v8146_v11, 0.0  ;;  %v4403_v21 = vmul.f32 %v8146_v11, %v8146_v11  ;;  %v4470_v35 = vmul.f32 %v5252_v28, %v4469_v48 }
0x1214   :  { %4386 = vadd.xlane.f32.xlu2 %v4385_v8  ;;  %4423 = vadd.xlane.f32.xlu1 %v4422_v36 }
0x1215   :  { %v4425_v17 = vsel %vm72_vm0, %v4403_v21, 0.0  ;;  %v4471_v50 = vmul.f32 0.5, %v4470_v35 }
0x1217   :  { %v4472_v5 = vsub.f32 1.5, %v4471_v50 }
0x1218   :  { %v5254_v0 = vpop.eup %5253 }
0x1219   :  { %v4479_v58 = vmul.f32 %v5254_v0, %v4461_v34  ;;  %vm4485_vm2 = vweird.f32 %v5254_v0  ;;  %v4473_v27 = vmul.f32 %v5252_v28, %v4472_v5 }
0x121a   :  { %vm4486_vm10 = vmor %vm4484_vm9, %vm4485_vm2 }
0x121b   :  { %v4480_v59 = vmul.f32 %v5254_v0, %v4479_v58  ;;  %v4477_v15 = vsel %vm4476_vm11, %v5252_v28, %v4473_v27 }
0x121c   :  { %4426 = vadd.xlane.f32.xlu2 %v4425_v17  ;;  %v4548_v4 = vmul.f32 %v4477_v15, %v7914_v37 }
0x121d   :  { %v4481_v14 = vmul.f32 0.5, %v4480_v59 }
0x121f   :  { %v4482_v6 = vsub.f32 1.5, %v4481_v14 }
0x1221   :  { %v4483_v55 = vmul.f32 %v5254_v0, %v4482_v6 }
0x1223   :  { %v4487_v44 = vsel %vm4486_vm10, %v5254_v0, %v4483_v55 }
0x1224   :  { %v4549_v62 = vmul.f32 %v4487_v44, %v7914_v37 }
0x1226   :  { %4566 = vrot.lane.b32.xlu0 %v4549_v62, %s5326_s20 }
0x122b   :  { %v4372_v42 = vpop.xlane.xlu2 %4371 }
0x122c   :  { %v8158_v49 = vmul.f32 %v4372_v42, %v8364_v20 }
0x122d   :  { %v4412_v47 = vpop.xlane.xlu0 %4411  ;;  %4564 = vrot.lane.b32.xlu1 %v4548_v4, %s5326_s20 }
0x122e   :  { %v4438_v61 = vmul.f32 %v8158_v49, %v8158_v49  ;;  %v4430_v7 = vmul.f32 %v4412_v47, %v8364_v20 }
0x1230   :  { %v4446_v25 = vsub.f32 %v4430_v7, %v4438_v61 }
0x1232   :  { %v4462_v31 = vadd.f32 1e-05, %v4446_v25 }
0x1233   :  { %v4375_v18 = vpop.xlane.xlu1 %4374 }
0x1234   :  { %5255 = vrsqrt.f32 %v4462_v31  ;;  %v8165_v41 = vmul.f32 %v4375_v18, %v8364_v20  ;;  %4596 = vrot.lane.b32.xlu2 %v7914_v37, %s5327_s13  ;;  %vm4494_vm14 = vweird.f32 %v4462_v31 }
0x1235   :  { %v4415_v53 = vpop.xlane.xlu2 %4414 }
0x1236   :  { %v4439_v22 = vmul.f32 %v8165_v41, %v8165_v41  ;;  %v4431_v56 = vmul.f32 %v4415_v53, %v8364_v20 }
0x1238   :  { %v4447_v32 = vsub.f32 %v4431_v56, %v4439_v22 }
0x123a   :  { %v5256_v9 = vpop.eup %5255  ;;  %v4463_v23 = vadd.f32 1e-05, %v4447_v32  ;;  %v4928_v32 = vld [vmem:[%s8247_s7 + $0x8] sm:$0xff] }
0x123b   :  { %v4489_v2 = vmul.f32 %v5256_v9, %v4462_v31  ;;  %vm4495_vm13 = vweird.f32 %v5256_v9  ;;  %4649 = vmatpush.bf16.msra.mxu0 %v4928_v32 }
0x123c   :  { %5257 = vrsqrt.f32 %v4463_v23  ;;  %vm4496_vm15 = vmor %vm4494_vm14, %vm4495_vm13  ;;  %vm4504_vm4 = vweird.f32 %v4463_v23 }
0x123d   :  { %v4490_v40 = vmul.f32 %v5256_v9, %v4489_v2  ;;  %v4927_v2 = vld [vmem:[%s8247_s7] sm:$0xff] }
0x123f   :  { %v4491_v33 = vmul.f32 0.5, %v4490_v40  ;;  %4650 = vmatpush.bf16.msra.mxu0 %v4927_v2 }
0x1241   :  { %v4492_v29 = vsub.f32 1.5, %v4491_v33 }
0x1242   :  { %v5258_v54 = vpop.eup %5257 }
0x1243   :  { %v4493_v3 = vmul.f32 %v5256_v9, %v4492_v29  ;;  %v4499_v19 = vmul.f32 %v5258_v54, %v4463_v23  ;;  %vm4505_vm3 = vweird.f32 %v5258_v54 }
0x1244   :  { %vm4506_vm5 = vmor %vm4504_vm4, %vm4505_vm3 }
0x1245   :  { %v4500_v24 = vmul.f32 %v5258_v54, %v4499_v19  ;;  %v4497_v60 = vsel %vm4496_vm15, %v5256_v9, %v4493_v3 }
0x1246   :  { %v4550_v13 = vmul.f32 %v4497_v60, %v7914_v37 }
0x1247   :  { %v4501_v51 = vmul.f32 0.5, %v4500_v24 }
0x1248   :  { %4568 = vrot.lane.b32.xlu0 %v4550_v13, %s5326_s20 }
0x1249   :  { %v4502_v39 = vsub.f32 1.5, %v4501_v51  ;;  %v4378_v1 = vpop.xlane.xlu1 %4377 }
0x124a   :  { %v8175_v26 = vmul.f32 %v4378_v1, %v8364_v20 }
0x124b   :  { %v4503_v43 = vmul.f32 %v5258_v54, %v4502_v39 }
0x124c   :  { %v4440_v36 = vmul.f32 %v8175_v26, %v8175_v26 }
0x124d   :  { %v4507_v63 = vsel %vm4506_vm5, %v5258_v54, %v4503_v43 }
0x124e   :  { %v4551_v34 = vmul.f32 %v4507_v63, %v7914_v37 }
0x1250   :  { %4570 = vrot.lane.b32.xlu1 %v4551_v34, %s5326_s20 }
0x1251   :  { %v4418_v28 = vpop.xlane.xlu1 %4417  ;;  %v4381_v8 = vpop.xlane.xlu2 %4380 }
0x1252   :  { %v4432_v48 = vmul.f32 %v4418_v28, %v8364_v20  ;;  %v8183_v35 = vmul.f32 %v4381_v8, %v8364_v20 }
0x1254   :  { %v4448_v21 = vsub.f32 %v4432_v48, %v4440_v36  ;;  %v4441_v59 = vmul.f32 %v8183_v35, %v8183_v35  ;;  %v4453_v36 = vsub.f32 %v8080_v52, %v8132_v12 }
0x1256   :  { %v4464_v0 = vadd.f32 1e-05, %v4448_v21 }
0x1258   :  { %5259 = vrsqrt.f32 %v4464_v0  ;;  %vm4514_vm7 = vweird.f32 %v4464_v0 }
0x1259   :  { %v4421_v58 = vpop.xlane.xlu2 %4420 }
0x125a   :  { %v4433_v17 = vmul.f32 %v4421_v58, %v8364_v20 }
0x125c   :  { %v4449_v50 = vsub.f32 %v4433_v17, %v4441_v59 }
0x125e   :  { %v5260_v14 = vpop.eup %5259  ;;  %v4465_v6 = vadd.f32 1e-05, %v4449_v50 }
0x125f   :  { %v4509_v5 = vmul.f32 %v5260_v14, %v4464_v0  ;;  %vm4515_vm6 = vweird.f32 %v5260_v14 }
0x1260   :  { %5261 = vrsqrt.f32 %v4465_v6  ;;  %vm4516_vm8 = vmor %vm4514_vm7, %vm4515_vm6  ;;  %vm4524_vm9 = vweird.f32 %v4465_v6 }
0x1261   :  { %v4510_v55 = vmul.f32 %v5260_v14, %v4509_v5 }
0x1263   :  { %v4511_v44 = vmul.f32 0.5, %v4510_v55 }
0x1265   :  { %v4512_v27 = vsub.f32 1.5, %v4511_v44 }
0x1266   :  { %v5262_v62 = vpop.eup %5261 }
0x1267   :  { %v4513_v15 = vmul.f32 %v5260_v14, %v4512_v27  ;;  %v4519_v42 = vmul.f32 %v5262_v62, %v4465_v6  ;;  %vm4525_vm2 = vweird.f32 %v5262_v62 }
0x1268   :  { %vm4526_vm10 = vmor %vm4524_vm9, %vm4525_vm2 }
0x1269   :  { %v4520_v4 = vmul.f32 %v5262_v62, %v4519_v42  ;;  %v4517_v47 = vsel %vm4516_vm8, %v5260_v14, %v4513_v15  ;;  %v4454_v15 = vsub.f32 %v8090_v45, %v8158_v49 }
0x126a   :  { %v4552_v61 = vmul.f32 %v4517_v47, %v7914_v37 }
0x126b   :  { %v4521_v7 = vmul.f32 0.5, %v4520_v4  ;;  %v4455_v4 = vsub.f32 %v8099_v30, %v8165_v41 }
0x126c   :  { %4572 = vrot.lane.b32.xlu0 %v4552_v61, %s5326_s20 }
0x126d   :  { %v4522_v25 = vsub.f32 1.5, %v4521_v7 }
0x126f   :  { %v4523_v31 = vmul.f32 %v5262_v62, %v4522_v25 }
0x1271   :  { %v4527_v18 = vsel %vm4526_vm10, %v5262_v62, %v4523_v31 }
0x1272   :  { %v4553_v53 = vmul.f32 %v4527_v18, %v7914_v37 }
0x1274   :  { %4574 = vrot.lane.b32.xlu2 %v4553_v53, %s5326_s20 }
0x127f   :  { %v4384_v22 = vpop.xlane.xlu1 %4383 }
0x1280   :  { %v8193_v56 = vmul.f32 %v4384_v22, %v8364_v20  ;;  %v4456_v22 = vsub.f32 %v8108_v10, %v8175_v26  ;;  %v4944_v10 = vld [vmem:[%s8248_s8] ss:$0 sm:$0xff]  ;;  %s5329_s8 = smov [#allocation2]  }
0x1281   :  { %s4684_s26 = sshll.u32 %s5329_s8, 4  ;;  %s4685_s26 = int_to_ptr.vmem [resolvable:$true] %s4684_s26 }
0x1282   :  { %v4442_v40 = vmul.f32 %v8193_v56, %v8193_v56 }
0x1287   :  { %v4424_v9 = vpop.xlane.xlu1 %4423  ;;  %v4387_v23 = vpop.xlane.xlu2 %4386 }
0x1288   :  { %v4434_v33 = vmul.f32 %v4424_v9, %v8364_v20  ;;  %v8205_v3 = vmul.f32 %v4387_v23, %v8364_v20  ;;  %v4458_v23 = vsub.f32 %v8135_v57, %v8193_v56 }
0x128a   :  { %v4450_v29 = vsub.f32 %v4434_v33, %v4442_v40  ;;  %v4443_v24 = vmul.f32 %v8205_v3, %v8205_v3  ;;  %v4459_v40 = vsub.f32 %v8146_v11, %v8205_v3 }
0x128c   :  { %v4466_v54 = vadd.f32 1e-05, %v4450_v29 }
0x128e   :  { %5263 = vrsqrt.f32 %v4466_v54  ;;  %vm4534_vm12 = vweird.f32 %v4466_v54 }
0x128f   :  { %v4427_v19 = vpop.xlane.xlu2 %4426 }
0x1290   :  { %v4435_v60 = vmul.f32 %v4427_v19, %v8364_v20  ;;  %v4452_v20 = vsub.f32 %v8072_v16, %v8125_v46 }
0x1292   :  { %v4451_v13 = vsub.f32 %v4435_v60, %v4443_v24 }
0x1294   :  { %v5264_v51 = vpop.eup %5263  ;;  %v4467_v39 = vadd.f32 1e-05, %v4451_v13 }
0x1295   :  { %v4529_v1 = vmul.f32 %v5264_v51, %v4466_v54  ;;  %vm4535_vm1 = vweird.f32 %v5264_v51 }
0x1296   :  { %5265 = vrsqrt.f32 %v4467_v39  ;;  %vm4536_vm11 = vmor %vm4534_vm12, %vm4535_vm1  ;;  %vm4544_vm14 = vweird.f32 %v4467_v39 }
0x1297   :  { %v4530_v43 = vmul.f32 %v5264_v51, %v4529_v1  ;;  %v4597_v59 = vpop.permute.xlu2 %4596 }
0x1298   :  { %v4567_v28 = vpop.permute.xlu0 %4566 }
0x1299   :  { %v4531_v63 = vmul.f32 0.5, %v4530_v43  ;;  %v4589_v0 = vmul.f32 %v4567_v28, %v4453_v36 }
0x129b   :  { %v4532_v34 = vsub.f32 1.5, %v4531_v63  ;;  %v4600_v44 = vadd.f32 %v4597_v59, %v4589_v0 }
0x129c   :  { %v5266_v8 = vpop.eup %5265 }
0x129d   :  { %v4533_v48 = vmul.f32 %v5264_v51, %v4532_v34  ;;  %v4539_v21 = vmul.f32 %v5266_v8, %v4467_v39  ;;  %vm4545_vm13 = vweird.f32 %v5266_v8 }
0x129e   :  { %vm4546_vm15 = vmor %vm4544_vm14, %vm4545_vm13 }
0x129f   :  { %v4540_v58 = vmul.f32 %v5266_v8, %v4539_v21  ;;  %v4565_v17 = vpop.permute.xlu1 %4564  ;;  %v4537_v50 = vsel %vm4536_vm11, %v5264_v51, %v4533_v48 }
0x12a0   :  { %v4588_v14 = vmul.f32 %v4565_v17, %v4452_v20  ;;  %v4554_v6 = vmul.f32 %v4537_v50, %v7914_v37 }
0x12a1   :  { %v4541_v5 = vmul.f32 0.5, %v4540_v58 }
0x12a2   :  { %v4599_v55 = vadd.f32 %v4597_v59, %v4588_v14  ;;  %4576 = vrot.lane.b32.xlu1 %v4554_v6, %s5326_s20 }
0x12a3   :  { %v4542_v52 = vsub.f32 1.5, %v4541_v5 }
0x12a4   :  { %v4607_v12 = vpack.c.bf16 %v4600_v44, %v4599_v55 }
0x12a5   :  { %v4543_v27 = vmul.f32 %v5266_v8, %v4542_v52 }
0x12a6   :  { %4903 = vmatmul.msk.bf16.vlgmr.msra.gmra.mxu0 %vm72_vm0, %v4607_v12 }
0x12a7   :  { %v4547_v16 = vsel %vm4546_vm15, %v5266_v8, %v4543_v27 }
0x12a8   :  { %v4555_v46 = vmul.f32 %v4547_v16, %v7914_v37  ;;  %v4457_v37 = vsub.f32 %v8116_v38, %v8183_v35 }
0x12aa   :  { %4578 = vrot.lane.b32.xlu0 %v4555_v46, %s5326_s20 }
0x12ba   :  { %v4569_v62 = vpop.permute.xlu0 %4568 }
0x12bb   :  { %v4590_v42 = vmul.f32 %v4569_v62, %v4454_v15 }
0x12bd   :  { %v4601_v7 = vadd.f32 %v4597_v59, %v4590_v42 }
0x12c2   :  { %v4571_v47 = vpop.permute.xlu1 %4570 }
0x12c3   :  { %v4591_v61 = vmul.f32 %v4571_v47, %v4455_v4 }
0x12c5   :  { %v4602_v25 = vadd.f32 %v4597_v59, %v4591_v61 }
0x12c7   :  { %v4608_v31 = vpack.c.bf16 %v4602_v25, %v4601_v7 }
0x12c9   :  { %4904 = vmatmul.msk.bf16.gmra.mxu0 %vm72_vm0, %v4608_v31 }
0x12ce   :  { %v4575_v18 = vpop.permute.xlu2 %4574 }
0x12cf   :  { %v4593_v53 = vmul.f32 %v4575_v18, %v4457_v37 }
0x12d1   :  { %v4604_v32 = vadd.f32 %v4597_v59, %v4593_v53 }
0x12de   :  { %v4573_v45 = vpop.permute.xlu0 %4572 }
0x12df   :  { %v4592_v49 = vmul.f32 %v4573_v45, %v4456_v22 }
0x12e1   :  { %v4603_v9 = vadd.f32 %v4597_v59, %v4592_v49 }
0x12e3   :  { %v4609_v30 = vpack.c.bf16 %v4604_v32, %v4603_v9 }
0x12e5   :  { %4905 = vmatmul.msk.bf16.gmra.mxu0 %vm72_vm0, %v4609_v30 }
0x1314   :  { %v4577_v41 = vpop.permute.xlu1 %4576 }
0x1315   :  { %v4594_v2 = vmul.f32 %v4577_v41, %v4458_v23 }
0x1317   :  { %v4605_v33 = vadd.f32 %v4597_v59, %v4594_v2 }
0x131c   :  { %v4579_v38 = vpop.permute.xlu0 %4578 }
0x131d   :  { %v4595_v35 = vmul.f32 %v4579_v38, %v4459_v40 }
0x131f   :  { %v4606_v29 = vadd.f32 %v4597_v59, %v4595_v35 }
0x1321   :  { %v4610_v26 = vpack.c.bf16 %v4606_v29, %v4605_v33 }
0x1323   :  { %v4652_v54 = vpop.f32.mrf.mxu0  ;;  %4906 = vmatmul.msk.bf16.gmra.mxu0 %vm72_vm0, %v4610_v26 }
0x1324   :  { %v4653_v19 = vadd.f32 %v4944_v10, %v4652_v54 }
0x1326   :  { %4672 = vst [vmem:[#allocation2] sm:$0xff] %v4653_v19 }
0x132b   :  { %v4654_v24 = vpop.f32.mrf.mxu0 }
0x132c   :  { %v4655_v57 = vadd.f32 %v4944_v10, %v4654_v24 }
0x132e   :  { %4673 = vst [vmem:[#allocation2 + $0x8] sm:$0xff] %v4655_v57 }
0x1346   :  { %v4657_v56 = vpop.f32.mrf.mxu0 }
0x1347   :  { %v4658_v60 = vadd.f32 %v4944_v10, %v4657_v56 }
0x1349   :  { %4674 = vst [vmem:[#allocation2 + $0x10] sm:$0xff] %v4658_v60 }
0x134e   :  { %v4659_v11 = vpop.f32.mrf.mxu0 }
0x134f   :  { %v4660_v3 = vadd.f32 %v4944_v10, %v4659_v11 }
0x1351   :  { %4675 = vst [vmem:[#allocation2 + $0x18] sm:$0xff] %v4660_v3 }
0x1362   :  { %v4662_v13 = vpop.f32.mrf.mxu0 }
0x1363   :  { %v4663_v51 = vadd.f32 %v4944_v10, %v4662_v13 }
0x1365   :  { %4676 = vst [vmem:[#allocation2 + $0x20] sm:$0xff] %v4663_v51 }
0x136a   :  { %v4664_v39 = vpop.f32.mrf.mxu0 }
0x136b   :  { %v4665_v1 = vadd.f32 %v4944_v10, %v4664_v39 }
0x136d   :  { %4677 = vst [vmem:[#allocation2 + $0x28] sm:$0xff] %v4665_v1 }
0x13a0   :  { %v4667_v43 = vpop.f32.mrf.mxu0 }
0x13a1   :  { %v4668_v63 = vadd.f32 %v4944_v10, %v4667_v43 }
0x13a3   :  { %4678 = vst [vmem:[#allocation2 + $0x30] sm:$0xff] %v4668_v63 }
0x13a8   :  { %v4669_v34 = vpop.f32.mrf.mxu0 }
0x13a9   :  { %v4670_v28 = vadd.f32 %v4944_v10, %v4669_v34 }
0x13ab   :  { %4679 = vst [vmem:[#allocation2 + $0x38] sm:$0xff] %v4670_v28 }
0x13ac   :  { %4692 = dma.vmem_to_hbm [thread:$0]  %s4685_s26, 1024, %s4687_s29, [#allocation3], %s5330_s10, %s5330_s10, %s5331_s11  }
0x13ad   :  { %5317 = dma.done.wait [#allocation3], 1024  }
0x13ae   :  { %5318 = vsyncadd [#allocation3], 4294966272 }
0x13af   :  { %4697 = vsyncpa [#allocation3], 1 }

</bundles_post_ra>
